<compile_context>
chip_gen: v5e
topology: v5e:2x2
jax: 0.10.0
libtpu: 0.0.40
codegen_flags: <defaults>
</compile_context>

<pallas_src>
import functools

import jax
import jax.numpy as jnp
from jax.experimental import pallas as pl
from jax.experimental.pallas import tpu as pltpu


# ----------------------------------------------------------------------------
# Pallas kernels
# ----------------------------------------------------------------------------
def _conv_sum_kernel(x_ref, w_ref, o_ref):
    """Windowed conv as in-kernel K-reduction: sum_k x[k] @ w[k].
    x:(Kw, TM, Cin) bf16, w:(Kw, Cin, Cout) bf16, o:(TM, Cout)."""
    acc = jnp.dot(x_ref[0], w_ref[0], preferred_element_type=jnp.float32)
    for k in range(1, x_ref.shape[0]):
        acc = acc + jnp.dot(x_ref[k], w_ref[k], preferred_element_type=jnp.float32)
    o_ref[...] = acc.astype(o_ref.dtype)


def _conv_sum_bnrelu_kernel(x_ref, w_ref, scale_ref, shift_ref, o_ref):
    """Windowed conv + fused inference-BN + ReLU epilogue (f32 on accumulator)."""
    acc = jnp.dot(x_ref[0], w_ref[0], preferred_element_type=jnp.float32)
    for k in range(1, x_ref.shape[0]):
        acc = acc + jnp.dot(x_ref[k], w_ref[k], preferred_element_type=jnp.float32)
    acc = jnp.maximum(acc * scale_ref[...] + shift_ref[...], 0.0)
    o_ref[...] = acc.astype(o_ref.dtype)


def _bottleneck_kernel(x_ref, s1_ref, t1_ref, w_ref, s2_ref, t2_ref, o_ref):
    """Fused dense-layer bottleneck: relu(bn2( relu(bn1(x)) @ W1 ))."""
    a = jnp.maximum(x_ref[...] * s1_ref[...] + t1_ref[...], 0.0)
    acc = jnp.dot(a.astype(jnp.bfloat16), w_ref[...],
                  preferred_element_type=jnp.float32)
    acc = jnp.maximum(acc * s2_ref[...] + t2_ref[...], 0.0)
    o_ref[...] = acc.astype(o_ref.dtype)


def _transition_kernel(x_ref, s_ref, t_ref, w_ref, o_ref):
    """Fused transition: (mean_k relu(bn(x[k]))) @ W.
    2x2 avg-pool is commuted before the 1x1 conv (exact: conv is linear)."""
    a = jnp.maximum(x_ref[0] * s_ref[...] + t_ref[...], 0.0)
    for k in range(1, x_ref.shape[0]):
        a = a + jnp.maximum(x_ref[k] * s_ref[...] + t_ref[...], 0.0)
    a = a * (1.0 / x_ref.shape[0])
    o_ref[...] = jnp.dot(a.astype(jnp.bfloat16), w_ref[...],
                         preferred_element_type=jnp.float32).astype(o_ref.dtype)


def _maxpool_kernel(x_ref, o_ref):
    # max over pooling-window axis: (K, M, C) -> (M, C)
    o_ref[...] = jnp.max(x_ref[...], axis=0)


def _tail_kernel(x_ref, s_ref, t_ref, w_ref, b_ref, o_ref):
    """Fused tail: relu(bn5(x)) -> global average pool -> classifier."""
    a = jnp.maximum(x_ref[...] * s_ref[...] + t_ref[...], 0.0)   # (HW, N, C)
    pooled = jnp.mean(a, axis=0)                                 # (N, C)
    o_ref[...] = (jnp.dot(pooled, w_ref[...],
                          preferred_element_type=jnp.float32) + b_ref[...])


# ----------------------------------------------------------------------------
# pallas_call helpers
# ----------------------------------------------------------------------------
_PARALLEL = pltpu.CompilerParams(dimension_semantics=("parallel",))
_ARBITRARY = pltpu.CompilerParams(dimension_semantics=("arbitrary",))


def _fixed_spec(shape):
    nd = len(shape)
    return pl.BlockSpec(shape, lambda i, _nd=nd: (0,) * _nd)


def _pick_tile(m):
    """M tile: whole slab at these sizes, 8-aligned tiles when M grows."""
    if m <= 512:
        return m
    for tm in (512, 256, 128, 64, 32, 16, 8):
        if m % tm == 0:
            return tm
    return m


def _bn_fold(bn, eps=1e-5):
    gamma, beta, mean, var = bn
    scale = gamma / jnp.sqrt(var + eps)
    shift = beta - mean * scale
    return scale, shift


def _conv_call(x_stack, w_stack, scale=None, shift=None, out_dtype=jnp.float32):
    """x_stack: (Kwin, M, Cin) bf16, w_stack: (Kwin, Cin, Cout) bf16.
    Optional fused BN+ReLU epilogue on the f32 accumulator."""
    kwin, m, cin = x_stack.shape
    cout = w_stack.shape[-1]
    tm = _pick_tile(m)
    grid = (m // tm,)
    x_spec = pl.BlockSpec((kwin, tm, cin), lambda i: (0, i, 0))
    w_spec = pl.BlockSpec((kwin, cin, cout), lambda i: (0, 0, 0))
    o_spec = pl.BlockSpec((tm, cout), lambda i: (i, 0))
    if scale is None:
        return pl.pallas_call(
            _conv_sum_kernel,
            out_shape=jax.ShapeDtypeStruct((m, cout), out_dtype),
            grid=grid, in_specs=[x_spec, w_spec], out_specs=o_spec,
            compiler_params=_PARALLEL,
        )(x_stack, w_stack)
    v_spec = pl.BlockSpec((1, cout), lambda i: (0, 0))
    return pl.pallas_call(
        _conv_sum_bnrelu_kernel,
        out_shape=jax.ShapeDtypeStruct((m, cout), out_dtype),
        grid=grid, in_specs=[x_spec, w_spec, v_spec, v_spec], out_specs=o_spec,
        compiler_params=_PARALLEL,
    )(x_stack, w_stack, scale.reshape(1, cout), shift.reshape(1, cout))


# ----------------------------------------------------------------------------
# Layer wrappers (glue: padding / window views / reshapes in plain JAX)
# ----------------------------------------------------------------------------
def stem_conv(x, w, bn):
    """conv0 (7x7, stride 2, pad 3, no bias) with fused norm0+relu0 epilogue."""
    cout, cin, kh, kw = w.shape
    n, h, wd, _ = x.shape
    stride, pad = 2, 3
    xb = jnp.pad(x.astype(jnp.bfloat16),
                 ((0, 0), (pad, pad), (pad, pad), (0, 0)))
    ho = (h + 2 * pad - kh) // stride + 1
    wo = (wd + 2 * pad - kw) // stride + 1
    m = n * ho * wo
    slabs = [xb[:, dy:dy + stride * ho:stride, dx:dx + stride * wo:stride, :]
             .reshape(m, cin) for dy in range(kh) for dx in range(kw)]
    patches = jnp.concatenate(slabs, axis=-1)[None]        # (1, M, kh*kw*cin)
    wm = jnp.transpose(w, (2, 3, 1, 0)).reshape(1, kh * kw * cin, cout)
    scale, shift = _bn_fold(bn)
    out = _conv_call(patches, wm.astype(jnp.bfloat16), scale, shift)
    return out.reshape(n, ho, wo, cout)


def max_pool(x, k=3, stride=2, padding=1):
    n, h, w, c = x.shape
    neg = jnp.finfo(jnp.float32).min
    xp = jnp.pad(x, ((0, 0), (padding, padding), (padding, padding), (0, 0)),
                 constant_values=neg)
    ho = (h + 2 * padding - k) // stride + 1
    wo = (w + 2 * padding - k) // stride + 1
    m = n * ho * wo
    slabs = [xp[:, dy:dy + stride * ho:stride, dx:dx + stride * wo:stride, :]
             .reshape(m, c) for dy in range(k) for dx in range(k)]
    stack = jnp.stack(slabs, axis=0)                       # (k*k, M, C)
    out = pl.pallas_call(
        _maxpool_kernel,
        out_shape=jax.ShapeDtypeStruct((m, c), x.dtype),
        grid=(1,), in_specs=[_fixed_spec(stack.shape)],
        out_specs=_fixed_spec((m, c)),
        compiler_params=_ARBITRARY,
    )(stack)
    return out.reshape(n, ho, wo, c)


def dense_layer(cat, p):
    """One _DenseLayer: fused norm1+relu1+conv1(1x1)+norm2+relu2, then 3x3 conv2."""
    n, h, w, ccat = cat.shape
    s1, t1 = _bn_fold(p["norm1"])
    s2, t2 = _bn_fold(p["norm2"])
    w1 = p["conv1"]                                        # (inter, ccat, 1, 1)
    inter = w1.shape[0]
    w1m = jnp.transpose(w1[:, :, 0, 0], (1, 0)).astype(jnp.bfloat16)
    m = n * h * w
    tm = _pick_tile(m)
    bott = pl.pallas_call(
        _bottleneck_kernel,
        out_shape=jax.ShapeDtypeStruct((m, inter), jnp.bfloat16),
        grid=(m // tm,),
        in_specs=[pl.BlockSpec((tm, ccat), lambda i: (i, 0)),
                  pl.BlockSpec((1, ccat), lambda i: (0, 0)),
                  pl.BlockSpec((1, ccat), lambda i: (0, 0)),
                  pl.BlockSpec((ccat, inter), lambda i: (0, 0)),
                  pl.BlockSpec((1, inter), lambda i: (0, 0)),
                  pl.BlockSpec((1, inter), lambda i: (0, 0))],
        out_specs=pl.BlockSpec((tm, inter), lambda i: (i, 0)),
        compiler_params=_PARALLEL,
    )(cat.reshape(m, ccat), s1.reshape(1, ccat), t1.reshape(1, ccat),
      w1m, s2.reshape(1, inter), t2.reshape(1, inter))
    hact = bott.reshape(n, h, w, inter)                    # post-relu2, bf16

    # 3x3 conv2 (stride 1, pad 1): K-reduction over the 9 window positions
    # inside the kernel (no im2col matrix in HBM).  Zero-padding is applied to
    # the already-activated tensor, matching PyTorch conv padding semantics.
    w2 = p["conv2"]                                        # (growth, inter, 3, 3)
    growth = w2.shape[0]
    hp = jnp.pad(hact, ((0, 0), (1, 1), (1, 1), (0, 0)))
    slabs = [hp[:, dy:dy + h, dx:dx + w, :].reshape(m, inter)
             for dy in range(3) for dx in range(3)]
    x_stack = jnp.stack(slabs, axis=0)                     # (9, M, inter) bf16
    w2m = jnp.transpose(w2, (2, 3, 1, 0)).reshape(9, inter, growth)
    new = _conv_call(x_stack, w2m.astype(jnp.bfloat16))    # raw conv output, f32
    # drop_rate == 0 -> no dropout
    return new.reshape(n, h, w, growth)


def transition(x, p):
    """norm + relu + 1x1 conv + 2x2/2 avg-pool, fused in one kernel."""
    n, h, w, cin = x.shape
    s, t = _bn_fold(p["norm"])
    wt = p["conv"]
    cout = wt.shape[0]
    wm = jnp.transpose(wt[:, :, 0, 0], (1, 0)).astype(jnp.bfloat16)
    ho, wo = h // 2, w // 2
    m4 = n * ho * wo
    slabs = [x[:, dy:2 * ho:2, dx:2 * wo:2, :].reshape(m4, cin)
             for dy in range(2) for dx in range(2)]
    stack = jnp.stack(slabs, axis=0)                       # (4, M/4, cin) f32
    out = pl.pallas_call(
        _transition_kernel,
        out_shape=jax.ShapeDtypeStruct((m4, cout), jnp.float32),
        grid=(1,),
        in_specs=[_fixed_spec(stack.shape),
                  _fixed_spec((1, cin)), _fixed_spec((1, cin)),
                  _fixed_spec((cin, cout))],
        out_specs=_fixed_spec((m4, cout)),
        compiler_params=_ARBITRARY,
    )(stack, s.reshape(1, cin), t.reshape(1, cin), wm)
    return out.reshape(n, ho, wo, cout)


def tail(x, bn5, fc_w, fc_b):
    """norm5 + ReLU + adaptive_avg_pool2d((1,1)) + flatten + Linear, fused."""
    n, h, w, c = x.shape
    s, t = _bn_fold(bn5)
    wc = jnp.transpose(fc_w, (1, 0))                       # (C, num_classes)
    ncls = wc.shape[1]
    xs = jnp.transpose(x.reshape(n, h * w, c), (1, 0, 2))  # (HW, N, C)
    return pl.pallas_call(
        _tail_kernel,
        out_shape=jax.ShapeDtypeStruct((n, ncls), jnp.float32),
        grid=(1,),
        in_specs=[_fixed_spec(xs.shape),
                  _fixed_spec((1, 1, c)), _fixed_spec((1, 1, c)),
                  _fixed_spec((c, ncls)), _fixed_spec((1, ncls))],
        out_specs=_fixed_spec((n, ncls)),
        compiler_params=_ARBITRARY,
    )(xs, s.reshape(1, 1, c), t.reshape(1, 1, c), wc, fc_b.reshape(1, ncls))


# ----------------------------------------------------------------------------
# Parameter construction (deterministic, mirrors DenseNet.__init__ shapes)
# ----------------------------------------------------------------------------
def _kaiming_conv(key, cout, cin, kh, kw):
    fan_in = cin * kh * kw
    return jax.random.normal(key, (cout, cin, kh, kw), jnp.float32) * jnp.sqrt(
        2.0 / fan_in
    )


def _bn_params(c):
    # matches module init: weight=1, bias=0, running_mean=0, running_var=1
    return (
        jnp.ones((c,), jnp.float32),
        jnp.zeros((c,), jnp.float32),
        jnp.zeros((c,), jnp.float32),
        jnp.ones((c,), jnp.float32),
    )


def init_densenet_params(
    key, growth_rate, block_config, num_init_features, bn_size, num_classes
):
    params = {}
    keys = iter(jax.random.split(key, 512))
    params["conv0"] = _kaiming_conv(next(keys), num_init_features, 3, 7, 7)
    params["norm0"] = _bn_params(num_init_features)

    num_features = num_init_features
    for bi, num_layers in enumerate(block_config):
        for li in range(num_layers):
            cin = num_features + li * growth_rate
            inter = bn_size * growth_rate
            params[f"db{bi}_l{li}"] = {
                "norm1": _bn_params(cin),
                "conv1": _kaiming_conv(next(keys), inter, cin, 1, 1),
                "norm2": _bn_params(inter),
                "conv2": _kaiming_conv(next(keys), growth_rate, inter, 3, 3),
            }
        num_features += num_layers * growth_rate
        if bi != len(block_config) - 1:
            params[f"tr{bi}"] = {
                "norm": _bn_params(num_features),
                "conv": _kaiming_conv(
                    next(keys), num_features // 2, num_features, 1, 1
                ),
            }
            num_features //= 2

    params["norm5"] = _bn_params(num_features)
    params["fc_w"] = jax.random.normal(
        next(keys), (num_classes, num_features), jnp.float32
    ) * (1.0 / jnp.sqrt(num_features))
    params["fc_b"] = jnp.zeros((num_classes,), jnp.float32)
    return params


# ----------------------------------------------------------------------------
# Forward pass (mirrors DenseNet.forward in eval mode)
# ----------------------------------------------------------------------------
def densenet_forward(params, x_nchw, block_config):
    x = jnp.transpose(x_nchw, (0, 2, 3, 1)).astype(jnp.float32)  # NCHW -> NHWC

    # features: conv0 -> norm0 -> relu0 (fused) -> pool0
    x = stem_conv(x, params["conv0"], params["norm0"])
    x = max_pool(x, k=3, stride=2, padding=1)

    for bi, num_layers in enumerate(block_config):
        feats = [x]
        for li in range(num_layers):
            p = params[f"db{bi}_l{li}"]
            cat = jnp.concatenate(feats, axis=-1)          # torch.cat(inputs, 1)
            feats.append(dense_layer(cat, p))
        x = jnp.concatenate(feats, axis=-1)

        if bi != len(block_config) - 1:
            x = transition(x, params[f"tr{bi}"])           # norm+relu+conv+avgpool

    # norm5 + F.relu + adaptive_avg_pool2d + flatten + classifier (fused)
    return tail(x, params["norm5"], params["fc_w"], params["fc_b"])


# ----------------------------------------------------------------------------
# Main
# ----------------------------------------------------------------------------
if __name__ == "__main__":
    # Small DenseNet-BC config consistent with the module's constructor
    growth_rate = 8
    block_config = (2, 2, 2, 2)
    num_init_features = 16
    bn_size = 2
    num_classes = 10

    key = jax.random.PRNGKey(0)
    pkey, xkey = jax.random.split(key)
    params = init_densenet_params(
        pkey, growth_rate, block_config, num_init_features, bn_size, num_classes
    )
    x = jax.random.normal(xkey, (2, 3, 32, 32), jnp.float32)  # NCHW like PyTorch

    fwd = jax.jit(functools.partial(densenet_forward, block_config=block_config))
    out = fwd(params, x)
    out = jax.block_until_ready(out)

    assert out.shape == (2, num_classes), out.shape
    assert bool(jnp.all(jnp.isfinite(out)))
    print("KERNEL_OK")
</pallas_src>

<mosaic_0001>
module attributes {stable_mosaic.version = 11 : i64} {
  func.func @_conv_sum_bnrelu_kernel(%arg0: i32, %arg1: memref<1x512x147xbf16, #tpu.memory_space<vmem>>, %arg2: memref<1x147x16xbf16, #tpu.memory_space<vmem>>, %arg3: memref<1x16xf32, #tpu.memory_space<vmem>>, %arg4: memref<1x16xf32, #tpu.memory_space<vmem>>, %arg5: memref<512x16xf32, #tpu.memory_space<vmem>>) attributes {dimension_semantics = [#tpu.dimension_semantics<parallel>], iteration_bounds = array<i64: 1>, scalar_prefetch = 0 : i64, scratch_operands = 0 : i64, tpu.core_type = #tpu.core_type<tc>, window_params = [{transform_indices = @transform_0, window_bounds = array<i64: 1, 512, 147>}, {pipeline_mode = #tpu.pipeline_mode<synchronous>, transform_indices = @transform_1, window_bounds = array<i64: 1, 147, 16>}, {pipeline_mode = #tpu.pipeline_mode<synchronous>, transform_indices = @transform_2, window_bounds = array<i64: 1, 16>}, {pipeline_mode = #tpu.pipeline_mode<synchronous>, transform_indices = @transform_3, window_bounds = array<i64: 1, 16>}, {transform_indices = @transform_4, window_bounds = array<i64: 512, 16>}]} {
    %c0 = arith.constant 0 : index
    %c0_0 = arith.constant 0 : index
    %c0_1 = arith.constant 0 : index
    %0 = vector.load %arg1[%c0, %c0_0, %c0_1] : memref<1x512x147xbf16, #tpu.memory_space<vmem>>, vector<1x512x147xbf16>
    %1 = vector.shape_cast %0 : vector<1x512x147xbf16> to vector<512x147xbf16>
    %c0_2 = arith.constant 0 : index
    %c0_3 = arith.constant 0 : index
    %c0_4 = arith.constant 0 : index
    %2 = vector.load %arg2[%c0_2, %c0_3, %c0_4] : memref<1x147x16xbf16, #tpu.memory_space<vmem>>, vector<1x147x16xbf16>
    %3 = vector.shape_cast %2 : vector<1x147x16xbf16> to vector<147x16xbf16>
    %cst = arith.constant dense<0.000000e+00> : vector<512x16xf32>
    %4 = tpu.matmul %1, %3, %cst {dimension_numbers = #tpu.dot_dimension_numbers<[1], [0], [0], [1], [0, 0, 1, 1], [], []>} : vector<512x147xbf16>, vector<147x16xbf16>, vector<512x16xf32> -> vector<512x16xf32>
    %c0_5 = arith.constant 0 : index
    %c0_6 = arith.constant 0 : index
    %5 = vector.load %arg3[%c0_5, %c0_6] : memref<1x16xf32, #tpu.memory_space<vmem>>, vector<1x16xf32>
    %6 = vector.broadcast %5 : vector<1x16xf32> to vector<512x16xf32>
    %7 = arith.mulf %4, %6 : vector<512x16xf32>
    %c0_7 = arith.constant 0 : index
    %c0_8 = arith.constant 0 : index
    %8 = vector.load %arg4[%c0_7, %c0_8] : memref<1x16xf32, #tpu.memory_space<vmem>>, vector<1x16xf32>
    %9 = vector.broadcast %8 : vector<1x16xf32> to vector<512x16xf32>
    %10 = arith.addf %7, %9 : vector<512x16xf32>
    %cst_9 = arith.constant 0.000000e+00 : f32
    %11 = vector.broadcast %cst_9 : f32 to vector<512x16xf32>
    %12 = arith.maximumf %10, %11 : vector<512x16xf32>
    %c0_10 = arith.constant 0 : index
    %c0_11 = arith.constant 0 : index
    %13 = vector.load %arg5[%c0_10, %c0_11] : memref<512x16xf32, #tpu.memory_space<vmem>>, vector<512x16xf32>
    tpu.vector_store %arg5[%c0_10, %c0_11], %12 {strides = array<i32>} : memref<512x16xf32, #tpu.memory_space<vmem>>, vector<512x16xf32>,
    return
  }
  func.func @transform_0(%arg0: i32) -> (i32, i32, i32) {
    %c0_i32 = arith.constant 0 : i32
    %c0_i32_0 = arith.constant 0 : i32
    %c0_i32_1 = arith.constant 0 : i32
    return %c0_i32, %arg0, %c0_i32_0 : i32, i32, i32
  }
  func.func @transform_1(%arg0: i32) -> (i32, i32, i32) {
    %c0_i32 = arith.constant 0 : i32
    %c0_i32_0 = arith.constant 0 : i32
    %c0_i32_1 = arith.constant 0 : i32
    %c0_i32_2 = arith.constant 0 : i32
    return %c0_i32, %c0_i32_0, %c0_i32_1 : i32, i32, i32
  }
  func.func @transform_2(%arg0: i32) -> (i32, i32) {
    %c0_i32 = arith.constant 0 : i32
    %c0_i32_0 = arith.constant 0 : i32
    %c0_i32_1 = arith.constant 0 : i32
    return %c0_i32, %c0_i32_0 : i32, i32
  }
  func.func @transform_3(%arg0: i32) -> (i32, i32) {
    %c0_i32 = arith.constant 0 : i32
    %c0_i32_0 = arith.constant 0 : i32
    %c0_i32_1 = arith.constant 0 : i32
    return %c0_i32, %c0_i32_0 : i32, i32
  }
  func.func @transform_4(%arg0: i32) -> (i32, i32) {
    %c0_i32 = arith.constant 0 : i32
    %c0_i32_0 = arith.constant 0 : i32
    return %arg0, %c0_i32 : i32, i32
  }
}

module attributes {stable_mosaic.version = 11 : i64} {
  func.func @_bottleneck_kernel(%arg0: i32, %arg1: memref<128x16xf32, #tpu.memory_space<vmem>>, %arg2: memref<1x16xf32, #tpu.memory_space<vmem>>, %arg3: memref<1x16xf32, #tpu.memory_space<vmem>>, %arg4: memref<16x16xbf16, #tpu.memory_space<vmem>>, %arg5: memref<1x16xf32, #tpu.memory_space<vmem>>, %arg6: memref<1x16xf32, #tpu.memory_space<vmem>>, %arg7: memref<128x16xbf16, #tpu.memory_space<vmem>>) attributes {dimension_semantics = [#tpu.dimension_semantics<parallel>], iteration_bounds = array<i64: 1>, scalar_prefetch = 0 : i64, scratch_operands = 0 : i64, tpu.core_type = #tpu.core_type<tc>, window_params = [{transform_indices = @transform_0, window_bounds = array<i64: 128, 16>}, {pipeline_mode = #tpu.pipeline_mode<synchronous>, transform_indices = @transform_1, window_bounds = array<i64: 1, 16>}, {pipeline_mode = #tpu.pipeline_mode<synchronous>, transform_indices = @transform_2, window_bounds = array<i64: 1, 16>}, {pipeline_mode = #tpu.pipeline_mode<synchronous>, transform_indices = @transform_3, window_bounds = array<i64: 16, 16>}, {pipeline_mode = #tpu.pipeline_mode<synchronous>, transform_indices = @transform_4, window_bounds = array<i64: 1, 16>}, {pipeline_mode = #tpu.pipeline_mode<synchronous>, transform_indices = @transform_5, window_bounds = array<i64: 1, 16>}, {transform_indices = @transform_6, window_bounds = array<i64: 128, 16>}]} {
    %c0 = arith.constant 0 : index
    %c0_0 = arith.constant 0 : index
    %0 = vector.load %arg1[%c0, %c0_0] : memref<128x16xf32, #tpu.memory_space<vmem>>, vector<128x16xf32>
    %c0_1 = arith.constant 0 : index
    %c0_2 = arith.constant 0 : index
    %1 = vector.load %arg2[%c0_1, %c0_2] : memref<1x16xf32, #tpu.memory_space<vmem>>, vector<1x16xf32>
    %2 = vector.broadcast %1 : vector<1x16xf32> to vector<128x16xf32>
    %3 = arith.mulf %0, %2 : vector<128x16xf32>
    %c0_3 = arith.constant 0 : index
    %c0_4 = arith.constant 0 : index
    %4 = vector.load %arg3[%c0_3, %c0_4] : memref<1x16xf32, #tpu.memory_space<vmem>>, vector<1x16xf32>
    %5 = vector.broadcast %4 : vector<1x16xf32> to vector<128x16xf32>
    %6 = arith.addf %3, %5 : vector<128x16xf32>
    %cst = arith.constant 0.000000e+00 : f32
    %7 = vector.broadcast %cst : f32 to vector<128x16xf32>
    %8 = arith.maximumf %6, %7 : vector<128x16xf32>
    %9 = arith.truncf %8 : vector<128x16xf32> to vector<128x16xbf16>
    %c0_5 = arith.constant 0 : index
    %c0_6 = arith.constant 0 : index
    %10 = vector.load %arg4[%c0_5, %c0_6] : memref<16x16xbf16, #tpu.memory_space<vmem>>, vector<16x16xbf16>
    %cst_7 = arith.constant dense<0.000000e+00> : vector<128x16xf32>
    %11 = tpu.matmul %9, %10, %cst_7 {dimension_numbers = #tpu.dot_dimension_numbers<[1], [0], [0], [1], [0, 0, 1, 1], [], []>} : vector<128x16xbf16>, vector<16x16xbf16>, vector<128x16xf32> -> vector<128x16xf32>
    %c0_8 = arith.constant 0 : index
    %c0_9 = arith.constant 0 : index
    %12 = vector.load %arg5[%c0_8, %c0_9] : memref<1x16xf32, #tpu.memory_space<vmem>>, vector<1x16xf32>
    %13 = vector.broadcast %12 : vector<1x16xf32> to vector<128x16xf32>
    %14 = arith.mulf %11, %13 : vector<128x16xf32>
    %c0_10 = arith.constant 0 : index
    %c0_11 = arith.constant 0 : index
    %15 = vector.load %arg6[%c0_10, %c0_11] : memref<1x16xf32, #tpu.memory_space<vmem>>, vector<1x16xf32>
    %16 = vector.broadcast %15 : vector<1x16xf32> to vector<128x16xf32>
    %17 = arith.addf %14, %16 : vector<128x16xf32>
    %cst_12 = arith.constant 0.000000e+00 : f32
    %18 = vector.broadcast %cst_12 : f32 to vector<128x16xf32>
    %19 = arith.maximumf %17, %18 : vector<128x16xf32>
    %20 = arith.truncf %19 : vector<128x16xf32> to vector<128x16xbf16>
    %c0_13 = arith.constant 0 : index
    %c0_14 = arith.constant 0 : index
    %21 = vector.load %arg7[%c0_13, %c0_14] : memref<128x16xbf16, #tpu.memory_space<vmem>>, vector<128x16xbf16>
    tpu.vector_store %arg7[%c0_13, %c0_14], %20 {strides = array<i32>} : memref<128x16xbf16, #tpu.memory_space<vmem>>, vector<128x16xbf16>,
    return
  }
  func.func @transform_0(%arg0: i32) -> (i32, i32) {
    %c0_i32 = arith.constant 0 : i32
    %c0_i32_0 = arith.constant 0 : i32
    return %arg0, %c0_i32 : i32, i32
  }
  func.func @transform_1(%arg0: i32) -> (i32, i32) {
    %c0_i32 = arith.constant 0 : i32
    %c0_i32_0 = arith.constant 0 : i32
    %c0_i32_1 = arith.constant 0 : i32
    return %c0_i32, %c0_i32_0 : i32, i32
  }
  func.func @transform_2(%arg0: i32) -> (i32, i32) {
    %c0_i32 = arith.constant 0 : i32
    %c0_i32_0 = arith.constant 0 : i32
    %c0_i32_1 = arith.constant 0 : i32
    return %c0_i32, %c0_i32_0 : i32, i32
  }
  func.func @transform_3(%arg0: i32) -> (i32, i32) {
    %c0_i32 = arith.constant 0 : i32
    %c0_i32_0 = arith.constant 0 : i32
    %c0_i32_1 = arith.constant 0 : i32
    return %c0_i32, %c0_i32_0 : i32, i32
  }
  func.func @transform_4(%arg0: i32) -> (i32, i32) {
    %c0_i32 = arith.constant 0 : i32
    %c0_i32_0 = arith.constant 0 : i32
    %c0_i32_1 = arith.constant 0 : i32
    return %c0_i32, %c0_i32_0 : i32, i32
  }
  func.func @transform_5(%arg0: i32) -> (i32, i32) {
    %c0_i32 = arith.constant 0 : i32
    %c0_i32_0 = arith.constant 0 : i32
    %c0_i32_1 = arith.constant 0 : i32
    return %c0_i32, %c0_i32_0 : i32, i32
  }
  func.func @transform_6(%arg0: i32) -> (i32, i32) {
    %c0_i32 = arith.constant 0 : i32
    %c0_i32_0 = arith.constant 0 : i32
    return %arg0, %c0_i32 : i32, i32
  }
}

module attributes {stable_mosaic.version = 11 : i64} {
  func.func @_maxpool_kernel(%arg0: i32, %arg1: memref<9x128x16xf32, #tpu.memory_space<vmem>>, %arg2: memref<128x16xf32, #tpu.memory_space<vmem>>) attributes {dimension_semantics = [#tpu.dimension_semantics<arbitrary>], iteration_bounds = array<i64: 1>, scalar_prefetch = 0 : i64, scratch_operands = 0 : i64, tpu.core_type = #tpu.core_type<tc>, window_params = [{pipeline_mode = #tpu.pipeline_mode<synchronous>, transform_indices = @transform_0, window_bounds = array<i64: 9, 128, 16>}, {pipeline_mode = #tpu.pipeline_mode<synchronous>, transform_indices = @transform_1, window_bounds = array<i64: 128, 16>}]} {
    %c0 = arith.constant 0 : index
    %c0_0 = arith.constant 0 : index
    %c0_1 = arith.constant 0 : index
    %0 = vector.load %arg1[%c0, %c0_0, %c0_1] : memref<9x128x16xf32, #tpu.memory_space<vmem>>, vector<9x128x16xf32>
    %cst = arith.constant dense<0xFF800000> : vector<128x16xf32>
    %1 = vector.multi_reduction <maximumf>, %0, %cst [0] : vector<9x128x16xf32> to vector<128x16xf32>
    %c0_2 = arith.constant 0 : index
    %c0_3 = arith.constant 0 : index
    %2 = vector.load %arg2[%c0_2, %c0_3] : memref<128x16xf32, #tpu.memory_space<vmem>>, vector<128x16xf32>
    tpu.vector_store %arg2[%c0_2, %c0_3], %1 {strides = array<i32>} : memref<128x16xf32, #tpu.memory_space<vmem>>, vector<128x16xf32>,
    return
  }
  func.func @transform_0(%arg0: i32) -> (i32, i32, i32) {
    %c0_i32 = arith.constant 0 : i32
    %c0_i32_0 = arith.constant 0 : i32
    %c0_i32_1 = arith.constant 0 : i32
    %c0_i32_2 = arith.constant 0 : i32
    return %c0_i32, %c0_i32_0, %c0_i32_1 : i32, i32, i32
  }
  func.func @transform_1(%arg0: i32) -> (i32, i32) {
    %c0_i32 = arith.constant 0 : i32
    %c0_i32_0 = arith.constant 0 : i32
    %c0_i32_1 = arith.constant 0 : i32
    return %c0_i32, %c0_i32_0 : i32, i32
  }
}

module attributes {stable_mosaic.version = 11 : i64} {
  func.func @_conv_sum_kernel(%arg0: i32, %arg1: memref<9x128x16xbf16, #tpu.memory_space<vmem>>, %arg2: memref<9x16x8xbf16, #tpu.memory_space<vmem>>, %arg3: memref<128x8xf32, #tpu.memory_space<vmem>>) attributes {dimension_semantics = [#tpu.dimension_semantics<parallel>], iteration_bounds = array<i64: 1>, scalar_prefetch = 0 : i64, scratch_operands = 0 : i64, tpu.core_type = #tpu.core_type<tc>, window_params = [{transform_indices = @transform_0, window_bounds = array<i64: 9, 128, 16>}, {pipeline_mode = #tpu.pipeline_mode<synchronous>, transform_indices = @transform_1, window_bounds = array<i64: 9, 16, 8>}, {transform_indices = @transform_2, window_bounds = array<i64: 128, 8>}]} {
    %c0 = arith.constant 0 : index
    %c0_0 = arith.constant 0 : index
    %c0_1 = arith.constant 0 : index
    %0 = vector.load %arg1[%c0, %c0_0, %c0_1] : memref<9x128x16xbf16, #tpu.memory_space<vmem>>, vector<1x128x16xbf16>
    %1 = vector.shape_cast %0 : vector<1x128x16xbf16> to vector<128x16xbf16>
    %c0_2 = arith.constant 0 : index
    %c0_3 = arith.constant 0 : index
    %c0_4 = arith.constant 0 : index
    %2 = vector.load %arg2[%c0_2, %c0_3, %c0_4] : memref<9x16x8xbf16, #tpu.memory_space<vmem>>, vector<1x16x8xbf16>
    %3 = vector.shape_cast %2 : vector<1x16x8xbf16> to vector<16x8xbf16>
    %cst = arith.constant dense<0.000000e+00> : vector<128x8xf32>
    %4 = tpu.matmul %1, %3, %cst {dimension_numbers = #tpu.dot_dimension_numbers<[1], [0], [0], [1], [0, 0, 1, 1], [], []>} : vector<128x16xbf16>, vector<16x8xbf16>, vector<128x8xf32> -> vector<128x8xf32>
    %c1 = arith.constant 1 : index
    %c0_5 = arith.constant 0 : index
    %c0_6 = arith.constant 0 : index
    %5 = vector.load %arg1[%c1, %c0_5, %c0_6] : memref<9x128x16xbf16, #tpu.memory_space<vmem>>, vector<1x128x16xbf16>
    %6 = vector.shape_cast %5 : vector<1x128x16xbf16> to vector<128x16xbf16>
    %c1_7 = arith.constant 1 : index
    %c0_8 = arith.constant 0 : index
    %c0_9 = arith.constant 0 : index
    %7 = vector.load %arg2[%c1_7, %c0_8, %c0_9] : memref<9x16x8xbf16, #tpu.memory_space<vmem>>, vector<1x16x8xbf16>
    %8 = vector.shape_cast %7 : vector<1x16x8xbf16> to vector<16x8xbf16>
    %cst_10 = arith.constant dense<0.000000e+00> : vector<128x8xf32>
    %9 = tpu.matmul %6, %8, %cst_10 {dimension_numbers = #tpu.dot_dimension_numbers<[1], [0], [0], [1], [0, 0, 1, 1], [], []>} : vector<128x16xbf16>, vector<16x8xbf16>, vector<128x8xf32> -> vector<128x8xf32>
    %10 = arith.addf %4, %9 : vector<128x8xf32>
    %c2 = arith.constant 2 : index
    %c0_11 = arith.constant 0 : index
    %c0_12 = arith.constant 0 : index
    %11 = vector.load %arg1[%c2, %c0_11, %c0_12] : memref<9x128x16xbf16, #tpu.memory_space<vmem>>, vector<1x128x16xbf16>
    %12 = vector.shape_cast %11 : vector<1x128x16xbf16> to vector<128x16xbf16>
    %c2_13 = arith.constant 2 : index
    %c0_14 = arith.constant 0 : index
    %c0_15 = arith.constant 0 : index
    %13 = vector.load %arg2[%c2_13, %c0_14, %c0_15] : memref<9x16x8xbf16, #tpu.memory_space<vmem>>, vector<1x16x8xbf16>
    %14 = vector.shape_cast %13 : vector<1x16x8xbf16> to vector<16x8xbf16>
    %cst_16 = arith.constant dense<0.000000e+00> : vector<128x8xf32>
    %15 = tpu.matmul %12, %14, %cst_16 {dimension_numbers = #tpu.dot_dimension_numbers<[1], [0], [0], [1], [0, 0, 1, 1], [], []>} : vector<128x16xbf16>, vector<16x8xbf16>, vector<128x8xf32> -> vector<128x8xf32>
    %16 = arith.addf %10, %15 : vector<128x8xf32>
    %c3 = arith.constant 3 : index
    %c0_17 = arith.constant 0 : index
    %c0_18 = arith.constant 0 : index
    %17 = vector.load %arg1[%c3, %c0_17, %c0_18] : memref<9x128x16xbf16, #tpu.memory_space<vmem>>, vector<1x128x16xbf16>
    %18 = vector.shape_cast %17 : vector<1x128x16xbf16> to vector<128x16xbf16>
    %c3_19 = arith.constant 3 : index
    %c0_20 = arith.constant 0 : index
    %c0_21 = arith.constant 0 : index
    %19 = vector.load %arg2[%c3_19, %c0_20, %c0_21] : memref<9x16x8xbf16, #tpu.memory_space<vmem>>, vector<1x16x8xbf16>
    %20 = vector.shape_cast %19 : vector<1x16x8xbf16> to vector<16x8xbf16>
    %cst_22 = arith.constant dense<0.000000e+00> : vector<128x8xf32>
    %21 = tpu.matmul %18, %20, %cst_22 {dimension_numbers = #tpu.dot_dimension_numbers<[1], [0], [0], [1], [0, 0, 1, 1], [], []>} : vector<128x16xbf16>, vector<16x8xbf16>, vector<128x8xf32> -> vector<128x8xf32>
    %22 = arith.addf %16, %21 : vector<128x8xf32>
    %c4 = arith.constant 4 : index
    %c0_23 = arith.constant 0 : index
    %c0_24 = arith.constant 0 : index
    %23 = vector.load %arg1[%c4, %c0_23, %c0_24] : memref<9x128x16xbf16, #tpu.memory_space<vmem>>, vector<1x128x16xbf16>
    %24 = vector.shape_cast %23 : vector<1x128x16xbf16> to vector<128x16xbf16>
    %c4_25 = arith.constant 4 : index
    %c0_26 = arith.constant 0 : index
    %c0_27 = arith.constant 0 : index
    %25 = vector.load %arg2[%c4_25, %c0_26, %c0_27] : memref<9x16x8xbf16, #tpu.memory_space<vmem>>, vector<1x16x8xbf16>
    %26 = vector.shape_cast %25 : vector<1x16x8xbf16> to vector<16x8xbf16>
    %cst_28 = arith.constant dense<0.000000e+00> : vector<128x8xf32>
    %27 = tpu.matmul %24, %26, %cst_28 {dimension_numbers = #tpu.dot_dimension_numbers<[1], [0], [0], [1], [0, 0, 1, 1], [], []>} : vector<128x16xbf16>, vector<16x8xbf16>, vector<128x8xf32> -> vector<128x8xf32>
    %28 = arith.addf %22, %27 : vector<128x8xf32>
    %c5 = arith.constant 5 : index
    %c0_29 = arith.constant 0 : index
    %c0_30 = arith.constant 0 : index
    %29 = vector.load %arg1[%c5, %c0_29, %c0_30] : memref<9x128x16xbf16, #tpu.memory_space<vmem>>, vector<1x128x16xbf16>
    %30 = vector.shape_cast %29 : vector<1x128x16xbf16> to vector<128x16xbf16>
    %c5_31 = arith.constant 5 : index
    %c0_32 = arith.constant 0 : index
    %c0_33 = arith.constant 0 : index
    %31 = vector.load %arg2[%c5_31, %c0_32, %c0_33] : memref<9x16x8xbf16, #tpu.memory_space<vmem>>, vector<1x16x8xbf16>
    %32 = vector.shape_cast %31 : vector<1x16x8xbf16> to vector<16x8xbf16>
    %cst_34 = arith.constant dense<0.000000e+00> : vector<128x8xf32>
    %33 = tpu.matmul %30, %32, %cst_34 {dimension_numbers = #tpu.dot_dimension_numbers<[1], [0], [0], [1], [0, 0, 1, 1], [], []>} : vector<128x16xbf16>, vector<16x8xbf16>, vector<128x8xf32> -> vector<128x8xf32>
    %34 = arith.addf %28, %33 : vector<128x8xf32>
    %c6 = arith.constant 6 : index
    %c0_35 = arith.constant 0 : index
    %c0_36 = arith.constant 0 : index
    %35 = vector.load %arg1[%c6, %c0_35, %c0_36] : memref<9x128x16xbf16, #tpu.memory_space<vmem>>, vector<1x128x16xbf16>
    %36 = vector.shape_cast %35 : vector<1x128x16xbf16> to vector<128x16xbf16>
    %c6_37 = arith.constant 6 : index
    %c0_38 = arith.constant 0 : index
    %c0_39 = arith.constant 0 : index
    %37 = vector.load %arg2[%c6_37, %c0_38, %c0_39] : memref<9x16x8xbf16, #tpu.memory_space<vmem>>, vector<1x16x8xbf16>
    %38 = vector.shape_cast %37 : vector<1x16x8xbf16> to vector<16x8xbf16>
    %cst_40 = arith.constant dense<0.000000e+00> : vector<128x8xf32>
    %39 = tpu.matmul %36, %38, %cst_40 {dimension_numbers = #tpu.dot_dimension_numbers<[1], [0], [0], [1], [0, 0, 1, 1], [], []>} : vector<128x16xbf16>, vector<16x8xbf16>, vector<128x8xf32> -> vector<128x8xf32>
    %40 = arith.addf %34, %39 : vector<128x8xf32>
    %c7 = arith.constant 7 : index
    %c0_41 = arith.constant 0 : index
    %c0_42 = arith.constant 0 : index
    %41 = vector.load %arg1[%c7, %c0_41, %c0_42] : memref<9x128x16xbf16, #tpu.memory_space<vmem>>, vector<1x128x16xbf16>
    %42 = vector.shape_cast %41 : vector<1x128x16xbf16> to vector<128x16xbf16>
    %c7_43 = arith.constant 7 : index
    %c0_44 = arith.constant 0 : index
    %c0_45 = arith.constant 0 : index
    %43 = vector.load %arg2[%c7_43, %c0_44, %c0_45] : memref<9x16x8xbf16, #tpu.memory_space<vmem>>, vector<1x16x8xbf16>
    %44 = vector.shape_cast %43 : vector<1x16x8xbf16> to vector<16x8xbf16>
    %cst_46 = arith.constant dense<0.000000e+00> : vector<128x8xf32>
    %45 = tpu.matmul %42, %44, %cst_46 {dimension_numbers = #tpu.dot_dimension_numbers<[1], [0], [0], [1], [0, 0, 1, 1], [], []>} : vector<128x16xbf16>, vector<16x8xbf16>, vector<128x8xf32> -> vector<128x8xf32>
    %46 = arith.addf %40, %45 : vector<128x8xf32>
    %c8 = arith.constant 8 : index
    %c0_47 = arith.constant 0 : index
    %c0_48 = arith.constant 0 : index
    %47 = vector.load %arg1[%c8, %c0_47, %c0_48] : memref<9x128x16xbf16, #tpu.memory_space<vmem>>, vector<1x128x16xbf16>
    %48 = vector.shape_cast %47 : vector<1x128x16xbf16> to vector<128x16xbf16>
    %c8_49 = arith.constant 8 : index
    %c0_50 = arith.constant 0 : index
    %c0_51 = arith.constant 0 : index
    %49 = vector.load %arg2[%c8_49, %c0_50, %c0_51] : memref<9x16x8xbf16, #tpu.memory_space<vmem>>, vector<1x16x8xbf16>
    %50 = vector.shape_cast %49 : vector<1x16x8xbf16> to vector<16x8xbf16>
    %cst_52 = arith.constant dense<0.000000e+00> : vector<128x8xf32>
    %51 = tpu.matmul %48, %50, %cst_52 {dimension_numbers = #tpu.dot_dimension_numbers<[1], [0], [0], [1], [0, 0, 1, 1], [], []>} : vector<128x16xbf16>, vector<16x8xbf16>, vector<128x8xf32> -> vector<128x8xf32>
    %52 = arith.addf %46, %51 : vector<128x8xf32>
    %c0_53 = arith.constant 0 : index
    %c0_54 = arith.constant 0 : index
    %53 = vector.load %arg3[%c0_53, %c0_54] : memref<128x8xf32, #tpu.memory_space<vmem>>, vector<128x8xf32>
    tpu.vector_store %arg3[%c0_53, %c0_54], %52 {strides = array<i32>} : memref<128x8xf32, #tpu.memory_space<vmem>>, vector<128x8xf32>,
    return
  }
  func.func @transform_0(%arg0: i32) -> (i32, i32, i32) {
    %c0_i32 = arith.constant 0 : i32
    %c0_i32_0 = arith.constant 0 : i32
    %c0_i32_1 = arith.constant 0 : i32
    return %c0_i32, %arg0, %c0_i32_0 : i32, i32, i32
  }
  func.func @transform_1(%arg0: i32) -> (i32, i32, i32) {
    %c0_i32 = arith.constant 0 : i32
    %c0_i32_0 = arith.constant 0 : i32
    %c0_i32_1 = arith.constant 0 : i32
    %c0_i32_2 = arith.constant 0 : i32
    return %c0_i32, %c0_i32_0, %c0_i32_1 : i32, i32, i32
  }
  func.func @transform_2(%arg0: i32) -> (i32, i32) {
    %c0_i32 = arith.constant 0 : i32
    %c0_i32_0 = arith.constant 0 : i32
    return %arg0, %c0_i32 : i32, i32
  }
}

module attributes {stable_mosaic.version = 11 : i64} {
  func.func @_bottleneck_kernel(%arg0: i32, %arg1: memref<128x24xf32, #tpu.memory_space<vmem>>, %arg2: memref<1x24xf32, #tpu.memory_space<vmem>>, %arg3: memref<1x24xf32, #tpu.memory_space<vmem>>, %arg4: memref<24x16xbf16, #tpu.memory_space<vmem>>, %arg5: memref<1x16xf32, #tpu.memory_space<vmem>>, %arg6: memref<1x16xf32, #tpu.memory_space<vmem>>, %arg7: memref<128x16xbf16, #tpu.memory_space<vmem>>) attributes {dimension_semantics = [#tpu.dimension_semantics<parallel>], iteration_bounds = array<i64: 1>, scalar_prefetch = 0 : i64, scratch_operands = 0 : i64, tpu.core_type = #tpu.core_type<tc>, window_params = [{transform_indices = @transform_0, window_bounds = array<i64: 128, 24>}, {pipeline_mode = #tpu.pipeline_mode<synchronous>, transform_indices = @transform_1, window_bounds = array<i64: 1, 24>}, {pipeline_mode = #tpu.pipeline_mode<synchronous>, transform_indices = @transform_2, window_bounds = array<i64: 1, 24>}, {pipeline_mode = #tpu.pipeline_mode<synchronous>, transform_indices = @transform_3, window_bounds = array<i64: 24, 16>}, {pipeline_mode = #tpu.pipeline_mode<synchronous>, transform_indices = @transform_4, window_bounds = array<i64: 1, 16>}, {pipeline_mode = #tpu.pipeline_mode<synchronous>, transform_indices = @transform_5, window_bounds = array<i64: 1, 16>}, {transform_indices = @transform_6, window_bounds = array<i64: 128, 16>}]} {
    %c0 = arith.constant 0 : index
    %c0_0 = arith.constant 0 : index
    %0 = vector.load %arg1[%c0, %c0_0] : memref<128x24xf32, #tpu.memory_space<vmem>>, vector<128x24xf32>
    %c0_1 = arith.constant 0 : index
    %c0_2 = arith.constant 0 : index
    %1 = vector.load %arg2[%c0_1, %c0_2] : memref<1x24xf32, #tpu.memory_space<vmem>>, vector<1x24xf32>
    %2 = vector.broadcast %1 : vector<1x24xf32> to vector<128x24xf32>
    %3 = arith.mulf %0, %2 : vector<128x24xf32>
    %c0_3 = arith.constant 0 : index
    %c0_4 = arith.constant 0 : index
    %4 = vector.load %arg3[%c0_3, %c0_4] : memref<1x24xf32, #tpu.memory_space<vmem>>, vector<1x24xf32>
    %5 = vector.broadcast %4 : vector<1x24xf32> to vector<128x24xf32>
    %6 = arith.addf %3, %5 : vector<128x24xf32>
    %cst = arith.constant 0.000000e+00 : f32
    %7 = vector.broadcast %cst : f32 to vector<128x24xf32>
    %8 = arith.maximumf %6, %7 : vector<128x24xf32>
    %9 = arith.truncf %8 : vector<128x24xf32> to vector<128x24xbf16>
    %c0_5 = arith.constant 0 : index
    %c0_6 = arith.constant 0 : index
    %10 = vector.load %arg4[%c0_5, %c0_6] : memref<24x16xbf16, #tpu.memory_space<vmem>>, vector<24x16xbf16>
    %cst_7 = arith.constant dense<0.000000e+00> : vector<128x16xf32>
    %11 = tpu.matmul %9, %10, %cst_7 {dimension_numbers = #tpu.dot_dimension_numbers<[1], [0], [0], [1], [0, 0, 1, 1], [], []>} : vector<128x24xbf16>, vector<24x16xbf16>, vector<128x16xf32> -> vector<128x16xf32>
    %c0_8 = arith.constant 0 : index
    %c0_9 = arith.constant 0 : index
    %12 = vector.load %arg5[%c0_8, %c0_9] : memref<1x16xf32, #tpu.memory_space<vmem>>, vector<1x16xf32>
    %13 = vector.broadcast %12 : vector<1x16xf32> to vector<128x16xf32>
    %14 = arith.mulf %11, %13 : vector<128x16xf32>
    %c0_10 = arith.constant 0 : index
    %c0_11 = arith.constant 0 : index
    %15 = vector.load %arg6[%c0_10, %c0_11] : memref<1x16xf32, #tpu.memory_space<vmem>>, vector<1x16xf32>
    %16 = vector.broadcast %15 : vector<1x16xf32> to vector<128x16xf32>
    %17 = arith.addf %14, %16 : vector<128x16xf32>
    %cst_12 = arith.constant 0.000000e+00 : f32
    %18 = vector.broadcast %cst_12 : f32 to vector<128x16xf32>
    %19 = arith.maximumf %17, %18 : vector<128x16xf32>
    %20 = arith.truncf %19 : vector<128x16xf32> to vector<128x16xbf16>
    %c0_13 = arith.constant 0 : index
    %c0_14 = arith.constant 0 : index
    %21 = vector.load %arg7[%c0_13, %c0_14] : memref<128x16xbf16, #tpu.memory_space<vmem>>, vector<128x16xbf16>
    tpu.vector_store %arg7[%c0_13, %c0_14], %20 {strides = array<i32>} : memref<128x16xbf16, #tpu.memory_space<vmem>>, vector<128x16xbf16>,
    return
  }
  func.func @transform_0(%arg0: i32) -> (i32, i32) {
    %c0_i32 = arith.constant 0 : i32
    %c0_i32_0 = arith.constant 0 : i32
    return %arg0, %c0_i32 : i32, i32
  }
  func.func @transform_1(%arg0: i32) -> (i32, i32) {
    %c0_i32 = arith.constant 0 : i32
    %c0_i32_0 = arith.constant 0 : i32
    %c0_i32_1 = arith.constant 0 : i32
    return %c0_i32, %c0_i32_0 : i32, i32
  }
  func.func @transform_2(%arg0: i32) -> (i32, i32) {
    %c0_i32 = arith.constant 0 : i32
    %c0_i32_0 = arith.constant 0 : i32
    %c0_i32_1 = arith.constant 0 : i32
    return %c0_i32, %c0_i32_0 : i32, i32
  }
  func.func @transform_3(%arg0: i32) -> (i32, i32) {
    %c0_i32 = arith.constant 0 : i32
    %c0_i32_0 = arith.constant 0 : i32
    %c0_i32_1 = arith.constant 0 : i32
    return %c0_i32, %c0_i32_0 : i32, i32
  }
  func.func @transform_4(%arg0: i32) -> (i32, i32) {
    %c0_i32 = arith.constant 0 : i32
    %c0_i32_0 = arith.constant 0 : i32
    %c0_i32_1 = arith.constant 0 : i32
    return %c0_i32, %c0_i32_0 : i32, i32
  }
  func.func @transform_5(%arg0: i32) -> (i32, i32) {
    %c0_i32 = arith.constant 0 : i32
    %c0_i32_0 = arith.constant 0 : i32
    %c0_i32_1 = arith.constant 0 : i32
    return %c0_i32, %c0_i32_0 : i32, i32
  }
  func.func @transform_6(%arg0: i32) -> (i32, i32) {
    %c0_i32 = arith.constant 0 : i32
    %c0_i32_0 = arith.constant 0 : i32
    return %arg0, %c0_i32 : i32, i32
  }
}

module attributes {stable_mosaic.version = 11 : i64} {
  func.func @_transition_kernel(%arg0: i32, %arg1: memref<4x32x32xf32, #tpu.memory_space<vmem>>, %arg2: memref<1x32xf32, #tpu.memory_space<vmem>>, %arg3: memref<1x32xf32, #tpu.memory_space<vmem>>, %arg4: memref<32x16xbf16, #tpu.memory_space<vmem>>, %arg5: memref<32x16xf32, #tpu.memory_space<vmem>>) attributes {dimension_semantics = [#tpu.dimension_semantics<arbitrary>], iteration_bounds = array<i64: 1>, scalar_prefetch = 0 : i64, scratch_operands = 0 : i64, tpu.core_type = #tpu.core_type<tc>, window_params = [{pipeline_mode = #tpu.pipeline_mode<synchronous>, transform_indices = @transform_0, window_bounds = array<i64: 4, 32, 32>}, {pipeline_mode = #tpu.pipeline_mode<synchronous>, transform_indices = @transform_1, window_bounds = array<i64: 1, 32>}, {pipeline_mode = #tpu.pipeline_mode<synchronous>, transform_indices = @transform_2, window_bounds = array<i64: 1, 32>}, {pipeline_mode = #tpu.pipeline_mode<synchronous>, transform_indices = @transform_3, window_bounds = array<i64: 32, 16>}, {pipeline_mode = #tpu.pipeline_mode<synchronous>, transform_indices = @transform_4, window_bounds = array<i64: 32, 16>}]} {
    %c0 = arith.constant 0 : index
    %c0_0 = arith.constant 0 : index
    %c0_1 = arith.constant 0 : index
    %0 = vector.load %arg1[%c0, %c0_0, %c0_1] : memref<4x32x32xf32, #tpu.memory_space<vmem>>, vector<1x32x32xf32>
    %1 = vector.shape_cast %0 : vector<1x32x32xf32> to vector<32x32xf32>
    %c0_2 = arith.constant 0 : index
    %c0_3 = arith.constant 0 : index
    %2 = vector.load %arg2[%c0_2, %c0_3] : memref<1x32xf32, #tpu.memory_space<vmem>>, vector<1x32xf32>
    %3 = vector.broadcast %2 : vector<1x32xf32> to vector<32x32xf32>
    %4 = arith.mulf %1, %3 : vector<32x32xf32>
    %c0_4 = arith.constant 0 : index
    %c0_5 = arith.constant 0 : index
    %5 = vector.load %arg3[%c0_4, %c0_5] : memref<1x32xf32, #tpu.memory_space<vmem>>, vector<1x32xf32>
    %6 = vector.broadcast %5 : vector<1x32xf32> to vector<32x32xf32>
    %7 = arith.addf %4, %6 : vector<32x32xf32>
    %cst = arith.constant 0.000000e+00 : f32
    %8 = vector.broadcast %cst : f32 to vector<32x32xf32>
    %9 = arith.maximumf %7, %8 : vector<32x32xf32>
    %c1 = arith.constant 1 : index
    %c0_6 = arith.constant 0 : index
    %c0_7 = arith.constant 0 : index
    %10 = vector.load %arg1[%c1, %c0_6, %c0_7] : memref<4x32x32xf32, #tpu.memory_space<vmem>>, vector<1x32x32xf32>
    %11 = vector.shape_cast %10 : vector<1x32x32xf32> to vector<32x32xf32>
    %c0_8 = arith.constant 0 : index
    %c0_9 = arith.constant 0 : index
    %12 = vector.load %arg2[%c0_8, %c0_9] : memref<1x32xf32, #tpu.memory_space<vmem>>, vector<1x32xf32>
    %13 = vector.broadcast %12 : vector<1x32xf32> to vector<32x32xf32>
    %14 = arith.mulf %11, %13 : vector<32x32xf32>
    %c0_10 = arith.constant 0 : index
    %c0_11 = arith.constant 0 : index
    %15 = vector.load %arg3[%c0_10, %c0_11] : memref<1x32xf32, #tpu.memory_space<vmem>>, vector<1x32xf32>
    %16 = vector.broadcast %15 : vector<1x32xf32> to vector<32x32xf32>
    %17 = arith.addf %14, %16 : vector<32x32xf32>
    %cst_12 = arith.constant 0.000000e+00 : f32
    %18 = vector.broadcast %cst_12 : f32 to vector<32x32xf32>
    %19 = arith.maximumf %17, %18 : vector<32x32xf32>
    %20 = arith.addf %9, %19 : vector<32x32xf32>
    %c2 = arith.constant 2 : index
    %c0_13 = arith.constant 0 : index
    %c0_14 = arith.constant 0 : index
    %21 = vector.load %arg1[%c2, %c0_13, %c0_14] : memref<4x32x32xf32, #tpu.memory_space<vmem>>, vector<1x32x32xf32>
    %22 = vector.shape_cast %21 : vector<1x32x32xf32> to vector<32x32xf32>
    %c0_15 = arith.constant 0 : index
    %c0_16 = arith.constant 0 : index
    %23 = vector.load %arg2[%c0_15, %c0_16] : memref<1x32xf32, #tpu.memory_space<vmem>>, vector<1x32xf32>
    %24 = vector.broadcast %23 : vector<1x32xf32> to vector<32x32xf32>
    %25 = arith.mulf %22, %24 : vector<32x32xf32>
    %c0_17 = arith.constant 0 : index
    %c0_18 = arith.constant 0 : index
    %26 = vector.load %arg3[%c0_17, %c0_18] : memref<1x32xf32, #tpu.memory_space<vmem>>, vector<1x32xf32>
    %27 = vector.broadcast %26 : vector<1x32xf32> to vector<32x32xf32>
    %28 = arith.addf %25, %27 : vector<32x32xf32>
    %cst_19 = arith.constant 0.000000e+00 : f32
    %29 = vector.broadcast %cst_19 : f32 to vector<32x32xf32>
    %30 = arith.maximumf %28, %29 : vector<32x32xf32>
    %31 = arith.addf %20, %30 : vector<32x32xf32>
    %c3 = arith.constant 3 : index
    %c0_20 = arith.constant 0 : index
    %c0_21 = arith.constant 0 : index
    %32 = vector.load %arg1[%c3, %c0_20, %c0_21] : memref<4x32x32xf32, #tpu.memory_space<vmem>>, vector<1x32x32xf32>
    %33 = vector.shape_cast %32 : vector<1x32x32xf32> to vector<32x32xf32>
    %c0_22 = arith.constant 0 : index
    %c0_23 = arith.constant 0 : index
    %34 = vector.load %arg2[%c0_22, %c0_23] : memref<1x32xf32, #tpu.memory_space<vmem>>, vector<1x32xf32>
    %35 = vector.broadcast %34 : vector<1x32xf32> to vector<32x32xf32>
    %36 = arith.mulf %33, %35 : vector<32x32xf32>
    %c0_24 = arith.constant 0 : index
    %c0_25 = arith.constant 0 : index
    %37 = vector.load %arg3[%c0_24, %c0_25] : memref<1x32xf32, #tpu.memory_space<vmem>>, vector<1x32xf32>
    %38 = vector.broadcast %37 : vector<1x32xf32> to vector<32x32xf32>
    %39 = arith.addf %36, %38 : vector<32x32xf32>
    %cst_26 = arith.constant 0.000000e+00 : f32
    %40 = vector.broadcast %cst_26 : f32 to vector<32x32xf32>
    %41 = arith.maximumf %39, %40 : vector<32x32xf32>
    %42 = arith.addf %31, %41 : vector<32x32xf32>
    %cst_27 = arith.constant 2.500000e-01 : f32
    %43 = vector.broadcast %cst_27 : f32 to vector<32x32xf32>
    %44 = arith.mulf %42, %43 : vector<32x32xf32>
    %45 = arith.truncf %44 : vector<32x32xf32> to vector<32x32xbf16>
    %c0_28 = arith.constant 0 : index
    %c0_29 = arith.constant 0 : index
    %46 = vector.load %arg4[%c0_28, %c0_29] : memref<32x16xbf16, #tpu.memory_space<vmem>>, vector<32x16xbf16>
    %cst_30 = arith.constant dense<0.000000e+00> : vector<32x16xf32>
    %47 = tpu.matmul %45, %46, %cst_30 {dimension_numbers = #tpu.dot_dimension_numbers<[1], [0], [0], [1], [0, 0, 1, 1], [], []>} : vector<32x32xbf16>, vector<32x16xbf16>, vector<32x16xf32> -> vector<32x16xf32>
    %c0_31 = arith.constant 0 : index
    %c0_32 = arith.constant 0 : index
    %48 = vector.load %arg5[%c0_31, %c0_32] : memref<32x16xf32, #tpu.memory_space<vmem>>, vector<32x16xf32>
    tpu.vector_store %arg5[%c0_31, %c0_32], %47 {strides = array<i32>} : memref<32x16xf32, #tpu.memory_space<vmem>>, vector<32x16xf32>,
    return
  }
  func.func @transform_0(%arg0: i32) -> (i32, i32, i32) {
    %c0_i32 = arith.constant 0 : i32
    %c0_i32_0 = arith.constant 0 : i32
    %c0_i32_1 = arith.constant 0 : i32
    %c0_i32_2 = arith.constant 0 : i32
    return %c0_i32, %c0_i32_0, %c0_i32_1 : i32, i32, i32
  }
  func.func @transform_1(%arg0: i32) -> (i32, i32) {
    %c0_i32 = arith.constant 0 : i32
    %c0_i32_0 = arith.constant 0 : i32
    %c0_i32_1 = arith.constant 0 : i32
    return %c0_i32, %c0_i32_0 : i32, i32
  }
  func.func @transform_2(%arg0: i32) -> (i32, i32) {
    %c0_i32 = arith.constant 0 : i32
    %c0_i32_0 = arith.constant 0 : i32
    %c0_i32_1 = arith.constant 0 : i32
    return %c0_i32, %c0_i32_0 : i32, i32
  }
  func.func @transform_3(%arg0: i32) -> (i32, i32) {
    %c0_i32 = arith.constant 0 : i32
    %c0_i32_0 = arith.constant 0 : i32
    %c0_i32_1 = arith.constant 0 : i32
    return %c0_i32, %c0_i32_0 : i32, i32
  }
  func.func @transform_4(%arg0: i32) -> (i32, i32) {
    %c0_i32 = arith.constant 0 : i32
    %c0_i32_0 = arith.constant 0 : i32
    %c0_i32_1 = arith.constant 0 : i32
    return %c0_i32, %c0_i32_0 : i32, i32
  }
}

module attributes {stable_mosaic.version = 11 : i64} {
  func.func @_bottleneck_kernel(%arg0: i32, %arg1: memref<32x16xf32, #tpu.memory_space<vmem>>, %arg2: memref<1x16xf32, #tpu.memory_space<vmem>>, %arg3: memref<1x16xf32, #tpu.memory_space<vmem>>, %arg4: memref<16x16xbf16, #tpu.memory_space<vmem>>, %arg5: memref<1x16xf32, #tpu.memory_space<vmem>>, %arg6: memref<1x16xf32, #tpu.memory_space<vmem>>, %arg7: memref<32x16xbf16, #tpu.memory_space<vmem>>) attributes {dimension_semantics = [#tpu.dimension_semantics<parallel>], iteration_bounds = array<i64: 1>, scalar_prefetch = 0 : i64, scratch_operands = 0 : i64, tpu.core_type = #tpu.core_type<tc>, window_params = [{transform_indices = @transform_0, window_bounds = array<i64: 32, 16>}, {pipeline_mode = #tpu.pipeline_mode<synchronous>, transform_indices = @transform_1, window_bounds = array<i64: 1, 16>}, {pipeline_mode = #tpu.pipeline_mode<synchronous>, transform_indices = @transform_2, window_bounds = array<i64: 1, 16>}, {pipeline_mode = #tpu.pipeline_mode<synchronous>, transform_indices = @transform_3, window_bounds = array<i64: 16, 16>}, {pipeline_mode = #tpu.pipeline_mode<synchronous>, transform_indices = @transform_4, window_bounds = array<i64: 1, 16>}, {pipeline_mode = #tpu.pipeline_mode<synchronous>, transform_indices = @transform_5, window_bounds = array<i64: 1, 16>}, {transform_indices = @transform_6, window_bounds = array<i64: 32, 16>}]} {
    %c0 = arith.constant 0 : index
    %c0_0 = arith.constant 0 : index
    %0 = vector.load %arg1[%c0, %c0_0] : memref<32x16xf32, #tpu.memory_space<vmem>>, vector<32x16xf32>
    %c0_1 = arith.constant 0 : index
    %c0_2 = arith.constant 0 : index
    %1 = vector.load %arg2[%c0_1, %c0_2] : memref<1x16xf32, #tpu.memory_space<vmem>>, vector<1x16xf32>
    %2 = vector.broadcast %1 : vector<1x16xf32> to vector<32x16xf32>
    %3 = arith.mulf %0, %2 : vector<32x16xf32>
    %c0_3 = arith.constant 0 : index
    %c0_4 = arith.constant 0 : index
    %4 = vector.load %arg3[%c0_3, %c0_4] : memref<1x16xf32, #tpu.memory_space<vmem>>, vector<1x16xf32>
    %5 = vector.broadcast %4 : vector<1x16xf32> to vector<32x16xf32>
    %6 = arith.addf %3, %5 : vector<32x16xf32>
    %cst = arith.constant 0.000000e+00 : f32
    %7 = vector.broadcast %cst : f32 to vector<32x16xf32>
    %8 = arith.maximumf %6, %7 : vector<32x16xf32>
    %9 = arith.truncf %8 : vector<32x16xf32> to vector<32x16xbf16>
    %c0_5 = arith.constant 0 : index
    %c0_6 = arith.constant 0 : index
    %10 = vector.load %arg4[%c0_5, %c0_6] : memref<16x16xbf16, #tpu.memory_space<vmem>>, vector<16x16xbf16>
    %cst_7 = arith.constant dense<0.000000e+00> : vector<32x16xf32>
    %11 = tpu.matmul %9, %10, %cst_7 {dimension_numbers = #tpu.dot_dimension_numbers<[1], [0], [0], [1], [0, 0, 1, 1], [], []>} : vector<32x16xbf16>, vector<16x16xbf16>, vector<32x16xf32> -> vector<32x16xf32>
    %c0_8 = arith.constant 0 : index
    %c0_9 = arith.constant 0 : index
    %12 = vector.load %arg5[%c0_8, %c0_9] : memref<1x16xf32, #tpu.memory_space<vmem>>, vector<1x16xf32>
    %13 = vector.broadcast %12 : vector<1x16xf32> to vector<32x16xf32>
    %14 = arith.mulf %11, %13 : vector<32x16xf32>
    %c0_10 = arith.constant 0 : index
    %c0_11 = arith.constant 0 : index
    %15 = vector.load %arg6[%c0_10, %c0_11] : memref<1x16xf32, #tpu.memory_space<vmem>>, vector<1x16xf32>
    %16 = vector.broadcast %15 : vector<1x16xf32> to vector<32x16xf32>
    %17 = arith.addf %14, %16 : vector<32x16xf32>
    %cst_12 = arith.constant 0.000000e+00 : f32
    %18 = vector.broadcast %cst_12 : f32 to vector<32x16xf32>
    %19 = arith.maximumf %17, %18 : vector<32x16xf32>
    %20 = arith.truncf %19 : vector<32x16xf32> to vector<32x16xbf16>
    %c0_13 = arith.constant 0 : index
    %c0_14 = arith.constant 0 : index
    %21 = vector.load %arg7[%c0_13, %c0_14] : memref<32x16xbf16, #tpu.memory_space<vmem>>, vector<32x16xbf16>
    tpu.vector_store %arg7[%c0_13, %c0_14], %20 {strides = array<i32>} : memref<32x16xbf16, #tpu.memory_space<vmem>>, vector<32x16xbf16>,
    return
  }
  func.func @transform_0(%arg0: i32) -> (i32, i32) {
    %c0_i32 = arith.constant 0 : i32
    %c0_i32_0 = arith.constant 0 : i32
    return %arg0, %c0_i32 : i32, i32
  }
  func.func @transform_1(%arg0: i32) -> (i32, i32) {
    %c0_i32 = arith.constant 0 : i32
    %c0_i32_0 = arith.constant 0 : i32
    %c0_i32_1 = arith.constant 0 : i32
    return %c0_i32, %c0_i32_0 : i32, i32
  }
  func.func @transform_2(%arg0: i32) -> (i32, i32) {
    %c0_i32 = arith.constant 0 : i32
    %c0_i32_0 = arith.constant 0 : i32
    %c0_i32_1 = arith.constant 0 : i32
    return %c0_i32, %c0_i32_0 : i32, i32
  }
  func.func @transform_3(%arg0: i32) -> (i32, i32) {
    %c0_i32 = arith.constant 0 : i32
    %c0_i32_0 = arith.constant 0 : i32
    %c0_i32_1 = arith.constant 0 : i32
    return %c0_i32, %c0_i32_0 : i32, i32
  }
  func.func @transform_4(%arg0: i32) -> (i32, i32) {
    %c0_i32 = arith.constant 0 : i32
    %c0_i32_0 = arith.constant 0 : i32
    %c0_i32_1 = arith.constant 0 : i32
    return %c0_i32, %c0_i32_0 : i32, i32
  }
  func.func @transform_5(%arg0: i32) -> (i32, i32) {
    %c0_i32 = arith.constant 0 : i32
    %c0_i32_0 = arith.constant 0 : i32
    %c0_i32_1 = arith.constant 0 : i32
    return %c0_i32, %c0_i32_0 : i32, i32
  }
  func.func @transform_6(%arg0: i32) -> (i32, i32) {
    %c0_i32 = arith.constant 0 : i32
    %c0_i32_0 = arith.constant 0 : i32
    return %arg0, %c0_i32 : i32, i32
  }
}

module attributes {stable_mosaic.version = 11 : i64} {
  func.func @_conv_sum_kernel(%arg0: i32, %arg1: memref<9x32x16xbf16, #tpu.memory_space<vmem>>, %arg2: memref<9x16x8xbf16, #tpu.memory_space<vmem>>, %arg3: memref<32x8xf32, #tpu.memory_space<vmem>>) attributes {dimension_semantics = [#tpu.dimension_semantics<parallel>], iteration_bounds = array<i64: 1>, scalar_prefetch = 0 : i64, scratch_operands = 0 : i64, tpu.core_type = #tpu.core_type<tc>, window_params = [{transform_indices = @transform_0, window_bounds = array<i64: 9, 32, 16>}, {pipeline_mode = #tpu.pipeline_mode<synchronous>, transform_indices = @transform_1, window_bounds = array<i64: 9, 16, 8>}, {transform_indices = @transform_2, window_bounds = array<i64: 32, 8>}]} {
    %c0 = arith.constant 0 : index
    %c0_0 = arith.constant 0 : index
    %c0_1 = arith.constant 0 : index
    %0 = vector.load %arg1[%c0, %c0_0, %c0_1] : memref<9x32x16xbf16, #tpu.memory_space<vmem>>, vector<1x32x16xbf16>
    %1 = vector.shape_cast %0 : vector<1x32x16xbf16> to vector<32x16xbf16>
    %c0_2 = arith.constant 0 : index
    %c0_3 = arith.constant 0 : index
    %c0_4 = arith.constant 0 : index
    %2 = vector.load %arg2[%c0_2, %c0_3, %c0_4] : memref<9x16x8xbf16, #tpu.memory_space<vmem>>, vector<1x16x8xbf16>
    %3 = vector.shape_cast %2 : vector<1x16x8xbf16> to vector<16x8xbf16>
    %cst = arith.constant dense<0.000000e+00> : vector<32x8xf32>
    %4 = tpu.matmul %1, %3, %cst {dimension_numbers = #tpu.dot_dimension_numbers<[1], [0], [0], [1], [0, 0, 1, 1], [], []>} : vector<32x16xbf16>, vector<16x8xbf16>, vector<32x8xf32> -> vector<32x8xf32>
    %c1 = arith.constant 1 : index
    %c0_5 = arith.constant 0 : index
    %c0_6 = arith.constant 0 : index
    %5 = vector.load %arg1[%c1, %c0_5, %c0_6] : memref<9x32x16xbf16, #tpu.memory_space<vmem>>, vector<1x32x16xbf16>
    %6 = vector.shape_cast %5 : vector<1x32x16xbf16> to vector<32x16xbf16>
    %c1_7 = arith.constant 1 : index
    %c0_8 = arith.constant 0 : index
    %c0_9 = arith.constant 0 : index
    %7 = vector.load %arg2[%c1_7, %c0_8, %c0_9] : memref<9x16x8xbf16, #tpu.memory_space<vmem>>, vector<1x16x8xbf16>
    %8 = vector.shape_cast %7 : vector<1x16x8xbf16> to vector<16x8xbf16>
    %cst_10 = arith.constant dense<0.000000e+00> : vector<32x8xf32>
    %9 = tpu.matmul %6, %8, %cst_10 {dimension_numbers = #tpu.dot_dimension_numbers<[1], [0], [0], [1], [0, 0, 1, 1], [], []>} : vector<32x16xbf16>, vector<16x8xbf16>, vector<32x8xf32> -> vector<32x8xf32>
    %10 = arith.addf %4, %9 : vector<32x8xf32>
    %c2 = arith.constant 2 : index
    %c0_11 = arith.constant 0 : index
    %c0_12 = arith.constant 0 : index
    %11 = vector.load %arg1[%c2, %c0_11, %c0_12] : memref<9x32x16xbf16, #tpu.memory_space<vmem>>, vector<1x32x16xbf16>
    %12 = vector.shape_cast %11 : vector<1x32x16xbf16> to vector<32x16xbf16>
    %c2_13 = arith.constant 2 : index
    %c0_14 = arith.constant 0 : index
    %c0_15 = arith.constant 0 : index
    %13 = vector.load %arg2[%c2_13, %c0_14, %c0_15] : memref<9x16x8xbf16, #tpu.memory_space<vmem>>, vector<1x16x8xbf16>
    %14 = vector.shape_cast %13 : vector<1x16x8xbf16> to vector<16x8xbf16>
    %cst_16 = arith.constant dense<0.000000e+00> : vector<32x8xf32>
    %15 = tpu.matmul %12, %14, %cst_16 {dimension_numbers = #tpu.dot_dimension_numbers<[1], [0], [0], [1], [0, 0, 1, 1], [], []>} : vector<32x16xbf16>, vector<16x8xbf16>, vector<32x8xf32> -> vector<32x8xf32>
    %16 = arith.addf %10, %15 : vector<32x8xf32>
    %c3 = arith.constant 3 : index
    %c0_17 = arith.constant 0 : index
    %c0_18 = arith.constant 0 : index
    %17 = vector.load %arg1[%c3, %c0_17, %c0_18] : memref<9x32x16xbf16, #tpu.memory_space<vmem>>, vector<1x32x16xbf16>
    %18 = vector.shape_cast %17 : vector<1x32x16xbf16> to vector<32x16xbf16>
    %c3_19 = arith.constant 3 : index
    %c0_20 = arith.constant 0 : index
    %c0_21 = arith.constant 0 : index
    %19 = vector.load %arg2[%c3_19, %c0_20, %c0_21] : memref<9x16x8xbf16, #tpu.memory_space<vmem>>, vector<1x16x8xbf16>
    %20 = vector.shape_cast %19 : vector<1x16x8xbf16> to vector<16x8xbf16>
    %cst_22 = arith.constant dense<0.000000e+00> : vector<32x8xf32>
    %21 = tpu.matmul %18, %20, %cst_22 {dimension_numbers = #tpu.dot_dimension_numbers<[1], [0], [0], [1], [0, 0, 1, 1], [], []>} : vector<32x16xbf16>, vector<16x8xbf16>, vector<32x8xf32> -> vector<32x8xf32>
    %22 = arith.addf %16, %21 : vector<32x8xf32>
    %c4 = arith.constant 4 : index
    %c0_23 = arith.constant 0 : index
    %c0_24 = arith.constant 0 : index
    %23 = vector.load %arg1[%c4, %c0_23, %c0_24] : memref<9x32x16xbf16, #tpu.memory_space<vmem>>, vector<1x32x16xbf16>
    %24 = vector.shape_cast %23 : vector<1x32x16xbf16> to vector<32x16xbf16>
    %c4_25 = arith.constant 4 : index
    %c0_26 = arith.constant 0 : index
    %c0_27 = arith.constant 0 : index
    %25 = vector.load %arg2[%c4_25, %c0_26, %c0_27] : memref<9x16x8xbf16, #tpu.memory_space<vmem>>, vector<1x16x8xbf16>
    %26 = vector.shape_cast %25 : vector<1x16x8xbf16> to vector<16x8xbf16>
    %cst_28 = arith.constant dense<0.000000e+00> : vector<32x8xf32>
    %27 = tpu.matmul %24, %26, %cst_28 {dimension_numbers = #tpu.dot_dimension_numbers<[1], [0], [0], [1], [0, 0, 1, 1], [], []>} : vector<32x16xbf16>, vector<16x8xbf16>, vector<32x8xf32> -> vector<32x8xf32>
    %28 = arith.addf %22, %27 : vector<32x8xf32>
    %c5 = arith.constant 5 : index
    %c0_29 = arith.constant 0 : index
    %c0_30 = arith.constant 0 : index
    %29 = vector.load %arg1[%c5, %c0_29, %c0_30] : memref<9x32x16xbf16, #tpu.memory_space<vmem>>, vector<1x32x16xbf16>
    %30 = vector.shape_cast %29 : vector<1x32x16xbf16> to vector<32x16xbf16>
    %c5_31 = arith.constant 5 : index
    %c0_32 = arith.constant 0 : index
    %c0_33 = arith.constant 0 : index
    %31 = vector.load %arg2[%c5_31, %c0_32, %c0_33] : memref<9x16x8xbf16, #tpu.memory_space<vmem>>, vector<1x16x8xbf16>
    %32 = vector.shape_cast %31 : vector<1x16x8xbf16> to vector<16x8xbf16>
    %cst_34 = arith.constant dense<0.000000e+00> : vector<32x8xf32>
    %33 = tpu.matmul %30, %32, %cst_34 {dimension_numbers = #tpu.dot_dimension_numbers<[1], [0], [0], [1], [0, 0, 1, 1], [], []>} : vector<32x16xbf16>, vector<16x8xbf16>, vector<32x8xf32> -> vector<32x8xf32>
    %34 = arith.addf %28, %33 : vector<32x8xf32>
    %c6 = arith.constant 6 : index
    %c0_35 = arith.constant 0 : index
    %c0_36 = arith.constant 0 : index
    %35 = vector.load %arg1[%c6, %c0_35, %c0_36] : memref<9x32x16xbf16, #tpu.memory_space<vmem>>, vector<1x32x16xbf16>
    %36 = vector.shape_cast %35 : vector<1x32x16xbf16> to vector<32x16xbf16>
    %c6_37 = arith.constant 6 : index
    %c0_38 = arith.constant 0 : index
    %c0_39 = arith.constant 0 : index
    %37 = vector.load %arg2[%c6_37, %c0_38, %c0_39] : memref<9x16x8xbf16, #tpu.memory_space<vmem>>, vector<1x16x8xbf16>
    %38 = vector.shape_cast %37 : vector<1x16x8xbf16> to vector<16x8xbf16>
    %cst_40 = arith.constant dense<0.000000e+00> : vector<32x8xf32>
    %39 = tpu.matmul %36, %38, %cst_40 {dimension_numbers = #tpu.dot_dimension_numbers<[1], [0], [0], [1], [0, 0, 1, 1], [], []>} : vector<32x16xbf16>, vector<16x8xbf16>, vector<32x8xf32> -> vector<32x8xf32>
    %40 = arith.addf %34, %39 : vector<32x8xf32>
    %c7 = arith.constant 7 : index
    %c0_41 = arith.constant 0 : index
    %c0_42 = arith.constant 0 : index
    %41 = vector.load %arg1[%c7, %c0_41, %c0_42] : memref<9x32x16xbf16, #tpu.memory_space<vmem>>, vector<1x32x16xbf16>
    %42 = vector.shape_cast %41 : vector<1x32x16xbf16> to vector<32x16xbf16>
    %c7_43 = arith.constant 7 : index
    %c0_44 = arith.constant 0 : index
    %c0_45 = arith.constant 0 : index
    %43 = vector.load %arg2[%c7_43, %c0_44, %c0_45] : memref<9x16x8xbf16, #tpu.memory_space<vmem>>, vector<1x16x8xbf16>
    %44 = vector.shape_cast %43 : vector<1x16x8xbf16> to vector<16x8xbf16>
    %cst_46 = arith.constant dense<0.000000e+00> : vector<32x8xf32>
    %45 = tpu.matmul %42, %44, %cst_46 {dimension_numbers = #tpu.dot_dimension_numbers<[1], [0], [0], [1], [0, 0, 1, 1], [], []>} : vector<32x16xbf16>, vector<16x8xbf16>, vector<32x8xf32> -> vector<32x8xf32>
    %46 = arith.addf %40, %45 : vector<32x8xf32>
    %c8 = arith.constant 8 : index
    %c0_47 = arith.constant 0 : index
    %c0_48 = arith.constant 0 : index
    %47 = vector.load %arg1[%c8, %c0_47, %c0_48] : memref<9x32x16xbf16, #tpu.memory_space<vmem>>, vector<1x32x16xbf16>
    %48 = vector.shape_cast %47 : vector<1x32x16xbf16> to vector<32x16xbf16>
    %c8_49 = arith.constant 8 : index
    %c0_50 = arith.constant 0 : index
    %c0_51 = arith.constant 0 : index
    %49 = vector.load %arg2[%c8_49, %c0_50, %c0_51] : memref<9x16x8xbf16, #tpu.memory_space<vmem>>, vector<1x16x8xbf16>
    %50 = vector.shape_cast %49 : vector<1x16x8xbf16> to vector<16x8xbf16>
    %cst_52 = arith.constant dense<0.000000e+00> : vector<32x8xf32>
    %51 = tpu.matmul %48, %50, %cst_52 {dimension_numbers = #tpu.dot_dimension_numbers<[1], [0], [0], [1], [0, 0, 1, 1], [], []>} : vector<32x16xbf16>, vector<16x8xbf16>, vector<32x8xf32> -> vector<32x8xf32>
    %52 = arith.addf %46, %51 : vector<32x8xf32>
    %c0_53 = arith.constant 0 : index
    %c0_54 = arith.constant 0 : index
    %53 = vector.load %arg3[%c0_53, %c0_54] : memref<32x8xf32, #tpu.memory_space<vmem>>, vector<32x8xf32>
    tpu.vector_store %arg3[%c0_53, %c0_54], %52 {strides = array<i32>} : memref<32x8xf32, #tpu.memory_space<vmem>>, vector<32x8xf32>,
    return
  }
  func.func @transform_0(%arg0: i32) -> (i32, i32, i32) {
    %c0_i32 = arith.constant 0 : i32
    %c0_i32_0 = arith.constant 0 : i32
    %c0_i32_1 = arith.constant 0 : i32
    return %c0_i32, %arg0, %c0_i32_0 : i32, i32, i32
  }
  func.func @transform_1(%arg0: i32) -> (i32, i32, i32) {
    %c0_i32 = arith.constant 0 : i32
    %c0_i32_0 = arith.constant 0 : i32
    %c0_i32_1 = arith.constant 0 : i32
    %c0_i32_2 = arith.constant 0 : i32
    return %c0_i32, %c0_i32_0, %c0_i32_1 : i32, i32, i32
  }
  func.func @transform_2(%arg0: i32) -> (i32, i32) {
    %c0_i32 = arith.constant 0 : i32
    %c0_i32_0 = arith.constant 0 : i32
    return %arg0, %c0_i32 : i32, i32
  }
}

module attributes {stable_mosaic.version = 11 : i64} {
  func.func @_bottleneck_kernel(%arg0: i32, %arg1: memref<32x24xf32, #tpu.memory_space<vmem>>, %arg2: memref<1x24xf32, #tpu.memory_space<vmem>>, %arg3: memref<1x24xf32, #tpu.memory_space<vmem>>, %arg4: memref<24x16xbf16, #tpu.memory_space<vmem>>, %arg5: memref<1x16xf32, #tpu.memory_space<vmem>>, %arg6: memref<1x16xf32, #tpu.memory_space<vmem>>, %arg7: memref<32x16xbf16, #tpu.memory_space<vmem>>) attributes {dimension_semantics = [#tpu.dimension_semantics<parallel>], iteration_bounds = array<i64: 1>, scalar_prefetch = 0 : i64, scratch_operands = 0 : i64, tpu.core_type = #tpu.core_type<tc>, window_params = [{transform_indices = @transform_0, window_bounds = array<i64: 32, 24>}, {pipeline_mode = #tpu.pipeline_mode<synchronous>, transform_indices = @transform_1, window_bounds = array<i64: 1, 24>}, {pipeline_mode = #tpu.pipeline_mode<synchronous>, transform_indices = @transform_2, window_bounds = array<i64: 1, 24>}, {pipeline_mode = #tpu.pipeline_mode<synchronous>, transform_indices = @transform_3, window_bounds = array<i64: 24, 16>}, {pipeline_mode = #tpu.pipeline_mode<synchronous>, transform_indices = @transform_4, window_bounds = array<i64: 1, 16>}, {pipeline_mode = #tpu.pipeline_mode<synchronous>, transform_indices = @transform_5, window_bounds = array<i64: 1, 16>}, {transform_indices = @transform_6, window_bounds = array<i64: 32, 16>}]} {
    %c0 = arith.constant 0 : index
    %c0_0 = arith.constant 0 : index
    %0 = vector.load %arg1[%c0, %c0_0] : memref<32x24xf32, #tpu.memory_space<vmem>>, vector<32x24xf32>
    %c0_1 = arith.constant 0 : index
    %c0_2 = arith.constant 0 : index
    %1 = vector.load %arg2[%c0_1, %c0_2] : memref<1x24xf32, #tpu.memory_space<vmem>>, vector<1x24xf32>
    %2 = vector.broadcast %1 : vector<1x24xf32> to vector<32x24xf32>
    %3 = arith.mulf %0, %2 : vector<32x24xf32>
    %c0_3 = arith.constant 0 : index
    %c0_4 = arith.constant 0 : index
    %4 = vector.load %arg3[%c0_3, %c0_4] : memref<1x24xf32, #tpu.memory_space<vmem>>, vector<1x24xf32>
    %5 = vector.broadcast %4 : vector<1x24xf32> to vector<32x24xf32>
    %6 = arith.addf %3, %5 : vector<32x24xf32>
    %cst = arith.constant 0.000000e+00 : f32
    %7 = vector.broadcast %cst : f32 to vector<32x24xf32>
    %8 = arith.maximumf %6, %7 : vector<32x24xf32>
    %9 = arith.truncf %8 : vector<32x24xf32> to vector<32x24xbf16>
    %c0_5 = arith.constant 0 : index
    %c0_6 = arith.constant 0 : index
    %10 = vector.load %arg4[%c0_5, %c0_6] : memref<24x16xbf16, #tpu.memory_space<vmem>>, vector<24x16xbf16>
    %cst_7 = arith.constant dense<0.000000e+00> : vector<32x16xf32>
    %11 = tpu.matmul %9, %10, %cst_7 {dimension_numbers = #tpu.dot_dimension_numbers<[1], [0], [0], [1], [0, 0, 1, 1], [], []>} : vector<32x24xbf16>, vector<24x16xbf16>, vector<32x16xf32> -> vector<32x16xf32>
    %c0_8 = arith.constant 0 : index
    %c0_9 = arith.constant 0 : index
    %12 = vector.load %arg5[%c0_8, %c0_9] : memref<1x16xf32, #tpu.memory_space<vmem>>, vector<1x16xf32>
    %13 = vector.broadcast %12 : vector<1x16xf32> to vector<32x16xf32>
    %14 = arith.mulf %11, %13 : vector<32x16xf32>
    %c0_10 = arith.constant 0 : index
    %c0_11 = arith.constant 0 : index
    %15 = vector.load %arg6[%c0_10, %c0_11] : memref<1x16xf32, #tpu.memory_space<vmem>>, vector<1x16xf32>
    %16 = vector.broadcast %15 : vector<1x16xf32> to vector<32x16xf32>
    %17 = arith.addf %14, %16 : vector<32x16xf32>
    %cst_12 = arith.constant 0.000000e+00 : f32
    %18 = vector.broadcast %cst_12 : f32 to vector<32x16xf32>
    %19 = arith.maximumf %17, %18 : vector<32x16xf32>
    %20 = arith.truncf %19 : vector<32x16xf32> to vector<32x16xbf16>
    %c0_13 = arith.constant 0 : index
    %c0_14 = arith.constant 0 : index
    %21 = vector.load %arg7[%c0_13, %c0_14] : memref<32x16xbf16, #tpu.memory_space<vmem>>, vector<32x16xbf16>
    tpu.vector_store %arg7[%c0_13, %c0_14], %20 {strides = array<i32>} : memref<32x16xbf16, #tpu.memory_space<vmem>>, vector<32x16xbf16>,
    return
  }
  func.func @transform_0(%arg0: i32) -> (i32, i32) {
    %c0_i32 = arith.constant 0 : i32
    %c0_i32_0 = arith.constant 0 : i32
    return %arg0, %c0_i32 : i32, i32
  }
  func.func @transform_1(%arg0: i32) -> (i32, i32) {
    %c0_i32 = arith.constant 0 : i32
    %c0_i32_0 = arith.constant 0 : i32
    %c0_i32_1 = arith.constant 0 : i32
    return %c0_i32, %c0_i32_0 : i32, i32
  }
  func.func @transform_2(%arg0: i32) -> (i32, i32) {
    %c0_i32 = arith.constant 0 : i32
    %c0_i32_0 = arith.constant 0 : i32
    %c0_i32_1 = arith.constant 0 : i32
    return %c0_i32, %c0_i32_0 : i32, i32
  }
  func.func @transform_3(%arg0: i32) -> (i32, i32) {
    %c0_i32 = arith.constant 0 : i32
    %c0_i32_0 = arith.constant 0 : i32
    %c0_i32_1 = arith.constant 0 : i32
    return %c0_i32, %c0_i32_0 : i32, i32
  }
  func.func @transform_4(%arg0: i32) -> (i32, i32) {
    %c0_i32 = arith.constant 0 : i32
    %c0_i32_0 = arith.constant 0 : i32
    %c0_i32_1 = arith.constant 0 : i32
    return %c0_i32, %c0_i32_0 : i32, i32
  }
  func.func @transform_5(%arg0: i32) -> (i32, i32) {
    %c0_i32 = arith.constant 0 : i32
    %c0_i32_0 = arith.constant 0 : i32
    %c0_i32_1 = arith.constant 0 : i32
    return %c0_i32, %c0_i32_0 : i32, i32
  }
  func.func @transform_6(%arg0: i32) -> (i32, i32) {
    %c0_i32 = arith.constant 0 : i32
    %c0_i32_0 = arith.constant 0 : i32
    return %arg0, %c0_i32 : i32, i32
  }
}

module attributes {stable_mosaic.version = 11 : i64} {
  func.func @_bottleneck_kernel(%arg0: i32, %arg1: memref<8x16xf32, #tpu.memory_space<vmem>>, %arg2: memref<1x16xf32, #tpu.memory_space<vmem>>, %arg3: memref<1x16xf32, #tpu.memory_space<vmem>>, %arg4: memref<16x16xbf16, #tpu.memory_space<vmem>>, %arg5: memref<1x16xf32, #tpu.memory_space<vmem>>, %arg6: memref<1x16xf32, #tpu.memory_space<vmem>>, %arg7: memref<8x16xbf16, #tpu.memory_space<vmem>>) attributes {dimension_semantics = [#tpu.dimension_semantics<parallel>], iteration_bounds = array<i64: 1>, scalar_prefetch = 0 : i64, scratch_operands = 0 : i64, tpu.core_type = #tpu.core_type<tc>, window_params = [{transform_indices = @transform_0, window_bounds = array<i64: 8, 16>}, {pipeline_mode = #tpu.pipeline_mode<synchronous>, transform_indices = @transform_1, window_bounds = array<i64: 1, 16>}, {pipeline_mode = #tpu.pipeline_mode<synchronous>, transform_indices = @transform_2, window_bounds = array<i64: 1, 16>}, {pipeline_mode = #tpu.pipeline_mode<synchronous>, transform_indices = @transform_3, window_bounds = array<i64: 16, 16>}, {pipeline_mode = #tpu.pipeline_mode<synchronous>, transform_indices = @transform_4, window_bounds = array<i64: 1, 16>}, {pipeline_mode = #tpu.pipeline_mode<synchronous>, transform_indices = @transform_5, window_bounds = array<i64: 1, 16>}, {transform_indices = @transform_6, window_bounds = array<i64: 8, 16>}]} {
    %c0 = arith.constant 0 : index
    %c0_0 = arith.constant 0 : index
    %0 = vector.load %arg1[%c0, %c0_0] : memref<8x16xf32, #tpu.memory_space<vmem>>, vector<8x16xf32>
    %c0_1 = arith.constant 0 : index
    %c0_2 = arith.constant 0 : index
    %1 = vector.load %arg2[%c0_1, %c0_2] : memref<1x16xf32, #tpu.memory_space<vmem>>, vector<1x16xf32>
    %2 = vector.broadcast %1 : vector<1x16xf32> to vector<8x16xf32>
    %3 = arith.mulf %0, %2 : vector<8x16xf32>
    %c0_3 = arith.constant 0 : index
    %c0_4 = arith.constant 0 : index
    %4 = vector.load %arg3[%c0_3, %c0_4] : memref<1x16xf32, #tpu.memory_space<vmem>>, vector<1x16xf32>
    %5 = vector.broadcast %4 : vector<1x16xf32> to vector<8x16xf32>
    %6 = arith.addf %3, %5 : vector<8x16xf32>
    %cst = arith.constant 0.000000e+00 : f32
    %7 = vector.broadcast %cst : f32 to vector<8x16xf32>
    %8 = arith.maximumf %6, %7 : vector<8x16xf32>
    %9 = arith.truncf %8 : vector<8x16xf32> to vector<8x16xbf16>
    %c0_5 = arith.constant 0 : index
    %c0_6 = arith.constant 0 : index
    %10 = vector.load %arg4[%c0_5, %c0_6] : memref<16x16xbf16, #tpu.memory_space<vmem>>, vector<16x16xbf16>
    %cst_7 = arith.constant dense<0.000000e+00> : vector<8x16xf32>
    %11 = tpu.matmul %9, %10, %cst_7 {dimension_numbers = #tpu.dot_dimension_numbers<[1], [0], [0], [1], [0, 0, 1, 1], [], []>} : vector<8x16xbf16>, vector<16x16xbf16>, vector<8x16xf32> -> vector<8x16xf32>
    %c0_8 = arith.constant 0 : index
    %c0_9 = arith.constant 0 : index
    %12 = vector.load %arg5[%c0_8, %c0_9] : memref<1x16xf32, #tpu.memory_space<vmem>>, vector<1x16xf32>
    %13 = vector.broadcast %12 : vector<1x16xf32> to vector<8x16xf32>
    %14 = arith.mulf %11, %13 : vector<8x16xf32>
    %c0_10 = arith.constant 0 : index
    %c0_11 = arith.constant 0 : index
    %15 = vector.load %arg6[%c0_10, %c0_11] : memref<1x16xf32, #tpu.memory_space<vmem>>, vector<1x16xf32>
    %16 = vector.broadcast %15 : vector<1x16xf32> to vector<8x16xf32>
    %17 = arith.addf %14, %16 : vector<8x16xf32>
    %cst_12 = arith.constant 0.000000e+00 : f32
    %18 = vector.broadcast %cst_12 : f32 to vector<8x16xf32>
    %19 = arith.maximumf %17, %18 : vector<8x16xf32>
    %20 = arith.truncf %19 : vector<8x16xf32> to vector<8x16xbf16>
    %c0_13 = arith.constant 0 : index
    %c0_14 = arith.constant 0 : index
    %21 = vector.load %arg7[%c0_13, %c0_14] : memref<8x16xbf16, #tpu.memory_space<vmem>>, vector<8x16xbf16>
    tpu.vector_store %arg7[%c0_13, %c0_14], %20 {strides = array<i32>} : memref<8x16xbf16, #tpu.memory_space<vmem>>, vector<8x16xbf16>,
    return
  }
  func.func @transform_0(%arg0: i32) -> (i32, i32) {
    %c0_i32 = arith.constant 0 : i32
    %c0_i32_0 = arith.constant 0 : i32
    return %arg0, %c0_i32 : i32, i32
  }
  func.func @transform_1(%arg0: i32) -> (i32, i32) {
    %c0_i32 = arith.constant 0 : i32
    %c0_i32_0 = arith.constant 0 : i32
    %c0_i32_1 = arith.constant 0 : i32
    return %c0_i32, %c0_i32_0 : i32, i32
  }
  func.func @transform_2(%arg0: i32) -> (i32, i32) {
    %c0_i32 = arith.constant 0 : i32
    %c0_i32_0 = arith.constant 0 : i32
    %c0_i32_1 = arith.constant 0 : i32
    return %c0_i32, %c0_i32_0 : i32, i32
  }
  func.func @transform_3(%arg0: i32) -> (i32, i32) {
    %c0_i32 = arith.constant 0 : i32
    %c0_i32_0 = arith.constant 0 : i32
    %c0_i32_1 = arith.constant 0 : i32
    return %c0_i32, %c0_i32_0 : i32, i32
  }
  func.func @transform_4(%arg0: i32) -> (i32, i32) {
    %c0_i32 = arith.constant 0 : i32
    %c0_i32_0 = arith.constant 0 : i32
    %c0_i32_1 = arith.constant 0 : i32
    return %c0_i32, %c0_i32_0 : i32, i32
  }
  func.func @transform_5(%arg0: i32) -> (i32, i32) {
    %c0_i32 = arith.constant 0 : i32
    %c0_i32_0 = arith.constant 0 : i32
    %c0_i32_1 = arith.constant 0 : i32
    return %c0_i32, %c0_i32_0 : i32, i32
  }
  func.func @transform_6(%arg0: i32) -> (i32, i32) {
    %c0_i32 = arith.constant 0 : i32
    %c0_i32_0 = arith.constant 0 : i32
    return %arg0, %c0_i32 : i32, i32
  }
}

module attributes {stable_mosaic.version = 11 : i64} {
  func.func @_transition_kernel(%arg0: i32, %arg1: memref<4x8x32xf32, #tpu.memory_space<vmem>>, %arg2: memref<1x32xf32, #tpu.memory_space<vmem>>, %arg3: memref<1x32xf32, #tpu.memory_space<vmem>>, %arg4: memref<32x16xbf16, #tpu.memory_space<vmem>>, %arg5: memref<8x16xf32, #tpu.memory_space<vmem>>) attributes {dimension_semantics = [#tpu.dimension_semantics<arbitrary>], iteration_bounds = array<i64: 1>, scalar_prefetch = 0 : i64, scratch_operands = 0 : i64, tpu.core_type = #tpu.core_type<tc>, window_params = [{pipeline_mode = #tpu.pipeline_mode<synchronous>, transform_indices = @transform_0, window_bounds = array<i64: 4, 8, 32>}, {pipeline_mode = #tpu.pipeline_mode<synchronous>, transform_indices = @transform_1, window_bounds = array<i64: 1, 32>}, {pipeline_mode = #tpu.pipeline_mode<synchronous>, transform_indices = @transform_2, window_bounds = array<i64: 1, 32>}, {pipeline_mode = #tpu.pipeline_mode<synchronous>, transform_indices = @transform_3, window_bounds = array<i64: 32, 16>}, {pipeline_mode = #tpu.pipeline_mode<synchronous>, transform_indices = @transform_4, window_bounds = array<i64: 8, 16>}]} {
    %c0 = arith.constant 0 : index
    %c0_0 = arith.constant 0 : index
    %c0_1 = arith.constant 0 : index
    %0 = vector.load %arg1[%c0, %c0_0, %c0_1] : memref<4x8x32xf32, #tpu.memory_space<vmem>>, vector<1x8x32xf32>
    %1 = vector.shape_cast %0 : vector<1x8x32xf32> to vector<8x32xf32>
    %c0_2 = arith.constant 0 : index
    %c0_3 = arith.constant 0 : index
    %2 = vector.load %arg2[%c0_2, %c0_3] : memref<1x32xf32, #tpu.memory_space<vmem>>, vector<1x32xf32>
    %3 = vector.broadcast %2 : vector<1x32xf32> to vector<8x32xf32>
    %4 = arith.mulf %1, %3 : vector<8x32xf32>
    %c0_4 = arith.constant 0 : index
    %c0_5 = arith.constant 0 : index
    %5 = vector.load %arg3[%c0_4, %c0_5] : memref<1x32xf32, #tpu.memory_space<vmem>>, vector<1x32xf32>
    %6 = vector.broadcast %5 : vector<1x32xf32> to vector<8x32xf32>
    %7 = arith.addf %4, %6 : vector<8x32xf32>
    %cst = arith.constant 0.000000e+00 : f32
    %8 = vector.broadcast %cst : f32 to vector<8x32xf32>
    %9 = arith.maximumf %7, %8 : vector<8x32xf32>
    %c1 = arith.constant 1 : index
    %c0_6 = arith.constant 0 : index
    %c0_7 = arith.constant 0 : index
    %10 = vector.load %arg1[%c1, %c0_6, %c0_7] : memref<4x8x32xf32, #tpu.memory_space<vmem>>, vector<1x8x32xf32>
    %11 = vector.shape_cast %10 : vector<1x8x32xf32> to vector<8x32xf32>
    %c0_8 = arith.constant 0 : index
    %c0_9 = arith.constant 0 : index
    %12 = vector.load %arg2[%c0_8, %c0_9] : memref<1x32xf32, #tpu.memory_space<vmem>>, vector<1x32xf32>
    %13 = vector.broadcast %12 : vector<1x32xf32> to vector<8x32xf32>
    %14 = arith.mulf %11, %13 : vector<8x32xf32>
    %c0_10 = arith.constant 0 : index
    %c0_11 = arith.constant 0 : index
    %15 = vector.load %arg3[%c0_10, %c0_11] : memref<1x32xf32, #tpu.memory_space<vmem>>, vector<1x32xf32>
    %16 = vector.broadcast %15 : vector<1x32xf32> to vector<8x32xf32>
    %17 = arith.addf %14, %16 : vector<8x32xf32>
    %cst_12 = arith.constant 0.000000e+00 : f32
    %18 = vector.broadcast %cst_12 : f32 to vector<8x32xf32>
    %19 = arith.maximumf %17, %18 : vector<8x32xf32>
    %20 = arith.addf %9, %19 : vector<8x32xf32>
    %c2 = arith.constant 2 : index
    %c0_13 = arith.constant 0 : index
    %c0_14 = arith.constant 0 : index
    %21 = vector.load %arg1[%c2, %c0_13, %c0_14] : memref<4x8x32xf32, #tpu.memory_space<vmem>>, vector<1x8x32xf32>
    %22 = vector.shape_cast %21 : vector<1x8x32xf32> to vector<8x32xf32>
    %c0_15 = arith.constant 0 : index
    %c0_16 = arith.constant 0 : index
    %23 = vector.load %arg2[%c0_15, %c0_16] : memref<1x32xf32, #tpu.memory_space<vmem>>, vector<1x32xf32>
    %24 = vector.broadcast %23 : vector<1x32xf32> to vector<8x32xf32>
    %25 = arith.mulf %22, %24 : vector<8x32xf32>
    %c0_17 = arith.constant 0 : index
    %c0_18 = arith.constant 0 : index
    %26 = vector.load %arg3[%c0_17, %c0_18] : memref<1x32xf32, #tpu.memory_space<vmem>>, vector<1x32xf32>
    %27 = vector.broadcast %26 : vector<1x32xf32> to vector<8x32xf32>
    %28 = arith.addf %25, %27 : vector<8x32xf32>
    %cst_19 = arith.constant 0.000000e+00 : f32
    %29 = vector.broadcast %cst_19 : f32 to vector<8x32xf32>
    %30 = arith.maximumf %28, %29 : vector<8x32xf32>
    %31 = arith.addf %20, %30 : vector<8x32xf32>
    %c3 = arith.constant 3 : index
    %c0_20 = arith.constant 0 : index
    %c0_21 = arith.constant 0 : index
    %32 = vector.load %arg1[%c3, %c0_20, %c0_21] : memref<4x8x32xf32, #tpu.memory_space<vmem>>, vector<1x8x32xf32>
    %33 = vector.shape_cast %32 : vector<1x8x32xf32> to vector<8x32xf32>
    %c0_22 = arith.constant 0 : index
    %c0_23 = arith.constant 0 : index
    %34 = vector.load %arg2[%c0_22, %c0_23] : memref<1x32xf32, #tpu.memory_space<vmem>>, vector<1x32xf32>
    %35 = vector.broadcast %34 : vector<1x32xf32> to vector<8x32xf32>
    %36 = arith.mulf %33, %35 : vector<8x32xf32>
    %c0_24 = arith.constant 0 : index
    %c0_25 = arith.constant 0 : index
    %37 = vector.load %arg3[%c0_24, %c0_25] : memref<1x32xf32, #tpu.memory_space<vmem>>, vector<1x32xf32>
    %38 = vector.broadcast %37 : vector<1x32xf32> to vector<8x32xf32>
    %39 = arith.addf %36, %38 : vector<8x32xf32>
    %cst_26 = arith.constant 0.000000e+00 : f32
    %40 = vector.broadcast %cst_26 : f32 to vector<8x32xf32>
    %41 = arith.maximumf %39, %40 : vector<8x32xf32>
    %42 = arith.addf %31, %41 : vector<8x32xf32>
    %cst_27 = arith.constant 2.500000e-01 : f32
    %43 = vector.broadcast %cst_27 : f32 to vector<8x32xf32>
    %44 = arith.mulf %42, %43 : vector<8x32xf32>
    %45 = arith.truncf %44 : vector<8x32xf32> to vector<8x32xbf16>
    %c0_28 = arith.constant 0 : index
    %c0_29 = arith.constant 0 : index
    %46 = vector.load %arg4[%c0_28, %c0_29] : memref<32x16xbf16, #tpu.memory_space<vmem>>, vector<32x16xbf16>
    %cst_30 = arith.constant dense<0.000000e+00> : vector<8x16xf32>
    %47 = tpu.matmul %45, %46, %cst_30 {dimension_numbers = #tpu.dot_dimension_numbers<[1], [0], [0], [1], [0, 0, 1, 1], [], []>} : vector<8x32xbf16>, vector<32x16xbf16>, vector<8x16xf32> -> vector<8x16xf32>
    %c0_31 = arith.constant 0 : index
    %c0_32 = arith.constant 0 : index
    %48 = vector.load %arg5[%c0_31, %c0_32] : memref<8x16xf32, #tpu.memory_space<vmem>>, vector<8x16xf32>
    tpu.vector_store %arg5[%c0_31, %c0_32], %47 {strides = array<i32>} : memref<8x16xf32, #tpu.memory_space<vmem>>, vector<8x16xf32>,
    return
  }
  func.func @transform_0(%arg0: i32) -> (i32, i32, i32) {
    %c0_i32 = arith.constant 0 : i32
    %c0_i32_0 = arith.constant 0 : i32
    %c0_i32_1 = arith.constant 0 : i32
    %c0_i32_2 = arith.constant 0 : i32
    return %c0_i32, %c0_i32_0, %c0_i32_1 : i32, i32, i32
  }
  func.func @transform_1(%arg0: i32) -> (i32, i32) {
    %c0_i32 = arith.constant 0 : i32
    %c0_i32_0 = arith.constant 0 : i32
    %c0_i32_1 = arith.constant 0 : i32
    return %c0_i32, %c0_i32_0 : i32, i32
  }
  func.func @transform_2(%arg0: i32) -> (i32, i32) {
    %c0_i32 = arith.constant 0 : i32
    %c0_i32_0 = arith.constant 0 : i32
    %c0_i32_1 = arith.constant 0 : i32
    return %c0_i32, %c0_i32_0 : i32, i32
  }
  func.func @transform_3(%arg0: i32) -> (i32, i32) {
    %c0_i32 = arith.constant 0 : i32
    %c0_i32_0 = arith.constant 0 : i32
    %c0_i32_1 = arith.constant 0 : i32
    return %c0_i32, %c0_i32_0 : i32, i32
  }
  func.func @transform_4(%arg0: i32) -> (i32, i32) {
    %c0_i32 = arith.constant 0 : i32
    %c0_i32_0 = arith.constant 0 : i32
    %c0_i32_1 = arith.constant 0 : i32
    return %c0_i32, %c0_i32_0 : i32, i32
  }
}

module attributes {stable_mosaic.version = 11 : i64} {
  func.func @_conv_sum_kernel(%arg0: i32, %arg1: memref<9x8x16xbf16, #tpu.memory_space<vmem>>, %arg2: memref<9x16x8xbf16, #tpu.memory_space<vmem>>, %arg3: memref<8x8xf32, #tpu.memory_space<vmem>>) attributes {dimension_semantics = [#tpu.dimension_semantics<parallel>], iteration_bounds = array<i64: 1>, scalar_prefetch = 0 : i64, scratch_operands = 0 : i64, tpu.core_type = #tpu.core_type<tc>, window_params = [{transform_indices = @transform_0, window_bounds = array<i64: 9, 8, 16>}, {pipeline_mode = #tpu.pipeline_mode<synchronous>, transform_indices = @transform_1, window_bounds = array<i64: 9, 16, 8>}, {transform_indices = @transform_2, window_bounds = array<i64: 8, 8>}]} {
    %c0 = arith.constant 0 : index
    %c0_0 = arith.constant 0 : index
    %c0_1 = arith.constant 0 : index
    %0 = vector.load %arg1[%c0, %c0_0, %c0_1] : memref<9x8x16xbf16, #tpu.memory_space<vmem>>, vector<1x8x16xbf16>
    %1 = vector.shape_cast %0 : vector<1x8x16xbf16> to vector<8x16xbf16>
    %c0_2 = arith.constant 0 : index
    %c0_3 = arith.constant 0 : index
    %c0_4 = arith.constant 0 : index
    %2 = vector.load %arg2[%c0_2, %c0_3, %c0_4] : memref<9x16x8xbf16, #tpu.memory_space<vmem>>, vector<1x16x8xbf16>
    %3 = vector.shape_cast %2 : vector<1x16x8xbf16> to vector<16x8xbf16>
    %cst = arith.constant dense<0.000000e+00> : vector<8x8xf32>
    %4 = tpu.matmul %1, %3, %cst {dimension_numbers = #tpu.dot_dimension_numbers<[1], [0], [0], [1], [0, 0, 1, 1], [], []>} : vector<8x16xbf16>, vector<16x8xbf16>, vector<8x8xf32> -> vector<8x8xf32>
    %c1 = arith.constant 1 : index
    %c0_5 = arith.constant 0 : index
    %c0_6 = arith.constant 0 : index
    %5 = vector.load %arg1[%c1, %c0_5, %c0_6] : memref<9x8x16xbf16, #tpu.memory_space<vmem>>, vector<1x8x16xbf16>
    %6 = vector.shape_cast %5 : vector<1x8x16xbf16> to vector<8x16xbf16>
    %c1_7 = arith.constant 1 : index
    %c0_8 = arith.constant 0 : index
    %c0_9 = arith.constant 0 : index
    %7 = vector.load %arg2[%c1_7, %c0_8, %c0_9] : memref<9x16x8xbf16, #tpu.memory_space<vmem>>, vector<1x16x8xbf16>
    %8 = vector.shape_cast %7 : vector<1x16x8xbf16> to vector<16x8xbf16>
    %cst_10 = arith.constant dense<0.000000e+00> : vector<8x8xf32>
    %9 = tpu.matmul %6, %8, %cst_10 {dimension_numbers = #tpu.dot_dimension_numbers<[1], [0], [0], [1], [0, 0, 1, 1], [], []>} : vector<8x16xbf16>, vector<16x8xbf16>, vector<8x8xf32> -> vector<8x8xf32>
    %10 = arith.addf %4, %9 : vector<8x8xf32>
    %c2 = arith.constant 2 : index
    %c0_11 = arith.constant 0 : index
    %c0_12 = arith.constant 0 : index
    %11 = vector.load %arg1[%c2, %c0_11, %c0_12] : memref<9x8x16xbf16, #tpu.memory_space<vmem>>, vector<1x8x16xbf16>
    %12 = vector.shape_cast %11 : vector<1x8x16xbf16> to vector<8x16xbf16>
    %c2_13 = arith.constant 2 : index
    %c0_14 = arith.constant 0 : index
    %c0_15 = arith.constant 0 : index
    %13 = vector.load %arg2[%c2_13, %c0_14, %c0_15] : memref<9x16x8xbf16, #tpu.memory_space<vmem>>, vector<1x16x8xbf16>
    %14 = vector.shape_cast %13 : vector<1x16x8xbf16> to vector<16x8xbf16>
    %cst_16 = arith.constant dense<0.000000e+00> : vector<8x8xf32>
    %15 = tpu.matmul %12, %14, %cst_16 {dimension_numbers = #tpu.dot_dimension_numbers<[1], [0], [0], [1], [0, 0, 1, 1], [], []>} : vector<8x16xbf16>, vector<16x8xbf16>, vector<8x8xf32> -> vector<8x8xf32>
    %16 = arith.addf %10, %15 : vector<8x8xf32>
    %c3 = arith.constant 3 : index
    %c0_17 = arith.constant 0 : index
    %c0_18 = arith.constant 0 : index
    %17 = vector.load %arg1[%c3, %c0_17, %c0_18] : memref<9x8x16xbf16, #tpu.memory_space<vmem>>, vector<1x8x16xbf16>
    %18 = vector.shape_cast %17 : vector<1x8x16xbf16> to vector<8x16xbf16>
    %c3_19 = arith.constant 3 : index
    %c0_20 = arith.constant 0 : index
    %c0_21 = arith.constant 0 : index
    %19 = vector.load %arg2[%c3_19, %c0_20, %c0_21] : memref<9x16x8xbf16, #tpu.memory_space<vmem>>, vector<1x16x8xbf16>
    %20 = vector.shape_cast %19 : vector<1x16x8xbf16> to vector<16x8xbf16>
    %cst_22 = arith.constant dense<0.000000e+00> : vector<8x8xf32>
    %21 = tpu.matmul %18, %20, %cst_22 {dimension_numbers = #tpu.dot_dimension_numbers<[1], [0], [0], [1], [0, 0, 1, 1], [], []>} : vector<8x16xbf16>, vector<16x8xbf16>, vector<8x8xf32> -> vector<8x8xf32>
    %22 = arith.addf %16, %21 : vector<8x8xf32>
    %c4 = arith.constant 4 : index
    %c0_23 = arith.constant 0 : index
    %c0_24 = arith.constant 0 : index
    %23 = vector.load %arg1[%c4, %c0_23, %c0_24] : memref<9x8x16xbf16, #tpu.memory_space<vmem>>, vector<1x8x16xbf16>
    %24 = vector.shape_cast %23 : vector<1x8x16xbf16> to vector<8x16xbf16>
    %c4_25 = arith.constant 4 : index
    %c0_26 = arith.constant 0 : index
    %c0_27 = arith.constant 0 : index
    %25 = vector.load %arg2[%c4_25, %c0_26, %c0_27] : memref<9x16x8xbf16, #tpu.memory_space<vmem>>, vector<1x16x8xbf16>
    %26 = vector.shape_cast %25 : vector<1x16x8xbf16> to vector<16x8xbf16>
    %cst_28 = arith.constant dense<0.000000e+00> : vector<8x8xf32>
    %27 = tpu.matmul %24, %26, %cst_28 {dimension_numbers = #tpu.dot_dimension_numbers<[1], [0], [0], [1], [0, 0, 1, 1], [], []>} : vector<8x16xbf16>, vector<16x8xbf16>, vector<8x8xf32> -> vector<8x8xf32>
    %28 = arith.addf %22, %27 : vector<8x8xf32>
    %c5 = arith.constant 5 : index
    %c0_29 = arith.constant 0 : index
    %c0_30 = arith.constant 0 : index
    %29 = vector.load %arg1[%c5, %c0_29, %c0_30] : memref<9x8x16xbf16, #tpu.memory_space<vmem>>, vector<1x8x16xbf16>
    %30 = vector.shape_cast %29 : vector<1x8x16xbf16> to vector<8x16xbf16>
    %c5_31 = arith.constant 5 : index
    %c0_32 = arith.constant 0 : index
    %c0_33 = arith.constant 0 : index
    %31 = vector.load %arg2[%c5_31, %c0_32, %c0_33] : memref<9x16x8xbf16, #tpu.memory_space<vmem>>, vector<1x16x8xbf16>
    %32 = vector.shape_cast %31 : vector<1x16x8xbf16> to vector<16x8xbf16>
    %cst_34 = arith.constant dense<0.000000e+00> : vector<8x8xf32>
    %33 = tpu.matmul %30, %32, %cst_34 {dimension_numbers = #tpu.dot_dimension_numbers<[1], [0], [0], [1], [0, 0, 1, 1], [], []>} : vector<8x16xbf16>, vector<16x8xbf16>, vector<8x8xf32> -> vector<8x8xf32>
    %34 = arith.addf %28, %33 : vector<8x8xf32>
    %c6 = arith.constant 6 : index
    %c0_35 = arith.constant 0 : index
    %c0_36 = arith.constant 0 : index
    %35 = vector.load %arg1[%c6, %c0_35, %c0_36] : memref<9x8x16xbf16, #tpu.memory_space<vmem>>, vector<1x8x16xbf16>
    %36 = vector.shape_cast %35 : vector<1x8x16xbf16> to vector<8x16xbf16>
    %c6_37 = arith.constant 6 : index
    %c0_38 = arith.constant 0 : index
    %c0_39 = arith.constant 0 : index
    %37 = vector.load %arg2[%c6_37, %c0_38, %c0_39] : memref<9x16x8xbf16, #tpu.memory_space<vmem>>, vector<1x16x8xbf16>
    %38 = vector.shape_cast %37 : vector<1x16x8xbf16> to vector<16x8xbf16>
    %cst_40 = arith.constant dense<0.000000e+00> : vector<8x8xf32>
    %39 = tpu.matmul %36, %38, %cst_40 {dimension_numbers = #tpu.dot_dimension_numbers<[1], [0], [0], [1], [0, 0, 1, 1], [], []>} : vector<8x16xbf16>, vector<16x8xbf16>, vector<8x8xf32> -> vector<8x8xf32>
    %40 = arith.addf %34, %39 : vector<8x8xf32>
    %c7 = arith.constant 7 : index
    %c0_41 = arith.constant 0 : index
    %c0_42 = arith.constant 0 : index
    %41 = vector.load %arg1[%c7, %c0_41, %c0_42] : memref<9x8x16xbf16, #tpu.memory_space<vmem>>, vector<1x8x16xbf16>
    %42 = vector.shape_cast %41 : vector<1x8x16xbf16> to vector<8x16xbf16>
    %c7_43 = arith.constant 7 : index
    %c0_44 = arith.constant 0 : index
    %c0_45 = arith.constant 0 : index
    %43 = vector.load %arg2[%c7_43, %c0_44, %c0_45] : memref<9x16x8xbf16, #tpu.memory_space<vmem>>, vector<1x16x8xbf16>
    %44 = vector.shape_cast %43 : vector<1x16x8xbf16> to vector<16x8xbf16>
    %cst_46 = arith.constant dense<0.000000e+00> : vector<8x8xf32>
    %45 = tpu.matmul %42, %44, %cst_46 {dimension_numbers = #tpu.dot_dimension_numbers<[1], [0], [0], [1], [0, 0, 1, 1], [], []>} : vector<8x16xbf16>, vector<16x8xbf16>, vector<8x8xf32> -> vector<8x8xf32>
    %46 = arith.addf %40, %45 : vector<8x8xf32>
    %c8 = arith.constant 8 : index
    %c0_47 = arith.constant 0 : index
    %c0_48 = arith.constant 0 : index
    %47 = vector.load %arg1[%c8, %c0_47, %c0_48] : memref<9x8x16xbf16, #tpu.memory_space<vmem>>, vector<1x8x16xbf16>
    %48 = vector.shape_cast %47 : vector<1x8x16xbf16> to vector<8x16xbf16>
    %c8_49 = arith.constant 8 : index
    %c0_50 = arith.constant 0 : index
    %c0_51 = arith.constant 0 : index
    %49 = vector.load %arg2[%c8_49, %c0_50, %c0_51] : memref<9x16x8xbf16, #tpu.memory_space<vmem>>, vector<1x16x8xbf16>
    %50 = vector.shape_cast %49 : vector<1x16x8xbf16> to vector<16x8xbf16>
    %cst_52 = arith.constant dense<0.000000e+00> : vector<8x8xf32>
    %51 = tpu.matmul %48, %50, %cst_52 {dimension_numbers = #tpu.dot_dimension_numbers<[1], [0], [0], [1], [0, 0, 1, 1], [], []>} : vector<8x16xbf16>, vector<16x8xbf16>, vector<8x8xf32> -> vector<8x8xf32>
    %52 = arith.addf %46, %51 : vector<8x8xf32>
    %c0_53 = arith.constant 0 : index
    %c0_54 = arith.constant 0 : index
    %53 = vector.load %arg3[%c0_53, %c0_54] : memref<8x8xf32, #tpu.memory_space<vmem>>, vector<8x8xf32>
    tpu.vector_store %arg3[%c0_53, %c0_54], %52 {strides = array<i32>} : memref<8x8xf32, #tpu.memory_space<vmem>>, vector<8x8xf32>,
    return
  }
  func.func @transform_0(%arg0: i32) -> (i32, i32, i32) {
    %c0_i32 = arith.constant 0 : i32
    %c0_i32_0 = arith.constant 0 : i32
    %c0_i32_1 = arith.constant 0 : i32
    return %c0_i32, %arg0, %c0_i32_0 : i32, i32, i32
  }
  func.func @transform_1(%arg0: i32) -> (i32, i32, i32) {
    %c0_i32 = arith.constant 0 : i32
    %c0_i32_0 = arith.constant 0 : i32
    %c0_i32_1 = arith.constant 0 : i32
    %c0_i32_2 = arith.constant 0 : i32
    return %c0_i32, %c0_i32_0, %c0_i32_1 : i32, i32, i32
  }
  func.func @transform_2(%arg0: i32) -> (i32, i32) {
    %c0_i32 = arith.constant 0 : i32
    %c0_i32_0 = arith.constant 0 : i32
    return %arg0, %c0_i32 : i32, i32
  }
}

module attributes {stable_mosaic.version = 11 : i64} {
  func.func @_bottleneck_kernel(%arg0: i32, %arg1: memref<8x24xf32, #tpu.memory_space<vmem>>, %arg2: memref<1x24xf32, #tpu.memory_space<vmem>>, %arg3: memref<1x24xf32, #tpu.memory_space<vmem>>, %arg4: memref<24x16xbf16, #tpu.memory_space<vmem>>, %arg5: memref<1x16xf32, #tpu.memory_space<vmem>>, %arg6: memref<1x16xf32, #tpu.memory_space<vmem>>, %arg7: memref<8x16xbf16, #tpu.memory_space<vmem>>) attributes {dimension_semantics = [#tpu.dimension_semantics<parallel>], iteration_bounds = array<i64: 1>, scalar_prefetch = 0 : i64, scratch_operands = 0 : i64, tpu.core_type = #tpu.core_type<tc>, window_params = [{transform_indices = @transform_0, window_bounds = array<i64: 8, 24>}, {pipeline_mode = #tpu.pipeline_mode<synchronous>, transform_indices = @transform_1, window_bounds = array<i64: 1, 24>}, {pipeline_mode = #tpu.pipeline_mode<synchronous>, transform_indices = @transform_2, window_bounds = array<i64: 1, 24>}, {pipeline_mode = #tpu.pipeline_mode<synchronous>, transform_indices = @transform_3, window_bounds = array<i64: 24, 16>}, {pipeline_mode = #tpu.pipeline_mode<synchronous>, transform_indices = @transform_4, window_bounds = array<i64: 1, 16>}, {pipeline_mode = #tpu.pipeline_mode<synchronous>, transform_indices = @transform_5, window_bounds = array<i64: 1, 16>}, {transform_indices = @transform_6, window_bounds = array<i64: 8, 16>}]} {
    %c0 = arith.constant 0 : index
    %c0_0 = arith.constant 0 : index
    %0 = vector.load %arg1[%c0, %c0_0] : memref<8x24xf32, #tpu.memory_space<vmem>>, vector<8x24xf32>
    %c0_1 = arith.constant 0 : index
    %c0_2 = arith.constant 0 : index
    %1 = vector.load %arg2[%c0_1, %c0_2] : memref<1x24xf32, #tpu.memory_space<vmem>>, vector<1x24xf32>
    %2 = vector.broadcast %1 : vector<1x24xf32> to vector<8x24xf32>
    %3 = arith.mulf %0, %2 : vector<8x24xf32>
    %c0_3 = arith.constant 0 : index
    %c0_4 = arith.constant 0 : index
    %4 = vector.load %arg3[%c0_3, %c0_4] : memref<1x24xf32, #tpu.memory_space<vmem>>, vector<1x24xf32>
    %5 = vector.broadcast %4 : vector<1x24xf32> to vector<8x24xf32>
    %6 = arith.addf %3, %5 : vector<8x24xf32>
    %cst = arith.constant 0.000000e+00 : f32
    %7 = vector.broadcast %cst : f32 to vector<8x24xf32>
    %8 = arith.maximumf %6, %7 : vector<8x24xf32>
    %9 = arith.truncf %8 : vector<8x24xf32> to vector<8x24xbf16>
    %c0_5 = arith.constant 0 : index
    %c0_6 = arith.constant 0 : index
    %10 = vector.load %arg4[%c0_5, %c0_6] : memref<24x16xbf16, #tpu.memory_space<vmem>>, vector<24x16xbf16>
    %cst_7 = arith.constant dense<0.000000e+00> : vector<8x16xf32>
    %11 = tpu.matmul %9, %10, %cst_7 {dimension_numbers = #tpu.dot_dimension_numbers<[1], [0], [0], [1], [0, 0, 1, 1], [], []>} : vector<8x24xbf16>, vector<24x16xbf16>, vector<8x16xf32> -> vector<8x16xf32>
    %c0_8 = arith.constant 0 : index
    %c0_9 = arith.constant 0 : index
    %12 = vector.load %arg5[%c0_8, %c0_9] : memref<1x16xf32, #tpu.memory_space<vmem>>, vector<1x16xf32>
    %13 = vector.broadcast %12 : vector<1x16xf32> to vector<8x16xf32>
    %14 = arith.mulf %11, %13 : vector<8x16xf32>
    %c0_10 = arith.constant 0 : index
    %c0_11 = arith.constant 0 : index
    %15 = vector.load %arg6[%c0_10, %c0_11] : memref<1x16xf32, #tpu.memory_space<vmem>>, vector<1x16xf32>
    %16 = vector.broadcast %15 : vector<1x16xf32> to vector<8x16xf32>
    %17 = arith.addf %14, %16 : vector<8x16xf32>
    %cst_12 = arith.constant 0.000000e+00 : f32
    %18 = vector.broadcast %cst_12 : f32 to vector<8x16xf32>
    %19 = arith.maximumf %17, %18 : vector<8x16xf32>
    %20 = arith.truncf %19 : vector<8x16xf32> to vector<8x16xbf16>
    %c0_13 = arith.constant 0 : index
    %c0_14 = arith.constant 0 : index
    %21 = vector.load %arg7[%c0_13, %c0_14] : memref<8x16xbf16, #tpu.memory_space<vmem>>, vector<8x16xbf16>
    tpu.vector_store %arg7[%c0_13, %c0_14], %20 {strides = array<i32>} : memref<8x16xbf16, #tpu.memory_space<vmem>>, vector<8x16xbf16>,
    return
  }
  func.func @transform_0(%arg0: i32) -> (i32, i32) {
    %c0_i32 = arith.constant 0 : i32
    %c0_i32_0 = arith.constant 0 : i32
    return %arg0, %c0_i32 : i32, i32
  }
  func.func @transform_1(%arg0: i32) -> (i32, i32) {
    %c0_i32 = arith.constant 0 : i32
    %c0_i32_0 = arith.constant 0 : i32
    %c0_i32_1 = arith.constant 0 : i32
    return %c0_i32, %c0_i32_0 : i32, i32
  }
  func.func @transform_2(%arg0: i32) -> (i32, i32) {
    %c0_i32 = arith.constant 0 : i32
    %c0_i32_0 = arith.constant 0 : i32
    %c0_i32_1 = arith.constant 0 : i32
    return %c0_i32, %c0_i32_0 : i32, i32
  }
  func.func @transform_3(%arg0: i32) -> (i32, i32) {
    %c0_i32 = arith.constant 0 : i32
    %c0_i32_0 = arith.constant 0 : i32
    %c0_i32_1 = arith.constant 0 : i32
    return %c0_i32, %c0_i32_0 : i32, i32
  }
  func.func @transform_4(%arg0: i32) -> (i32, i32) {
    %c0_i32 = arith.constant 0 : i32
    %c0_i32_0 = arith.constant 0 : i32
    %c0_i32_1 = arith.constant 0 : i32
    return %c0_i32, %c0_i32_0 : i32, i32
  }
  func.func @transform_5(%arg0: i32) -> (i32, i32) {
    %c0_i32 = arith.constant 0 : i32
    %c0_i32_0 = arith.constant 0 : i32
    %c0_i32_1 = arith.constant 0 : i32
    return %c0_i32, %c0_i32_0 : i32, i32
  }
  func.func @transform_6(%arg0: i32) -> (i32, i32) {
    %c0_i32 = arith.constant 0 : i32
    %c0_i32_0 = arith.constant 0 : i32
    return %arg0, %c0_i32 : i32, i32
  }
}

module attributes {stable_mosaic.version = 11 : i64} {
  func.func @_transition_kernel(%arg0: i32, %arg1: memref<4x2x32xf32, #tpu.memory_space<vmem>>, %arg2: memref<1x32xf32, #tpu.memory_space<vmem>>, %arg3: memref<1x32xf32, #tpu.memory_space<vmem>>, %arg4: memref<32x16xbf16, #tpu.memory_space<vmem>>, %arg5: memref<2x16xf32, #tpu.memory_space<vmem>>) attributes {dimension_semantics = [#tpu.dimension_semantics<arbitrary>], iteration_bounds = array<i64: 1>, scalar_prefetch = 0 : i64, scratch_operands = 0 : i64, tpu.core_type = #tpu.core_type<tc>, window_params = [{pipeline_mode = #tpu.pipeline_mode<synchronous>, transform_indices = @transform_0, window_bounds = array<i64: 4, 2, 32>}, {pipeline_mode = #tpu.pipeline_mode<synchronous>, transform_indices = @transform_1, window_bounds = array<i64: 1, 32>}, {pipeline_mode = #tpu.pipeline_mode<synchronous>, transform_indices = @transform_2, window_bounds = array<i64: 1, 32>}, {pipeline_mode = #tpu.pipeline_mode<synchronous>, transform_indices = @transform_3, window_bounds = array<i64: 32, 16>}, {pipeline_mode = #tpu.pipeline_mode<synchronous>, transform_indices = @transform_4, window_bounds = array<i64: 2, 16>}]} {
    %c0 = arith.constant 0 : index
    %c0_0 = arith.constant 0 : index
    %c0_1 = arith.constant 0 : index
    %0 = vector.load %arg1[%c0, %c0_0, %c0_1] : memref<4x2x32xf32, #tpu.memory_space<vmem>>, vector<1x2x32xf32>
    %1 = vector.shape_cast %0 : vector<1x2x32xf32> to vector<2x32xf32>
    %c0_2 = arith.constant 0 : index
    %c0_3 = arith.constant 0 : index
    %2 = vector.load %arg2[%c0_2, %c0_3] : memref<1x32xf32, #tpu.memory_space<vmem>>, vector<1x32xf32>
    %3 = vector.broadcast %2 : vector<1x32xf32> to vector<2x32xf32>
    %4 = arith.mulf %1, %3 : vector<2x32xf32>
    %c0_4 = arith.constant 0 : index
    %c0_5 = arith.constant 0 : index
    %5 = vector.load %arg3[%c0_4, %c0_5] : memref<1x32xf32, #tpu.memory_space<vmem>>, vector<1x32xf32>
    %6 = vector.broadcast %5 : vector<1x32xf32> to vector<2x32xf32>
    %7 = arith.addf %4, %6 : vector<2x32xf32>
    %cst = arith.constant 0.000000e+00 : f32
    %8 = vector.broadcast %cst : f32 to vector<2x32xf32>
    %9 = arith.maximumf %7, %8 : vector<2x32xf32>
    %c1 = arith.constant 1 : index
    %c0_6 = arith.constant 0 : index
    %c0_7 = arith.constant 0 : index
    %10 = vector.load %arg1[%c1, %c0_6, %c0_7] : memref<4x2x32xf32, #tpu.memory_space<vmem>>, vector<1x2x32xf32>
    %11 = vector.shape_cast %10 : vector<1x2x32xf32> to vector<2x32xf32>
    %c0_8 = arith.constant 0 : index
    %c0_9 = arith.constant 0 : index
    %12 = vector.load %arg2[%c0_8, %c0_9] : memref<1x32xf32, #tpu.memory_space<vmem>>, vector<1x32xf32>
    %13 = vector.broadcast %12 : vector<1x32xf32> to vector<2x32xf32>
    %14 = arith.mulf %11, %13 : vector<2x32xf32>
    %c0_10 = arith.constant 0 : index
    %c0_11 = arith.constant 0 : index
    %15 = vector.load %arg3[%c0_10, %c0_11] : memref<1x32xf32, #tpu.memory_space<vmem>>, vector<1x32xf32>
    %16 = vector.broadcast %15 : vector<1x32xf32> to vector<2x32xf32>
    %17 = arith.addf %14, %16 : vector<2x32xf32>
    %cst_12 = arith.constant 0.000000e+00 : f32
    %18 = vector.broadcast %cst_12 : f32 to vector<2x32xf32>
    %19 = arith.maximumf %17, %18 : vector<2x32xf32>
    %20 = arith.addf %9, %19 : vector<2x32xf32>
    %c2 = arith.constant 2 : index
    %c0_13 = arith.constant 0 : index
    %c0_14 = arith.constant 0 : index
    %21 = vector.load %arg1[%c2, %c0_13, %c0_14] : memref<4x2x32xf32, #tpu.memory_space<vmem>>, vector<1x2x32xf32>
    %22 = vector.shape_cast %21 : vector<1x2x32xf32> to vector<2x32xf32>
    %c0_15 = arith.constant 0 : index
    %c0_16 = arith.constant 0 : index
    %23 = vector.load %arg2[%c0_15, %c0_16] : memref<1x32xf32, #tpu.memory_space<vmem>>, vector<1x32xf32>
    %24 = vector.broadcast %23 : vector<1x32xf32> to vector<2x32xf32>
    %25 = arith.mulf %22, %24 : vector<2x32xf32>
    %c0_17 = arith.constant 0 : index
    %c0_18 = arith.constant 0 : index
    %26 = vector.load %arg3[%c0_17, %c0_18] : memref<1x32xf32, #tpu.memory_space<vmem>>, vector<1x32xf32>
    %27 = vector.broadcast %26 : vector<1x32xf32> to vector<2x32xf32>
    %28 = arith.addf %25, %27 : vector<2x32xf32>
    %cst_19 = arith.constant 0.000000e+00 : f32
    %29 = vector.broadcast %cst_19 : f32 to vector<2x32xf32>
    %30 = arith.maximumf %28, %29 : vector<2x32xf32>
    %31 = arith.addf %20, %30 : vector<2x32xf32>
    %c3 = arith.constant 3 : index
    %c0_20 = arith.constant 0 : index
    %c0_21 = arith.constant 0 : index
    %32 = vector.load %arg1[%c3, %c0_20, %c0_21] : memref<4x2x32xf32, #tpu.memory_space<vmem>>, vector<1x2x32xf32>
    %33 = vector.shape_cast %32 : vector<1x2x32xf32> to vector<2x32xf32>
    %c0_22 = arith.constant 0 : index
    %c0_23 = arith.constant 0 : index
    %34 = vector.load %arg2[%c0_22, %c0_23] : memref<1x32xf32, #tpu.memory_space<vmem>>, vector<1x32xf32>
    %35 = vector.broadcast %34 : vector<1x32xf32> to vector<2x32xf32>
    %36 = arith.mulf %33, %35 : vector<2x32xf32>
    %c0_24 = arith.constant 0 : index
    %c0_25 = arith.constant 0 : index
    %37 = vector.load %arg3[%c0_24, %c0_25] : memref<1x32xf32, #tpu.memory_space<vmem>>, vector<1x32xf32>
    %38 = vector.broadcast %37 : vector<1x32xf32> to vector<2x32xf32>
    %39 = arith.addf %36, %38 : vector<2x32xf32>
    %cst_26 = arith.constant 0.000000e+00 : f32
    %40 = vector.broadcast %cst_26 : f32 to vector<2x32xf32>
    %41 = arith.maximumf %39, %40 : vector<2x32xf32>
    %42 = arith.addf %31, %41 : vector<2x32xf32>
    %cst_27 = arith.constant 2.500000e-01 : f32
    %43 = vector.broadcast %cst_27 : f32 to vector<2x32xf32>
    %44 = arith.mulf %42, %43 : vector<2x32xf32>
    %45 = arith.truncf %44 : vector<2x32xf32> to vector<2x32xbf16>
    %c0_28 = arith.constant 0 : index
    %c0_29 = arith.constant 0 : index
    %46 = vector.load %arg4[%c0_28, %c0_29] : memref<32x16xbf16, #tpu.memory_space<vmem>>, vector<32x16xbf16>
    %cst_30 = arith.constant dense<0.000000e+00> : vector<2x16xf32>
    %47 = tpu.matmul %45, %46, %cst_30 {dimension_numbers = #tpu.dot_dimension_numbers<[1], [0], [0], [1], [0, 0, 1, 1], [], []>} : vector<2x32xbf16>, vector<32x16xbf16>, vector<2x16xf32> -> vector<2x16xf32>
    %c0_31 = arith.constant 0 : index
    %c0_32 = arith.constant 0 : index
    %48 = vector.load %arg5[%c0_31, %c0_32] : memref<2x16xf32, #tpu.memory_space<vmem>>, vector<2x16xf32>
    tpu.vector_store %arg5[%c0_31, %c0_32], %47 {strides = array<i32>} : memref<2x16xf32, #tpu.memory_space<vmem>>, vector<2x16xf32>,
    return
  }
  func.func @transform_0(%arg0: i32) -> (i32, i32, i32) {
    %c0_i32 = arith.constant 0 : i32
    %c0_i32_0 = arith.constant 0 : i32
    %c0_i32_1 = arith.constant 0 : i32
    %c0_i32_2 = arith.constant 0 : i32
    return %c0_i32, %c0_i32_0, %c0_i32_1 : i32, i32, i32
  }
  func.func @transform_1(%arg0: i32) -> (i32, i32) {
    %c0_i32 = arith.constant 0 : i32
    %c0_i32_0 = arith.constant 0 : i32
    %c0_i32_1 = arith.constant 0 : i32
    return %c0_i32, %c0_i32_0 : i32, i32
  }
  func.func @transform_2(%arg0: i32) -> (i32, i32) {
    %c0_i32 = arith.constant 0 : i32
    %c0_i32_0 = arith.constant 0 : i32
    %c0_i32_1 = arith.constant 0 : i32
    return %c0_i32, %c0_i32_0 : i32, i32
  }
  func.func @transform_3(%arg0: i32) -> (i32, i32) {
    %c0_i32 = arith.constant 0 : i32
    %c0_i32_0 = arith.constant 0 : i32
    %c0_i32_1 = arith.constant 0 : i32
    return %c0_i32, %c0_i32_0 : i32, i32
  }
  func.func @transform_4(%arg0: i32) -> (i32, i32) {
    %c0_i32 = arith.constant 0 : i32
    %c0_i32_0 = arith.constant 0 : i32
    %c0_i32_1 = arith.constant 0 : i32
    return %c0_i32, %c0_i32_0 : i32, i32
  }
}

module attributes {stable_mosaic.version = 11 : i64} {
  func.func @_bottleneck_kernel(%arg0: i32, %arg1: memref<2x16xf32, #tpu.memory_space<vmem>>, %arg2: memref<1x16xf32, #tpu.memory_space<vmem>>, %arg3: memref<1x16xf32, #tpu.memory_space<vmem>>, %arg4: memref<16x16xbf16, #tpu.memory_space<vmem>>, %arg5: memref<1x16xf32, #tpu.memory_space<vmem>>, %arg6: memref<1x16xf32, #tpu.memory_space<vmem>>, %arg7: memref<2x16xbf16, #tpu.memory_space<vmem>>) attributes {dimension_semantics = [#tpu.dimension_semantics<parallel>], iteration_bounds = array<i64: 1>, scalar_prefetch = 0 : i64, scratch_operands = 0 : i64, tpu.core_type = #tpu.core_type<tc>, window_params = [{transform_indices = @transform_0, window_bounds = array<i64: 2, 16>}, {pipeline_mode = #tpu.pipeline_mode<synchronous>, transform_indices = @transform_1, window_bounds = array<i64: 1, 16>}, {pipeline_mode = #tpu.pipeline_mode<synchronous>, transform_indices = @transform_2, window_bounds = array<i64: 1, 16>}, {pipeline_mode = #tpu.pipeline_mode<synchronous>, transform_indices = @transform_3, window_bounds = array<i64: 16, 16>}, {pipeline_mode = #tpu.pipeline_mode<synchronous>, transform_indices = @transform_4, window_bounds = array<i64: 1, 16>}, {pipeline_mode = #tpu.pipeline_mode<synchronous>, transform_indices = @transform_5, window_bounds = array<i64: 1, 16>}, {transform_indices = @transform_6, window_bounds = array<i64: 2, 16>}]} {
    %c0 = arith.constant 0 : index
    %c0_0 = arith.constant 0 : index
    %0 = vector.load %arg1[%c0, %c0_0] : memref<2x16xf32, #tpu.memory_space<vmem>>, vector<2x16xf32>
    %c0_1 = arith.constant 0 : index
    %c0_2 = arith.constant 0 : index
    %1 = vector.load %arg2[%c0_1, %c0_2] : memref<1x16xf32, #tpu.memory_space<vmem>>, vector<1x16xf32>
    %2 = vector.broadcast %1 : vector<1x16xf32> to vector<2x16xf32>
    %3 = arith.mulf %0, %2 : vector<2x16xf32>
    %c0_3 = arith.constant 0 : index
    %c0_4 = arith.constant 0 : index
    %4 = vector.load %arg3[%c0_3, %c0_4] : memref<1x16xf32, #tpu.memory_space<vmem>>, vector<1x16xf32>
    %5 = vector.broadcast %4 : vector<1x16xf32> to vector<2x16xf32>
    %6 = arith.addf %3, %5 : vector<2x16xf32>
    %cst = arith.constant 0.000000e+00 : f32
    %7 = vector.broadcast %cst : f32 to vector<2x16xf32>
    %8 = arith.maximumf %6, %7 : vector<2x16xf32>
    %9 = arith.truncf %8 : vector<2x16xf32> to vector<2x16xbf16>
    %c0_5 = arith.constant 0 : index
    %c0_6 = arith.constant 0 : index
    %10 = vector.load %arg4[%c0_5, %c0_6] : memref<16x16xbf16, #tpu.memory_space<vmem>>, vector<16x16xbf16>
    %cst_7 = arith.constant dense<0.000000e+00> : vector<2x16xf32>
    %11 = tpu.matmul %9, %10, %cst_7 {dimension_numbers = #tpu.dot_dimension_numbers<[1], [0], [0], [1], [0, 0, 1, 1], [], []>} : vector<2x16xbf16>, vector<16x16xbf16>, vector<2x16xf32> -> vector<2x16xf32>
    %c0_8 = arith.constant 0 : index
    %c0_9 = arith.constant 0 : index
    %12 = vector.load %arg5[%c0_8, %c0_9] : memref<1x16xf32, #tpu.memory_space<vmem>>, vector<1x16xf32>
    %13 = vector.broadcast %12 : vector<1x16xf32> to vector<2x16xf32>
    %14 = arith.mulf %11, %13 : vector<2x16xf32>
    %c0_10 = arith.constant 0 : index
    %c0_11 = arith.constant 0 : index
    %15 = vector.load %arg6[%c0_10, %c0_11] : memref<1x16xf32, #tpu.memory_space<vmem>>, vector<1x16xf32>
    %16 = vector.broadcast %15 : vector<1x16xf32> to vector<2x16xf32>
    %17 = arith.addf %14, %16 : vector<2x16xf32>
    %cst_12 = arith.constant 0.000000e+00 : f32
    %18 = vector.broadcast %cst_12 : f32 to vector<2x16xf32>
    %19 = arith.maximumf %17, %18 : vector<2x16xf32>
    %20 = arith.truncf %19 : vector<2x16xf32> to vector<2x16xbf16>
    %c0_13 = arith.constant 0 : index
    %c0_14 = arith.constant 0 : index
    %21 = vector.load %arg7[%c0_13, %c0_14] : memref<2x16xbf16, #tpu.memory_space<vmem>>, vector<2x16xbf16>
    tpu.vector_store %arg7[%c0_13, %c0_14], %20 {strides = array<i32>} : memref<2x16xbf16, #tpu.memory_space<vmem>>, vector<2x16xbf16>,
    return
  }
  func.func @transform_0(%arg0: i32) -> (i32, i32) {
    %c0_i32 = arith.constant 0 : i32
    %c0_i32_0 = arith.constant 0 : i32
    return %arg0, %c0_i32 : i32, i32
  }
  func.func @transform_1(%arg0: i32) -> (i32, i32) {
    %c0_i32 = arith.constant 0 : i32
    %c0_i32_0 = arith.constant 0 : i32
    %c0_i32_1 = arith.constant 0 : i32
    return %c0_i32, %c0_i32_0 : i32, i32
  }
  func.func @transform_2(%arg0: i32) -> (i32, i32) {
    %c0_i32 = arith.constant 0 : i32
    %c0_i32_0 = arith.constant 0 : i32
    %c0_i32_1 = arith.constant 0 : i32
    return %c0_i32, %c0_i32_0 : i32, i32
  }
  func.func @transform_3(%arg0: i32) -> (i32, i32) {
    %c0_i32 = arith.constant 0 : i32
    %c0_i32_0 = arith.constant 0 : i32
    %c0_i32_1 = arith.constant 0 : i32
    return %c0_i32, %c0_i32_0 : i32, i32
  }
  func.func @transform_4(%arg0: i32) -> (i32, i32) {
    %c0_i32 = arith.constant 0 : i32
    %c0_i32_0 = arith.constant 0 : i32
    %c0_i32_1 = arith.constant 0 : i32
    return %c0_i32, %c0_i32_0 : i32, i32
  }
  func.func @transform_5(%arg0: i32) -> (i32, i32) {
    %c0_i32 = arith.constant 0 : i32
    %c0_i32_0 = arith.constant 0 : i32
    %c0_i32_1 = arith.constant 0 : i32
    return %c0_i32, %c0_i32_0 : i32, i32
  }
  func.func @transform_6(%arg0: i32) -> (i32, i32) {
    %c0_i32 = arith.constant 0 : i32
    %c0_i32_0 = arith.constant 0 : i32
    return %arg0, %c0_i32 : i32, i32
  }
}

module attributes {stable_mosaic.version = 11 : i64} {
  func.func @_conv_sum_kernel(%arg0: i32, %arg1: memref<9x2x16xbf16, #tpu.memory_space<vmem>>, %arg2: memref<9x16x8xbf16, #tpu.memory_space<vmem>>, %arg3: memref<2x8xf32, #tpu.memory_space<vmem>>) attributes {dimension_semantics = [#tpu.dimension_semantics<parallel>], iteration_bounds = array<i64: 1>, scalar_prefetch = 0 : i64, scratch_operands = 0 : i64, tpu.core_type = #tpu.core_type<tc>, window_params = [{transform_indices = @transform_0, window_bounds = array<i64: 9, 2, 16>}, {pipeline_mode = #tpu.pipeline_mode<synchronous>, transform_indices = @transform_1, window_bounds = array<i64: 9, 16, 8>}, {transform_indices = @transform_2, window_bounds = array<i64: 2, 8>}]} {
    %c0 = arith.constant 0 : index
    %c0_0 = arith.constant 0 : index
    %c0_1 = arith.constant 0 : index
    %0 = vector.load %arg1[%c0, %c0_0, %c0_1] : memref<9x2x16xbf16, #tpu.memory_space<vmem>>, vector<1x2x16xbf16>
    %1 = vector.shape_cast %0 : vector<1x2x16xbf16> to vector<2x16xbf16>
    %c0_2 = arith.constant 0 : index
    %c0_3 = arith.constant 0 : index
    %c0_4 = arith.constant 0 : index
    %2 = vector.load %arg2[%c0_2, %c0_3, %c0_4] : memref<9x16x8xbf16, #tpu.memory_space<vmem>>, vector<1x16x8xbf16>
    %3 = vector.shape_cast %2 : vector<1x16x8xbf16> to vector<16x8xbf16>
    %cst = arith.constant dense<0.000000e+00> : vector<2x8xf32>
    %4 = tpu.matmul %1, %3, %cst {dimension_numbers = #tpu.dot_dimension_numbers<[1], [0], [0], [1], [0, 0, 1, 1], [], []>} : vector<2x16xbf16>, vector<16x8xbf16>, vector<2x8xf32> -> vector<2x8xf32>
    %c1 = arith.constant 1 : index
    %c0_5 = arith.constant 0 : index
    %c0_6 = arith.constant 0 : index
    %5 = vector.load %arg1[%c1, %c0_5, %c0_6] : memref<9x2x16xbf16, #tpu.memory_space<vmem>>, vector<1x2x16xbf16>
    %6 = vector.shape_cast %5 : vector<1x2x16xbf16> to vector<2x16xbf16>
    %c1_7 = arith.constant 1 : index
    %c0_8 = arith.constant 0 : index
    %c0_9 = arith.constant 0 : index
    %7 = vector.load %arg2[%c1_7, %c0_8, %c0_9] : memref<9x16x8xbf16, #tpu.memory_space<vmem>>, vector<1x16x8xbf16>
    %8 = vector.shape_cast %7 : vector<1x16x8xbf16> to vector<16x8xbf16>
    %cst_10 = arith.constant dense<0.000000e+00> : vector<2x8xf32>
    %9 = tpu.matmul %6, %8, %cst_10 {dimension_numbers = #tpu.dot_dimension_numbers<[1], [0], [0], [1], [0, 0, 1, 1], [], []>} : vector<2x16xbf16>, vector<16x8xbf16>, vector<2x8xf32> -> vector<2x8xf32>
    %10 = arith.addf %4, %9 : vector<2x8xf32>
    %c2 = arith.constant 2 : index
    %c0_11 = arith.constant 0 : index
    %c0_12 = arith.constant 0 : index
    %11 = vector.load %arg1[%c2, %c0_11, %c0_12] : memref<9x2x16xbf16, #tpu.memory_space<vmem>>, vector<1x2x16xbf16>
    %12 = vector.shape_cast %11 : vector<1x2x16xbf16> to vector<2x16xbf16>
    %c2_13 = arith.constant 2 : index
    %c0_14 = arith.constant 0 : index
    %c0_15 = arith.constant 0 : index
    %13 = vector.load %arg2[%c2_13, %c0_14, %c0_15] : memref<9x16x8xbf16, #tpu.memory_space<vmem>>, vector<1x16x8xbf16>
    %14 = vector.shape_cast %13 : vector<1x16x8xbf16> to vector<16x8xbf16>
    %cst_16 = arith.constant dense<0.000000e+00> : vector<2x8xf32>
    %15 = tpu.matmul %12, %14, %cst_16 {dimension_numbers = #tpu.dot_dimension_numbers<[1], [0], [0], [1], [0, 0, 1, 1], [], []>} : vector<2x16xbf16>, vector<16x8xbf16>, vector<2x8xf32> -> vector<2x8xf32>
    %16 = arith.addf %10, %15 : vector<2x8xf32>
    %c3 = arith.constant 3 : index
    %c0_17 = arith.constant 0 : index
    %c0_18 = arith.constant 0 : index
    %17 = vector.load %arg1[%c3, %c0_17, %c0_18] : memref<9x2x16xbf16, #tpu.memory_space<vmem>>, vector<1x2x16xbf16>
    %18 = vector.shape_cast %17 : vector<1x2x16xbf16> to vector<2x16xbf16>
    %c3_19 = arith.constant 3 : index
    %c0_20 = arith.constant 0 : index
    %c0_21 = arith.constant 0 : index
    %19 = vector.load %arg2[%c3_19, %c0_20, %c0_21] : memref<9x16x8xbf16, #tpu.memory_space<vmem>>, vector<1x16x8xbf16>
    %20 = vector.shape_cast %19 : vector<1x16x8xbf16> to vector<16x8xbf16>
    %cst_22 = arith.constant dense<0.000000e+00> : vector<2x8xf32>
    %21 = tpu.matmul %18, %20, %cst_22 {dimension_numbers = #tpu.dot_dimension_numbers<[1], [0], [0], [1], [0, 0, 1, 1], [], []>} : vector<2x16xbf16>, vector<16x8xbf16>, vector<2x8xf32> -> vector<2x8xf32>
    %22 = arith.addf %16, %21 : vector<2x8xf32>
    %c4 = arith.constant 4 : index
    %c0_23 = arith.constant 0 : index
    %c0_24 = arith.constant 0 : index
    %23 = vector.load %arg1[%c4, %c0_23, %c0_24] : memref<9x2x16xbf16, #tpu.memory_space<vmem>>, vector<1x2x16xbf16>
    %24 = vector.shape_cast %23 : vector<1x2x16xbf16> to vector<2x16xbf16>
    %c4_25 = arith.constant 4 : index
    %c0_26 = arith.constant 0 : index
    %c0_27 = arith.constant 0 : index
    %25 = vector.load %arg2[%c4_25, %c0_26, %c0_27] : memref<9x16x8xbf16, #tpu.memory_space<vmem>>, vector<1x16x8xbf16>
    %26 = vector.shape_cast %25 : vector<1x16x8xbf16> to vector<16x8xbf16>
    %cst_28 = arith.constant dense<0.000000e+00> : vector<2x8xf32>
    %27 = tpu.matmul %24, %26, %cst_28 {dimension_numbers = #tpu.dot_dimension_numbers<[1], [0], [0], [1], [0, 0, 1, 1], [], []>} : vector<2x16xbf16>, vector<16x8xbf16>, vector<2x8xf32> -> vector<2x8xf32>
    %28 = arith.addf %22, %27 : vector<2x8xf32>
    %c5 = arith.constant 5 : index
    %c0_29 = arith.constant 0 : index
    %c0_30 = arith.constant 0 : index
    %29 = vector.load %arg1[%c5, %c0_29, %c0_30] : memref<9x2x16xbf16, #tpu.memory_space<vmem>>, vector<1x2x16xbf16>
    %30 = vector.shape_cast %29 : vector<1x2x16xbf16> to vector<2x16xbf16>
    %c5_31 = arith.constant 5 : index
    %c0_32 = arith.constant 0 : index
    %c0_33 = arith.constant 0 : index
    %31 = vector.load %arg2[%c5_31, %c0_32, %c0_33] : memref<9x16x8xbf16, #tpu.memory_space<vmem>>, vector<1x16x8xbf16>
    %32 = vector.shape_cast %31 : vector<1x16x8xbf16> to vector<16x8xbf16>
    %cst_34 = arith.constant dense<0.000000e+00> : vector<2x8xf32>
    %33 = tpu.matmul %30, %32, %cst_34 {dimension_numbers = #tpu.dot_dimension_numbers<[1], [0], [0], [1], [0, 0, 1, 1], [], []>} : vector<2x16xbf16>, vector<16x8xbf16>, vector<2x8xf32> -> vector<2x8xf32>
    %34 = arith.addf %28, %33 : vector<2x8xf32>
    %c6 = arith.constant 6 : index
    %c0_35 = arith.constant 0 : index
    %c0_36 = arith.constant 0 : index
    %35 = vector.load %arg1[%c6, %c0_35, %c0_36] : memref<9x2x16xbf16, #tpu.memory_space<vmem>>, vector<1x2x16xbf16>
    %36 = vector.shape_cast %35 : vector<1x2x16xbf16> to vector<2x16xbf16>
    %c6_37 = arith.constant 6 : index
    %c0_38 = arith.constant 0 : index
    %c0_39 = arith.constant 0 : index
    %37 = vector.load %arg2[%c6_37, %c0_38, %c0_39] : memref<9x16x8xbf16, #tpu.memory_space<vmem>>, vector<1x16x8xbf16>
    %38 = vector.shape_cast %37 : vector<1x16x8xbf16> to vector<16x8xbf16>
    %cst_40 = arith.constant dense<0.000000e+00> : vector<2x8xf32>
    %39 = tpu.matmul %36, %38, %cst_40 {dimension_numbers = #tpu.dot_dimension_numbers<[1], [0], [0], [1], [0, 0, 1, 1], [], []>} : vector<2x16xbf16>, vector<16x8xbf16>, vector<2x8xf32> -> vector<2x8xf32>
    %40 = arith.addf %34, %39 : vector<2x8xf32>
    %c7 = arith.constant 7 : index
    %c0_41 = arith.constant 0 : index
    %c0_42 = arith.constant 0 : index
    %41 = vector.load %arg1[%c7, %c0_41, %c0_42] : memref<9x2x16xbf16, #tpu.memory_space<vmem>>, vector<1x2x16xbf16>
    %42 = vector.shape_cast %41 : vector<1x2x16xbf16> to vector<2x16xbf16>
    %c7_43 = arith.constant 7 : index
    %c0_44 = arith.constant 0 : index
    %c0_45 = arith.constant 0 : index
    %43 = vector.load %arg2[%c7_43, %c0_44, %c0_45] : memref<9x16x8xbf16, #tpu.memory_space<vmem>>, vector<1x16x8xbf16>
    %44 = vector.shape_cast %43 : vector<1x16x8xbf16> to vector<16x8xbf16>
    %cst_46 = arith.constant dense<0.000000e+00> : vector<2x8xf32>
    %45 = tpu.matmul %42, %44, %cst_46 {dimension_numbers = #tpu.dot_dimension_numbers<[1], [0], [0], [1], [0, 0, 1, 1], [], []>} : vector<2x16xbf16>, vector<16x8xbf16>, vector<2x8xf32> -> vector<2x8xf32>
    %46 = arith.addf %40, %45 : vector<2x8xf32>
    %c8 = arith.constant 8 : index
    %c0_47 = arith.constant 0 : index
    %c0_48 = arith.constant 0 : index
    %47 = vector.load %arg1[%c8, %c0_47, %c0_48] : memref<9x2x16xbf16, #tpu.memory_space<vmem>>, vector<1x2x16xbf16>
    %48 = vector.shape_cast %47 : vector<1x2x16xbf16> to vector<2x16xbf16>
    %c8_49 = arith.constant 8 : index
    %c0_50 = arith.constant 0 : index
    %c0_51 = arith.constant 0 : index
    %49 = vector.load %arg2[%c8_49, %c0_50, %c0_51] : memref<9x16x8xbf16, #tpu.memory_space<vmem>>, vector<1x16x8xbf16>
    %50 = vector.shape_cast %49 : vector<1x16x8xbf16> to vector<16x8xbf16>
    %cst_52 = arith.constant dense<0.000000e+00> : vector<2x8xf32>
    %51 = tpu.matmul %48, %50, %cst_52 {dimension_numbers = #tpu.dot_dimension_numbers<[1], [0], [0], [1], [0, 0, 1, 1], [], []>} : vector<2x16xbf16>, vector<16x8xbf16>, vector<2x8xf32> -> vector<2x8xf32>
    %52 = arith.addf %46, %51 : vector<2x8xf32>
    %c0_53 = arith.constant 0 : index
    %c0_54 = arith.constant 0 : index
    %53 = vector.load %arg3[%c0_53, %c0_54] : memref<2x8xf32, #tpu.memory_space<vmem>>, vector<2x8xf32>
    tpu.vector_store %arg3[%c0_53, %c0_54], %52 {strides = array<i32>} : memref<2x8xf32, #tpu.memory_space<vmem>>, vector<2x8xf32>,
    return
  }
  func.func @transform_0(%arg0: i32) -> (i32, i32, i32) {
    %c0_i32 = arith.constant 0 : i32
    %c0_i32_0 = arith.constant 0 : i32
    %c0_i32_1 = arith.constant 0 : i32
    return %c0_i32, %arg0, %c0_i32_0 : i32, i32, i32
  }
  func.func @transform_1(%arg0: i32) -> (i32, i32, i32) {
    %c0_i32 = arith.constant 0 : i32
    %c0_i32_0 = arith.constant 0 : i32
    %c0_i32_1 = arith.constant 0 : i32
    %c0_i32_2 = arith.constant 0 : i32
    return %c0_i32, %c0_i32_0, %c0_i32_1 : i32, i32, i32
  }
  func.func @transform_2(%arg0: i32) -> (i32, i32) {
    %c0_i32 = arith.constant 0 : i32
    %c0_i32_0 = arith.constant 0 : i32
    return %arg0, %c0_i32 : i32, i32
  }
}

module attributes {stable_mosaic.version = 11 : i64} {
  func.func @_bottleneck_kernel(%arg0: i32, %arg1: memref<2x24xf32, #tpu.memory_space<vmem>>, %arg2: memref<1x24xf32, #tpu.memory_space<vmem>>, %arg3: memref<1x24xf32, #tpu.memory_space<vmem>>, %arg4: memref<24x16xbf16, #tpu.memory_space<vmem>>, %arg5: memref<1x16xf32, #tpu.memory_space<vmem>>, %arg6: memref<1x16xf32, #tpu.memory_space<vmem>>, %arg7: memref<2x16xbf16, #tpu.memory_space<vmem>>) attributes {dimension_semantics = [#tpu.dimension_semantics<parallel>], iteration_bounds = array<i64: 1>, scalar_prefetch = 0 : i64, scratch_operands = 0 : i64, tpu.core_type = #tpu.core_type<tc>, window_params = [{transform_indices = @transform_0, window_bounds = array<i64: 2, 24>}, {pipeline_mode = #tpu.pipeline_mode<synchronous>, transform_indices = @transform_1, window_bounds = array<i64: 1, 24>}, {pipeline_mode = #tpu.pipeline_mode<synchronous>, transform_indices = @transform_2, window_bounds = array<i64: 1, 24>}, {pipeline_mode = #tpu.pipeline_mode<synchronous>, transform_indices = @transform_3, window_bounds = array<i64: 24, 16>}, {pipeline_mode = #tpu.pipeline_mode<synchronous>, transform_indices = @transform_4, window_bounds = array<i64: 1, 16>}, {pipeline_mode = #tpu.pipeline_mode<synchronous>, transform_indices = @transform_5, window_bounds = array<i64: 1, 16>}, {transform_indices = @transform_6, window_bounds = array<i64: 2, 16>}]} {
    %c0 = arith.constant 0 : index
    %c0_0 = arith.constant 0 : index
    %0 = vector.load %arg1[%c0, %c0_0] : memref<2x24xf32, #tpu.memory_space<vmem>>, vector<2x24xf32>
    %c0_1 = arith.constant 0 : index
    %c0_2 = arith.constant 0 : index
    %1 = vector.load %arg2[%c0_1, %c0_2] : memref<1x24xf32, #tpu.memory_space<vmem>>, vector<1x24xf32>
    %2 = vector.broadcast %1 : vector<1x24xf32> to vector<2x24xf32>
    %3 = arith.mulf %0, %2 : vector<2x24xf32>
    %c0_3 = arith.constant 0 : index
    %c0_4 = arith.constant 0 : index
    %4 = vector.load %arg3[%c0_3, %c0_4] : memref<1x24xf32, #tpu.memory_space<vmem>>, vector<1x24xf32>
    %5 = vector.broadcast %4 : vector<1x24xf32> to vector<2x24xf32>
    %6 = arith.addf %3, %5 : vector<2x24xf32>
    %cst = arith.constant 0.000000e+00 : f32
    %7 = vector.broadcast %cst : f32 to vector<2x24xf32>
    %8 = arith.maximumf %6, %7 : vector<2x24xf32>
    %9 = arith.truncf %8 : vector<2x24xf32> to vector<2x24xbf16>
    %c0_5 = arith.constant 0 : index
    %c0_6 = arith.constant 0 : index
    %10 = vector.load %arg4[%c0_5, %c0_6] : memref<24x16xbf16, #tpu.memory_space<vmem>>, vector<24x16xbf16>
    %cst_7 = arith.constant dense<0.000000e+00> : vector<2x16xf32>
    %11 = tpu.matmul %9, %10, %cst_7 {dimension_numbers = #tpu.dot_dimension_numbers<[1], [0], [0], [1], [0, 0, 1, 1], [], []>} : vector<2x24xbf16>, vector<24x16xbf16>, vector<2x16xf32> -> vector<2x16xf32>
    %c0_8 = arith.constant 0 : index
    %c0_9 = arith.constant 0 : index
    %12 = vector.load %arg5[%c0_8, %c0_9] : memref<1x16xf32, #tpu.memory_space<vmem>>, vector<1x16xf32>
    %13 = vector.broadcast %12 : vector<1x16xf32> to vector<2x16xf32>
    %14 = arith.mulf %11, %13 : vector<2x16xf32>
    %c0_10 = arith.constant 0 : index
    %c0_11 = arith.constant 0 : index
    %15 = vector.load %arg6[%c0_10, %c0_11] : memref<1x16xf32, #tpu.memory_space<vmem>>, vector<1x16xf32>
    %16 = vector.broadcast %15 : vector<1x16xf32> to vector<2x16xf32>
    %17 = arith.addf %14, %16 : vector<2x16xf32>
    %cst_12 = arith.constant 0.000000e+00 : f32
    %18 = vector.broadcast %cst_12 : f32 to vector<2x16xf32>
    %19 = arith.maximumf %17, %18 : vector<2x16xf32>
    %20 = arith.truncf %19 : vector<2x16xf32> to vector<2x16xbf16>
    %c0_13 = arith.constant 0 : index
    %c0_14 = arith.constant 0 : index
    %21 = vector.load %arg7[%c0_13, %c0_14] : memref<2x16xbf16, #tpu.memory_space<vmem>>, vector<2x16xbf16>
    tpu.vector_store %arg7[%c0_13, %c0_14], %20 {strides = array<i32>} : memref<2x16xbf16, #tpu.memory_space<vmem>>, vector<2x16xbf16>,
    return
  }
  func.func @transform_0(%arg0: i32) -> (i32, i32) {
    %c0_i32 = arith.constant 0 : i32
    %c0_i32_0 = arith.constant 0 : i32
    return %arg0, %c0_i32 : i32, i32
  }
  func.func @transform_1(%arg0: i32) -> (i32, i32) {
    %c0_i32 = arith.constant 0 : i32
    %c0_i32_0 = arith.constant 0 : i32
    %c0_i32_1 = arith.constant 0 : i32
    return %c0_i32, %c0_i32_0 : i32, i32
  }
  func.func @transform_2(%arg0: i32) -> (i32, i32) {
    %c0_i32 = arith.constant 0 : i32
    %c0_i32_0 = arith.constant 0 : i32
    %c0_i32_1 = arith.constant 0 : i32
    return %c0_i32, %c0_i32_0 : i32, i32
  }
  func.func @transform_3(%arg0: i32) -> (i32, i32) {
    %c0_i32 = arith.constant 0 : i32
    %c0_i32_0 = arith.constant 0 : i32
    %c0_i32_1 = arith.constant 0 : i32
    return %c0_i32, %c0_i32_0 : i32, i32
  }
  func.func @transform_4(%arg0: i32) -> (i32, i32) {
    %c0_i32 = arith.constant 0 : i32
    %c0_i32_0 = arith.constant 0 : i32
    %c0_i32_1 = arith.constant 0 : i32
    return %c0_i32, %c0_i32_0 : i32, i32
  }
  func.func @transform_5(%arg0: i32) -> (i32, i32) {
    %c0_i32 = arith.constant 0 : i32
    %c0_i32_0 = arith.constant 0 : i32
    %c0_i32_1 = arith.constant 0 : i32
    return %c0_i32, %c0_i32_0 : i32, i32
  }
  func.func @transform_6(%arg0: i32) -> (i32, i32) {
    %c0_i32 = arith.constant 0 : i32
    %c0_i32_0 = arith.constant 0 : i32
    return %arg0, %c0_i32 : i32, i32
  }
}

module attributes {stable_mosaic.version = 11 : i64} {
  func.func @_tail_kernel(%arg0: i32, %arg1: memref<1x2x32xf32, #tpu.memory_space<vmem>>, %arg2: memref<1x1x32xf32, #tpu.memory_space<vmem>>, %arg3: memref<1x1x32xf32, #tpu.memory_space<vmem>>, %arg4: memref<32x10xf32, #tpu.memory_space<vmem>>, %arg5: memref<1x10xf32, #tpu.memory_space<vmem>>, %arg6: memref<2x10xf32, #tpu.memory_space<vmem>>) attributes {dimension_semantics = [#tpu.dimension_semantics<arbitrary>], iteration_bounds = array<i64: 1>, scalar_prefetch = 0 : i64, scratch_operands = 0 : i64, tpu.core_type = #tpu.core_type<tc>, window_params = [{pipeline_mode = #tpu.pipeline_mode<synchronous>, transform_indices = @transform_0, window_bounds = array<i64: 1, 2, 32>}, {pipeline_mode = #tpu.pipeline_mode<synchronous>, transform_indices = @transform_1, window_bounds = array<i64: 1, 1, 32>}, {pipeline_mode = #tpu.pipeline_mode<synchronous>, transform_indices = @transform_2, window_bounds = array<i64: 1, 1, 32>}, {pipeline_mode = #tpu.pipeline_mode<synchronous>, transform_indices = @transform_3, window_bounds = array<i64: 32, 10>}, {pipeline_mode = #tpu.pipeline_mode<synchronous>, transform_indices = @transform_4, window_bounds = array<i64: 1, 10>}, {pipeline_mode = #tpu.pipeline_mode<synchronous>, transform_indices = @transform_5, window_bounds = array<i64: 2, 10>}]} {
    %c0 = arith.constant 0 : index
    %c0_0 = arith.constant 0 : index
    %c0_1 = arith.constant 0 : index
    %0 = vector.load %arg1[%c0, %c0_0, %c0_1] : memref<1x2x32xf32, #tpu.memory_space<vmem>>, vector<1x2x32xf32>
    %c0_2 = arith.constant 0 : index
    %c0_3 = arith.constant 0 : index
    %c0_4 = arith.constant 0 : index
    %1 = vector.load %arg2[%c0_2, %c0_3, %c0_4] : memref<1x1x32xf32, #tpu.memory_space<vmem>>, vector<1x1x32xf32>
    %2 = vector.broadcast %1 : vector<1x1x32xf32> to vector<1x2x32xf32>
    %3 = arith.mulf %0, %2 : vector<1x2x32xf32>
    %c0_5 = arith.constant 0 : index
    %c0_6 = arith.constant 0 : index
    %c0_7 = arith.constant 0 : index
    %4 = vector.load %arg3[%c0_5, %c0_6, %c0_7] : memref<1x1x32xf32, #tpu.memory_space<vmem>>, vector<1x1x32xf32>
    %5 = vector.broadcast %4 : vector<1x1x32xf32> to vector<1x2x32xf32>
    %6 = arith.addf %3, %5 : vector<1x2x32xf32>
    %cst = arith.constant 0.000000e+00 : f32
    %7 = vector.broadcast %cst : f32 to vector<1x2x32xf32>
    %8 = arith.maximumf %6, %7 : vector<1x2x32xf32>
    %cst_8 = arith.constant dense<0.000000e+00> : vector<2x32xf32>
    %9 = vector.multi_reduction <add>, %8, %cst_8 [0] : vector<1x2x32xf32> to vector<2x32xf32>
    %cst_9 = arith.constant 1.000000e+00 : f32
    %10 = vector.broadcast %cst_9 : f32 to vector<2x32xf32>
    %11 = arith.divf %9, %10 : vector<2x32xf32>
    %c0_10 = arith.constant 0 : index
    %c0_11 = arith.constant 0 : index
    %12 = vector.load %arg4[%c0_10, %c0_11] : memref<32x10xf32, #tpu.memory_space<vmem>>, vector<32x10xf32>
    %cst_12 = arith.constant dense<0.000000e+00> : vector<2x10xf32>
    %13 = tpu.matmul %11, %12, %cst_12 {dimension_numbers = #tpu.dot_dimension_numbers<[1], [0], [0], [1], [0, 0, 1, 1], [], []>} : vector<2x32xf32>, vector<32x10xf32>, vector<2x10xf32> -> vector<2x10xf32>
    %c0_13 = arith.constant 0 : index
    %c0_14 = arith.constant 0 : index
    %14 = vector.load %arg5[%c0_13, %c0_14] : memref<1x10xf32, #tpu.memory_space<vmem>>, vector<1x10xf32>
    %15 = vector.broadcast %14 : vector<1x10xf32> to vector<2x10xf32>
    %16 = arith.addf %13, %15 : vector<2x10xf32>
    %c0_15 = arith.constant 0 : index
    %c0_16 = arith.constant 0 : index
    %17 = vector.load %arg6[%c0_15, %c0_16] : memref<2x10xf32, #tpu.memory_space<vmem>>, vector<2x10xf32>
    tpu.vector_store %arg6[%c0_15, %c0_16], %16 {strides = array<i32>} : memref<2x10xf32, #tpu.memory_space<vmem>>, vector<2x10xf32>,
    return
  }
  func.func @transform_0(%arg0: i32) -> (i32, i32, i32) {
    %c0_i32 = arith.constant 0 : i32
    %c0_i32_0 = arith.constant 0 : i32
    %c0_i32_1 = arith.constant 0 : i32
    %c0_i32_2 = arith.constant 0 : i32
    return %c0_i32, %c0_i32_0, %c0_i32_1 : i32, i32, i32
  }
  func.func @transform_1(%arg0: i32) -> (i32, i32, i32) {
    %c0_i32 = arith.constant 0 : i32
    %c0_i32_0 = arith.constant 0 : i32
    %c0_i32_1 = arith.constant 0 : i32
    %c0_i32_2 = arith.constant 0 : i32
    return %c0_i32, %c0_i32_0, %c0_i32_1 : i32, i32, i32
  }
  func.func @transform_2(%arg0: i32) -> (i32, i32, i32) {
    %c0_i32 = arith.constant 0 : i32
    %c0_i32_0 = arith.constant 0 : i32
    %c0_i32_1 = arith.constant 0 : i32
    %c0_i32_2 = arith.constant 0 : i32
    return %c0_i32, %c0_i32_0, %c0_i32_1 : i32, i32, i32
  }
  func.func @transform_3(%arg0: i32) -> (i32, i32) {
    %c0_i32 = arith.constant 0 : i32
    %c0_i32_0 = arith.constant 0 : i32
    %c0_i32_1 = arith.constant 0 : i32
    return %c0_i32, %c0_i32_0 : i32, i32
  }
  func.func @transform_4(%arg0: i32) -> (i32, i32) {
    %c0_i32 = arith.constant 0 : i32
    %c0_i32_0 = arith.constant 0 : i32
    %c0_i32_1 = arith.constant 0 : i32
    return %c0_i32, %c0_i32_0 : i32, i32
  }
  func.func @transform_5(%arg0: i32) -> (i32, i32) {
    %c0_i32 = arith.constant 0 : i32
    %c0_i32_0 = arith.constant 0 : i32
    %c0_i32_1 = arith.constant 0 : i32
    return %c0_i32, %c0_i32_0 : i32, i32
  }
}

</mosaic_0001>

<bundles_post_ra>
// kernel: densenet_forward.24
= control target key start
LH: loop header
LB: loop body
LE: loop exit
PB: predicated region body
PF: predicated region fallthrough
CT: control target
= control target key end

     0   :  { %vm543_vm0 = vcmask 1040384   ;;  %vm544_vm1 = vcmask 1041408   ;;  %v1569_v2 = vmov 65535   ;;  %vm446_vm2 = vcmask 154624   ;;  %s2475_s1 = inlined_call_operand.vmem [shape: bf16[1,147,16], index: 1, kind: input, shape index: {}]   ;;  %s2476_s0 = inlined_call_operand.vmem [shape: bf16[1,512,147], index: 0, kind: input, shape index: {}]   ;;  %s2477_s2 = inlined_call_operand.vmem [shape: f32[1,16], index: 2, kind: input, shape index: {}]   ;;  %s2478_s3 = inlined_call_operand.vmem [shape: f32[1,16], index: 3, kind: input, shape index: {}]   ;;  %s2479_s4 = inlined_call_operand.vmem [shape: f32[512,16], index: 4, kind: output, shape index: {}]  }
   0x1   :  { %v1552_v0 = vld [vmem:[%s2475_s1 + $0x38] sm:$0xff]  ;;  %v100_v1 = vld [vmem:[%s2475_s1 + $0x48] sm:$0x3]  ;;  %v545_v3 = vsel %vm543_vm0, 4294967295, %v1569_v2  ;;  %v1551_v5 = vld [vmem:[%s2475_s1 + $0x30] sm:$0xff]  ;;  %vm1088_vm3 = vcmask 130048  }
   0x2   :  { %v426_v4 = vunpack.c.l.b16 %v100_v1  ;;  %550 = vmatpush.bf16.msra.mxu0 %v1552_v0  ;;  %1554 = vmatpush.bf16.msra.mxu2 %v1552_v0  ;;  %v546_v6 = vsel %vm544_vm1, %v545_v3, 0  ;;  %v1550_v9 = vld [vmem:[%s2475_s1 + $0x28] sm:$0xff]  ;;  %v1553_v10 = vld [vmem:[%s2475_s1 + $0x40] sm:$0xff]  ;;  %v1515_v13 = vld [vmem:[%s2476_s0 + $0x114] sm:$0xf] }
   0x3   :  { %v1481_v11 = vld [vmem:[%s2476_s0 + $0x4] sm:$0xf]  ;;  %v1161_v12 = vld [vmem:[%s2476_s0 + $0x8] sm:$0xf0]  ;;  %v1297_v14 = vld [vmem:[%s2476_s0 + $0x118] sm:$0xf0] }
   0x4   :  { %v436_v7 = vpack.c.b16 %v426_v4, %v426_v4  ;;  %v1164_v15 = vor.u32 %v1481_v11, %v1161_v12  ;;  %v1549_v16 = vld [vmem:[%s2475_s1 + $0x20] sm:$0xff]  ;;  %v1300_v17 = vor.u32 %v1515_v13, %v1297_v14  ;;  %v1548_v18 = vld [vmem:[%s2475_s1 + $0x18] sm:$0xff]  ;;  %v1547_v19 = vld [vmem:[%s2475_s1 + $0x10] sm:$0xff] }
   0x5   :  { %v1546_v20 = vld [vmem:[%s2475_s1 + $0x8] sm:$0xff]  ;;  %v1483_v21 = vld [vmem:[%s2476_s0 + $0x14] sm:$0xf]  ;;  %v1169_v22 = vld [vmem:[%s2476_s0 + $0x18] sm:$0xf0] }
   0x6   :  { %v548_v8 = vand.u32 %v546_v6, %v436_v7  ;;  %551 = vmatpush.bf16.msra.mxu0 %v1551_v5  ;;  %1555 = vmatpush.bf16.msra.mxu2 %v1551_v5  ;;  %v1517_v23 = vld [vmem:[%s2476_s0 + $0x124] sm:$0xf]  ;;  %v1305_v24 = vld [vmem:[%s2476_s0 + $0x128] sm:$0xf0]  ;;  %v1172_v25 = vor.u32 %v1483_v21, %v1169_v22  ;;  %v1159_v27 = vld [vmem:[%s2476_s0] sm:$0xf] }
   0x7   :  { %v1545_v26 = vld [vmem:[%s2475_s1] sm:$0xff]  ;;  %v1482_v28 = vld [vmem:[%s2476_s0 + $0x4] sm:$0xf0]  ;;  %v1308_v31 = vor.u32 %v1517_v23, %v1305_v24  ;;  %v1177_v35 = vld [vmem:[%s2476_s0 + $0x28] sm:$0xf0] }
   0x8   :  { %725 = vmatpush.bf16.msra.mxu1 %v548_v8  ;;  %1562 = vmatpush.bf16.msra.mxu3 %v548_v8  ;;  %v1287_v29 = vld [vmem:[%s2476_s0 + $0x100] sm:$0xf]  ;;  %v1514_v30 = vld [vmem:[%s2476_s0 + $0x104] sm:$0xf0]  ;;  %v1160_v32 = vor.u32 %v1482_v28, %v1159_v27  ;;  %v1485_v34 = vld [vmem:[%s2476_s0 + $0x24] sm:$0xf] }
   0x9   :  { %v1288_v33 = vor.u32 %v1514_v30, %v1287_v29  ;;  %v1519_v36 = vld [vmem:[%s2476_s0 + $0x134] sm:$0xf]  ;;  %v1313_v37 = vld [vmem:[%s2476_s0 + $0x138] sm:$0xf0]  ;;  %v1180_v38 = vor.u32 %v1485_v34, %v1177_v35  ;;  %v1167_v39 = vld [vmem:[%s2476_s0 + $0x10] sm:$0xf] }
   0xa   :  { %552 = vmatpush.bf16.msra.mxu0 %v1550_v9  ;;  %1556 = vmatpush.bf16.msra.mxu2 %v1550_v9  ;;  %v1484_v40 = vld [vmem:[%s2476_s0 + $0x14] sm:$0xf0]  ;;  %v1295_v41 = vld [vmem:[%s2476_s0 + $0x110] sm:$0xf]  ;;  %v1316_v43 = vor.u32 %v1519_v36, %v1313_v37  ;;  %v1487_v46 = vld [vmem:[%s2476_s0 + $0x34] sm:$0xf] }
   0xb   :  { %v1516_v42 = vld [vmem:[%s2476_s0 + $0x114] sm:$0xf0]  ;;  %v1168_v44 = vor.u32 %v1484_v40, %v1167_v39  ;;  %v1185_v47 = vld [vmem:[%s2476_s0 + $0x38] sm:$0xf0]  ;;  %v1521_v48 = vld [vmem:[%s2476_s0 + $0x144] sm:$0xf] }
   0xc   :  { %726 = vmatpush.bf16.msra.mxu1 %v1553_v10  ;;  %1563 = vmatpush.bf16.msra.mxu3 %v1553_v10  ;;  %v1296_v45 = vor.u32 %v1516_v42, %v1295_v41  ;;  %v1321_v49 = vld [vmem:[%s2476_s0 + $0x148] sm:$0xf0]  ;;  %v1188_v50 = vor.u32 %v1487_v46, %v1185_v47  ;;  %v1175_v51 = vld [vmem:[%s2476_s0 + $0x20] sm:$0xf]  ;;  %v1486_v52 = vld [vmem:[%s2476_s0 + $0x24] sm:$0xf0] }
   0xd   :  { %v1303_v53 = vld [vmem:[%s2476_s0 + $0x120] sm:$0xf]  ;;  %v1518_v54 = vld [vmem:[%s2476_s0 + $0x124] sm:$0xf0]  ;;  %v1324_v55 = vor.u32 %v1521_v48, %v1321_v49  ;;  %v1176_v56 = vor.u32 %v1486_v52, %v1175_v51  ;;  %v1489_v58 = vld [vmem:[%s2476_s0 + $0x44] sm:$0xf] }
   0xe   :  { %553 = vmatpush.bf16.msra.mxu0 %v1549_v16  ;;  %1557 = vmatpush.bf16.msra.mxu2 %v1549_v16  ;;  %v1304_v57 = vor.u32 %v1518_v54, %v1303_v53  ;;  %v1193_v59 = vld [vmem:[%s2476_s0 + $0x48] sm:$0xf0]  ;;  %v1523_v60 = vld [vmem:[%s2476_s0 + $0x154] sm:$0xf]  ;;  %v1329_v61 = vld [vmem:[%s2476_s0 + $0x158] sm:$0xf0] }
   0xf   :  { %1449 = vmatmul.msk.bf16.vlgmr.msra.gmra.mxu1 %vm446_vm2, %v1164_v15  ;;  %1466 = vmatmul.msk.bf16.vlgmr.msra.gmra.mxu3 %vm446_vm2, %v1300_v17  ;;  %v1196_v62 = vor.u32 %v1489_v58, %v1193_v59  ;;  %v1183_v63 = vld [vmem:[%s2476_s0 + $0x30] sm:$0xf]  ;;  %v1488_v0 = vld [vmem:[%s2476_s0 + $0x34] sm:$0xf0]  ;;  %v1332_v3 = vor.u32 %v1523_v60, %v1329_v61  ;;  %v1491_v6 = vld [vmem:[%s2476_s0 + $0x54] sm:$0xf] }
  0x10   :  { %v1311_v1 = vld [vmem:[%s2476_s0 + $0x130] sm:$0xf]  ;;  %v1520_v2 = vld [vmem:[%s2476_s0 + $0x134] sm:$0xf0]  ;;  %v1184_v4 = vor.u32 %v1488_v0, %v1183_v63  ;;  %v1201_v7 = vld [vmem:[%s2476_s0 + $0x58] sm:$0xf0] }
  0x11   :  { %v1312_v5 = vor.u32 %v1520_v2, %v1311_v1  ;;  %v1525_v8 = vld [vmem:[%s2476_s0 + $0x164] sm:$0xf]  ;;  %v1337_v9 = vld [vmem:[%s2476_s0 + $0x168] sm:$0xf0]  ;;  %v1204_v10 = vor.u32 %v1491_v6, %v1201_v7  ;;  %v1191_v11 = vld [vmem:[%s2476_s0 + $0x40] sm:$0xf] }
  0x12   :  { %554 = vmatpush.bf16.msra.mxu0 %v1548_v18  ;;  %1558 = vmatpush.bf16.msra.mxu2 %v1548_v18  ;;  %v1490_v12 = vld [vmem:[%s2476_s0 + $0x44] sm:$0xf0]  ;;  %v1319_v13 = vld [vmem:[%s2476_s0 + $0x140] sm:$0xf]  ;;  %v1340_v15 = vor.u32 %v1525_v8, %v1337_v9  ;;  %v1493_v18 = vld [vmem:[%s2476_s0 + $0x64] sm:$0xf] }
  0x13   :  { %v1522_v14 = vld [vmem:[%s2476_s0 + $0x144] sm:$0xf0]  ;;  %v1192_v16 = vor.u32 %v1490_v12, %v1191_v11  ;;  %v1345_v21 = vld [vmem:[%s2476_s0 + $0x178] sm:$0xf0]  ;;  %v1199_v23 = vld [vmem:[%s2476_s0 + $0x50] sm:$0xf] }
  0x14   :  { %v1320_v17 = vor.u32 %v1522_v14, %v1319_v13  ;;  %v1492_v24 = vld [vmem:[%s2476_s0 + $0x54] sm:$0xf0]  ;;  %v1495_v30 = vld [vmem:[%s2476_s0 + $0x74] sm:$0xf]  ;;  %v1207_v35 = vld [vmem:[%s2476_s0 + $0x60] sm:$0xf] }
  0x15   :  { %v1200_v28 = vor.u32 %v1492_v24, %v1199_v23  ;;  %v1494_v36 = vld [vmem:[%s2476_s0 + $0x64] sm:$0xf0]  ;;  %v1335_v37 = vld [vmem:[%s2476_s0 + $0x160] sm:$0xf]  ;;  %v1497_v42 = vld [vmem:[%s2476_s0 + $0x84] sm:$0xf] }
  0x16   :  { %555 = vmatpush.bf16.msra.mxu0 %v1547_v19  ;;  %1559 = vmatpush.bf16.msra.mxu2 %v1547_v19  ;;  %v1209_v19 = vld [vmem:[%s2476_s0 + $0x68] sm:$0xf0]  ;;  %v1208_v40 = vor.u32 %v1494_v36, %v1207_v35  ;;  %v1215_v47 = vld [vmem:[%s2476_s0 + $0x70] sm:$0xf]  ;;  %v1496_v48 = vld [vmem:[%s2476_s0 + $0x74] sm:$0xf0] }
  0x17   :  { %v1212_v22 = vor.u32 %v1493_v18, %v1209_v19  ;;  %v1528_v51 = vld [vmem:[%s2476_s0 + $0x174] sm:$0xf0]  ;;  %v1216_v53 = vor.u32 %v1496_v48, %v1215_v47  ;;  %v1233_v58 = vld [vmem:[%s2476_s0 + $0x98] sm:$0xf0]  ;;  %v1533_v59 = vld [vmem:[%s2476_s0 + $0x1a4] sm:$0xf] }
  0x18   :  { %v1369_v60 = vld [vmem:[%s2476_s0 + $0x1a8] sm:$0xf0]  ;;  %v1498_v63 = vld [vmem:[%s2476_s0 + $0x84] sm:$0xf0]  ;;  %v1351_v2 = vld [vmem:[%s2476_s0 + $0x180] sm:$0xf] }
  0x19   :  { %v1501_v19 = vld [vmem:[%s2476_s0 + $0xa4] sm:$0xf]  ;;  %v1503_v48 = vld [vmem:[%s2476_s0 + $0xb4] sm:$0xf] }
  0x1a   :  { %556 = vmatpush.bf16.msra.mxu0 %v1546_v20  ;;  %1560 = vmatpush.bf16.msra.mxu2 %v1546_v20  ;;  %v1527_v20 = vld [vmem:[%s2476_s0 + $0x174] sm:$0xf] }
  0x1b   :  { %v1348_v27 = vor.u32 %v1527_v20, %v1345_v21  ;;  %v1241_v20 = vld [vmem:[%s2476_s0 + $0xa8] sm:$0xf0]  ;;  %v1535_v21 = vld [vmem:[%s2476_s0 + $0x1b4] sm:$0xf] }
  0x1c   :  { %v1244_v24 = vor.u32 %v1501_v19, %v1241_v20 }
  0x1e   :  { %557 = vmatpush.bf16.msra.mxu0 %v1545_v26  ;;  %1561 = vmatpush.bf16.msra.mxu2 %v1545_v26  ;;  %v1524_v26 = vld [vmem:[%s2476_s0 + $0x154] sm:$0xf0] }
  0x1f   :  { %1450 = vmatmul.msk.bf16.gmra.mxu1 %vm446_vm2, %v1172_v25  ;;  %1467 = vmatmul.msk.bf16.gmra.mxu3 %vm446_vm2, %v1308_v31  ;;  %v1327_v25 = vld [vmem:[%s2476_s0 + $0x150] sm:$0xf]  ;;  %v1217_v31 = vld [vmem:[%s2476_s0 + $0x78] sm:$0xf0] }
  0x20   :  { %v1328_v29 = vor.u32 %v1524_v26, %v1327_v25  ;;  %v1220_v34 = vor.u32 %v1495_v30, %v1217_v31  ;;  %v1231_v25 = vld [vmem:[%s2476_s0 + $0x90] sm:$0xf]  ;;  %v1500_v26 = vld [vmem:[%s2476_s0 + $0x94] sm:$0xf0] }
  0x21   :  { %558 = vmatmul.bf16.vlgmr.msra.gmra.mxu0 %v1160_v32  ;;  %638 = vmatmul.bf16.vlgmr.msra.gmra.mxu2 %v1288_v33  ;;  %v1529_v32 = vld [vmem:[%s2476_s0 + $0x184] sm:$0xf]  ;;  %v1353_v33 = vld [vmem:[%s2476_s0 + $0x188] sm:$0xf0]  ;;  %v1359_v30 = vld [vmem:[%s2476_s0 + $0x190] sm:$0xf]  ;;  %v1232_v35 = vor.u32 %v1500_v26, %v1231_v25 }
  0x22   :  { %v1356_v39 = vor.u32 %v1529_v32, %v1353_v33  ;;  %v1532_v31 = vld [vmem:[%s2476_s0 + $0x194] sm:$0xf0]  ;;  %v1257_v25 = vld [vmem:[%s2476_s0 + $0xc8] sm:$0xf0] }
  0x2f   :  { %1451 = vmatmul.msk.bf16.gmra.mxu1 %vm446_vm2, %v1180_v38  ;;  %1468 = vmatmul.msk.bf16.gmra.mxu3 %vm446_vm2, %v1316_v43  ;;  %v1526_v38 = vld [vmem:[%s2476_s0 + $0x164] sm:$0xf0]  ;;  %v1225_v43 = vld [vmem:[%s2476_s0 + $0x88] sm:$0xf0] }
  0x30   :  { %v1336_v41 = vor.u32 %v1526_v38, %v1335_v37  ;;  %v1228_v46 = vor.u32 %v1497_v42, %v1225_v43  ;;  %v1360_v37 = vor.u32 %v1532_v31, %v1359_v30 }
  0x31   :  { %563 = vmatmul.bf16.gmra.mxu0 %v1168_v44  ;;  %643 = vmatmul.bf16.gmra.mxu2 %v1296_v45  ;;  %v1531_v44 = vld [vmem:[%s2476_s0 + $0x194] sm:$0xf]  ;;  %v1361_v45 = vld [vmem:[%s2476_s0 + $0x198] sm:$0xf0] }
  0x32   :  { %v1364_v52 = vor.u32 %v1531_v44, %v1361_v45 }
  0x3f   :  { %1452 = vmatmul.msk.bf16.gmra.mxu1 %vm446_vm2, %v1188_v50  ;;  %1469 = vmatmul.msk.bf16.gmra.mxu3 %vm446_vm2, %v1324_v55  ;;  %v1343_v50 = vld [vmem:[%s2476_s0 + $0x170] sm:$0xf] }
  0x40   :  { %v1344_v54 = vor.u32 %v1528_v51, %v1343_v50  ;;  %v1537_v51 = vld [vmem:[%s2476_s0 + $0x1c4] sm:$0xf] }
  0x41   :  { %568 = vmatmul.bf16.gmra.mxu0 %v1176_v56  ;;  %648 = vmatmul.bf16.gmra.mxu2 %v1304_v57  ;;  %v1499_v57 = vld [vmem:[%s2476_s0 + $0x94] sm:$0xf] }
  0x42   :  { %v1236_v61 = vor.u32 %v1499_v57, %v1233_v58  ;;  %v1502_v57 = vld [vmem:[%s2476_s0 + $0xa4] sm:$0xf0] }
  0x4f   :  { %1453 = vmatmul.msk.bf16.gmra.mxu1 %vm446_vm2, %v1196_v62  ;;  %1470 = vmatmul.msk.bf16.gmra.mxu3 %vm446_vm2, %v1332_v3  ;;  %v1223_v62 = vld [vmem:[%s2476_s0 + $0x80] sm:$0xf]  ;;  %v1530_v3 = vld [vmem:[%s2476_s0 + $0x184] sm:$0xf0] }
  0x50   :  { %v1224_v6 = vor.u32 %v1498_v63, %v1223_v62  ;;  %v1352_v8 = vor.u32 %v1530_v3, %v1351_v2  ;;  %v1534_v62 = vld [vmem:[%s2476_s0 + $0x1a4] sm:$0xf0] }
  0x51   :  { %573 = vmatmul.bf16.gmra.mxu0 %v1184_v4  ;;  %653 = vmatmul.bf16.gmra.mxu2 %v1312_v5  ;;  %v1372_v4 = vor.u32 %v1533_v59, %v1369_v60  ;;  %v1878_v5 = vld [vmem:[%s2477_s2] ss:$0 sm:$0xff] }
  0x5f   :  { %1454 = vmatmul.msk.bf16.gmra.mxu1 %vm446_vm2, %v1204_v10  ;;  %1471 = vmatmul.msk.bf16.gmra.mxu3 %vm446_vm2, %v1340_v15  ;;  %v1884_v10 = vld [vmem:[%s2478_s3] ss:$0 sm:$0xff] }
  0x61   :  { %578 = vmatmul.bf16.gmra.mxu0 %v1192_v16  ;;  %658 = vmatmul.bf16.gmra.mxu2 %v1320_v17 }
  0x6f   :  { %1455 = vmatmul.msk.bf16.gmra.mxu1 %vm446_vm2, %v1212_v22  ;;  %1472 = vmatmul.msk.bf16.gmra.mxu3 %vm446_vm2, %v1348_v27  ;;  %v1377_v22 = vld [vmem:[%s2476_s0 + $0x1b8] sm:$0xf0] }
  0x70   :  { %v1380_v32 = vor.u32 %v1535_v21, %v1377_v22 }
  0x71   :  { %583 = vmatmul.bf16.gmra.mxu0 %v1200_v28  ;;  %663 = vmatmul.bf16.gmra.mxu2 %v1328_v29 }
  0x7f   :  { %1456 = vmatmul.msk.bf16.gmra.mxu1 %vm446_vm2, %v1220_v34  ;;  %1473 = vmatmul.msk.bf16.gmra.mxu3 %vm446_vm2, %v1356_v39 }
  0x81   :  { %588 = vmatmul.bf16.gmra.mxu0 %v1208_v40  ;;  %668 = vmatmul.bf16.gmra.mxu2 %v1336_v41 }
  0x8c   :  { %v728_v49 = vpop.f32.mrf.mxu1 }
  0x8f   :  { %1457 = vmatmul.msk.bf16.gmra.mxu1 %vm446_vm2, %v1228_v46  ;;  %1474 = vmatmul.msk.bf16.gmra.mxu3 %vm446_vm2, %v1364_v52  ;;  %v1385_v52 = vld [vmem:[%s2476_s0 + $0x1c8] sm:$0xf0] }
  0x90   :  { %v1388_v63 = vor.u32 %v1537_v51, %v1385_v52 }
  0x91   :  { %593 = vmatmul.bf16.gmra.mxu0 %v1216_v53  ;;  %673 = vmatmul.bf16.gmra.mxu2 %v1344_v54 }
  0x92   :  { %v1847_v55 = vpop.f32.mrf.mxu3 }
  0x94   :  { %v730_v56 = vpop.f32.mrf.mxu1 }
  0x9a   :  { %v1867_v0 = vpop.f32.mrf.mxu3 }
  0x9c   :  { %v733_v1 = vpop.f32.mrf.mxu1 }
  0x9e   :  { %v559_v7 = vpop.f32.mrf.mxu0 }
  0x9f   :  { %1458 = vmatmul.msk.bf16.gmra.mxu1 %vm446_vm2, %v1236_v61  ;;  %v729_v9 = vadd.f32 %v728_v49, %v559_v7  ;;  %1475 = vmatmul.msk.bf16.gmra.mxu3 %vm446_vm2, %v1372_v4  ;;  %v1249_v49 = vld [vmem:[%s2476_s0 + $0xb8] sm:$0xf0]  ;;  %v1367_v61 = vld [vmem:[%s2476_s0 + $0x1a0] sm:$0xf] }
  0xa1   :  { %v892_v11 = vmul.f32 %v1878_v5, %v729_v9  ;;  %598 = vmatmul.bf16.gmra.mxu0 %v1224_v6  ;;  %678 = vmatmul.bf16.gmra.mxu2 %v1352_v8  ;;  %v1368_v8 = vor.u32 %v1534_v62, %v1367_v61  ;;  %v1507_v62 = vld [vmem:[%s2476_s0 + $0xd4] sm:$0xf] }
  0xa2   :  { %v1888_v12 = vpop.f32.mrf.mxu3 }
  0xa3   :  { %v960_v13 = vadd.f32 %v1884_v10, %v892_v11 }
  0xa4   :  { %v735_v14 = vpop.f32.mrf.mxu1  ;;  %v1891_v16 = vpop.f32.mrf.mxu2 }
  0xa5   :  { %v1024_v15 = vmax.f32 %v960_v13, 0.0 }
  0xa6   :  { %v561_v17 = vpop.f32.mrf.mxu0 }
  0xa7   :  { %1089 = vst.msk [vmem:[%s2479_s4] sm:$0xff] %vm1088_vm3, %v1024_v15  ;;  %v731_v18 = vadd.f32 %v730_v56, %v561_v17  ;;  %v1239_v56 = vld [vmem:[%s2476_s0 + $0xa0] sm:$0xf] }
  0xa8   :  { %v1240_v4 = vor.u32 %v1502_v57, %v1239_v56 }
  0xa9   :  { %v893_v23 = vmul.f32 %v1878_v5, %v731_v18 }
  0xaa   :  { %v1916_v27 = vpop.f32.mrf.mxu3 }
  0xab   :  { %v961_v28 = vadd.f32 %v1884_v10, %v893_v23 }
  0xac   :  { %v738_v29 = vpop.f32.mrf.mxu1  ;;  %v1925_v34 = vpop.f32.mrf.mxu2 }
  0xad   :  { %v1025_v33 = vmax.f32 %v961_v28, 0.0  ;;  %v1393_v28 = vld [vmem:[%s2476_s0 + $0x1d8] sm:$0xf0] }
  0xae   :  { %v564_v36 = vpop.f32.mrf.mxu0 }
  0xaf   :  { %1459 = vmatmul.msk.bf16.gmra.mxu1 %vm446_vm2, %v1244_v24  ;;  %1090 = vst.msk [vmem:[%s2479_s4 + $0x8] sm:$0xff] %vm1088_vm3, %v1025_v33  ;;  %v734_v38 = vadd.f32 %v733_v1, %v564_v36  ;;  %1476 = vmatmul.msk.bf16.gmra.mxu3 %vm446_vm2, %v1380_v32  ;;  %v1505_v24 = vld [vmem:[%s2476_s0 + $0xc4] sm:$0xf]  ;;  %v1247_v32 = vld [vmem:[%s2476_s0 + $0xb0] sm:$0xf] }
  0xb0   :  { %v1260_v31 = vor.u32 %v1505_v24, %v1257_v25  ;;  %v1504_v33 = vld [vmem:[%s2476_s0 + $0xb4] sm:$0xf0] }
  0xb1   :  { %v894_v39 = vmul.f32 %v1878_v5, %v734_v38  ;;  %603 = vmatmul.bf16.gmra.mxu0 %v1232_v35  ;;  %683 = vmatmul.bf16.gmra.mxu2 %v1360_v37  ;;  %v1375_v38 = vld [vmem:[%s2476_s0 + $0x1b0] sm:$0xf] }
  0xb2   :  { %v1934_v40 = vpop.f32.mrf.mxu3 }
  0xb3   :  { %v962_v41 = vadd.f32 %v1884_v10, %v894_v39  ;;  %v1536_v39 = vld [vmem:[%s2476_s0 + $0x1b4] sm:$0xf0] }
  0xb4   :  { %v740_v42 = vpop.f32.mrf.mxu1  ;;  %v644_v44 = vpop.f32.mrf.mxu2 }
  0xb5   :  { %v1026_v43 = vmax.f32 %v962_v41, 0.0  ;;  %v814_v45 = vadd.f32 %v1847_v55, %v644_v44  ;;  %v1252_v55 = vor.u32 %v1503_v48, %v1249_v49  ;;  %v1376_v48 = vor.u32 %v1536_v39, %v1375_v38  ;;  %v1509_v39 = vld [vmem:[%s2476_s0 + $0xe4] sm:$0xf] }
  0xb6   :  { %v566_v46 = vpop.f32.mrf.mxu0 }
  0xb7   :  { %1091 = vst.msk [vmem:[%s2479_s4 + $0x10] sm:$0xff] %vm1088_vm3, %v1026_v43  ;;  %v736_v47 = vadd.f32 %v735_v14, %v566_v46  ;;  %v926_v50 = vmul.f32 %v1878_v5, %v814_v45  ;;  %v1248_v45 = vor.u32 %v1504_v33, %v1247_v32 }
  0xb9   :  { %v895_v53 = vmul.f32 %v1878_v5, %v736_v47  ;;  %v994_v54 = vadd.f32 %v1884_v10, %v926_v50 }
  0xba   :  { %v1963_v58 = vpop.f32.mrf.mxu3 }
  0xbb   :  { %v963_v59 = vadd.f32 %v1884_v10, %v895_v53  ;;  %v1058_v1 = vmax.f32 %v994_v54, 0.0 }
  0xbc   :  { %v743_v60 = vpop.f32.mrf.mxu1  ;;  %v646_v3 = vpop.f32.mrf.mxu2 }
  0xbd   :  { %v1027_v2 = vmax.f32 %v963_v59, 0.0  ;;  %1123 = vst.msk [vmem:[%s2479_s4 + $0x110] sm:$0xff] %vm1088_vm3, %v1058_v1  ;;  %v816_v6 = vadd.f32 %v1867_v0, %v646_v3 }
  0xbe   :  { %v569_v7 = vpop.f32.mrf.mxu0 }
  0xbf   :  { %1460 = vmatmul.msk.bf16.gmra.mxu1 %vm446_vm2, %v1252_v55  ;;  %1092 = vst.msk [vmem:[%s2479_s4 + $0x18] sm:$0xff] %vm1088_vm3, %v1027_v2  ;;  %v739_v9 = vadd.f32 %v738_v29, %v569_v7  ;;  %1477 = vmatmul.msk.bf16.gmra.mxu3 %vm446_vm2, %v1388_v63  ;;  %v927_v11 = vmul.f32 %v1878_v5, %v816_v6  ;;  %v1265_v63 = vld [vmem:[%s2476_s0 + $0xd8] sm:$0xf0]  ;;  %v1401_v2 = vld [vmem:[%s2476_s0 + $0x1e8] sm:$0xf0] }
  0xc0   :  { %v1268_v6 = vor.u32 %v1507_v62, %v1265_v63  ;;  %v1255_v7 = vld [vmem:[%s2476_s0 + $0xc0] sm:$0xf] }
  0xc1   :  { %v896_v13 = vmul.f32 %v1878_v5, %v739_v9  ;;  %608 = vmatmul.bf16.gmra.mxu0 %v1240_v4  ;;  %v995_v14 = vadd.f32 %v1884_v10, %v927_v11  ;;  %688 = vmatmul.bf16.gmra.mxu2 %v1368_v8  ;;  %v1506_v8 = vld [vmem:[%s2476_s0 + $0xc4] sm:$0xf0] }
  0xc2   :  { %v1986_v0 = vpop.f32.mrf.mxu3 }
  0xc3   :  { %v964_v15 = vadd.f32 %v1884_v10, %v896_v13  ;;  %v1059_v18 = vmax.f32 %v995_v14, 0.0  ;;  %v1383_v14 = vld [vmem:[%s2476_s0 + $0x1c0] sm:$0xf] }
  0xc4   :  { %v745_v17 = vpop.f32.mrf.mxu1  ;;  %v649_v20 = vpop.f32.mrf.mxu2 }
  0xc5   :  { %v1028_v19 = vmax.f32 %v964_v15, 0.0  ;;  %1124 = vst.msk [vmem:[%s2479_s4 + $0x118] sm:$0xff] %vm1088_vm3, %v1059_v18  ;;  %v819_v21 = vadd.f32 %v1888_v12, %v649_v20  ;;  %v1539_v12 = vld [vmem:[%s2476_s0 + $0x1d4] sm:$0xf]  ;;  %v1538_v15 = vld [vmem:[%s2476_s0 + $0x1c4] sm:$0xf0] }
  0xc6   :  { %v571_v22 = vpop.f32.mrf.mxu0  ;;  %v1396_v41 = vor.u32 %v1539_v12, %v1393_v28  ;;  %v1384_v24 = vor.u32 %v1538_v15, %v1383_v14  ;;  %v1511_v15 = vld [vmem:[%s2476_s0 + $0xf4] sm:$0xf] }
  0xc7   :  { %1093 = vst.msk [vmem:[%s2479_s4 + $0x20] sm:$0xff] %vm1088_vm3, %v1028_v19  ;;  %v741_v23 = vadd.f32 %v740_v42, %v571_v22  ;;  %v928_v26 = vmul.f32 %v1878_v5, %v819_v21  ;;  %v1256_v21 = vor.u32 %v1506_v8, %v1255_v7 }
  0xc9   :  { %v897_v29 = vmul.f32 %v1878_v5, %v741_v23  ;;  %v996_v30 = vadd.f32 %v1884_v10, %v928_v26 }
  0xca   :  { %v2019_v35 = vpop.f32.mrf.mxu3 }
  0xcb   :  { %v965_v36 = vadd.f32 %v1884_v10, %v897_v29  ;;  %v1060_v42 = vmax.f32 %v996_v30, 0.0 }
  0xcc   :  { %v748_v37 = vpop.f32.mrf.mxu1  ;;  %v651_v44 = vpop.f32.mrf.mxu2 }
  0xcd   :  { %v1029_v43 = vmax.f32 %v965_v36, 0.0  ;;  %1125 = vst.msk [vmem:[%s2479_s4 + $0x120] sm:$0xff] %vm1088_vm3, %v1060_v42  ;;  %v821_v46 = vadd.f32 %v1916_v27, %v651_v44 }
  0xce   :  { %v574_v47 = vpop.f32.mrf.mxu0 }
  0xcf   :  { %1461 = vmatmul.msk.bf16.gmra.mxu1 %vm446_vm2, %v1260_v31  ;;  %1094 = vst.msk [vmem:[%s2479_s4 + $0x28] sm:$0xff] %vm1088_vm3, %v1029_v43  ;;  %v744_v49 = vadd.f32 %v743_v60, %v574_v47  ;;  %1478 = vmatmul.msk.bf16.gmra.mxu3 %vm446_vm2, %v1396_v41  ;;  %v929_v50 = vmul.f32 %v1878_v5, %v821_v46  ;;  %v1273_v41 = vld [vmem:[%s2476_s0 + $0xe8] sm:$0xf0]  ;;  %v1409_v43 = vld [vmem:[%s2476_s0 + $0x1f8] sm:$0xf0] }
  0xd0   :  { %v1276_v46 = vor.u32 %v1509_v39, %v1273_v41  ;;  %v1263_v47 = vld [vmem:[%s2476_s0 + $0xd0] sm:$0xf] }
  0xd1   :  { %v898_v51 = vmul.f32 %v1878_v5, %v744_v49  ;;  %613 = vmatmul.bf16.gmra.mxu0 %v1248_v45  ;;  %v997_v52 = vadd.f32 %v1884_v10, %v929_v50  ;;  %693 = vmatmul.bf16.gmra.mxu2 %v1376_v48  ;;  %v1508_v48 = vld [vmem:[%s2476_s0 + $0xd4] sm:$0xf0] }
  0xd2   :  { %v2042_v27 = vpop.f32.mrf.mxu3 }
  0xd3   :  { %v966_v53 = vadd.f32 %v1884_v10, %v898_v51  ;;  %v1061_v55 = vmax.f32 %v997_v52, 0.0  ;;  %v1391_v52 = vld [vmem:[%s2476_s0 + $0x1d0] sm:$0xf] }
  0xd4   :  { %v750_v54 = vpop.f32.mrf.mxu1  ;;  %v654_v57 = vpop.f32.mrf.mxu2 }
  0xd5   :  { %v1030_v56 = vmax.f32 %v966_v53, 0.0  ;;  %1126 = vst.msk [vmem:[%s2479_s4 + $0x128] sm:$0xff] %vm1088_vm3, %v1061_v55  ;;  %v824_v59 = vadd.f32 %v1934_v40, %v654_v57  ;;  %v1541_v40 = vld [vmem:[%s2476_s0 + $0x1e4] sm:$0xf]  ;;  %v1540_v53 = vld [vmem:[%s2476_s0 + $0x1d4] sm:$0xf0] }
  0xd6   :  { %v576_v60 = vpop.f32.mrf.mxu0  ;;  %v1392_v62 = vor.u32 %v1540_v53, %v1391_v52 }
  0xd7   :  { %1095 = vst.msk [vmem:[%s2479_s4 + $0x30] sm:$0xff] %vm1088_vm3, %v1030_v56  ;;  %v746_v61 = vadd.f32 %v745_v17, %v576_v60  ;;  %v930_v1 = vmul.f32 %v1878_v5, %v824_v59  ;;  %v1404_v17 = vor.u32 %v1541_v40, %v1401_v2  ;;  %v1264_v59 = vor.u32 %v1508_v48, %v1263_v47  ;;  %v1513_v48 = vld [vmem:[%s2476_s0 + $0x104] sm:$0xf] }
  0xd9   :  { %v899_v3 = vmul.f32 %v1878_v5, %v746_v61  ;;  %v998_v4 = vadd.f32 %v1884_v10, %v930_v1 }
  0xda   :  { %v2075_v9 = vpop.f32.mrf.mxu3 }
  0xdb   :  { %v967_v11 = vadd.f32 %v1884_v10, %v899_v3  ;;  %v1062_v18 = vmax.f32 %v998_v4, 0.0 }
  0xdc   :  { %v753_v13 = vpop.f32.mrf.mxu1  ;;  %v656_v20 = vpop.f32.mrf.mxu2 }
  0xdd   :  { %v1031_v19 = vmax.f32 %v967_v11, 0.0  ;;  %1127 = vst.msk [vmem:[%s2479_s4 + $0x130] sm:$0xff] %vm1088_vm3, %v1062_v18  ;;  %v826_v22 = vadd.f32 %v1963_v58, %v656_v20 }
  0xde   :  { %v579_v23 = vpop.f32.mrf.mxu0 }
  0xdf   :  { %1462 = vmatmul.msk.bf16.gmra.mxu1 %vm446_vm2, %v1268_v6  ;;  %1096 = vst.msk [vmem:[%s2479_s4 + $0x38] sm:$0xff] %vm1088_vm3, %v1031_v19  ;;  %v749_v25 = vadd.f32 %v748_v37, %v579_v23  ;;  %1479 = vmatmul.msk.bf16.gmra.mxu3 %vm446_vm2, %v1404_v17  ;;  %v931_v26 = vmul.f32 %v1878_v5, %v826_v22  ;;  %v1281_v17 = vld [vmem:[%s2476_s0 + $0xf8] sm:$0xf0]  ;;  %v1510_v22 = vld [vmem:[%s2476_s0 + $0xe4] sm:$0xf0] }
  0xe0   :  { %v1284_v20 = vor.u32 %v1511_v15, %v1281_v17 }
  0xe1   :  { %v900_v12 = vmul.f32 %v1878_v5, %v749_v25  ;;  %618 = vmatmul.bf16.gmra.mxu0 %v1256_v21  ;;  %v999_v28 = vadd.f32 %v1884_v10, %v931_v26  ;;  %698 = vmatmul.bf16.gmra.mxu2 %v1384_v24  ;;  %v1271_v21 = vld [vmem:[%s2476_s0 + $0xe0] sm:$0xf]  ;;  %v1542_v26 = vld [vmem:[%s2476_s0 + $0x1e4] sm:$0xf0] }
  0xe2   :  { %v2098_v58 = vpop.f32.mrf.mxu3  ;;  %v1399_v25 = vld [vmem:[%s2476_s0 + $0x1e0] sm:$0xf] }
  0xe3   :  { %v968_v29 = vadd.f32 %v1884_v10, %v900_v12  ;;  %v1063_v31 = vmax.f32 %v999_v28, 0.0 }
  0xe4   :  { %v755_v30 = vpop.f32.mrf.mxu1  ;;  %v659_v33 = vpop.f32.mrf.mxu2 }
  0xe5   :  { %v1032_v32 = vmax.f32 %v968_v29, 0.0  ;;  %1128 = vst.msk [vmem:[%s2479_s4 + $0x138] sm:$0xff] %vm1088_vm3, %v1063_v31  ;;  %v829_v36 = vadd.f32 %v1986_v0, %v659_v33  ;;  %v1543_v0 = vld [vmem:[%s2476_s0 + $0x1f4] sm:$0xf] }
  0xe6   :  { %v581_v37 = vpop.f32.mrf.mxu0 }
  0xe7   :  { %1097 = vst.msk [vmem:[%s2479_s4 + $0x40] sm:$0xff] %vm1088_vm3, %v1032_v32  ;;  %v751_v38 = vadd.f32 %v750_v54, %v581_v37  ;;  %v932_v42 = vmul.f32 %v1878_v5, %v829_v36  ;;  %v1412_v54 = vor.u32 %v1543_v0, %v1409_v43  ;;  %v1400_v36 = vor.u32 %v1542_v26, %v1399_v25 }
  0xe9   :  { %v901_v44 = vmul.f32 %v1878_v5, %v751_v38  ;;  %v1000_v45 = vadd.f32 %v1884_v10, %v932_v42 }
  0xea   :  { %v2131_v49 = vpop.f32.mrf.mxu3 }
  0xeb   :  { %v969_v50 = vadd.f32 %v1884_v10, %v901_v44  ;;  %v1064_v55 = vmax.f32 %v1000_v45, 0.0 }
  0xec   :  { %v758_v51 = vpop.f32.mrf.mxu1  ;;  %v661_v57 = vpop.f32.mrf.mxu2 }
  0xed   :  { %v1033_v56 = vmax.f32 %v969_v50, 0.0  ;;  %1129 = vst.msk [vmem:[%s2479_s4 + $0x140] sm:$0xff] %vm1088_vm3, %v1064_v55  ;;  %v831_v60 = vadd.f32 %v2019_v35, %v661_v57  ;;  %v1289_v50 = vld [vmem:[%s2476_s0 + $0x108] sm:$0xf0]  ;;  %v1279_v55 = vld [vmem:[%s2476_s0 + $0xf0] sm:$0xf] }
  0xee   :  { %v584_v61 = vpop.f32.mrf.mxu0 }
  0xef   :  { %1463 = vmatmul.msk.bf16.gmra.mxu1 %vm446_vm2, %v1276_v46  ;;  %1098 = vst.msk [vmem:[%s2479_s4 + $0x48] sm:$0xff] %vm1088_vm3, %v1033_v56  ;;  %v754_v63 = vadd.f32 %v753_v13, %v584_v61  ;;  %1480 = vmatmul.msk.bf16.gmra.mxu3 %vm446_vm2, %v1412_v54  ;;  %v933_v1 = vmul.f32 %v1878_v5, %v831_v60  ;;  %v1512_v56 = vld [vmem:[%s2476_s0 + $0xf4] sm:$0xf0]  ;;  %v1407_v60 = vld [vmem:[%s2476_s0 + $0x1f0] sm:$0xf] }
  0xf0   :  { %v1292_v54 = vor.u32 %v1513_v48, %v1289_v50  ;;  %v1544_v61 = vld [vmem:[%s2476_s0 + $0x1f4] sm:$0xf0] }
  0xf1   :  { %v902_v40 = vmul.f32 %v1878_v5, %v754_v63  ;;  %623 = vmatmul.bf16.gmra.mxu0 %v1264_v59  ;;  %v1001_v2 = vadd.f32 %v1884_v10, %v933_v1  ;;  %703 = vmatmul.bf16.gmra.mxu2 %v1392_v62 }
  0xf2   :  { %v2155_v4 = vpop.f32.mrf.mxu3 }
  0xf3   :  { %v970_v35 = vadd.f32 %v1884_v10, %v902_v40  ;;  %v1065_v6 = vmax.f32 %v1001_v2, 0.0  ;;  %v1280_v40 = vor.u32 %v1512_v56, %v1279_v55 }
  0xf4   :  { %v760_v3 = vpop.f32.mrf.mxu1  ;;  %v664_v8 = vpop.f32.mrf.mxu2 }
  0xf5   :  { %v1034_v7 = vmax.f32 %v970_v35, 0.0  ;;  %1130 = vst.msk [vmem:[%s2479_s4 + $0x148] sm:$0xff] %vm1088_vm3, %v1065_v6  ;;  %v834_v11 = vadd.f32 %v2042_v27, %v664_v8 }
  0xf6   :  { %v586_v13 = vpop.f32.mrf.mxu0 }
  0xf7   :  { %1099 = vst.msk [vmem:[%s2479_s4 + $0x50] sm:$0xff] %vm1088_vm3, %v1034_v7  ;;  %v756_v14 = vadd.f32 %v755_v30, %v586_v13  ;;  %v934_v18 = vmul.f32 %v1878_v5, %v834_v11  ;;  %v1272_v30 = vor.u32 %v1510_v22, %v1271_v21 }
  0xf9   :  { %v903_v19 = vmul.f32 %v1878_v5, %v756_v14  ;;  %v1002_v27 = vadd.f32 %v1884_v10, %v934_v18 }
  0xfa   :  { %v2188_v31 = vpop.f32.mrf.mxu3 }
  0xfb   :  { %v971_v23 = vadd.f32 %v1884_v10, %v903_v19  ;;  %v1066_v12 = vmax.f32 %v1002_v27, 0.0 }
  0xfc   :  { %v763_v24 = vpop.f32.mrf.mxu1  ;;  %v666_v29 = vpop.f32.mrf.mxu2 }
  0xfd   :  { %v1035_v28 = vmax.f32 %v971_v23, 0.0  ;;  %1131 = vst.msk [vmem:[%s2479_s4 + $0x150] sm:$0xff] %vm1088_vm3, %v1066_v12  ;;  %v836_v32 = vadd.f32 %v2075_v9, %v666_v29 }
  0xfe   :  { %v589_v33 = vpop.f32.mrf.mxu0 }
  0xff   :  { %1464 = vmatmul.msk.bf16.gmra.mxu1 %vm446_vm2, %v1284_v20  ;;  %1100 = vst.msk [vmem:[%s2479_s4 + $0x58] sm:$0xff] %vm1088_vm3, %v1035_v28  ;;  %v759_v37 = vadd.f32 %v758_v51, %v589_v33  ;;  %v935_v38 = vmul.f32 %v1878_v5, %v836_v32 }
 0x101   :  { %v904_v39 = vmul.f32 %v1878_v5, %v759_v37  ;;  %628 = vmatmul.bf16.gmra.mxu0 %v1272_v30  ;;  %v1003_v41 = vadd.f32 %v1884_v10, %v935_v38  ;;  %708 = vmatmul.bf16.gmra.mxu2 %v1400_v36 }
 0x102   :  { %v848_v51 = vpop.f32.mrf.mxu3 }
 0x103   :  { %v972_v9 = vadd.f32 %v1884_v10, %v904_v39  ;;  %v1067_v0 = vmax.f32 %v1003_v41, 0.0 }
 0x104   :  { %v765_v42 = vpop.f32.mrf.mxu1  ;;  %v669_v44 = vpop.f32.mrf.mxu2 }
 0x105   :  { %v1036_v43 = vmax.f32 %v972_v9, 0.0  ;;  %1132 = vst.msk [vmem:[%s2479_s4 + $0x158] sm:$0xff] %vm1088_vm3, %v1067_v0  ;;  %v839_v45 = vadd.f32 %v2098_v58, %v669_v44 }
 0x106   :  { %v591_v46 = vpop.f32.mrf.mxu0 }
 0x107   :  { %1101 = vst.msk [vmem:[%s2479_s4 + $0x60] sm:$0xff] %vm1088_vm3, %v1036_v43  ;;  %v761_v47 = vadd.f32 %v760_v3, %v591_v46  ;;  %v936_v52 = vmul.f32 %v1878_v5, %v839_v45  ;;  %v1408_v3 = vor.u32 %v1544_v61, %v1407_v60 }
 0x109   :  { %v905_v58 = vmul.f32 %v1878_v5, %v761_v47  ;;  %v1004_v53 = vadd.f32 %v1884_v10, %v936_v52 }
 0x10a   :  { %v850_v11 = vpop.f32.mrf.mxu3 }
 0x10b   :  { %v973_v57 = vadd.f32 %v1884_v10, %v905_v58  ;;  %v1068_v62 = vmax.f32 %v1004_v53, 0.0 }
 0x10c   :  { %v768_v59 = vpop.f32.mrf.mxu1  ;;  %v671_v1 = vpop.f32.mrf.mxu2 }
 0x10d   :  { %v1037_v63 = vmax.f32 %v973_v57, 0.0  ;;  %1133 = vst.msk [vmem:[%s2479_s4 + $0x160] sm:$0xff] %vm1088_vm3, %v1068_v62  ;;  %v841_v2 = vadd.f32 %v2131_v49, %v671_v1 }
 0x10e   :  { %v594_v35 = vpop.f32.mrf.mxu0 }
 0x10f   :  { %1465 = vmatmul.msk.bf16.gmra.mxu1 %vm446_vm2, %v1292_v54  ;;  %1102 = vst.msk [vmem:[%s2479_s4 + $0x68] sm:$0xff] %vm1088_vm3, %v1037_v63  ;;  %v764_v6 = vadd.f32 %v763_v24, %v594_v35  ;;  %v937_v7 = vmul.f32 %v1878_v5, %v841_v2 }
 0x111   :  { %v906_v8 = vmul.f32 %v1878_v5, %v764_v6  ;;  %633 = vmatmul.bf16.gmra.mxu0 %v1280_v40  ;;  %v1005_v13 = vadd.f32 %v1884_v10, %v937_v7  ;;  %713 = vmatmul.bf16.gmra.mxu2 %v1408_v3 }
 0x112   :  { %v853_v26 = vpop.f32.mrf.mxu3 }
 0x113   :  { %v974_v49 = vadd.f32 %v1884_v10, %v906_v8  ;;  %v1069_v15 = vmax.f32 %v1005_v13, 0.0 }
 0x114   :  { %v770_v14 = vpop.f32.mrf.mxu1  ;;  %v674_v18 = vpop.f32.mrf.mxu2 }
 0x115   :  { %v1038_v17 = vmax.f32 %v974_v49, 0.0  ;;  %1134 = vst.msk [vmem:[%s2479_s4 + $0x168] sm:$0xff] %vm1088_vm3, %v1069_v15  ;;  %v844_v19 = vadd.f32 %v2155_v4, %v674_v18 }
 0x116   :  { %v596_v27 = vpop.f32.mrf.mxu0 }
 0x117   :  { %1103 = vst.msk [vmem:[%s2479_s4 + $0x70] sm:$0xff] %vm1088_vm3, %v1038_v17  ;;  %v766_v20 = vadd.f32 %v765_v42, %v596_v27  ;;  %v938_v21 = vmul.f32 %v1878_v5, %v844_v19 }
 0x119   :  { %v907_v22 = vmul.f32 %v1878_v5, %v766_v20  ;;  %v1006_v23 = vadd.f32 %v1884_v10, %v938_v21 }
 0x11b   :  { %v975_v24 = vadd.f32 %v1884_v10, %v907_v22  ;;  %v1070_v12 = vmax.f32 %v1006_v23, 0.0 }
 0x11c   :  { %v773_v25 = vpop.f32.mrf.mxu1  ;;  %v676_v4 = vpop.f32.mrf.mxu2 }
 0x11d   :  { %v1039_v28 = vmax.f32 %v975_v24, 0.0  ;;  %1135 = vst.msk [vmem:[%s2479_s4 + $0x170] sm:$0xff] %vm1088_vm3, %v1070_v12  ;;  %v846_v29 = vadd.f32 %v2188_v31, %v676_v4  ;;  %v855_v31 = vpop.f32.mrf.mxu3 }
 0x11e   :  { %v599_v30 = vpop.f32.mrf.mxu0 }
 0x11f   :  { %1104 = vst.msk [vmem:[%s2479_s4 + $0x78] sm:$0xff] %vm1088_vm3, %v1039_v28  ;;  %v769_v32 = vadd.f32 %v768_v59, %v599_v30  ;;  %v939_v33 = vmul.f32 %v1878_v5, %v846_v29 }
 0x121   :  { %v908_v36 = vmul.f32 %v1878_v5, %v769_v32  ;;  %v1007_v37 = vadd.f32 %v1884_v10, %v939_v33 }
 0x123   :  { %v976_v38 = vadd.f32 %v1884_v10, %v908_v36  ;;  %v1071_v41 = vmax.f32 %v1007_v37, 0.0 }
 0x124   :  { %v775_v39 = vpop.f32.mrf.mxu1  ;;  %v679_v42 = vpop.f32.mrf.mxu2 }
 0x125   :  { %v1040_v9 = vmax.f32 %v976_v38, 0.0  ;;  %1136 = vst.msk [vmem:[%s2479_s4 + $0x178] sm:$0xff] %vm1088_vm3, %v1071_v41  ;;  %v849_v0 = vadd.f32 %v848_v51, %v679_v42  ;;  %v858_v56 = vpop.f32.mrf.mxu3 }
 0x126   :  { %v601_v43 = vpop.f32.mrf.mxu0 }
 0x127   :  { %1105 = vst.msk [vmem:[%s2479_s4 + $0x80] sm:$0xff] %vm1088_vm3, %v1040_v9  ;;  %v771_v44 = vadd.f32 %v770_v14, %v601_v43  ;;  %v940_v45 = vmul.f32 %v1878_v5, %v849_v0 }
 0x129   :  { %v909_v46 = vmul.f32 %v1878_v5, %v771_v44  ;;  %v1008_v47 = vadd.f32 %v1884_v10, %v940_v45 }
 0x12b   :  { %v977_v48 = vadd.f32 %v1884_v10, %v909_v46  ;;  %v1072_v52 = vmax.f32 %v1008_v47, 0.0 }
 0x12c   :  { %v778_v50 = vpop.f32.mrf.mxu1  ;;  %v681_v53 = vpop.f32.mrf.mxu2 }
 0x12d   :  { %v1041_v58 = vmax.f32 %v977_v48, 0.0  ;;  %1137 = vst.msk [vmem:[%s2479_s4 + $0x180] sm:$0xff] %vm1088_vm3, %v1072_v52  ;;  %v851_v51 = vadd.f32 %v850_v11, %v681_v53  ;;  %v860_v8 = vpop.f32.mrf.mxu3 }
 0x12e   :  { %v604_v54 = vpop.f32.mrf.mxu0 }
 0x12f   :  { %1106 = vst.msk [vmem:[%s2479_s4 + $0x88] sm:$0xff] %vm1088_vm3, %v1041_v58  ;;  %v774_v55 = vadd.f32 %v773_v25, %v604_v54  ;;  %v941_v57 = vmul.f32 %v1878_v5, %v851_v51 }
 0x131   :  { %v910_v59 = vmul.f32 %v1878_v5, %v774_v55  ;;  %v1009_v60 = vadd.f32 %v1884_v10, %v941_v57 }
 0x133   :  { %v978_v61 = vadd.f32 %v1884_v10, %v910_v59  ;;  %v1073_v63 = vmax.f32 %v1009_v60, 0.0 }
 0x134   :  { %v780_v62 = vpop.f32.mrf.mxu1  ;;  %v684_v40 = vpop.f32.mrf.mxu2 }
 0x135   :  { %v1042_v1 = vmax.f32 %v978_v61, 0.0  ;;  %1138 = vst.msk [vmem:[%s2479_s4 + $0x188] sm:$0xff] %vm1088_vm3, %v1073_v63  ;;  %v854_v2 = vadd.f32 %v853_v26, %v684_v40  ;;  %v863_v25 = vpop.f32.mrf.mxu3 }
 0x136   :  { %v606_v35 = vpop.f32.mrf.mxu0 }
 0x137   :  { %1107 = vst.msk [vmem:[%s2479_s4 + $0x90] sm:$0xff] %vm1088_vm3, %v1042_v1  ;;  %v776_v3 = vadd.f32 %v775_v39, %v606_v35  ;;  %v942_v6 = vmul.f32 %v1878_v5, %v854_v2 }
 0x139   :  { %v911_v7 = vmul.f32 %v1878_v5, %v776_v3  ;;  %v1010_v11 = vadd.f32 %v1884_v10, %v942_v6 }
 0x13b   :  { %v979_v13 = vadd.f32 %v1884_v10, %v911_v7  ;;  %v1074_v14 = vmax.f32 %v1010_v11, 0.0 }
 0x13c   :  { %v783_v49 = vpop.f32.mrf.mxu1  ;;  %v686_v17 = vpop.f32.mrf.mxu2 }
 0x13d   :  { %v1043_v15 = vmax.f32 %v979_v13, 0.0  ;;  %1139 = vst.msk [vmem:[%s2479_s4 + $0x190] sm:$0xff] %vm1088_vm3, %v1074_v14  ;;  %v856_v18 = vadd.f32 %v855_v31, %v686_v17  ;;  %v865_v42 = vpop.f32.mrf.mxu3 }
 0x13e   :  { %v609_v19 = vpop.f32.mrf.mxu0 }
 0x13f   :  { %1108 = vst.msk [vmem:[%s2479_s4 + $0x98] sm:$0xff] %vm1088_vm3, %v1043_v15  ;;  %v779_v27 = vadd.f32 %v778_v50, %v609_v19  ;;  %v943_v20 = vmul.f32 %v1878_v5, %v856_v18 }
 0x141   :  { %v912_v21 = vmul.f32 %v1878_v5, %v779_v27  ;;  %v1011_v22 = vadd.f32 %v1884_v10, %v943_v20 }
 0x143   :  { %v980_v23 = vadd.f32 %v1884_v10, %v912_v21  ;;  %v1075_v26 = vmax.f32 %v1011_v22, 0.0 }
 0x144   :  { %v785_v24 = vpop.f32.mrf.mxu1  ;;  %v689_v28 = vpop.f32.mrf.mxu2 }
 0x145   :  { %v1044_v12 = vmax.f32 %v980_v23, 0.0  ;;  %1140 = vst.msk [vmem:[%s2479_s4 + $0x198] sm:$0xff] %vm1088_vm3, %v1075_v26  ;;  %v859_v4 = vadd.f32 %v858_v56, %v689_v28  ;;  %v868_v55 = vpop.f32.mrf.mxu3 }
 0x146   :  { %v611_v29 = vpop.f32.mrf.mxu0 }
 0x147   :  { %1109 = vst.msk [vmem:[%s2479_s4 + $0xa0] sm:$0xff] %vm1088_vm3, %v1044_v12  ;;  %v781_v30 = vadd.f32 %v780_v62, %v611_v29  ;;  %v944_v32 = vmul.f32 %v1878_v5, %v859_v4 }
 0x149   :  { %v913_v33 = vmul.f32 %v1878_v5, %v781_v30  ;;  %v1012_v36 = vadd.f32 %v1884_v10, %v944_v32 }
 0x14b   :  { %v981_v37 = vadd.f32 %v1884_v10, %v913_v33  ;;  %v1076_v39 = vmax.f32 %v1012_v36, 0.0 }
 0x14c   :  { %v788_v38 = vpop.f32.mrf.mxu1  ;;  %v691_v9 = vpop.f32.mrf.mxu2 }
 0x14d   :  { %v1045_v41 = vmax.f32 %v981_v37, 0.0  ;;  %1141 = vst.msk [vmem:[%s2479_s4 + $0x1a0] sm:$0xff] %vm1088_vm3, %v1076_v39  ;;  %v861_v31 = vadd.f32 %v860_v8, %v691_v9  ;;  %v870_v7 = vpop.f32.mrf.mxu3 }
 0x14e   :  { %v614_v0 = vpop.f32.mrf.mxu0 }
 0x14f   :  { %1110 = vst.msk [vmem:[%s2479_s4 + $0xa8] sm:$0xff] %vm1088_vm3, %v1045_v41  ;;  %v784_v43 = vadd.f32 %v783_v49, %v614_v0  ;;  %v945_v44 = vmul.f32 %v1878_v5, %v861_v31 }
 0x151   :  { %v914_v45 = vmul.f32 %v1878_v5, %v784_v43  ;;  %v1013_v46 = vadd.f32 %v1884_v10, %v945_v44 }
 0x153   :  { %v982_v47 = vadd.f32 %v1884_v10, %v914_v45  ;;  %v1077_v50 = vmax.f32 %v1013_v46, 0.0 }
 0x154   :  { %v790_v48 = vpop.f32.mrf.mxu1  ;;  %v694_v58 = vpop.f32.mrf.mxu2 }
 0x155   :  { %v1046_v52 = vmax.f32 %v982_v47, 0.0  ;;  %1142 = vst.msk [vmem:[%s2479_s4 + $0x1a8] sm:$0xff] %vm1088_vm3, %v1077_v50  ;;  %v864_v53 = vadd.f32 %v863_v25, %v694_v58 }
 0x156   :  { %v616_v51 = vpop.f32.mrf.mxu0 }
 0x157   :  { %1111 = vst.msk [vmem:[%s2479_s4 + $0xb0] sm:$0xff] %vm1088_vm3, %v1046_v52  ;;  %v786_v54 = vadd.f32 %v785_v24, %v616_v51  ;;  %v946_v56 = vmul.f32 %v1878_v5, %v864_v53  ;;  %v873_v24 = vpop.f32.mrf.mxu3 }
 0x159   :  { %v915_v57 = vmul.f32 %v1878_v5, %v786_v54  ;;  %v1014_v59 = vadd.f32 %v1884_v10, %v946_v56 }
 0x15b   :  { %v983_v60 = vadd.f32 %v1884_v10, %v915_v57  ;;  %v1078_v62 = vmax.f32 %v1014_v59, 0.0 }
 0x15c   :  { %v793_v61 = vpop.f32.mrf.mxu1  ;;  %v696_v1 = vpop.f32.mrf.mxu2 }
 0x15d   :  { %v1047_v63 = vmax.f32 %v983_v60, 0.0  ;;  %1143 = vst.msk [vmem:[%s2479_s4 + $0x1b0] sm:$0xff] %vm1088_vm3, %v1078_v62  ;;  %v866_v40 = vadd.f32 %v865_v42, %v696_v1 }
 0x15e   :  { %v619_v2 = vpop.f32.mrf.mxu0 }
 0x15f   :  { %1112 = vst.msk [vmem:[%s2479_s4 + $0xb8] sm:$0xff] %vm1088_vm3, %v1047_v63  ;;  %v789_v35 = vadd.f32 %v788_v38, %v619_v2  ;;  %v947_v3 = vmul.f32 %v1878_v5, %v866_v40  ;;  %v875_v9 = vpop.f32.mrf.mxu3 }
 0x161   :  { %v916_v6 = vmul.f32 %v1878_v5, %v789_v35  ;;  %v1015_v8 = vadd.f32 %v1884_v10, %v947_v3 }
 0x163   :  { %v984_v11 = vadd.f32 %v1884_v10, %v916_v6  ;;  %v1079_v49 = vmax.f32 %v1015_v8, 0.0 }
 0x164   :  { %v795_v13 = vpop.f32.mrf.mxu1  ;;  %v699_v15 = vpop.f32.mrf.mxu2 }
 0x165   :  { %v1048_v14 = vmax.f32 %v984_v11, 0.0  ;;  %1144 = vst.msk [vmem:[%s2479_s4 + $0x1b8] sm:$0xff] %vm1088_vm3, %v1079_v49  ;;  %v869_v17 = vadd.f32 %v868_v55, %v699_v15 }
 0x166   :  { %v621_v18 = vpop.f32.mrf.mxu0 }
 0x167   :  { %1113 = vst.msk [vmem:[%s2479_s4 + $0xc0] sm:$0xff] %vm1088_vm3, %v1048_v14  ;;  %v791_v19 = vadd.f32 %v790_v48, %v621_v18  ;;  %v948_v27 = vmul.f32 %v1878_v5, %v869_v17  ;;  %v878_v51 = vpop.f32.mrf.mxu3  ;;  %v1567_v17 = vld [vmem:[%s2477_s2] ss:$0 sm:$0xff] }
 0x169   :  { %v917_v20 = vmul.f32 %v1878_v5, %v791_v19  ;;  %v1016_v21 = vadd.f32 %v1884_v10, %v948_v27 }
 0x16b   :  { %v985_v22 = vadd.f32 %v1884_v10, %v917_v20  ;;  %v1080_v25 = vmax.f32 %v1016_v21, 0.0 }
 0x16c   :  { %v798_v23 = vpop.f32.mrf.mxu1  ;;  %v701_v12 = vpop.f32.mrf.mxu2 }
 0x16d   :  { %v1049_v26 = vmax.f32 %v985_v22, 0.0  ;;  %1145 = vst.msk [vmem:[%s2479_s4 + $0x1c0] sm:$0xff] %vm1088_vm3, %v1080_v25  ;;  %v871_v28 = vadd.f32 %v870_v7, %v701_v12 }
 0x16e   :  { %v624_v4 = vpop.f32.mrf.mxu0 }
 0x16f   :  { %1114 = vst.msk [vmem:[%s2479_s4 + $0xc8] sm:$0xff] %vm1088_vm3, %v1049_v26  ;;  %v794_v29 = vadd.f32 %v793_v61, %v624_v4  ;;  %v949_v30 = vmul.f32 %v1878_v5, %v871_v28  ;;  %v880_v3 = vpop.f32.mrf.mxu3 }
 0x171   :  { %v918_v32 = vmul.f32 %v1878_v5, %v794_v29  ;;  %v1017_v33 = vadd.f32 %v1884_v10, %v949_v30 }
 0x173   :  { %v986_v36 = vadd.f32 %v1884_v10, %v918_v32  ;;  %v1081_v38 = vmax.f32 %v1017_v33, 0.0 }
 0x174   :  { %v800_v37 = vpop.f32.mrf.mxu1  ;;  %v704_v41 = vpop.f32.mrf.mxu2 }
 0x175   :  { %v1050_v39 = vmax.f32 %v986_v36, 0.0  ;;  %1146 = vst.msk [vmem:[%s2479_s4 + $0x1c8] sm:$0xff] %vm1088_vm3, %v1081_v38  ;;  %v874_v42 = vadd.f32 %v873_v24, %v704_v41 }
 0x176   :  { %v626_v31 = vpop.f32.mrf.mxu0 }
 0x177   :  { %1115 = vst.msk [vmem:[%s2479_s4 + $0xd0] sm:$0xff] %vm1088_vm3, %v1050_v39  ;;  %v796_v0 = vadd.f32 %v795_v13, %v626_v31  ;;  %v950_v43 = vmul.f32 %v1878_v5, %v874_v42  ;;  %v883_v24 = vpop.f32.mrf.mxu3 }
 0x179   :  { %v919_v44 = vmul.f32 %v1878_v5, %v796_v0  ;;  %v1018_v45 = vadd.f32 %v1884_v10, %v950_v43 }
 0x17b   :  { %v987_v46 = vadd.f32 %v1884_v10, %v919_v44  ;;  %v1082_v48 = vmax.f32 %v1018_v45, 0.0 }
 0x17c   :  { %v803_v47 = vpop.f32.mrf.mxu1  ;;  %v706_v52 = vpop.f32.mrf.mxu2 }
 0x17d   :  { %v1051_v50 = vmax.f32 %v987_v46, 0.0  ;;  %1147 = vst.msk [vmem:[%s2479_s4 + $0x1d0] sm:$0xff] %vm1088_vm3, %v1082_v48  ;;  %v876_v58 = vadd.f32 %v875_v9, %v706_v52 }
 0x17e   :  { %v629_v53 = vpop.f32.mrf.mxu0 }
 0x17f   :  { %1116 = vst.msk [vmem:[%s2479_s4 + $0xd8] sm:$0xff] %vm1088_vm3, %v1051_v50  ;;  %v799_v54 = vadd.f32 %v798_v23, %v629_v53  ;;  %v951_v55 = vmul.f32 %v1878_v5, %v876_v58  ;;  %v885_v31 = vpop.f32.mrf.mxu3 }
 0x181   :  { %v920_v56 = vmul.f32 %v1878_v5, %v799_v54  ;;  %v1019_v57 = vadd.f32 %v1884_v10, %v951_v55 }
 0x183   :  { %v988_v59 = vadd.f32 %v1884_v10, %v920_v56  ;;  %v1083_v61 = vmax.f32 %v1019_v57, 0.0 }
 0x184   :  { %v805_v60 = vpop.f32.mrf.mxu1  ;;  %v709_v63 = vpop.f32.mrf.mxu2 }
 0x185   :  { %v1052_v62 = vmax.f32 %v988_v59, 0.0  ;;  %1148 = vst.msk [vmem:[%s2479_s4 + $0x1d8] sm:$0xff] %vm1088_vm3, %v1083_v61  ;;  %v879_v1 = vadd.f32 %v878_v51, %v709_v63 }
 0x186   :  { %v631_v40 = vpop.f32.mrf.mxu0 }
 0x187   :  { %1117 = vst.msk [vmem:[%s2479_s4 + $0xe0] sm:$0xff] %vm1088_vm3, %v1052_v62  ;;  %v801_v2 = vadd.f32 %v800_v37, %v631_v40  ;;  %v952_v35 = vmul.f32 %v1878_v5, %v879_v1 }
 0x189   :  { %v921_v6 = vmul.f32 %v1878_v5, %v801_v2  ;;  %v1020_v7 = vadd.f32 %v1884_v10, %v952_v35 }
 0x18b   :  { %v989_v8 = vadd.f32 %v1884_v10, %v921_v6  ;;  %v1084_v13 = vmax.f32 %v1020_v7, 0.0 }
 0x18c   :  { %v808_v11 = vpop.f32.mrf.mxu1  ;;  %v711_v15 = vpop.f32.mrf.mxu2 }
 0x18d   :  { %v809_v49 = vadd.f32 %v808_v11, %v1891_v16  ;;  %v1053_v14 = vmax.f32 %v989_v8, 0.0  ;;  %1149 = vst.msk [vmem:[%s2479_s4 + $0x1e0] sm:$0xff] %vm1088_vm3, %v1084_v13  ;;  %v881_v18 = vadd.f32 %v880_v3, %v711_v15  ;;  %v1568_v16 = vld [vmem:[%s2478_s3] ss:$0 sm:$0xff] }
 0x18e   :  { %v634_v19 = vpop.f32.mrf.mxu0 }
 0x18f   :  { %v924_v5 = vmul.f32 %v1567_v17, %v809_v49  ;;  %1118 = vst.msk [vmem:[%s2479_s4 + $0xe8] sm:$0xff] %vm1088_vm3, %v1053_v14  ;;  %v804_v10 = vadd.f32 %v803_v47, %v634_v19  ;;  %v953_v20 = vmul.f32 %v1567_v17, %v881_v18 }
 0x191   :  { %v992_v27 = vadd.f32 %v1568_v16, %v924_v5  ;;  %v922_v21 = vmul.f32 %v1567_v17, %v804_v10  ;;  %v1021_v23 = vadd.f32 %v1568_v16, %v953_v20 }
 0x193   :  { %v1056_v22 = vmax.f32 %v992_v27, 0.0  ;;  %v990_v25 = vadd.f32 %v1568_v16, %v922_v21  ;;  %v1085_v12 = vmax.f32 %v1021_v23, 0.0 }
 0x194   :  { %v810_v26 = vpop.f32.mrf.mxu1  ;;  %v714_v29 = vpop.f32.mrf.mxu2 }
 0x195   :  { %1121 = vst.msk [vmem:[%s2479_s4 + $0x100] sm:$0xff] %vm1088_vm3, %v1056_v22  ;;  %v811_v28 = vadd.f32 %v810_v26, %v1925_v34  ;;  %v1054_v4 = vmax.f32 %v990_v25, 0.0  ;;  %v884_v32 = vadd.f32 %v883_v24, %v714_v29 }
 0x196   :  { %1150 = vst.msk [vmem:[%s2479_s4 + $0x1e8] sm:$0xff] %vm1088_vm3, %v1085_v12  ;;  %v636_v33 = vpop.f32.mrf.mxu0 }
 0x197   :  { %v925_v30 = vmul.f32 %v1567_v17, %v811_v28  ;;  %1119 = vst.msk [vmem:[%s2479_s4 + $0xf0] sm:$0xff] %vm1088_vm3, %v1054_v4  ;;  %v806_v36 = vadd.f32 %v805_v60, %v636_v33  ;;  %v954_v38 = vmul.f32 %v1567_v17, %v884_v32 }
 0x199   :  { %v993_v37 = vadd.f32 %v1568_v16, %v925_v30  ;;  %v923_v39 = vmul.f32 %v1567_v17, %v806_v36  ;;  %v1022_v41 = vadd.f32 %v1568_v16, %v954_v38 }
 0x19b   :  { %v1057_v34 = vmax.f32 %v993_v37, 0.0  ;;  %v991_v9 = vadd.f32 %v1568_v16, %v923_v39  ;;  %v1086_v42 = vmax.f32 %v1022_v41, 0.0 }
 0x19c   :  { %v716_v43 = vpop.f32.mrf.mxu2 }
 0x19d   :  { %1122 = vst.msk [vmem:[%s2479_s4 + $0x108] sm:$0xff] %vm1088_vm3, %v1057_v34  ;;  %v1055_v0 = vmax.f32 %v991_v9, 0.0  ;;  %v886_v44 = vadd.f32 %v885_v31, %v716_v43 }
 0x19e   :  { %1151 = vst.msk [vmem:[%s2479_s4 + $0x1f0] sm:$0xff] %vm1088_vm3, %v1086_v42 }
 0x19f   :  { %1120 = vst.msk [vmem:[%s2479_s4 + $0xf8] sm:$0xff] %vm1088_vm3, %v1055_v0  ;;  %v955_v45 = vmul.f32 %v1567_v17, %v886_v44 }
 0x1a1   :  { %v1023_v46 = vadd.f32 %v1568_v16, %v955_v45 }
 0x1a3   :  { %v1087_v47 = vmax.f32 %v1023_v46, 0.0 }
 0x1a5   :  { %1152 = vst.msk [vmem:[%s2479_s4 + $0x1f8] sm:$0xff] %vm1088_vm3, %v1087_v47 }

// kernel: densenet_forward.26
= control target key start
LH: loop header
LB: loop body
LE: loop exit
PB: predicated region body
PF: predicated region fallthrough
CT: control target
= control target key end

     0   :  { %vm112_vm0 = vcmask 130048   ;;  %vm258_vm1 = vcmask 125952   ;;  %s523_s3 = inlined_call_operand.vmem [shape: bf16[16,16], index: 3, kind: input, shape index: {}]   ;;  %s524_s0 = inlined_call_operand.vmem [shape: f32[128,16], index: 0, kind: input, shape index: {}]   ;;  %s525_s1 = inlined_call_operand.vmem [shape: f32[1,16], index: 1, kind: input, shape index: {}]   ;;  %s526_s2 = inlined_call_operand.vmem [shape: f32[1,16], index: 2, kind: input, shape index: {}]   ;;  %s527_s4 = inlined_call_operand.vmem [shape: f32[1,16], index: 4, kind: input, shape index: {}]   ;;  %s528_s5 = inlined_call_operand.vmem [shape: f32[1,16], index: 5, kind: input, shape index: {}]   ;;  %s529_s6 = inlined_call_operand.vmem [shape: bf16[128,16], index: 6, kind: output, shape index: {}]  }
   0x1   :  { %v291_v0 = vld [vmem:[%s523_s3] sm:$0xff]  ;;  %v25_v2 = vld [vmem:[%s524_s0 + $0x8] sm:$0xff]  ;;  %v26_v26 = vld [vmem:[%s524_s0 + $0x10] sm:$0xff] }
   0x2   :  { %v24_v1 = vld [vmem:[%s524_s0] sm:$0xff]  ;;  %144 = vmatpush.bf16.msra.mxu0 %v291_v0  ;;  %292 = vmatpush.bf16.msra.mxu1 %v291_v0  ;;  %v29_v6 = vld [vmem:[%s524_s0 + $0x28] sm:$0xff]  ;;  %v27_v27 = vld [vmem:[%s524_s0 + $0x18] sm:$0xff] }
   0x3   :  { %v295_v3 = vld [vmem:[%s525_s1] ss:$0 sm:$0xff]  ;;  %293 = vmatpush.bf16.msra.mxu2 %v291_v0  ;;  %294 = vmatpush.bf16.msra.mxu3 %v291_v0  ;;  %v33_v11 = vld [vmem:[%s524_s0 + $0x48] sm:$0xff]  ;;  %v30_v32 = vld [vmem:[%s524_s0 + $0x30] sm:$0xff] }
   0x4   :  { %v349_v4 = vld [vmem:[%s526_s2] ss:$0 sm:$0xff]  ;;  %v44_v7 = vmul.f32 %v295_v3, %v24_v1  ;;  %v45_v8 = vmul.f32 %v295_v3, %v25_v2  ;;  %v49_v13 = vmul.f32 %v295_v3, %v29_v6  ;;  %v53_v15 = vmul.f32 %v295_v3, %v33_v11  ;;  %v37_v16 = vld [vmem:[%s524_s0 + $0x68] sm:$0xff]  ;;  %v31_v39 = vld [vmem:[%s524_s0 + $0x38] sm:$0xff] }
   0x5   :  { %v28_v5 = vld [vmem:[%s524_s0 + $0x20] sm:$0xff]  ;;  %v57_v21 = vmul.f32 %v295_v3, %v37_v16  ;;  %v34_v40 = vld [vmem:[%s524_s0 + $0x50] sm:$0xff]  ;;  %v35_v41 = vld [vmem:[%s524_s0 + $0x58] sm:$0xff]  ;;  %v46_v46 = vmul.f32 %v295_v3, %v26_v26  ;;  %v47_v47 = vmul.f32 %v295_v3, %v27_v27  ;;  %v50_v48 = vmul.f32 %v295_v3, %v30_v32 }
   0x6   :  { %v48_v9 = vmul.f32 %v295_v3, %v28_v5  ;;  %v32_v10 = vld [vmem:[%s524_s0 + $0x40] sm:$0xff]  ;;  %v64_v18 = vadd.f32 %v349_v4, %v44_v7  ;;  %v65_v19 = vadd.f32 %v349_v4, %v45_v8  ;;  %v69_v22 = vadd.f32 %v349_v4, %v49_v13  ;;  %v38_v44 = vld [vmem:[%s524_s0 + $0x70] sm:$0xff]  ;;  %v39_v49 = vld [vmem:[%s524_s0 + $0x78] sm:$0xff] }
   0x7   :  { %v36_v12 = vld [vmem:[%s524_s0 + $0x60] sm:$0xff]  ;;  %v52_v14 = vmul.f32 %v295_v3, %v32_v10  ;;  %v73_v24 = vadd.f32 %v349_v4, %v53_v15  ;;  %v77_v31 = vadd.f32 %v349_v4, %v57_v21  ;;  %v51_v50 = vmul.f32 %v295_v3, %v31_v39 }
   0x8   :  { %v56_v17 = vmul.f32 %v295_v3, %v36_v12  ;;  %v68_v20 = vadd.f32 %v349_v4, %v48_v9  ;;  %v80_v28 = vmax.f32 %v64_v18, 0.0  ;;  %v81_v29 = vmax.f32 %v65_v19, 0.0  ;;  %v425_v12 = vld [vmem:[%s528_s5] ss:$0 sm:$0xff] }
   0x9   :  { %v72_v23 = vadd.f32 %v349_v4, %v52_v14  ;;  %v85_v33 = vmax.f32 %v69_v22, 0.0  ;;  %v89_v35 = vmax.f32 %v73_v24, 0.0  ;;  %v93_v38 = vmax.f32 %v77_v31, 0.0 }
   0xa   :  { %v76_v25 = vadd.f32 %v349_v4, %v56_v17  ;;  %v84_v30 = vmax.f32 %v68_v20, 0.0  ;;  %v96_v37 = vpack.c.bf16 %v81_v29, %v80_v28  ;;  %v54_v51 = vmul.f32 %v295_v3, %v34_v40 }
   0xb   :  { %v88_v34 = vmax.f32 %v72_v23, 0.0  ;;  %v55_v52 = vmul.f32 %v295_v3, %v35_v41  ;;  %v58_v53 = vmul.f32 %v295_v3, %v38_v44  ;;  %v59_v54 = vmul.f32 %v295_v3, %v39_v49 }
   0xc   :  { %v92_v36 = vmax.f32 %v76_v25, 0.0  ;;  %v98_v42 = vpack.c.bf16 %v85_v33, %v84_v30  ;;  %283 = vmatmul.msk.bf16.vlgmr.msra.gmra.mxu0 %vm112_vm0, %v96_v37  ;;  %v66_v55 = vadd.f32 %v349_v4, %v46_v46  ;;  %v67_v56 = vadd.f32 %v349_v4, %v47_v47 }
   0xd   :  { %v100_v43 = vpack.c.bf16 %v89_v35, %v88_v34  ;;  %v70_v57 = vadd.f32 %v349_v4, %v50_v48  ;;  %v71_v58 = vadd.f32 %v349_v4, %v51_v50  ;;  %v74_v59 = vadd.f32 %v349_v4, %v54_v51 }
   0xe   :  { %v102_v45 = vpack.c.bf16 %v93_v38, %v92_v36  ;;  %285 = vmatmul.msk.bf16.vlgmr.msra.gmra.mxu1 %vm112_vm0, %v98_v42  ;;  %v75_v60 = vadd.f32 %v349_v4, %v55_v52  ;;  %v78_v61 = vadd.f32 %v349_v4, %v58_v53  ;;  %v79_v62 = vadd.f32 %v349_v4, %v59_v54  ;;  %v420_v4 = vld [vmem:[%s527_s4] ss:$0 sm:$0xff] }
   0xf   :  { %287 = vmatmul.msk.bf16.vlgmr.msra.gmra.mxu2 %vm112_vm0, %v100_v43  ;;  %v82_v63 = vmax.f32 %v66_v55, 0.0  ;;  %v83_v0 = vmax.f32 %v67_v56, 0.0  ;;  %v86_v1 = vmax.f32 %v70_v57, 0.0  ;;  %v87_v2 = vmax.f32 %v71_v58, 0.0 }
  0x10   :  { %289 = vmatmul.msk.bf16.vlgmr.msra.gmra.mxu3 %vm112_vm0, %v102_v45  ;;  %v90_v3 = vmax.f32 %v74_v59, 0.0  ;;  %v91_v5 = vmax.f32 %v75_v60, 0.0  ;;  %v94_v6 = vmax.f32 %v78_v61, 0.0  ;;  %v95_v7 = vmax.f32 %v79_v62, 0.0 }
  0x11   :  { %v97_v8 = vpack.c.bf16 %v83_v0, %v82_v63  ;;  %v99_v9 = vpack.c.bf16 %v87_v2, %v86_v1 }
  0x12   :  { %v101_v10 = vpack.c.bf16 %v91_v5, %v90_v3  ;;  %v103_v11 = vpack.c.bf16 %v95_v7, %v94_v6 }
  0x1c   :  { %284 = vmatmul.msk.bf16.gmra.mxu0 %vm112_vm0, %v97_v8 }
  0x1e   :  { %286 = vmatmul.msk.bf16.gmra.mxu1 %vm112_vm0, %v99_v9 }
  0x1f   :  { %288 = vmatmul.msk.bf16.gmra.mxu2 %vm112_vm0, %v101_v10 }
  0x20   :  { %290 = vmatmul.msk.bf16.gmra.mxu3 %vm112_vm0, %v103_v11 }
  0x89   :  { %v146_v13 = vpop.f32.mrf.mxu0 }
  0x8a   :  { %v190_v14 = vmul.f32 %v420_v4, %v146_v13 }
  0x8b   :  { %v156_v15 = vpop.f32.mrf.mxu1 }
  0x8c   :  { %v194_v16 = vmul.f32 %v420_v4, %v156_v15  ;;  %v210_v17 = vadd.f32 %v425_v12, %v190_v14 }
  0x8e   :  { %v214_v18 = vadd.f32 %v425_v12, %v194_v16  ;;  %v226_v19 = vmax.f32 %v210_v17, 0.0 }
  0x90   :  { %v230_v20 = vmax.f32 %v214_v18, 0.0  ;;  %v242_v21 = vpack.c.bf16 %v226_v19, %v226_v19 }
  0x91   :  { %v148_v26 = vpop.f32.mrf.mxu0 }
  0x92   :  { %v166_v22 = vpop.f32.mrf.mxu2  ;;  %v246_v23 = vpack.c.bf16 %v230_v20, %v230_v20  ;;  %259 = vst.msk [vmem:[%s529_s6] sm:$0xf] %vm258_vm1, %v242_v21  ;;  %v191_v28 = vmul.f32 %v420_v4, %v148_v26 }
  0x93   :  { %v198_v24 = vmul.f32 %v420_v4, %v166_v22  ;;  %v176_v25 = vpop.f32.mrf.mxu3  ;;  %v158_v29 = vpop.f32.mrf.mxu1 }
  0x94   :  { %v202_v27 = vmul.f32 %v420_v4, %v176_v25  ;;  %263 = vst.msk [vmem:[%s529_s6 + $0x10] sm:$0xf] %vm258_vm1, %v246_v23  ;;  %v195_v31 = vmul.f32 %v420_v4, %v158_v29  ;;  %v211_v33 = vadd.f32 %v425_v12, %v191_v28 }
  0x95   :  { %v218_v30 = vadd.f32 %v425_v12, %v198_v24 }
  0x96   :  { %v222_v32 = vadd.f32 %v425_v12, %v202_v27  ;;  %v215_v35 = vadd.f32 %v425_v12, %v195_v31  ;;  %v227_v37 = vmax.f32 %v211_v33, 0.0 }
  0x97   :  { %v234_v34 = vmax.f32 %v218_v30, 0.0 }
  0x98   :  { %v238_v36 = vmax.f32 %v222_v32, 0.0  ;;  %v231_v39 = vmax.f32 %v215_v35, 0.0  ;;  %v243_v41 = vpack.c.bf16 %v227_v37, %v227_v37 }
  0x99   :  { %v250_v38 = vpack.c.bf16 %v234_v34, %v234_v34  ;;  %v151_v46 = vpop.f32.mrf.mxu0 }
  0x9a   :  { %v254_v40 = vpack.c.bf16 %v238_v36, %v238_v36  ;;  %v168_v42 = vpop.f32.mrf.mxu2  ;;  %v247_v43 = vpack.c.bf16 %v231_v39, %v231_v39  ;;  %v192_v48 = vmul.f32 %v420_v4, %v151_v46  ;;  %260 = vst.msk [vmem:[%s529_s6 + $0x4] sm:$0xf] %vm258_vm1, %v243_v41 }
  0x9b   :  { %267 = vst.msk [vmem:[%s529_s6 + $0x20] sm:$0xf] %vm258_vm1, %v250_v38  ;;  %v199_v44 = vmul.f32 %v420_v4, %v168_v42  ;;  %v178_v45 = vpop.f32.mrf.mxu3  ;;  %v161_v49 = vpop.f32.mrf.mxu1 }
  0x9c   :  { %271 = vst.msk [vmem:[%s529_s6 + $0x30] sm:$0xf] %vm258_vm1, %v254_v40  ;;  %v203_v47 = vmul.f32 %v420_v4, %v178_v45  ;;  %v196_v51 = vmul.f32 %v420_v4, %v161_v49  ;;  %v212_v53 = vadd.f32 %v425_v12, %v192_v48 }
  0x9d   :  { %v219_v50 = vadd.f32 %v425_v12, %v199_v44  ;;  %264 = vst.msk [vmem:[%s529_s6 + $0x14] sm:$0xf] %vm258_vm1, %v247_v43 }
  0x9e   :  { %v223_v52 = vadd.f32 %v425_v12, %v203_v47  ;;  %v216_v55 = vadd.f32 %v425_v12, %v196_v51  ;;  %v228_v57 = vmax.f32 %v212_v53, 0.0 }
  0x9f   :  { %v235_v54 = vmax.f32 %v219_v50, 0.0 }
  0xa0   :  { %v239_v56 = vmax.f32 %v223_v52, 0.0  ;;  %v232_v59 = vmax.f32 %v216_v55, 0.0  ;;  %v244_v61 = vpack.c.bf16 %v228_v57, %v228_v57 }
  0xa1   :  { %v251_v58 = vpack.c.bf16 %v235_v54, %v235_v54  ;;  %v153_v2 = vpop.f32.mrf.mxu0 }
  0xa2   :  { %v255_v60 = vpack.c.bf16 %v239_v56, %v239_v56  ;;  %v171_v62 = vpop.f32.mrf.mxu2  ;;  %v248_v63 = vpack.c.bf16 %v232_v59, %v232_v59  ;;  %v193_v5 = vmul.f32 %v420_v4, %v153_v2  ;;  %261 = vst.msk [vmem:[%s529_s6 + $0x8] sm:$0xf] %vm258_vm1, %v244_v61 }
  0xa3   :  { %268 = vst.msk [vmem:[%s529_s6 + $0x24] sm:$0xf] %vm258_vm1, %v251_v58  ;;  %v200_v0 = vmul.f32 %v420_v4, %v171_v62  ;;  %v181_v1 = vpop.f32.mrf.mxu3  ;;  %v163_v6 = vpop.f32.mrf.mxu1 }
  0xa4   :  { %272 = vst.msk [vmem:[%s529_s6 + $0x34] sm:$0xf] %vm258_vm1, %v255_v60  ;;  %v204_v3 = vmul.f32 %v420_v4, %v181_v1  ;;  %v197_v8 = vmul.f32 %v420_v4, %v163_v6  ;;  %v213_v10 = vadd.f32 %v425_v12, %v193_v5 }
  0xa5   :  { %v220_v7 = vadd.f32 %v425_v12, %v200_v0  ;;  %265 = vst.msk [vmem:[%s529_s6 + $0x18] sm:$0xf] %vm258_vm1, %v248_v63 }
  0xa6   :  { %v224_v9 = vadd.f32 %v425_v12, %v204_v3  ;;  %v217_v13 = vadd.f32 %v425_v12, %v197_v8  ;;  %v229_v15 = vmax.f32 %v213_v10, 0.0 }
  0xa7   :  { %v236_v11 = vmax.f32 %v220_v7, 0.0 }
  0xa8   :  { %v240_v14 = vmax.f32 %v224_v9, 0.0  ;;  %v233_v17 = vmax.f32 %v217_v13, 0.0  ;;  %v245_v19 = vpack.c.bf16 %v229_v15, %v229_v15 }
  0xa9   :  { %v252_v16 = vpack.c.bf16 %v236_v11, %v236_v11 }
  0xaa   :  { %v256_v18 = vpack.c.bf16 %v240_v14, %v240_v14  ;;  %v173_v20 = vpop.f32.mrf.mxu2  ;;  %v249_v21 = vpack.c.bf16 %v233_v17, %v233_v17  ;;  %262 = vst.msk [vmem:[%s529_s6 + $0xc] sm:$0xf] %vm258_vm1, %v245_v19 }
  0xab   :  { %269 = vst.msk [vmem:[%s529_s6 + $0x28] sm:$0xf] %vm258_vm1, %v252_v16  ;;  %v201_v22 = vmul.f32 %v420_v4, %v173_v20  ;;  %v183_v23 = vpop.f32.mrf.mxu3 }
  0xac   :  { %273 = vst.msk [vmem:[%s529_s6 + $0x38] sm:$0xf] %vm258_vm1, %v256_v18  ;;  %v205_v24 = vmul.f32 %v420_v4, %v183_v23 }
  0xad   :  { %v221_v25 = vadd.f32 %v425_v12, %v201_v22  ;;  %266 = vst.msk [vmem:[%s529_s6 + $0x1c] sm:$0xf] %vm258_vm1, %v249_v21 }
  0xae   :  { %v225_v26 = vadd.f32 %v425_v12, %v205_v24 }
  0xaf   :  { %v237_v27 = vmax.f32 %v221_v25, 0.0 }
  0xb0   :  { %v241_v28 = vmax.f32 %v225_v26, 0.0 }
  0xb1   :  { %v253_v29 = vpack.c.bf16 %v237_v27, %v237_v27 }
  0xb2   :  { %v257_v30 = vpack.c.bf16 %v241_v28, %v241_v28 }
  0xb3   :  { %270 = vst.msk [vmem:[%s529_s6 + $0x2c] sm:$0xf] %vm258_vm1, %v253_v29 }
  0xb4   :  { %274 = vst.msk [vmem:[%s529_s6 + $0x3c] sm:$0xf] %vm258_vm1, %v257_v30 }

// kernel: densenet_forward.25
= control target key start
LH: loop header
LB: loop body
LE: loop exit
PB: predicated region body
PF: predicated region fallthrough
CT: control target
= control target key end

     0   :  { %vm152_vm0 = vcmask 130048   ;;  %s1095_s0 = inlined_call_operand.vmem [shape: f32[9,128,16], index: 0, kind: input, shape index: {}]   ;;  %s1096_s1 = inlined_call_operand.vmem [shape: f32[128,16], index: 1, kind: output, shape index: {}]  }
   0x1   :  { %v8_v0 = vld [vmem:[%s1095_s0] sm:$0xff]  ;;  %v9_v13 = vld [vmem:[%s1095_s0 + $0x8] sm:$0xff]  ;;  %v10_v32 = vld [vmem:[%s1095_s0 + $0x10] sm:$0xff] }
   0x2   :  { %v24_v1 = vld [vmem:[%s1095_s0 + $0x80] sm:$0xff]  ;;  %v153_v5 = vsel %vm152_vm0, %v8_v0, -inf  ;;  %v25_v14 = vld [vmem:[%s1095_s0 + $0x88] sm:$0xff]  ;;  %v170_v19 = vsel %vm152_vm0, %v9_v13, -inf  ;;  %v26_v33 = vld [vmem:[%s1095_s0 + $0x90] sm:$0xff]  ;;  %v187_v38 = vsel %vm152_vm0, %v10_v32, -inf }
   0x3   :  { %v40_v2 = vld [vmem:[%s1095_s0 + $0x100] sm:$0xff]  ;;  %v154_v6 = vsel %vm152_vm0, %v24_v1, -inf  ;;  %v41_v15 = vld [vmem:[%s1095_s0 + $0x108] sm:$0xff]  ;;  %v171_v20 = vsel %vm152_vm0, %v25_v14, -inf  ;;  %v42_v34 = vld [vmem:[%s1095_s0 + $0x110] sm:$0xff]  ;;  %v188_v39 = vsel %vm152_vm0, %v26_v33, -inf }
   0x4   :  { %v56_v3 = vld [vmem:[%s1095_s0 + $0x180] sm:$0xff]  ;;  %v156_v7 = vsel %vm152_vm0, %v40_v2, -inf  ;;  %v155_v11 = vmax.f32 %v153_v5, %v154_v6  ;;  %v57_v18 = vld [vmem:[%s1095_s0 + $0x188] sm:$0xff]  ;;  %v173_v21 = vsel %vm152_vm0, %v41_v15, -inf  ;;  %v172_v27 = vmax.f32 %v170_v19, %v171_v20  ;;  %v58_v37 = vld [vmem:[%s1095_s0 + $0x190] sm:$0xff] }
   0x5   :  { %v72_v4 = vld [vmem:[%s1095_s0 + $0x200] sm:$0xff]  ;;  %v158_v12 = vsel %vm152_vm0, %v56_v3, -inf  ;;  %v73_v24 = vld [vmem:[%s1095_s0 + $0x208] sm:$0xff]  ;;  %v175_v31 = vsel %vm152_vm0, %v57_v18, -inf  ;;  %v190_v40 = vsel %vm152_vm0, %v42_v34, -inf  ;;  %v74_v45 = vld [vmem:[%s1095_s0 + $0x210] sm:$0xff]  ;;  %v189_v46 = vmax.f32 %v187_v38, %v188_v39 }
   0x6   :  { %v88_v8 = vld [vmem:[%s1095_s0 + $0x280] sm:$0xff]  ;;  %v157_v17 = vmax.f32 %v155_v11, %v156_v7  ;;  %v160_v22 = vsel %vm152_vm0, %v72_v4, -inf  ;;  %v89_v25 = vld [vmem:[%s1095_s0 + $0x288] sm:$0xff]  ;;  %v174_v36 = vmax.f32 %v172_v27, %v173_v21  ;;  %v177_v44 = vsel %vm152_vm0, %v73_v24, -inf  ;;  %v11_v51 = vld [vmem:[%s1095_s0 + $0x18] sm:$0xff] }
   0x7   :  { %v104_v9 = vld [vmem:[%s1095_s0 + $0x300] sm:$0xff]  ;;  %v162_v23 = vsel %vm152_vm0, %v88_v8, -inf  ;;  %v105_v26 = vld [vmem:[%s1095_s0 + $0x308] sm:$0xff]  ;;  %v179_v48 = vsel %vm152_vm0, %v89_v25, -inf  ;;  %v192_v50 = vsel %vm152_vm0, %v58_v37, -inf  ;;  %v27_v52 = vld [vmem:[%s1095_s0 + $0x98] sm:$0xff]  ;;  %v191_v58 = vmax.f32 %v189_v46, %v190_v40 }
   0x8   :  { %v120_v10 = vld [vmem:[%s1095_s0 + $0x380] sm:$0xff]  ;;  %v159_v28 = vmax.f32 %v157_v17, %v158_v12  ;;  %v164_v29 = vsel %vm152_vm0, %v104_v9, -inf  ;;  %v121_v35 = vld [vmem:[%s1095_s0 + $0x388] sm:$0xff]  ;;  %v176_v47 = vmax.f32 %v174_v36, %v175_v31  ;;  %v181_v49 = vsel %vm152_vm0, %v105_v26, -inf  ;;  %v43_v53 = vld [vmem:[%s1095_s0 + $0x118] sm:$0xff] }
   0x9   :  { %v136_v16 = vld [vmem:[%s1095_s0 + $0x400] sm:$0xff]  ;;  %v166_v30 = vsel %vm152_vm0, %v120_v10, -inf  ;;  %v137_v43 = vld [vmem:[%s1095_s0 + $0x408] sm:$0xff]  ;;  %v183_v55 = vsel %vm152_vm0, %v121_v35, -inf  ;;  %v90_v56 = vld [vmem:[%s1095_s0 + $0x290] sm:$0xff]  ;;  %v204_v60 = vsel %vm152_vm0, %v11_v51, -inf  ;;  %v193_v4 = vmax.f32 %v191_v58, %v192_v50 }
   0xa   :  { %v161_v41 = vmax.f32 %v159_v28, %v160_v22  ;;  %v168_v42 = vsel %vm152_vm0, %v136_v16, -inf  ;;  %v106_v57 = vld [vmem:[%s1095_s0 + $0x310] sm:$0xff]  ;;  %v59_v59 = vld [vmem:[%s1095_s0 + $0x198] sm:$0xff]  ;;  %v178_v61 = vmax.f32 %v176_v47, %v177_v44  ;;  %v194_v62 = vsel %vm152_vm0, %v74_v45, -inf  ;;  %v12_v6 = vld [vmem:[%s1095_s0 + $0x20] sm:$0xff] }
   0xb   :  { %v75_v63 = vld [vmem:[%s1095_s0 + $0x218] sm:$0xff]  ;;  %v205_v0 = vsel %vm152_vm0, %v27_v52, -inf  ;;  %v207_v1 = vsel %vm152_vm0, %v43_v53, -inf  ;;  %v185_v3 = vsel %vm152_vm0, %v137_v43, -inf  ;;  %v28_v7 = vld [vmem:[%s1095_s0 + $0xa0] sm:$0xff]  ;;  %v196_v10 = vsel %vm152_vm0, %v90_v56, -inf }
   0xc   :  { %v163_v54 = vmax.f32 %v161_v41, %v162_v23  ;;  %v206_v5 = vmax.f32 %v204_v60, %v205_v0  ;;  %v44_v8 = vld [vmem:[%s1095_s0 + $0x120] sm:$0xff]  ;;  %v180_v9 = vmax.f32 %v178_v61, %v179_v48  ;;  %v198_v11 = vsel %vm152_vm0, %v106_v57, -inf  ;;  %v122_v14 = vld [vmem:[%s1095_s0 + $0x390] sm:$0xff]  ;;  %v91_v16 = vld [vmem:[%s1095_s0 + $0x298] sm:$0xff] }
   0xd   :  { %v209_v12 = vsel %vm152_vm0, %v59_v59, -inf  ;;  %v195_v15 = vmax.f32 %v193_v4, %v194_v62  ;;  %v211_v18 = vsel %vm152_vm0, %v75_v63, -inf  ;;  %v60_v19 = vld [vmem:[%s1095_s0 + $0x1a0] sm:$0xff]  ;;  %v138_v21 = vld [vmem:[%s1095_s0 + $0x410] sm:$0xff]  ;;  %v221_v22 = vsel %vm152_vm0, %v12_v6, -inf  ;;  %v107_v27 = vld [vmem:[%s1095_s0 + $0x318] sm:$0xff] }
   0xe   :  { %v165_v2 = vmax.f32 %v163_v54, %v164_v29  ;;  %v208_v17 = vmax.f32 %v206_v5, %v207_v1  ;;  %v182_v20 = vmax.f32 %v180_v9, %v181_v49  ;;  %v222_v23 = vsel %vm152_vm0, %v28_v7, -inf  ;;  %v76_v29 = vld [vmem:[%s1095_s0 + $0x220] sm:$0xff]  ;;  %v13_v31 = vld [vmem:[%s1095_s0 + $0x28] sm:$0xff]  ;;  %v123_v39 = vld [vmem:[%s1095_s0 + $0x398] sm:$0xff] }
   0xf   :  { %v224_v24 = vsel %vm152_vm0, %v44_v8, -inf  ;;  %v197_v26 = vmax.f32 %v195_v15, %v196_v10  ;;  %v200_v33 = vsel %vm152_vm0, %v122_v14, -inf  ;;  %v213_v34 = vsel %vm152_vm0, %v91_v16, -inf  ;;  %v29_v36 = vld [vmem:[%s1095_s0 + $0xa8] sm:$0xff]  ;;  %v92_v41 = vld [vmem:[%s1095_s0 + $0x2a0] sm:$0xff]  ;;  %v139_v50 = vld [vmem:[%s1095_s0 + $0x418] sm:$0xff] }
  0x10   :  { %v167_v13 = vmax.f32 %v165_v2, %v166_v30  ;;  %v210_v28 = vmax.f32 %v208_v17, %v209_v12  ;;  %v223_v30 = vmax.f32 %v221_v22, %v222_v23  ;;  %v184_v32 = vmax.f32 %v182_v20, %v183_v55  ;;  %v45_v43 = vld [vmem:[%s1095_s0 + $0x128] sm:$0xff]  ;;  %v108_v52 = vld [vmem:[%s1095_s0 + $0x320] sm:$0xff]  ;;  %v14_v60 = vld [vmem:[%s1095_s0 + $0x30] sm:$0xff] }
  0x11   :  { %v226_v35 = vsel %vm152_vm0, %v60_v19, -inf  ;;  %v199_v37 = vmax.f32 %v197_v26, %v198_v11  ;;  %v202_v38 = vsel %vm152_vm0, %v138_v21, -inf  ;;  %v215_v45 = vsel %vm152_vm0, %v107_v27, -inf  ;;  %v61_v47 = vld [vmem:[%s1095_s0 + $0x1a8] sm:$0xff]  ;;  %v30_v61 = vld [vmem:[%s1095_s0 + $0xb0] sm:$0xff]  ;;  %v124_v0 = vld [vmem:[%s1095_s0 + $0x3a0] sm:$0xff] }
  0x12   :  { %v169_v25 = vmax.f32 %v167_v13, %v168_v42  ;;  %v212_v40 = vmax.f32 %v210_v28, %v211_v18  ;;  %v225_v42 = vmax.f32 %v223_v30, %v224_v24  ;;  %v186_v44 = vmax.f32 %v184_v32, %v185_v3  ;;  %v77_v54 = vld [vmem:[%s1095_s0 + $0x228] sm:$0xff]  ;;  %v46_v3 = vld [vmem:[%s1095_s0 + $0x130] sm:$0xff]  ;;  %v140_v11 = vld [vmem:[%s1095_s0 + $0x420] sm:$0xff] }
  0x13   :  { %v228_v46 = vsel %vm152_vm0, %v76_v29, -inf  ;;  %v238_v48 = vsel %vm152_vm0, %v13_v31, -inf  ;;  %v201_v49 = vmax.f32 %v199_v37, %v200_v33  ;;  %v239_v55 = vsel %vm152_vm0, %v29_v36, -inf  ;;  %v93_v6 = vld [vmem:[%s1095_s0 + $0x2a8] sm:$0xff]  ;;  %v62_v9 = vld [vmem:[%s1095_s0 + $0x1b0] sm:$0xff]  ;;  %v15_v21 = vld [vmem:[%s1095_s0 + $0x38] sm:$0xff] }
  0x14   :  { %425 = vst.msk [vmem:[%s1096_s1] sm:$0xff] %vm152_vm0, %v169_v25  ;;  %v214_v51 = vmax.f32 %v212_v40, %v213_v34  ;;  %v227_v53 = vmax.f32 %v225_v42, %v226_v35  ;;  %v217_v56 = vsel %vm152_vm0, %v123_v39, -inf  ;;  %v230_v57 = vsel %vm152_vm0, %v92_v41, -inf  ;;  %v109_v13 = vld [vmem:[%s1095_s0 + $0x328] sm:$0xff]  ;;  %v78_v18 = vld [vmem:[%s1095_s0 + $0x230] sm:$0xff]  ;;  %v31_v22 = vld [vmem:[%s1095_s0 + $0xb8] sm:$0xff] }
  0x15   :  { %426 = vst.msk [vmem:[%s1096_s1 + $0x8] sm:$0xff] %vm152_vm0, %v186_v44  ;;  %v240_v58 = vmax.f32 %v238_v48, %v239_v55  ;;  %v241_v59 = vsel %vm152_vm0, %v45_v43, -inf  ;;  %v203_v62 = vmax.f32 %v201_v49, %v202_v38  ;;  %v243_v2 = vsel %vm152_vm0, %v61_v47, -inf  ;;  %v47_v27 = vld [vmem:[%s1095_s0 + $0x138] sm:$0xff]  ;;  %v125_v29 = vld [vmem:[%s1095_s0 + $0x3a8] sm:$0xff]  ;;  %v94_v32 = vld [vmem:[%s1095_s0 + $0x2b0] sm:$0xff] }
  0x16   :  { %v216_v63 = vmax.f32 %v214_v51, %v215_v45  ;;  %v229_v1 = vmax.f32 %v227_v53, %v228_v46  ;;  %v219_v4 = vsel %vm152_vm0, %v139_v50, -inf  ;;  %v232_v5 = vsel %vm152_vm0, %v108_v52, -inf  ;;  %v63_v34 = vld [vmem:[%s1095_s0 + $0x1b8] sm:$0xff]  ;;  %v141_v36 = vld [vmem:[%s1095_s0 + $0x428] sm:$0xff]  ;;  %v110_v37 = vld [vmem:[%s1095_s0 + $0x330] sm:$0xff] }
  0x17   :  { %v242_v7 = vmax.f32 %v240_v58, %v241_v59  ;;  %v245_v8 = vsel %vm152_vm0, %v77_v54, -inf  ;;  %427 = vst.msk [vmem:[%s1096_s1 + $0x10] sm:$0xff] %vm152_vm0, %v203_v62  ;;  %v255_v14 = vsel %vm152_vm0, %v14_v60, -inf  ;;  %v256_v15 = vsel %vm152_vm0, %v30_v61, -inf  ;;  %v79_v43 = vld [vmem:[%s1095_s0 + $0x238] sm:$0xff]  ;;  %v16_v46 = vld [vmem:[%s1095_s0 + $0x40] sm:$0xff] }
  0x18   :  { %v218_v10 = vmax.f32 %v216_v63, %v217_v56  ;;  %v231_v12 = vmax.f32 %v229_v1, %v230_v57  ;;  %v234_v16 = vsel %vm152_vm0, %v124_v0, -inf  ;;  %v257_v19 = vmax.f32 %v255_v14, %v256_v15  ;;  %v32_v47 = vld [vmem:[%s1095_s0 + $0xc0] sm:$0xff]  ;;  %v126_v50 = vld [vmem:[%s1095_s0 + $0x3b0] sm:$0xff]  ;;  %v95_v56 = vld [vmem:[%s1095_s0 + $0x2b8] sm:$0xff] }
  0x19   :  { %v244_v17 = vmax.f32 %v242_v7, %v243_v2  ;;  %v258_v20 = vsel %vm152_vm0, %v46_v3, -inf  ;;  %v247_v25 = vsel %vm152_vm0, %v93_v6, -inf  ;;  %v260_v26 = vsel %vm152_vm0, %v62_v9, -inf  ;;  %v48_v58 = vld [vmem:[%s1095_s0 + $0x140] sm:$0xff]  ;;  %v142_v60 = vld [vmem:[%s1095_s0 + $0x430] sm:$0xff]  ;;  %v111_v3 = vld [vmem:[%s1095_s0 + $0x338] sm:$0xff] }
  0x1a   :  { %v220_v23 = vmax.f32 %v218_v10, %v219_v4  ;;  %v233_v24 = vmax.f32 %v231_v12, %v232_v5  ;;  %v236_v28 = vsel %vm152_vm0, %v140_v11, -inf  ;;  %v249_v31 = vsel %vm152_vm0, %v109_v13, -inf  ;;  %v64_v59 = vld [vmem:[%s1095_s0 + $0x1c0] sm:$0xff]  ;;  %v17_v7 = vld [vmem:[%s1095_s0 + $0x48] sm:$0xff]  ;;  %v127_v15 = vld [vmem:[%s1095_s0 + $0x3b8] sm:$0xff] }
  0x1b   :  { %v246_v30 = vmax.f32 %v244_v17, %v245_v8  ;;  %v259_v33 = vmax.f32 %v257_v19, %v258_v20  ;;  %v262_v38 = vsel %vm152_vm0, %v78_v18, -inf  ;;  %v272_v39 = vsel %vm152_vm0, %v15_v21, -inf  ;;  %v80_v5 = vld [vmem:[%s1095_s0 + $0x240] sm:$0xff]  ;;  %v33_v12 = vld [vmem:[%s1095_s0 + $0xc8] sm:$0xff] }
  0x1c   :  { %428 = vst.msk [vmem:[%s1096_s1 + $0x18] sm:$0xff] %vm152_vm0, %v220_v23  ;;  %v235_v35 = vmax.f32 %v233_v24, %v234_v16  ;;  %v273_v40 = vsel %vm152_vm0, %v31_v22, -inf  ;;  %v275_v45 = vsel %vm152_vm0, %v47_v27, -inf  ;;  %v251_v49 = vsel %vm152_vm0, %v125_v29, -inf  ;;  %v96_v17 = vld [vmem:[%s1095_s0 + $0x2c0] sm:$0xff]  ;;  %v49_v19 = vld [vmem:[%s1095_s0 + $0x148] sm:$0xff] }
  0x1d   :  { %v248_v41 = vmax.f32 %v246_v30, %v247_v25  ;;  %v261_v42 = vmax.f32 %v259_v33, %v260_v26  ;;  %v274_v44 = vmax.f32 %v272_v39, %v273_v40  ;;  %v264_v51 = vsel %vm152_vm0, %v94_v32, -inf  ;;  %v65_v23 = vld [vmem:[%s1095_s0 + $0x1c8] sm:$0xff]  ;;  %v143_v26 = vld [vmem:[%s1095_s0 + $0x438] sm:$0xff]  ;;  %v128_v40 = vld [vmem:[%s1095_s0 + $0x3c0] sm:$0xff] }
  0x1e   :  { %v237_v48 = vmax.f32 %v235_v35, %v236_v28  ;;  %v277_v52 = vsel %vm152_vm0, %v63_v34, -inf  ;;  %v253_v54 = vsel %vm152_vm0, %v141_v36, -inf  ;;  %v266_v61 = vsel %vm152_vm0, %v110_v37, -inf  ;;  %v112_v28 = vld [vmem:[%s1095_s0 + $0x340] sm:$0xff]  ;;  %v81_v30 = vld [vmem:[%s1095_s0 + $0x248] sm:$0xff]  ;;  %v18_v36 = vld [vmem:[%s1095_s0 + $0x50] sm:$0xff] }
  0x1f   :  { %v250_v53 = vmax.f32 %v248_v41, %v249_v31  ;;  %v263_v55 = vmax.f32 %v261_v42, %v262_v38  ;;  %v276_v57 = vmax.f32 %v274_v44, %v275_v45  ;;  %v279_v62 = vsel %vm152_vm0, %v79_v43, -inf  ;;  %v34_v37 = vld [vmem:[%s1095_s0 + $0xd0] sm:$0xff] }
  0x20   :  { %429 = vst.msk [vmem:[%s1096_s1 + $0x20] sm:$0xff] %vm152_vm0, %v237_v48  ;;  %v289_v63 = vsel %vm152_vm0, %v16_v46, -inf  ;;  %v290_v0 = vsel %vm152_vm0, %v32_v47, -inf  ;;  %v268_v8 = vsel %vm152_vm0, %v126_v50, -inf  ;;  %v281_v9 = vsel %vm152_vm0, %v95_v56, -inf  ;;  %v50_v43 = vld [vmem:[%s1095_s0 + $0x150] sm:$0xff] }
  0x21   :  { %v252_v1 = vmax.f32 %v250_v53, %v251_v49  ;;  %v265_v2 = vmax.f32 %v263_v55, %v264_v51  ;;  %v278_v4 = vmax.f32 %v276_v57, %v277_v52  ;;  %v291_v6 = vmax.f32 %v289_v63, %v290_v0  ;;  %v97_v46 = vld [vmem:[%s1095_s0 + $0x2c8] sm:$0xff]  ;;  %v66_v49 = vld [vmem:[%s1095_s0 + $0x1d0] sm:$0xff]  ;;  %v144_v51 = vld [vmem:[%s1095_s0 + $0x440] sm:$0xff] }
  0x22   :  { %v292_v10 = vsel %vm152_vm0, %v48_v58, -inf  ;;  %v294_v11 = vsel %vm152_vm0, %v64_v59, -inf  ;;  %v270_v20 = vsel %vm152_vm0, %v142_v60, -inf  ;;  %v283_v21 = vsel %vm152_vm0, %v111_v3, -inf  ;;  %v113_v53 = vld [vmem:[%s1095_s0 + $0x348] sm:$0xff]  ;;  %v82_v58 = vld [vmem:[%s1095_s0 + $0x250] sm:$0xff] }
  0x23   :  { %v254_v13 = vmax.f32 %v252_v1, %v253_v54  ;;  %v267_v14 = vmax.f32 %v265_v2, %v266_v61  ;;  %v280_v16 = vmax.f32 %v278_v4, %v279_v62  ;;  %v293_v18 = vmax.f32 %v291_v6, %v292_v10  ;;  %v19_v61 = vld [vmem:[%s1095_s0 + $0x58] sm:$0xff] }
  0x24   :  { %v296_v22 = vsel %vm152_vm0, %v80_v5, -inf  ;;  %v306_v24 = vsel %vm152_vm0, %v17_v7, -inf  ;;  %v307_v31 = vsel %vm152_vm0, %v33_v12, -inf  ;;  %v285_v32 = vsel %vm152_vm0, %v127_v15, -inf  ;;  %v35_v62 = vld [vmem:[%s1095_s0 + $0xd8] sm:$0xff]  ;;  %v129_v5 = vld [vmem:[%s1095_s0 + $0x3c8] sm:$0xff] }
  0x25   :  { %430 = vst.msk [vmem:[%s1096_s1 + $0x28] sm:$0xff] %vm152_vm0, %v254_v13  ;;  %v269_v25 = vmax.f32 %v267_v14, %v268_v8  ;;  %v282_v27 = vmax.f32 %v280_v16, %v281_v9  ;;  %v295_v29 = vmax.f32 %v293_v18, %v294_v11  ;;  %v298_v33 = vsel %vm152_vm0, %v96_v17, -inf  ;;  %v51_v3 = vld [vmem:[%s1095_s0 + $0x158] sm:$0xff]  ;;  %v98_v8 = vld [vmem:[%s1095_s0 + $0x2d0] sm:$0xff]  ;;  %v145_v12 = vld [vmem:[%s1095_s0 + $0x448] sm:$0xff] }
  0x26   :  { %v308_v34 = vmax.f32 %v306_v24, %v307_v31  ;;  %v309_v35 = vsel %vm152_vm0, %v49_v19, -inf  ;;  %v311_v42 = vsel %vm152_vm0, %v65_v23, -inf  ;;  %v287_v44 = vsel %vm152_vm0, %v143_v26, -inf  ;;  %v67_v10 = vld [vmem:[%s1095_s0 + $0x1d8] sm:$0xff]  ;;  %v114_v13 = vld [vmem:[%s1095_s0 + $0x350] sm:$0xff]  ;;  %v36_v23 = vld [vmem:[%s1095_s0 + $0xe0] sm:$0xff] }
  0x27   :  { %v271_v38 = vmax.f32 %v269_v25, %v270_v20  ;;  %v284_v39 = vmax.f32 %v282_v27, %v283_v21  ;;  %v297_v41 = vmax.f32 %v295_v29, %v296_v22  ;;  %v300_v45 = vsel %vm152_vm0, %v112_v28, -inf  ;;  %v83_v19 = vld [vmem:[%s1095_s0 + $0x258] sm:$0xff]  ;;  %v20_v22 = vld [vmem:[%s1095_s0 + $0x60] sm:$0xff]  ;;  %v130_v26 = vld [vmem:[%s1095_s0 + $0x3d0] sm:$0xff] }
  0x28   :  { %v310_v47 = vmax.f32 %v308_v34, %v309_v35  ;;  %v313_v48 = vsel %vm152_vm0, %v81_v30, -inf  ;;  %v323_v54 = vsel %vm152_vm0, %v18_v36, -inf  ;;  %v324_v55 = vsel %vm152_vm0, %v34_v37, -inf  ;;  %v52_v34 = vld [vmem:[%s1095_s0 + $0x160] sm:$0xff]  ;;  %v146_v36 = vld [vmem:[%s1095_s0 + $0x450] sm:$0xff] }
  0x29   :  { %431 = vst.msk [vmem:[%s1096_s1 + $0x30] sm:$0xff] %vm152_vm0, %v271_v38  ;;  %v286_v50 = vmax.f32 %v284_v39, %v285_v32  ;;  %v299_v52 = vmax.f32 %v297_v41, %v298_v33  ;;  %v302_v56 = vsel %vm152_vm0, %v128_v40, -inf  ;;  %v325_v59 = vmax.f32 %v323_v54, %v324_v55  ;;  %v99_v32 = vld [vmem:[%s1095_s0 + $0x2d8] sm:$0xff]  ;;  %v68_v35 = vld [vmem:[%s1095_s0 + $0x1e0] sm:$0xff] }
  0x2a   :  { %v312_v57 = vmax.f32 %v310_v47, %v311_v42  ;;  %v326_v60 = vsel %vm152_vm0, %v50_v43, -inf  ;;  %v315_v1 = vsel %vm152_vm0, %v97_v46, -inf  ;;  %v328_v2 = vsel %vm152_vm0, %v66_v49, -inf  ;;  %v115_v43 = vld [vmem:[%s1095_s0 + $0x358] sm:$0xff]  ;;  %v21_v47 = vld [vmem:[%s1095_s0 + $0x68] sm:$0xff] }
  0x2b   :  { %v288_v63 = vmax.f32 %v286_v50, %v287_v44  ;;  %v301_v0 = vmax.f32 %v299_v52, %v300_v45  ;;  %v304_v4 = vsel %vm152_vm0, %v144_v51, -inf  ;;  %v317_v7 = vsel %vm152_vm0, %v113_v53, -inf  ;;  %v84_v45 = vld [vmem:[%s1095_s0 + $0x260] sm:$0xff]  ;;  %v37_v52 = vld [vmem:[%s1095_s0 + $0xe8] sm:$0xff]  ;;  %v131_v55 = vld [vmem:[%s1095_s0 + $0x3d8] sm:$0xff] }
  0x2c   :  { %v314_v6 = vmax.f32 %v312_v57, %v313_v48  ;;  %v327_v9 = vmax.f32 %v325_v59, %v326_v60  ;;  %v330_v14 = vsel %vm152_vm0, %v82_v58, -inf  ;;  %v340_v15 = vsel %vm152_vm0, %v19_v61, -inf  ;;  %v100_v57 = vld [vmem:[%s1095_s0 + $0x2e0] sm:$0xff]  ;;  %v53_v59 = vld [vmem:[%s1095_s0 + $0x168] sm:$0xff] }
  0x2d   :  { %432 = vst.msk [vmem:[%s1096_s1 + $0x38] sm:$0xff] %vm152_vm0, %v288_v63  ;;  %v303_v11 = vmax.f32 %v301_v0, %v302_v56  ;;  %v341_v16 = vsel %vm152_vm0, %v35_v62, -inf  ;;  %v343_v21 = vsel %vm152_vm0, %v51_v3, -inf  ;;  %v319_v25 = vsel %vm152_vm0, %v129_v5, -inf  ;;  %v69_v63 = vld [vmem:[%s1095_s0 + $0x1e8] sm:$0xff] }
  0x2e   :  { %v316_v17 = vmax.f32 %v314_v6, %v315_v1  ;;  %v329_v18 = vmax.f32 %v327_v9, %v328_v2  ;;  %v342_v20 = vmax.f32 %v340_v15, %v341_v16  ;;  %v332_v27 = vsel %vm152_vm0, %v98_v8, -inf  ;;  %v147_v2 = vld [vmem:[%s1095_s0 + $0x458] sm:$0xff]  ;;  %v85_v6 = vld [vmem:[%s1095_s0 + $0x268] sm:$0xff]  ;;  %v132_v16 = vld [vmem:[%s1095_s0 + $0x3e0] sm:$0xff] }
  0x2f   :  { %v305_v24 = vmax.f32 %v303_v11, %v304_v4  ;;  %v345_v28 = vsel %vm152_vm0, %v67_v10, -inf  ;;  %v321_v30 = vsel %vm152_vm0, %v145_v12, -inf  ;;  %v334_v37 = vsel %vm152_vm0, %v114_v13, -inf  ;;  %v116_v4 = vld [vmem:[%s1095_s0 + $0x360] sm:$0xff]  ;;  %v22_v12 = vld [vmem:[%s1095_s0 + $0x70] sm:$0xff] }
  0x30   :  { %v318_v29 = vmax.f32 %v316_v17, %v317_v7  ;;  %v331_v31 = vmax.f32 %v329_v18, %v330_v14  ;;  %v344_v33 = vmax.f32 %v342_v20, %v343_v21  ;;  %v347_v38 = vsel %vm152_vm0, %v83_v19, -inf  ;;  %v38_v13 = vld [vmem:[%s1095_s0 + $0xf0] sm:$0xff] }
  0x31   :  { %433 = vst.msk [vmem:[%s1096_s1 + $0x40] sm:$0xff] %vm152_vm0, %v305_v24  ;;  %v357_v39 = vsel %vm152_vm0, %v20_v22, -inf  ;;  %v358_v40 = vsel %vm152_vm0, %v36_v23, -inf  ;;  %v336_v48 = vsel %vm152_vm0, %v130_v26, -inf  ;;  %v349_v49 = vsel %vm152_vm0, %v99_v32, -inf  ;;  %v54_v19 = vld [vmem:[%s1095_s0 + $0x170] sm:$0xff] }
  0x32   :  { %v320_v41 = vmax.f32 %v318_v29, %v319_v25  ;;  %v333_v42 = vmax.f32 %v331_v31, %v332_v27  ;;  %v346_v44 = vmax.f32 %v344_v33, %v345_v28  ;;  %v359_v46 = vmax.f32 %v357_v39, %v358_v40  ;;  %v101_v22 = vld [vmem:[%s1095_s0 + $0x2e8] sm:$0xff]  ;;  %v70_v25 = vld [vmem:[%s1095_s0 + $0x1f0] sm:$0xff]  ;;  %v148_v27 = vld [vmem:[%s1095_s0 + $0x460] sm:$0xff] }
  0x33   :  { %v360_v50 = vsel %vm152_vm0, %v52_v34, -inf  ;;  %v362_v51 = vsel %vm152_vm0, %v68_v35, -inf  ;;  %v338_v60 = vsel %vm152_vm0, %v146_v36, -inf  ;;  %v351_v61 = vsel %vm152_vm0, %v115_v43, -inf  ;;  %v117_v29 = vld [vmem:[%s1095_s0 + $0x368] sm:$0xff]  ;;  %v86_v34 = vld [vmem:[%s1095_s0 + $0x270] sm:$0xff] }
  0x34   :  { %v322_v53 = vmax.f32 %v320_v41, %v321_v30  ;;  %v335_v54 = vmax.f32 %v333_v42, %v334_v37  ;;  %v348_v56 = vmax.f32 %v346_v44, %v347_v38  ;;  %v361_v58 = vmax.f32 %v359_v46, %v360_v50  ;;  %v23_v37 = vld [vmem:[%s1095_s0 + $0x78] sm:$0xff] }
  0x35   :  { %v364_v62 = vsel %vm152_vm0, %v84_v45, -inf  ;;  %v374_v0 = vsel %vm152_vm0, %v21_v47, -inf  ;;  %v375_v7 = vsel %vm152_vm0, %v37_v52, -inf  ;;  %v353_v8 = vsel %vm152_vm0, %v131_v55, -inf  ;;  %v39_v38 = vld [vmem:[%s1095_s0 + $0xf8] sm:$0xff]  ;;  %v133_v45 = vld [vmem:[%s1095_s0 + $0x3e8] sm:$0xff] }
  0x36   :  { %434 = vst.msk [vmem:[%s1096_s1 + $0x48] sm:$0xff] %vm152_vm0, %v322_v53  ;;  %v337_v1 = vmax.f32 %v335_v54, %v336_v48  ;;  %v350_v3 = vmax.f32 %v348_v56, %v349_v49  ;;  %v363_v5 = vmax.f32 %v361_v58, %v362_v51  ;;  %v366_v9 = vsel %vm152_vm0, %v100_v57, -inf  ;;  %v55_v43 = vld [vmem:[%s1095_s0 + $0x178] sm:$0xff]  ;;  %v102_v48 = vld [vmem:[%s1095_s0 + $0x2f0] sm:$0xff]  ;;  %v149_v55 = vld [vmem:[%s1095_s0 + $0x468] sm:$0xff] }
  0x37   :  { %v376_v10 = vmax.f32 %v374_v0, %v375_v7  ;;  %v377_v11 = vsel %vm152_vm0, %v53_v59, -inf  ;;  %v379_v18 = vsel %vm152_vm0, %v69_v63, -inf  ;;  %v355_v20 = vsel %vm152_vm0, %v147_v2, -inf  ;;  %v71_v50 = vld [vmem:[%s1095_s0 + $0x1f8] sm:$0xff]  ;;  %v118_v57 = vld [vmem:[%s1095_s0 + $0x370] sm:$0xff] }
  0x38   :  { %v339_v14 = vmax.f32 %v337_v1, %v338_v60  ;;  %v352_v15 = vmax.f32 %v350_v3, %v351_v61  ;;  %v365_v17 = vmax.f32 %v363_v5, %v364_v62  ;;  %v368_v21 = vsel %vm152_vm0, %v116_v4, -inf  ;;  %v87_v59 = vld [vmem:[%s1095_s0 + $0x278] sm:$0xff]  ;;  %v134_v3 = vld [vmem:[%s1095_s0 + $0x3f0] sm:$0xff] }
  0x39   :  { %v378_v23 = vmax.f32 %v376_v10, %v377_v11  ;;  %v381_v24 = vsel %vm152_vm0, %v85_v6, -inf  ;;  %v391_v30 = vsel %vm152_vm0, %v22_v12, -inf  ;;  %v392_v31 = vsel %vm152_vm0, %v38_v13, -inf  ;;  %v103_v5 = vld [vmem:[%s1095_s0 + $0x2f8] sm:$0xff]  ;;  %v150_v11 = vld [vmem:[%s1095_s0 + $0x470] sm:$0xff] }
  0x3a   :  { %435 = vst.msk [vmem:[%s1096_s1 + $0x50] sm:$0xff] %vm152_vm0, %v339_v14  ;;  %v354_v26 = vmax.f32 %v352_v15, %v353_v8  ;;  %v367_v28 = vmax.f32 %v365_v17, %v366_v9  ;;  %v370_v32 = vsel %vm152_vm0, %v132_v16, -inf  ;;  %v393_v35 = vmax.f32 %v391_v30, %v392_v31  ;;  %v119_v13 = vld [vmem:[%s1095_s0 + $0x378] sm:$0xff] }
  0x3b   :  { %v380_v33 = vmax.f32 %v378_v23, %v379_v18  ;;  %v394_v36 = vsel %vm152_vm0, %v54_v19, -inf  ;;  %v383_v41 = vsel %vm152_vm0, %v101_v22, -inf  ;;  %v396_v42 = vsel %vm152_vm0, %v70_v25, -inf  ;;  %v135_v19 = vld [vmem:[%s1095_s0 + $0x3f8] sm:$0xff] }
  0x3c   :  { %v356_v39 = vmax.f32 %v354_v26, %v355_v20  ;;  %v369_v40 = vmax.f32 %v367_v28, %v368_v21  ;;  %v372_v44 = vsel %vm152_vm0, %v148_v27, -inf  ;;  %v385_v47 = vsel %vm152_vm0, %v117_v29, -inf }
  0x3d   :  { %v382_v46 = vmax.f32 %v380_v33, %v381_v24  ;;  %v395_v49 = vmax.f32 %v393_v35, %v394_v36  ;;  %v398_v52 = vsel %vm152_vm0, %v86_v34, -inf  ;;  %v408_v53 = vsel %vm152_vm0, %v23_v37, -inf  ;;  %v151_v24 = vld [vmem:[%s1095_s0 + $0x478] sm:$0xff] }
  0x3e   :  { %436 = vst.msk [vmem:[%s1096_s1 + $0x58] sm:$0xff] %vm152_vm0, %v356_v39  ;;  %v371_v51 = vmax.f32 %v369_v40, %v370_v32  ;;  %v409_v54 = vsel %vm152_vm0, %v39_v38, -inf  ;;  %v411_v61 = vsel %vm152_vm0, %v55_v43, -inf  ;;  %v387_v63 = vsel %vm152_vm0, %v133_v45, -inf }
  0x3f   :  { %v384_v56 = vmax.f32 %v382_v46, %v383_v41  ;;  %v397_v58 = vmax.f32 %v395_v49, %v396_v42  ;;  %v410_v60 = vmax.f32 %v408_v53, %v409_v54  ;;  %v400_v0 = vsel %vm152_vm0, %v102_v48, -inf }
  0x40   :  { %v373_v62 = vmax.f32 %v371_v51, %v372_v44  ;;  %v413_v1 = vsel %vm152_vm0, %v71_v50, -inf  ;;  %v389_v7 = vsel %vm152_vm0, %v149_v55, -inf  ;;  %v402_v8 = vsel %vm152_vm0, %v118_v57, -inf }
  0x41   :  { %v386_v2 = vmax.f32 %v384_v56, %v385_v47  ;;  %v399_v4 = vmax.f32 %v397_v58, %v398_v52  ;;  %v412_v6 = vmax.f32 %v410_v60, %v411_v61  ;;  %v415_v9 = vsel %vm152_vm0, %v87_v59, -inf }
  0x42   :  { %437 = vst.msk [vmem:[%s1096_s1 + $0x60] sm:$0xff] %vm152_vm0, %v373_v62  ;;  %v404_v15 = vsel %vm152_vm0, %v134_v3, -inf  ;;  %v417_v16 = vsel %vm152_vm0, %v103_v5, -inf  ;;  %v406_v21 = vsel %vm152_vm0, %v150_v11, -inf  ;;  %v419_v22 = vsel %vm152_vm0, %v119_v13, -inf }
  0x43   :  { %v388_v10 = vmax.f32 %v386_v2, %v387_v63  ;;  %v401_v12 = vmax.f32 %v399_v4, %v400_v0  ;;  %v414_v14 = vmax.f32 %v412_v6, %v413_v1  ;;  %v421_v26 = vsel %vm152_vm0, %v135_v19, -inf }
  0x44   :  { %v423_v29 = vsel %vm152_vm0, %v151_v24, -inf }
  0x45   :  { %v390_v17 = vmax.f32 %v388_v10, %v389_v7  ;;  %v403_v18 = vmax.f32 %v401_v12, %v402_v8  ;;  %v416_v20 = vmax.f32 %v414_v14, %v415_v9 }
  0x47   :  { %438 = vst.msk [vmem:[%s1096_s1 + $0x68] sm:$0xff] %vm152_vm0, %v390_v17  ;;  %v405_v23 = vmax.f32 %v403_v18, %v404_v15  ;;  %v418_v25 = vmax.f32 %v416_v20, %v417_v16 }
  0x49   :  { %v407_v27 = vmax.f32 %v405_v23, %v406_v21  ;;  %v420_v28 = vmax.f32 %v418_v25, %v419_v22 }
  0x4b   :  { %439 = vst.msk [vmem:[%s1096_s1 + $0x70] sm:$0xff] %vm152_vm0, %v407_v27  ;;  %v422_v30 = vmax.f32 %v420_v28, %v421_v26 }
  0x4d   :  { %v424_v31 = vmax.f32 %v422_v30, %v423_v29 }
  0x4f   :  { %440 = vst.msk [vmem:[%s1096_s1 + $0x78] sm:$0xff] %vm152_vm0, %v424_v31 }

// kernel: densenet_forward.28
= control target key start
LH: loop header
LB: loop body
LE: loop exit
PB: predicated region body
PF: predicated region fallthrough
CT: control target
= control target key end

     0   :  { %vm141_vm0 = vcmask 1043456   ;;  %vm116_vm1 = vcmask 195584   ;;  %vm266_vm2 = vcmask 125952   ;;  %s555_s3 = inlined_call_operand.vmem [shape: bf16[24,16], index: 3, kind: input, shape index: {}]   ;;  %s556_s0 = inlined_call_operand.vmem [shape: f32[128,24], index: 0, kind: input, shape index: {}]   ;;  %s557_s1 = inlined_call_operand.vmem [shape: f32[1,24], index: 1, kind: input, shape index: {}]   ;;  %s558_s2 = inlined_call_operand.vmem [shape: f32[1,24], index: 2, kind: input, shape index: {}]   ;;  %s559_s4 = inlined_call_operand.vmem [shape: f32[1,16], index: 4, kind: input, shape index: {}]   ;;  %s560_s5 = inlined_call_operand.vmem [shape: f32[1,16], index: 5, kind: input, shape index: {}]   ;;  %s561_s6 = inlined_call_operand.vmem [shape: bf16[128,16], index: 6, kind: output, shape index: {}]  }
   0x1   :  { %v106_v0 = vld [vmem:[%s555_s3 + $0x8] sm:$0xf]  ;;  %v24_v1 = vld [vmem:[%s556_s0] sm:$0xff]  ;;  %v26_v37 = vld [vmem:[%s556_s0 + $0x10] sm:$0xff] }
   0x2   :  { %v112_v2 = vunpack.c.l.b16 %v106_v0  ;;  %v25_v3 = vld [vmem:[%s556_s0 + $0x8] sm:$0xff]  ;;  %v357_v4 = vld [vmem:[%s557_s1] ss:$0 sm:$0xff]  ;;  %v27_v41 = vld [vmem:[%s556_s0 + $0x18] sm:$0xff] }
   0x3   :  { %v362_v5 = vld [vmem:[%s558_s2] ss:$0 sm:$0xff]  ;;  %v44_v8 = vmul.f32 %v357_v4, %v24_v1  ;;  %v45_v9 = vmul.f32 %v357_v4, %v25_v3  ;;  %v29_v10 = vld [vmem:[%s556_s0 + $0x28] sm:$0xff]  ;;  %v30_v42 = vld [vmem:[%s556_s0 + $0x30] sm:$0xff]  ;;  %v46_v48 = vmul.f32 %v357_v4, %v26_v37  ;;  %v47_v49 = vmul.f32 %v357_v4, %v27_v41 }
   0x4   :  { %v28_v6 = vld [vmem:[%s556_s0 + $0x20] sm:$0xff]  ;;  %v114_v7 = vpack.c.b16 %v112_v2, %v112_v2  ;;  %v33_v13 = vld [vmem:[%s556_s0 + $0x48] sm:$0xff]  ;;  %v49_v14 = vmul.f32 %v357_v4, %v29_v10  ;;  %v31_v43 = vld [vmem:[%s556_s0 + $0x38] sm:$0xff]  ;;  %v50_v50 = vmul.f32 %v357_v4, %v30_v42 }
   0x5   :  { %v48_v11 = vmul.f32 %v357_v4, %v28_v6  ;;  %v32_v12 = vld [vmem:[%s556_s0 + $0x40] sm:$0xff]  ;;  %v53_v16 = vmul.f32 %v357_v4, %v33_v13  ;;  %v64_v19 = vadd.f32 %v362_v5, %v44_v8  ;;  %v65_v20 = vadd.f32 %v362_v5, %v45_v9  ;;  %v37_v22 = vld [vmem:[%s556_s0 + $0x68] sm:$0xff]  ;;  %v34_v45 = vld [vmem:[%s556_s0 + $0x50] sm:$0xff] }
   0x6   :  { %v52_v15 = vmul.f32 %v357_v4, %v32_v12  ;;  %v36_v17 = vld [vmem:[%s556_s0 + $0x60] sm:$0xff]  ;;  %v143_v18 = vsel %vm141_vm0, %v114_v7, 0  ;;  %v69_v24 = vadd.f32 %v362_v5, %v49_v14  ;;  %v57_v34 = vmul.f32 %v357_v4, %v37_v22  ;;  %v35_v46 = vld [vmem:[%s556_s0 + $0x58] sm:$0xff]  ;;  %v38_v52 = vld [vmem:[%s556_s0 + $0x70] sm:$0xff] }
   0x7   :  { %v68_v21 = vadd.f32 %v362_v5, %v48_v11  ;;  %151 = vmatpush.bf16.msra.mxu0 %v143_v18  ;;  %300 = vmatpush.bf16.msra.mxu1 %v143_v18  ;;  %v299_v23 = vld [vmem:[%s555_s3] sm:$0xff]  ;;  %v73_v26 = vadd.f32 %v362_v5, %v53_v16  ;;  %v80_v27 = vmax.f32 %v64_v19, 0.0  ;;  %v81_v28 = vmax.f32 %v65_v20, 0.0  ;;  %v39_v53 = vld [vmem:[%s556_s0 + $0x78] sm:$0xff] }
   0x8   :  { %v72_v25 = vadd.f32 %v362_v5, %v52_v15  ;;  %301 = vmatpush.bf16.msra.mxu2 %v143_v18  ;;  %302 = vmatpush.bf16.msra.mxu3 %v143_v18  ;;  %v56_v30 = vmul.f32 %v357_v4, %v36_v17  ;;  %v85_v31 = vmax.f32 %v69_v24, 0.0  ;;  %v77_v40 = vadd.f32 %v362_v5, %v57_v34  ;;  %v457_v16 = vld [vmem:[%s560_s5] ss:$0 sm:$0xff] }
   0x9   :  { %v84_v29 = vmax.f32 %v68_v21, 0.0  ;;  %v89_v33 = vmax.f32 %v73_v26, 0.0  ;;  %v96_v35 = vpack.c.bf16 %v81_v28, %v80_v27  ;;  %v51_v51 = vmul.f32 %v357_v4, %v31_v43 }
   0xa   :  { %v88_v32 = vmax.f32 %v72_v25, 0.0  ;;  %v76_v36 = vadd.f32 %v362_v5, %v56_v30  ;;  %v93_v47 = vmax.f32 %v77_v40, 0.0  ;;  %v54_v55 = vmul.f32 %v357_v4, %v34_v45 }
   0xb   :  { %152 = vmatpush.bf16.msra.mxu0 %v299_v23  ;;  %303 = vmatpush.bf16.msra.mxu1 %v299_v23  ;;  %v98_v38 = vpack.c.bf16 %v85_v31, %v84_v29  ;;  %v55_v56 = vmul.f32 %v357_v4, %v35_v46  ;;  %v58_v57 = vmul.f32 %v357_v4, %v38_v52 }
   0xc   :  { %v100_v39 = vpack.c.bf16 %v89_v33, %v88_v32  ;;  %304 = vmatpush.bf16.msra.mxu2 %v299_v23  ;;  %305 = vmatpush.bf16.msra.mxu3 %v299_v23  ;;  %v92_v44 = vmax.f32 %v76_v36, 0.0  ;;  %v59_v58 = vmul.f32 %v357_v4, %v39_v53  ;;  %v66_v59 = vadd.f32 %v362_v5, %v46_v48 }
   0xd   :  { %v67_v60 = vadd.f32 %v362_v5, %v47_v49  ;;  %v70_v61 = vadd.f32 %v362_v5, %v50_v50  ;;  %v71_v62 = vadd.f32 %v362_v5, %v51_v51  ;;  %v74_v63 = vadd.f32 %v362_v5, %v54_v55 }
   0xe   :  { %291 = vmatmul.msk.bf16.vlgmr.msra.gmra.mxu0 %vm116_vm1, %v96_v35  ;;  %293 = vmatmul.msk.bf16.vlgmr.msra.gmra.mxu1 %vm116_vm1, %v98_v38  ;;  %v102_v54 = vpack.c.bf16 %v93_v47, %v92_v44  ;;  %v75_v0 = vadd.f32 %v362_v5, %v55_v56  ;;  %v78_v1 = vadd.f32 %v362_v5, %v58_v57  ;;  %v82_v3 = vmax.f32 %v66_v59, 0.0 }
   0xf   :  { %295 = vmatmul.msk.bf16.vlgmr.msra.gmra.mxu2 %vm116_vm1, %v100_v39  ;;  %v79_v2 = vadd.f32 %v362_v5, %v59_v58  ;;  %v83_v6 = vmax.f32 %v67_v60, 0.0  ;;  %v86_v7 = vmax.f32 %v70_v61, 0.0  ;;  %v87_v4 = vmax.f32 %v71_v62, 0.0  ;;  %v452_v5 = vld [vmem:[%s559_s4] ss:$0 sm:$0xff] }
  0x10   :  { %297 = vmatmul.msk.bf16.vlgmr.msra.gmra.mxu3 %vm116_vm1, %v102_v54  ;;  %v90_v8 = vmax.f32 %v74_v63, 0.0  ;;  %v91_v9 = vmax.f32 %v75_v0, 0.0  ;;  %v94_v10 = vmax.f32 %v78_v1, 0.0 }
  0x11   :  { %v95_v11 = vmax.f32 %v79_v2, 0.0  ;;  %v97_v12 = vpack.c.bf16 %v83_v6, %v82_v3  ;;  %v99_v13 = vpack.c.bf16 %v87_v4, %v86_v7 }
  0x12   :  { %v101_v14 = vpack.c.bf16 %v91_v9, %v90_v8 }
  0x13   :  { %v103_v15 = vpack.c.bf16 %v95_v11, %v94_v10 }
  0x1e   :  { %292 = vmatmul.msk.bf16.gmra.mxu0 %vm116_vm1, %v97_v12  ;;  %294 = vmatmul.msk.bf16.gmra.mxu1 %vm116_vm1, %v99_v13 }
  0x1f   :  { %296 = vmatmul.msk.bf16.gmra.mxu2 %vm116_vm1, %v101_v14 }
  0x20   :  { %298 = vmatmul.msk.bf16.gmra.mxu3 %vm116_vm1, %v103_v15 }
  0x8b   :  { %v154_v17 = vpop.f32.mrf.mxu0  ;;  %v164_v18 = vpop.f32.mrf.mxu1 }
  0x8c   :  { %v198_v19 = vmul.f32 %v452_v5, %v154_v17  ;;  %v202_v20 = vmul.f32 %v452_v5, %v164_v18 }
  0x8e   :  { %v218_v21 = vadd.f32 %v457_v16, %v198_v19  ;;  %v222_v22 = vadd.f32 %v457_v16, %v202_v20 }
  0x90   :  { %v234_v23 = vmax.f32 %v218_v21, 0.0  ;;  %v238_v24 = vmax.f32 %v222_v22, 0.0 }
  0x92   :  { %v250_v25 = vpack.c.bf16 %v234_v23, %v234_v23  ;;  %v254_v26 = vpack.c.bf16 %v238_v24, %v238_v24  ;;  %v174_v27 = vpop.f32.mrf.mxu2 }
  0x93   :  { %v206_v28 = vmul.f32 %v452_v5, %v174_v27  ;;  %v156_v29 = vpop.f32.mrf.mxu0  ;;  %v166_v30 = vpop.f32.mrf.mxu1 }
  0x94   :  { %267 = vst.msk [vmem:[%s561_s6] sm:$0xf] %vm266_vm2, %v250_v25  ;;  %v184_v31 = vpop.f32.mrf.mxu3  ;;  %v199_v32 = vmul.f32 %v452_v5, %v156_v29  ;;  %v203_v33 = vmul.f32 %v452_v5, %v166_v30 }
  0x95   :  { %271 = vst.msk [vmem:[%s561_s6 + $0x10] sm:$0xf] %vm266_vm2, %v254_v26  ;;  %v226_v34 = vadd.f32 %v457_v16, %v206_v28  ;;  %v210_v35 = vmul.f32 %v452_v5, %v184_v31 }
  0x96   :  { %v219_v36 = vadd.f32 %v457_v16, %v199_v32  ;;  %v223_v37 = vadd.f32 %v457_v16, %v203_v33 }
  0x97   :  { %v242_v38 = vmax.f32 %v226_v34, 0.0  ;;  %v230_v39 = vadd.f32 %v457_v16, %v210_v35 }
  0x98   :  { %v235_v40 = vmax.f32 %v219_v36, 0.0  ;;  %v239_v41 = vmax.f32 %v223_v37, 0.0 }
  0x99   :  { %v258_v42 = vpack.c.bf16 %v242_v38, %v242_v38  ;;  %v246_v43 = vmax.f32 %v230_v39, 0.0 }
  0x9a   :  { %v251_v44 = vpack.c.bf16 %v235_v40, %v235_v40  ;;  %v255_v45 = vpack.c.bf16 %v239_v41, %v239_v41  ;;  %v176_v46 = vpop.f32.mrf.mxu2 }
  0x9b   :  { %275 = vst.msk [vmem:[%s561_s6 + $0x20] sm:$0xf] %vm266_vm2, %v258_v42  ;;  %v262_v47 = vpack.c.bf16 %v246_v43, %v246_v43  ;;  %v207_v48 = vmul.f32 %v452_v5, %v176_v46  ;;  %v159_v49 = vpop.f32.mrf.mxu0  ;;  %v169_v50 = vpop.f32.mrf.mxu1 }
  0x9c   :  { %268 = vst.msk [vmem:[%s561_s6 + $0x4] sm:$0xf] %vm266_vm2, %v251_v44  ;;  %v186_v51 = vpop.f32.mrf.mxu3  ;;  %v200_v52 = vmul.f32 %v452_v5, %v159_v49  ;;  %v204_v53 = vmul.f32 %v452_v5, %v169_v50 }
  0x9d   :  { %279 = vst.msk [vmem:[%s561_s6 + $0x30] sm:$0xf] %vm266_vm2, %v262_v47  ;;  %v227_v54 = vadd.f32 %v457_v16, %v207_v48  ;;  %v211_v55 = vmul.f32 %v452_v5, %v186_v51 }
  0x9e   :  { %272 = vst.msk [vmem:[%s561_s6 + $0x14] sm:$0xf] %vm266_vm2, %v255_v45  ;;  %v220_v56 = vadd.f32 %v457_v16, %v200_v52  ;;  %v224_v57 = vadd.f32 %v457_v16, %v204_v53 }
  0x9f   :  { %v243_v58 = vmax.f32 %v227_v54, 0.0  ;;  %v231_v59 = vadd.f32 %v457_v16, %v211_v55 }
  0xa0   :  { %v236_v60 = vmax.f32 %v220_v56, 0.0  ;;  %v240_v61 = vmax.f32 %v224_v57, 0.0 }
  0xa1   :  { %v259_v62 = vpack.c.bf16 %v243_v58, %v243_v58  ;;  %v247_v63 = vmax.f32 %v231_v59, 0.0 }
  0xa2   :  { %v252_v0 = vpack.c.bf16 %v236_v60, %v236_v60  ;;  %v256_v1 = vpack.c.bf16 %v240_v61, %v240_v61  ;;  %v179_v2 = vpop.f32.mrf.mxu2 }
  0xa3   :  { %276 = vst.msk [vmem:[%s561_s6 + $0x24] sm:$0xf] %vm266_vm2, %v259_v62  ;;  %v263_v3 = vpack.c.bf16 %v247_v63, %v247_v63  ;;  %v208_v6 = vmul.f32 %v452_v5, %v179_v2  ;;  %v161_v7 = vpop.f32.mrf.mxu0  ;;  %v171_v4 = vpop.f32.mrf.mxu1 }
  0xa4   :  { %269 = vst.msk [vmem:[%s561_s6 + $0x8] sm:$0xf] %vm266_vm2, %v252_v0  ;;  %v189_v8 = vpop.f32.mrf.mxu3  ;;  %v201_v9 = vmul.f32 %v452_v5, %v161_v7  ;;  %v205_v10 = vmul.f32 %v452_v5, %v171_v4 }
  0xa5   :  { %280 = vst.msk [vmem:[%s561_s6 + $0x34] sm:$0xf] %vm266_vm2, %v263_v3  ;;  %v228_v11 = vadd.f32 %v457_v16, %v208_v6  ;;  %v212_v12 = vmul.f32 %v452_v5, %v189_v8 }
  0xa6   :  { %273 = vst.msk [vmem:[%s561_s6 + $0x18] sm:$0xf] %vm266_vm2, %v256_v1  ;;  %v221_v13 = vadd.f32 %v457_v16, %v201_v9  ;;  %v225_v14 = vadd.f32 %v457_v16, %v205_v10 }
  0xa7   :  { %v244_v15 = vmax.f32 %v228_v11, 0.0  ;;  %v232_v17 = vadd.f32 %v457_v16, %v212_v12 }
  0xa8   :  { %v237_v18 = vmax.f32 %v221_v13, 0.0  ;;  %v241_v19 = vmax.f32 %v225_v14, 0.0 }
  0xa9   :  { %v260_v20 = vpack.c.bf16 %v244_v15, %v244_v15  ;;  %v248_v21 = vmax.f32 %v232_v17, 0.0 }
  0xaa   :  { %v253_v22 = vpack.c.bf16 %v237_v18, %v237_v18  ;;  %v257_v23 = vpack.c.bf16 %v241_v19, %v241_v19  ;;  %v181_v24 = vpop.f32.mrf.mxu2 }
  0xab   :  { %277 = vst.msk [vmem:[%s561_s6 + $0x28] sm:$0xf] %vm266_vm2, %v260_v20  ;;  %v264_v25 = vpack.c.bf16 %v248_v21, %v248_v21  ;;  %v209_v26 = vmul.f32 %v452_v5, %v181_v24 }
  0xac   :  { %270 = vst.msk [vmem:[%s561_s6 + $0xc] sm:$0xf] %vm266_vm2, %v253_v22  ;;  %v191_v27 = vpop.f32.mrf.mxu3 }
  0xad   :  { %281 = vst.msk [vmem:[%s561_s6 + $0x38] sm:$0xf] %vm266_vm2, %v264_v25  ;;  %v229_v28 = vadd.f32 %v457_v16, %v209_v26  ;;  %v213_v29 = vmul.f32 %v452_v5, %v191_v27 }
  0xae   :  { %274 = vst.msk [vmem:[%s561_s6 + $0x1c] sm:$0xf] %vm266_vm2, %v257_v23 }
  0xaf   :  { %v245_v30 = vmax.f32 %v229_v28, 0.0  ;;  %v233_v31 = vadd.f32 %v457_v16, %v213_v29 }
  0xb1   :  { %v261_v32 = vpack.c.bf16 %v245_v30, %v245_v30  ;;  %v249_v33 = vmax.f32 %v233_v31, 0.0 }
  0xb3   :  { %278 = vst.msk [vmem:[%s561_s6 + $0x2c] sm:$0xf] %vm266_vm2, %v261_v32  ;;  %v265_v34 = vpack.c.bf16 %v249_v33, %v249_v33 }
  0xb5   :  { %282 = vst.msk [vmem:[%s561_s6 + $0x3c] sm:$0xf] %vm266_vm2, %v265_v34 }

// kernel: densenet_forward.27
= control target key start
LH: loop header
LB: loop body
LE: loop exit
PB: predicated region body
PF: predicated region fallthrough
CT: control target
= control target key end

     0   :  { %vm96_vm0 = vcmask 130048   ;;  %vm1374_vm1 = vcmask 64512   ;;  %s2497_s1 = inlined_call_operand.vmem [shape: bf16[9,16,8], index: 1, kind: input, shape index: {}]   ;;  %s2498_s0 = inlined_call_operand.vmem [shape: bf16[9,128,16], index: 0, kind: input, shape index: {}]   ;;  %s2499_s2 = inlined_call_operand.vmem [shape: f32[128,8], index: 2, kind: output, shape index: {}]  }
   0x1   :  { %v1952_v0 = vld [vmem:[%s2497_s1 + $0x8] sm:$0xff]  ;;  %v1946_v1 = vld [vmem:[%s2498_s0 + $0x50] sm:$0xff]  ;;  %v1948_v2 = vld [vmem:[%s2498_s0 + $0x60] sm:$0xff] }
   0x2   :  { %v1961_v3 = vld [vmem:[%s2497_s1 + $0x10] sm:$0xff]  ;;  %2016 = vmatpush.bf16.msra.mxu1 %v1952_v0  ;;  %2017 = vmatpush.bf16.msra.mxu2 %v1952_v0  ;;  %v1944_v5 = vld [vmem:[%s2498_s0 + $0x40] sm:$0xff]  ;;  %v1970_v6 = vld [vmem:[%s2497_s1 + $0x18] sm:$0xff] }
   0x3   :  { %v1950_v4 = vld [vmem:[%s2498_s0 + $0x70] sm:$0xff]  ;;  %2018 = vmatpush.bf16.msra.mxu3 %v1952_v0  ;;  %128 = vmatpush.bf16.msra.mxu0 %v1952_v0  ;;  %v1943_v7 = vld [vmem:[%s2497_s1] sm:$0xff]  ;;  %v2006_v10 = vld [vmem:[%s2497_s1 + $0x38] sm:$0xff] }
   0x4   :  { %v1979_v8 = vld [vmem:[%s2497_s1 + $0x20] sm:$0xff]  ;;  %v1997_v9 = vld [vmem:[%s2497_s1 + $0x30] sm:$0xff]  ;;  %v1988_v11 = vld [vmem:[%s2497_s1 + $0x28] sm:$0xff] }
   0x5   :  { %1451 = vmatmul.msk.bf16.vlgmr.msra.gmra.mxu1 %vm96_vm0, %v1946_v1  ;;  %1453 = vmatmul.msk.bf16.vlgmr.msra.gmra.mxu2 %vm96_vm0, %v1948_v2  ;;  %v2015_v12 = vld [vmem:[%s2497_s1 + $0x40] sm:$0xff]  ;;  %v1947_v13 = vld [vmem:[%s2498_s0 + $0x58] sm:$0xff]  ;;  %v1949_v14 = vld [vmem:[%s2498_s0 + $0x68] sm:$0xff] }
   0x6   :  { %386 = vmatpush.bf16.msrb.mxu2 %v1961_v3  ;;  %1455 = vmatmul.msk.bf16.vlgmr.msra.gmra.mxu3 %vm96_vm0, %v1950_v4  ;;  %v1951_v15 = vld [vmem:[%s2498_s0 + $0x78] sm:$0xff]  ;;  %v1945_v16 = vld [vmem:[%s2498_s0 + $0x48] sm:$0xff]  ;;  %v1935_v17 = vld [vmem:[%s2498_s0] sm:$0xff] }
   0x7   :  { %541 = vmatpush.bf16.msrb.mxu3 %v1970_v6  ;;  %1449 = vmatmul.msk.bf16.vlgmr.msra.gmra.mxu0 %vm96_vm0, %v1944_v5  ;;  %v1953_v18 = vld [vmem:[%s2498_s0 + $0x80] sm:$0xff]  ;;  %v1936_v21 = vld [vmem:[%s2498_s0 + $0x8] sm:$0xff]  ;;  %v1937_v25 = vld [vmem:[%s2498_s0 + $0x10] sm:$0xff] }
   0x8   :  { %247 = vmatpush.bf16.msrb.mxu1 %v1943_v7  ;;  %696 = vmatpush.bf16.msrb.mxu0 %v1979_v8  ;;  %v1962_v19 = vld [vmem:[%s2498_s0 + $0xc0] sm:$0xff]  ;;  %v1954_v22 = vld [vmem:[%s2498_s0 + $0x88] sm:$0xff]  ;;  %v1955_v26 = vld [vmem:[%s2498_s0 + $0x90] sm:$0xff] }
   0x9   :  { %v1971_v20 = vld [vmem:[%s2498_s0 + $0x100] sm:$0xff]  ;;  %v1963_v23 = vld [vmem:[%s2498_s0 + $0xc8] sm:$0xff]  ;;  %v1964_v27 = vld [vmem:[%s2498_s0 + $0xd0] sm:$0xff] }
   0xa   :  { %1006 = vmatpush.bf16.msra.mxu2 %v1997_v9  ;;  %v1972_v24 = vld [vmem:[%s2498_s0 + $0x108] sm:$0xff]  ;;  %v1973_v28 = vld [vmem:[%s2498_s0 + $0x110] sm:$0xff]  ;;  %v1938_v29 = vld [vmem:[%s2498_s0 + $0x18] sm:$0xff] }
   0xb   :  { %1161 = vmatpush.bf16.msra.mxu3 %v2006_v10  ;;  %v1956_v30 = vld [vmem:[%s2498_s0 + $0x98] sm:$0xff]  ;;  %v1939_v33 = vld [vmem:[%s2498_s0 + $0x20] sm:$0xff]  ;;  %v1940_v37 = vld [vmem:[%s2498_s0 + $0x28] sm:$0xff] }
   0xc   :  { %851 = vmatpush.bf16.msra.mxu1 %v1988_v11  ;;  %1316 = vmatpush.bf16.msra.mxu0 %v2015_v12  ;;  %v1965_v31 = vld [vmem:[%s2498_s0 + $0xd8] sm:$0xff]  ;;  %v1957_v34 = vld [vmem:[%s2498_s0 + $0xa0] sm:$0xff]  ;;  %v1958_v38 = vld [vmem:[%s2498_s0 + $0xa8] sm:$0xff] }
   0xd   :  { %v1974_v32 = vld [vmem:[%s2498_s0 + $0x118] sm:$0xff]  ;;  %v1966_v35 = vld [vmem:[%s2498_s0 + $0xe0] sm:$0xff]  ;;  %v1967_v39 = vld [vmem:[%s2498_s0 + $0xe8] sm:$0xff] }
   0xe   :  { %v1975_v36 = vld [vmem:[%s2498_s0 + $0x120] sm:$0xff]  ;;  %v1976_v40 = vld [vmem:[%s2498_s0 + $0x128] sm:$0xff]  ;;  %v1941_v41 = vld [vmem:[%s2498_s0 + $0x30] sm:$0xff] }
   0xf   :  { %v1959_v42 = vld [vmem:[%s2498_s0 + $0xb0] sm:$0xff]  ;;  %v1942_v53 = vld [vmem:[%s2498_s0 + $0x38] sm:$0xff]  ;;  %v1980_v1 = vld [vmem:[%s2498_s0 + $0x140] sm:$0xff] }
  0x10   :  { %v1968_v44 = vld [vmem:[%s2498_s0 + $0xf0] sm:$0xff]  ;;  %v1960_v54 = vld [vmem:[%s2498_s0 + $0xb8] sm:$0xff]  ;;  %v1989_v2 = vld [vmem:[%s2498_s0 + $0x180] sm:$0xff] }
  0x11   :  { %v1977_v45 = vld [vmem:[%s2498_s0 + $0x130] sm:$0xff]  ;;  %v1969_v56 = vld [vmem:[%s2498_s0 + $0xf8] sm:$0xff]  ;;  %v1998_v4 = vld [vmem:[%s2498_s0 + $0x1c0] sm:$0xff] }
  0x12   :  { %v1978_v57 = vld [vmem:[%s2498_s0 + $0x138] sm:$0xff]  ;;  %v2007_v5 = vld [vmem:[%s2498_s0 + $0x200] sm:$0xff] }
  0x15   :  { %1452 = vmatmul.msk.bf16.gmra.mxu1 %vm96_vm0, %v1947_v13  ;;  %1454 = vmatmul.msk.bf16.gmra.mxu2 %vm96_vm0, %v1949_v14 }
  0x16   :  { %1456 = vmatmul.msk.bf16.gmra.mxu3 %vm96_vm0, %v1951_v15 }
  0x17   :  { %1450 = vmatmul.msk.bf16.gmra.mxu0 %vm96_vm0, %v1945_v16 }
  0x25   :  { %1493 = vmatmul.msk.bf16.vlgmr.msrb.gmra.mxu1 %vm96_vm0, %v1935_v17  ;;  %1555 = vmatmul.msk.bf16.vlgmr.msrb.gmra.mxu2 %vm96_vm0, %v1953_v18 }
  0x26   :  { %1617 = vmatmul.msk.bf16.vlgmr.msrb.gmra.mxu3 %vm96_vm0, %v1962_v19  ;;  %v1981_v19 = vld [vmem:[%s2498_s0 + $0x148] sm:$0xff] }
  0x27   :  { %1679 = vmatmul.msk.bf16.vlgmr.msrb.gmra.mxu0 %vm96_vm0, %v1971_v20  ;;  %v1990_v20 = vld [vmem:[%s2498_s0 + $0x188] sm:$0xff] }
  0x35   :  { %1494 = vmatmul.msk.bf16.gmra.mxu1 %vm96_vm0, %v1936_v21  ;;  %1556 = vmatmul.msk.bf16.gmra.mxu2 %vm96_vm0, %v1954_v22  ;;  %v1999_v22 = vld [vmem:[%s2498_s0 + $0x1c8] sm:$0xff] }
  0x36   :  { %1618 = vmatmul.msk.bf16.gmra.mxu3 %vm96_vm0, %v1963_v23  ;;  %v2008_v23 = vld [vmem:[%s2498_s0 + $0x208] sm:$0xff] }
  0x37   :  { %1680 = vmatmul.msk.bf16.gmra.mxu0 %vm96_vm0, %v1972_v24 }
  0x45   :  { %1495 = vmatmul.msk.bf16.gmra.mxu1 %vm96_vm0, %v1937_v25  ;;  %1557 = vmatmul.msk.bf16.gmra.mxu2 %vm96_vm0, %v1955_v26 }
  0x46   :  { %1619 = vmatmul.msk.bf16.gmra.mxu3 %vm96_vm0, %v1964_v27 }
  0x47   :  { %1681 = vmatmul.msk.bf16.gmra.mxu0 %vm96_vm0, %v1973_v28 }
  0x55   :  { %1496 = vmatmul.msk.bf16.gmra.mxu1 %vm96_vm0, %v1938_v29  ;;  %1558 = vmatmul.msk.bf16.gmra.mxu2 %vm96_vm0, %v1956_v30 }
  0x56   :  { %1620 = vmatmul.msk.bf16.gmra.mxu3 %vm96_vm0, %v1965_v31 }
  0x57   :  { %1682 = vmatmul.msk.bf16.gmra.mxu0 %vm96_vm0, %v1974_v32 }
  0x65   :  { %1497 = vmatmul.msk.bf16.gmra.mxu1 %vm96_vm0, %v1939_v33  ;;  %1559 = vmatmul.msk.bf16.gmra.mxu2 %vm96_vm0, %v1957_v34 }
  0x66   :  { %1621 = vmatmul.msk.bf16.gmra.mxu3 %vm96_vm0, %v1966_v35 }
  0x67   :  { %1683 = vmatmul.msk.bf16.gmra.mxu0 %vm96_vm0, %v1975_v36 }
  0x75   :  { %1498 = vmatmul.msk.bf16.gmra.mxu1 %vm96_vm0, %v1940_v37  ;;  %1560 = vmatmul.msk.bf16.gmra.mxu2 %vm96_vm0, %v1958_v38 }
  0x76   :  { %1622 = vmatmul.msk.bf16.gmra.mxu3 %vm96_vm0, %v1967_v39  ;;  %v1982_v39 = vld [vmem:[%s2498_s0 + $0x150] sm:$0xff] }
  0x77   :  { %1684 = vmatmul.msk.bf16.gmra.mxu0 %vm96_vm0, %v1976_v40  ;;  %v1991_v40 = vld [vmem:[%s2498_s0 + $0x190] sm:$0xff] }
  0x82   :  { %v2195_v43 = vpop.f32.mrf.mxu1 }
  0x84   :  { %v130_v46 = vpop.f32.mrf.mxu0 }
  0x85   :  { %1499 = vmatmul.msk.bf16.gmra.mxu1 %vm96_vm0, %v1941_v41  ;;  %1561 = vmatmul.msk.bf16.gmra.mxu2 %vm96_vm0, %v1959_v42  ;;  %v2000_v42 = vld [vmem:[%s2498_s0 + $0x1d0] sm:$0xff] }
  0x86   :  { %1623 = vmatmul.msk.bf16.gmra.mxu3 %vm96_vm0, %v1968_v44  ;;  %v2009_v44 = vld [vmem:[%s2498_s0 + $0x210] sm:$0xff] }
  0x87   :  { %1685 = vmatmul.msk.bf16.gmra.mxu0 %vm96_vm0, %v1977_v45 }
  0x88   :  { %v2207_v47 = vpop.f32.mrf.mxu2 }
  0x89   :  { %v2209_v48 = vpop.f32.mrf.mxu3 }
  0x8a   :  { %v2211_v49 = vpop.f32.mrf.mxu1 }
  0x8c   :  { %v132_v50 = vpop.f32.mrf.mxu0 }
  0x90   :  { %v2213_v51 = vpop.f32.mrf.mxu2 }
  0x91   :  { %v2215_v52 = vpop.f32.mrf.mxu3 }
  0x92   :  { %v2223_v55 = vpop.f32.mrf.mxu1 }
  0x94   :  { %v135_v58 = vpop.f32.mrf.mxu0 }
  0x95   :  { %1500 = vmatmul.msk.bf16.gmra.mxu1 %vm96_vm0, %v1942_v53  ;;  %1562 = vmatmul.msk.bf16.gmra.mxu2 %vm96_vm0, %v1960_v54 }
  0x96   :  { %1624 = vmatmul.msk.bf16.gmra.mxu3 %vm96_vm0, %v1969_v56 }
  0x97   :  { %1686 = vmatmul.msk.bf16.gmra.mxu0 %vm96_vm0, %v1978_v57 }
  0x98   :  { %v2235_v59 = vpop.f32.mrf.mxu2 }
  0x99   :  { %v2237_v60 = vpop.f32.mrf.mxu3 }
  0x9a   :  { %v2239_v61 = vpop.f32.mrf.mxu1 }
  0x9c   :  { %v137_v62 = vpop.f32.mrf.mxu0 }
  0xa0   :  { %v2241_v63 = vpop.f32.mrf.mxu2 }
  0xa1   :  { %v2243_v0 = vpop.f32.mrf.mxu3 }
  0xa2   :  { %v249_v3 = vpop.f32.mrf.mxu1 }
  0xa3   :  { %v250_v6 = vadd.f32 %v249_v3, %v130_v46 }
  0xa4   :  { %v698_v7 = vpop.f32.mrf.mxu0 }
  0xa5   :  { %1741 = vmatmul.msk.bf16.vlgmr.msra.gmra.mxu1 %vm96_vm0, %v1980_v1  ;;  %1803 = vmatmul.msk.bf16.vlgmr.msra.gmra.mxu2 %vm96_vm0, %v1989_v2 }
  0xa6   :  { %1865 = vmatmul.msk.bf16.vlgmr.msra.gmra.mxu3 %vm96_vm0, %v1998_v4 }
  0xa7   :  { %1927 = vmatmul.msk.bf16.vlgmr.msra.gmra.mxu0 %vm96_vm0, %v2007_v5 }
  0xa8   :  { %v388_v8 = vpop.f32.mrf.mxu2 }
  0xa9   :  { %v428_v9 = vadd.f32 %v388_v8, %v250_v6  ;;  %v543_v10 = vpop.f32.mrf.mxu3  ;;  %v1983_v6 = vld [vmem:[%s2498_s0 + $0x158] sm:$0xff] }
  0xaa   :  { %v251_v11 = vpop.f32.mrf.mxu1 }
  0xab   :  { %v583_v12 = vadd.f32 %v543_v10, %v428_v9  ;;  %v252_v13 = vadd.f32 %v251_v11, %v132_v50  ;;  %v2001_v9 = vld [vmem:[%s2498_s0 + $0x1d8] sm:$0xff] }
  0xac   :  { %v700_v14 = vpop.f32.mrf.mxu0 }
  0xad   :  { %v2261_v15 = vadd.f32 %v698_v7, %v583_v12  ;;  %v1992_v7 = vld [vmem:[%s2498_s0 + $0x198] sm:$0xff] }
  0xb0   :  { %v390_v16 = vpop.f32.mrf.mxu2 }
  0xb1   :  { %v429_v17 = vadd.f32 %v390_v16, %v252_v13  ;;  %v545_v18 = vpop.f32.mrf.mxu3 }
  0xb2   :  { %v254_v21 = vpop.f32.mrf.mxu1 }
  0xb3   :  { %v584_v24 = vadd.f32 %v545_v18, %v429_v17  ;;  %v255_v25 = vadd.f32 %v254_v21, %v135_v58 }
  0xb4   :  { %v703_v26 = vpop.f32.mrf.mxu0 }
  0xb5   :  { %1742 = vmatmul.msk.bf16.gmra.mxu1 %vm96_vm0, %v1981_v19  ;;  %1804 = vmatmul.msk.bf16.gmra.mxu2 %vm96_vm0, %v1990_v20  ;;  %v2277_v27 = vadd.f32 %v700_v14, %v584_v24 }
  0xb6   :  { %1866 = vmatmul.msk.bf16.gmra.mxu3 %vm96_vm0, %v1999_v22 }
  0xb7   :  { %1928 = vmatmul.msk.bf16.gmra.mxu0 %vm96_vm0, %v2008_v23 }
  0xb8   :  { %v393_v28 = vpop.f32.mrf.mxu2 }
  0xb9   :  { %v430_v29 = vadd.f32 %v393_v28, %v255_v25  ;;  %v548_v30 = vpop.f32.mrf.mxu3  ;;  %v1984_v25 = vld [vmem:[%s2498_s0 + $0x160] sm:$0xff] }
  0xba   :  { %v256_v31 = vpop.f32.mrf.mxu1 }
  0xbb   :  { %v585_v32 = vadd.f32 %v548_v30, %v430_v29  ;;  %v257_v33 = vadd.f32 %v256_v31, %v137_v62  ;;  %v2002_v29 = vld [vmem:[%s2498_s0 + $0x1e0] sm:$0xff] }
  0xbc   :  { %v705_v34 = vpop.f32.mrf.mxu0 }
  0xbd   :  { %v2281_v35 = vadd.f32 %v703_v26, %v585_v32  ;;  %v1993_v26 = vld [vmem:[%s2498_s0 + $0x1a0] sm:$0xff] }
  0xc0   :  { %v395_v36 = vpop.f32.mrf.mxu2 }
  0xc1   :  { %v431_v37 = vadd.f32 %v395_v36, %v257_v33  ;;  %v550_v38 = vpop.f32.mrf.mxu3 }
  0xc2   :  { %v259_v41 = vpop.f32.mrf.mxu1 }
  0xc3   :  { %v586_v45 = vadd.f32 %v550_v38, %v431_v37  ;;  %v260_v46 = vadd.f32 %v259_v41, %v2195_v43 }
  0xc4   :  { %v708_v50 = vpop.f32.mrf.mxu0 }
  0xc5   :  { %1743 = vmatmul.msk.bf16.gmra.mxu1 %vm96_vm0, %v1982_v39  ;;  %1805 = vmatmul.msk.bf16.gmra.mxu2 %vm96_vm0, %v1991_v40  ;;  %v2298_v53 = vadd.f32 %v705_v34, %v586_v45 }
  0xc6   :  { %1867 = vmatmul.msk.bf16.gmra.mxu3 %vm96_vm0, %v2000_v42 }
  0xc7   :  { %1929 = vmatmul.msk.bf16.gmra.mxu0 %vm96_vm0, %v2009_v44 }
  0xc8   :  { %v398_v54 = vpop.f32.mrf.mxu2 }
  0xc9   :  { %v432_v56 = vadd.f32 %v398_v54, %v260_v46  ;;  %v553_v57 = vpop.f32.mrf.mxu3 }
  0xca   :  { %v261_v58 = vpop.f32.mrf.mxu1 }
  0xcb   :  { %v587_v62 = vadd.f32 %v553_v57, %v432_v56  ;;  %v262_v1 = vadd.f32 %v261_v58, %v2211_v49  ;;  %v2010_v49 = vld [vmem:[%s2498_s0 + $0x218] sm:$0xff]  ;;  %v2003_v56 = vld [vmem:[%s2498_s0 + $0x1e8] sm:$0xff] }
  0xcc   :  { %v710_v2 = vpop.f32.mrf.mxu0 }
  0xcd   :  { %v2303_v43 = vadd.f32 %v708_v50, %v587_v62  ;;  %v1985_v50 = vld [vmem:[%s2498_s0 + $0x168] sm:$0xff] }
  0xd0   :  { %v400_v3 = vpop.f32.mrf.mxu2 }
  0xd1   :  { %v433_v4 = vadd.f32 %v400_v3, %v262_v1  ;;  %v555_v5 = vpop.f32.mrf.mxu3 }
  0xd2   :  { %v264_v8 = vpop.f32.mrf.mxu1 }
  0xd3   :  { %v588_v10 = vadd.f32 %v555_v5, %v433_v4  ;;  %v265_v11 = vadd.f32 %v264_v8, %v2223_v55 }
  0xd4   :  { %v713_v12 = vpop.f32.mrf.mxu0 }
  0xd5   :  { %1744 = vmatmul.msk.bf16.gmra.mxu1 %vm96_vm0, %v1983_v6  ;;  %1806 = vmatmul.msk.bf16.gmra.mxu2 %vm96_vm0, %v1992_v7  ;;  %v2320_v13 = vadd.f32 %v710_v2, %v588_v10 }
  0xd6   :  { %1868 = vmatmul.msk.bf16.gmra.mxu3 %vm96_vm0, %v2001_v9 }
  0xd7   :  { %1930 = vmatmul.msk.bf16.gmra.mxu0 %vm96_vm0, %v2010_v49 }
  0xd8   :  { %v403_v14 = vpop.f32.mrf.mxu2 }
  0xd9   :  { %v434_v16 = vadd.f32 %v403_v14, %v265_v11  ;;  %v558_v17 = vpop.f32.mrf.mxu3 }
  0xda   :  { %v266_v18 = vpop.f32.mrf.mxu1 }
  0xdb   :  { %v589_v19 = vadd.f32 %v558_v17, %v434_v16  ;;  %v267_v20 = vadd.f32 %v266_v18, %v2239_v61  ;;  %v2011_v61 = vld [vmem:[%s2498_s0 + $0x220] sm:$0xff]  ;;  %v2004_v16 = vld [vmem:[%s2498_s0 + $0x1f0] sm:$0xff] }
  0xdc   :  { %v715_v21 = vpop.f32.mrf.mxu0 }
  0xdd   :  { %v2325_v55 = vadd.f32 %v713_v12, %v589_v19  ;;  %v1986_v12 = vld [vmem:[%s2498_s0 + $0x170] sm:$0xff] }
  0xe0   :  { %v405_v22 = vpop.f32.mrf.mxu2 }
  0xe1   :  { %v435_v23 = vadd.f32 %v405_v22, %v267_v20  ;;  %v560_v24 = vpop.f32.mrf.mxu3 }
  0xe2   :  { %v269_v28 = vpop.f32.mrf.mxu1 }
  0xe3   :  { %v590_v30 = vadd.f32 %v560_v24, %v435_v23  ;;  %v270_v33 = vadd.f32 %v269_v28, %v2207_v47  ;;  %v1994_v47 = vld [vmem:[%s2498_s0 + $0x1a8] sm:$0xff] }
  0xe4   :  { %v718_v31 = vpop.f32.mrf.mxu0 }
  0xe5   :  { %1745 = vmatmul.msk.bf16.gmra.mxu1 %vm96_vm0, %v1984_v25  ;;  %1807 = vmatmul.msk.bf16.gmra.mxu2 %vm96_vm0, %v1993_v26  ;;  %v2341_v32 = vadd.f32 %v715_v21, %v590_v30 }
  0xe6   :  { %1869 = vmatmul.msk.bf16.gmra.mxu3 %vm96_vm0, %v2002_v29 }
  0xe7   :  { %1931 = vmatmul.msk.bf16.gmra.mxu0 %vm96_vm0, %v2011_v61 }
  0xe8   :  { %v408_v34 = vpop.f32.mrf.mxu2 }
  0xe9   :  { %v436_v36 = vadd.f32 %v408_v34, %v270_v33  ;;  %v563_v37 = vpop.f32.mrf.mxu3  ;;  %v1987_v33 = vld [vmem:[%s2498_s0 + $0x178] sm:$0xff] }
  0xea   :  { %v271_v38 = vpop.f32.mrf.mxu1 }
  0xeb   :  { %v591_v39 = vadd.f32 %v563_v37, %v436_v36  ;;  %v272_v42 = vadd.f32 %v271_v38, %v2213_v51  ;;  %v2012_v51 = vld [vmem:[%s2498_s0 + $0x228] sm:$0xff]  ;;  %v2005_v36 = vld [vmem:[%s2498_s0 + $0x1f8] sm:$0xff] }
  0xec   :  { %v720_v40 = vpop.f32.mrf.mxu0 }
  0xed   :  { %v2346_v41 = vadd.f32 %v718_v31, %v591_v39 }
  0xf0   :  { %v410_v44 = vpop.f32.mrf.mxu2 }
  0xf1   :  { %v437_v45 = vadd.f32 %v410_v44, %v272_v42  ;;  %v565_v46 = vpop.f32.mrf.mxu3 }
  0xf2   :  { %v274_v54 = vpop.f32.mrf.mxu1 }
  0xf3   :  { %v592_v57 = vadd.f32 %v565_v46, %v437_v45  ;;  %v275_v1 = vadd.f32 %v274_v54, %v2235_v59  ;;  %v1995_v59 = vld [vmem:[%s2498_s0 + $0x1b0] sm:$0xff] }
  0xf4   :  { %v723_v58 = vpop.f32.mrf.mxu0 }
  0xf5   :  { %1746 = vmatmul.msk.bf16.gmra.mxu1 %vm96_vm0, %v1985_v50  ;;  %1808 = vmatmul.msk.bf16.gmra.mxu2 %vm96_vm0, %v1994_v47  ;;  %v2363_v62 = vadd.f32 %v720_v40, %v592_v57 }
  0xf6   :  { %1870 = vmatmul.msk.bf16.gmra.mxu3 %vm96_vm0, %v2003_v56 }
  0xf7   :  { %1932 = vmatmul.msk.bf16.gmra.mxu0 %vm96_vm0, %v2012_v51 }
  0xf8   :  { %v413_v2 = vpop.f32.mrf.mxu2 }
  0xf9   :  { %v438_v3 = vadd.f32 %v413_v2, %v275_v1  ;;  %v568_v4 = vpop.f32.mrf.mxu3 }
  0xfa   :  { %v276_v5 = vpop.f32.mrf.mxu1 }
  0xfb   :  { %v593_v6 = vadd.f32 %v568_v4, %v438_v3  ;;  %v277_v9 = vadd.f32 %v276_v5, %v2241_v63  ;;  %v2013_v63 = vld [vmem:[%s2498_s0 + $0x230] sm:$0xff] }
  0xfc   :  { %v725_v7 = vpop.f32.mrf.mxu0 }
  0xfd   :  { %v2368_v8 = vadd.f32 %v723_v58, %v593_v6 }
 0x100   :  { %v415_v49 = vpop.f32.mrf.mxu2 }
 0x101   :  { %v439_v10 = vadd.f32 %v415_v49, %v277_v9  ;;  %v570_v11 = vpop.f32.mrf.mxu3 }
 0x102   :  { %v279_v14 = vpop.f32.mrf.mxu1 }
 0x103   :  { %v594_v17 = vadd.f32 %v570_v11, %v439_v10  ;;  %v280_v20 = vadd.f32 %v279_v14, %v2209_v48  ;;  %v1996_v48 = vld [vmem:[%s2498_s0 + $0x1b8] sm:$0xff] }
 0x104   :  { %v728_v18 = vpop.f32.mrf.mxu0 }
 0x105   :  { %1747 = vmatmul.msk.bf16.gmra.mxu1 %vm96_vm0, %v1986_v12  ;;  %1809 = vmatmul.msk.bf16.gmra.mxu2 %vm96_vm0, %v1995_v59  ;;  %v2385_v19 = vadd.f32 %v725_v7, %v594_v17 }
 0x106   :  { %1871 = vmatmul.msk.bf16.gmra.mxu3 %vm96_vm0, %v2004_v16 }
 0x107   :  { %1933 = vmatmul.msk.bf16.gmra.mxu0 %vm96_vm0, %v2013_v63 }
 0x108   :  { %v418_v21 = vpop.f32.mrf.mxu2 }
 0x109   :  { %v440_v22 = vadd.f32 %v418_v21, %v280_v20  ;;  %v573_v23 = vpop.f32.mrf.mxu3 }
 0x10a   :  { %v281_v24 = vpop.f32.mrf.mxu1 }
 0x10b   :  { %v595_v25 = vadd.f32 %v573_v23, %v440_v22  ;;  %v282_v29 = vadd.f32 %v281_v24, %v2215_v52  ;;  %v2014_v52 = vld [vmem:[%s2498_s0 + $0x238] sm:$0xff] }
 0x10c   :  { %v730_v26 = vpop.f32.mrf.mxu0 }
 0x10d   :  { %v2390_v28 = vadd.f32 %v728_v18, %v595_v25 }
 0x110   :  { %v420_v61 = vpop.f32.mrf.mxu2 }
 0x111   :  { %v441_v30 = vadd.f32 %v420_v61, %v282_v29  ;;  %v575_v31 = vpop.f32.mrf.mxu3 }
 0x112   :  { %v284_v34 = vpop.f32.mrf.mxu1 }
 0x113   :  { %v596_v37 = vadd.f32 %v575_v31, %v441_v30  ;;  %v285_v40 = vadd.f32 %v284_v34, %v2237_v60 }
 0x114   :  { %v733_v38 = vpop.f32.mrf.mxu0 }
 0x115   :  { %1748 = vmatmul.msk.bf16.gmra.mxu1 %vm96_vm0, %v1987_v33  ;;  %1810 = vmatmul.msk.bf16.gmra.mxu2 %vm96_vm0, %v1996_v48  ;;  %v2407_v39 = vadd.f32 %v730_v26, %v596_v37 }
 0x116   :  { %1872 = vmatmul.msk.bf16.gmra.mxu3 %vm96_vm0, %v2005_v36 }
 0x117   :  { %1934 = vmatmul.msk.bf16.gmra.mxu0 %vm96_vm0, %v2014_v52 }
 0x118   :  { %v423_v42 = vpop.f32.mrf.mxu2 }
 0x119   :  { %v442_v44 = vadd.f32 %v423_v42, %v285_v40  ;;  %v578_v45 = vpop.f32.mrf.mxu3 }
 0x11a   :  { %v286_v46 = vpop.f32.mrf.mxu1 }
 0x11b   :  { %v597_v50 = vadd.f32 %v578_v45, %v442_v44  ;;  %v287_v56 = vadd.f32 %v286_v46, %v2243_v0 }
 0x11c   :  { %v735_v47 = vpop.f32.mrf.mxu0 }
 0x11d   :  { %v2412_v54 = vadd.f32 %v733_v38, %v597_v50 }
 0x120   :  { %v425_v51 = vpop.f32.mrf.mxu2 }
 0x121   :  { %v443_v57 = vadd.f32 %v425_v51, %v287_v56  ;;  %v580_v58 = vpop.f32.mrf.mxu3 }
 0x122   :  { %v853_v1 = vpop.f32.mrf.mxu1 }
 0x123   :  { %v598_v2 = vadd.f32 %v580_v58, %v443_v57  ;;  %v893_v60 = vadd.f32 %v853_v1, %v2261_v15 }
 0x124   :  { %v1318_v3 = vpop.f32.mrf.mxu0 }
 0x125   :  { %v2415_v4 = vadd.f32 %v735_v47, %v598_v2 }
 0x128   :  { %v1008_v5 = vpop.f32.mrf.mxu2 }
 0x129   :  { %v1048_v6 = vadd.f32 %v1008_v5, %v893_v60  ;;  %v1163_v7 = vpop.f32.mrf.mxu3 }
 0x12a   :  { %v855_v9 = vpop.f32.mrf.mxu1 }
 0x12b   :  { %v1203_v49 = vadd.f32 %v1163_v7, %v1048_v6  ;;  %v894_v0 = vadd.f32 %v855_v9, %v2277_v27 }
 0x12c   :  { %v1320_v10 = vpop.f32.mrf.mxu0 }
 0x12d   :  { %v1358_v11 = vadd.f32 %v1318_v3, %v1203_v49 }
 0x12f   :  { %1375 = vst.msk [vmem:[%s2499_s2] sm:$0xff] %vm1374_vm1, %v1358_v11 }
 0x130   :  { %v1010_v12 = vpop.f32.mrf.mxu2 }
 0x131   :  { %v1049_v59 = vadd.f32 %v1010_v12, %v894_v0  ;;  %v1165_v14 = vpop.f32.mrf.mxu3 }
 0x132   :  { %v858_v16 = vpop.f32.mrf.mxu1 }
 0x133   :  { %v1204_v15 = vadd.f32 %v1165_v14, %v1049_v59  ;;  %v895_v18 = vadd.f32 %v858_v16, %v2281_v35 }
 0x134   :  { %v1323_v63 = vpop.f32.mrf.mxu0 }
 0x135   :  { %v1359_v17 = vadd.f32 %v1320_v10, %v1204_v15 }
 0x137   :  { %1376 = vst.msk [vmem:[%s2499_s2 + $0x8] sm:$0xff] %vm1374_vm1, %v1359_v17 }
 0x138   :  { %v1013_v20 = vpop.f32.mrf.mxu2 }
 0x139   :  { %v1050_v21 = vadd.f32 %v1013_v20, %v895_v18  ;;  %v1168_v22 = vpop.f32.mrf.mxu3 }
 0x13a   :  { %v860_v23 = vpop.f32.mrf.mxu1 }
 0x13b   :  { %v1205_v24 = vadd.f32 %v1168_v22, %v1050_v21  ;;  %v896_v26 = vadd.f32 %v860_v23, %v2298_v53 }
 0x13c   :  { %v1325_v27 = vpop.f32.mrf.mxu0 }
 0x13d   :  { %v1360_v25 = vadd.f32 %v1323_v63, %v1205_v24 }
 0x13f   :  { %1377 = vst.msk [vmem:[%s2499_s2 + $0x10] sm:$0xff] %vm1374_vm1, %v1360_v25 }
 0x140   :  { %v1015_v29 = vpop.f32.mrf.mxu2 }
 0x141   :  { %v1051_v61 = vadd.f32 %v1015_v29, %v896_v26  ;;  %v1170_v30 = vpop.f32.mrf.mxu3 }
 0x142   :  { %v863_v31 = vpop.f32.mrf.mxu1 }
 0x143   :  { %v1206_v33 = vadd.f32 %v1170_v30, %v1051_v61  ;;  %v897_v34 = vadd.f32 %v863_v31, %v2303_v43 }
 0x144   :  { %v1328_v35 = vpop.f32.mrf.mxu0 }
 0x145   :  { %v1361_v48 = vadd.f32 %v1325_v27, %v1206_v33 }
 0x147   :  { %1378 = vst.msk [vmem:[%s2499_s2 + $0x18] sm:$0xff] %vm1374_vm1, %v1361_v48 }
 0x148   :  { %v1018_v36 = vpop.f32.mrf.mxu2 }
 0x149   :  { %v1052_v52 = vadd.f32 %v1018_v36, %v897_v34  ;;  %v1173_v37 = vpop.f32.mrf.mxu3 }
 0x14a   :  { %v865_v38 = vpop.f32.mrf.mxu1 }
 0x14b   :  { %v1207_v40 = vadd.f32 %v1173_v37, %v1052_v52  ;;  %v898_v44 = vadd.f32 %v865_v38, %v2320_v13 }
 0x14c   :  { %v1330_v53 = vpop.f32.mrf.mxu0 }
 0x14d   :  { %v1362_v42 = vadd.f32 %v1328_v35, %v1207_v40 }
 0x14f   :  { %1379 = vst.msk [vmem:[%s2499_s2 + $0x20] sm:$0xff] %vm1374_vm1, %v1362_v42 }
 0x150   :  { %v1020_v45 = vpop.f32.mrf.mxu2 }
 0x151   :  { %v1053_v46 = vadd.f32 %v1020_v45, %v898_v44  ;;  %v1175_v50 = vpop.f32.mrf.mxu3 }
 0x152   :  { %v868_v47 = vpop.f32.mrf.mxu1 }
 0x153   :  { %v1208_v56 = vadd.f32 %v1175_v50, %v1053_v46  ;;  %v899_v57 = vadd.f32 %v868_v47, %v2325_v55 }
 0x154   :  { %v1333_v43 = vpop.f32.mrf.mxu0 }
 0x155   :  { %v1363_v51 = vadd.f32 %v1330_v53, %v1208_v56 }
 0x157   :  { %1380 = vst.msk [vmem:[%s2499_s2 + $0x28] sm:$0xff] %vm1374_vm1, %v1363_v51 }
 0x158   :  { %v1023_v58 = vpop.f32.mrf.mxu2 }
 0x159   :  { %v1054_v1 = vadd.f32 %v1023_v58, %v899_v57  ;;  %v1178_v2 = vpop.f32.mrf.mxu3 }
 0x15a   :  { %v870_v3 = vpop.f32.mrf.mxu1 }
 0x15b   :  { %v1209_v60 = vadd.f32 %v1178_v2, %v1054_v1  ;;  %v900_v6 = vadd.f32 %v870_v3, %v2341_v32 }
 0x15c   :  { %v1335_v13 = vpop.f32.mrf.mxu0 }
 0x15d   :  { %v1364_v5 = vadd.f32 %v1333_v43, %v1209_v60 }
 0x15f   :  { %1381 = vst.msk [vmem:[%s2499_s2 + $0x30] sm:$0xff] %vm1374_vm1, %v1364_v5 }
 0x160   :  { %v1025_v7 = vpop.f32.mrf.mxu2 }
 0x161   :  { %v1055_v9 = vadd.f32 %v1025_v7, %v900_v6  ;;  %v1180_v49 = vpop.f32.mrf.mxu3 }
 0x162   :  { %v873_v10 = vpop.f32.mrf.mxu1 }
 0x163   :  { %v1210_v11 = vadd.f32 %v1180_v49, %v1055_v9  ;;  %v901_v12 = vadd.f32 %v873_v10, %v2346_v41 }
 0x164   :  { %v1338_v55 = vpop.f32.mrf.mxu0 }
 0x165   :  { %v1365_v0 = vadd.f32 %v1335_v13, %v1210_v11 }
 0x167   :  { %1382 = vst.msk [vmem:[%s2499_s2 + $0x38] sm:$0xff] %vm1374_vm1, %v1365_v0 }
 0x168   :  { %v1028_v59 = vpop.f32.mrf.mxu2 }
 0x169   :  { %v1056_v14 = vadd.f32 %v1028_v59, %v901_v12  ;;  %v1183_v16 = vpop.f32.mrf.mxu3 }
 0x16a   :  { %v875_v15 = vpop.f32.mrf.mxu1 }
 0x16b   :  { %v1211_v63 = vadd.f32 %v1183_v16, %v1056_v14  ;;  %v902_v18 = vadd.f32 %v875_v15, %v2363_v62 }
 0x16c   :  { %v1340_v32 = vpop.f32.mrf.mxu0 }
 0x16d   :  { %v1366_v17 = vadd.f32 %v1338_v55, %v1211_v63 }
 0x16f   :  { %1383 = vst.msk [vmem:[%s2499_s2 + $0x40] sm:$0xff] %vm1374_vm1, %v1366_v17 }
 0x170   :  { %v1030_v20 = vpop.f32.mrf.mxu2 }
 0x171   :  { %v1057_v21 = vadd.f32 %v1030_v20, %v902_v18  ;;  %v1185_v22 = vpop.f32.mrf.mxu3 }
 0x172   :  { %v878_v23 = vpop.f32.mrf.mxu1 }
 0x173   :  { %v1212_v24 = vadd.f32 %v1185_v22, %v1057_v21  ;;  %v903_v25 = vadd.f32 %v878_v23, %v2368_v8 }
 0x174   :  { %v1343_v41 = vpop.f32.mrf.mxu0 }
 0x175   :  { %v1367_v27 = vadd.f32 %v1340_v32, %v1212_v24 }
 0x177   :  { %1384 = vst.msk [vmem:[%s2499_s2 + $0x48] sm:$0xff] %vm1374_vm1, %v1367_v27 }
 0x178   :  { %v1033_v26 = vpop.f32.mrf.mxu2 }
 0x179   :  { %v1058_v29 = vadd.f32 %v1033_v26, %v903_v25  ;;  %v1188_v61 = vpop.f32.mrf.mxu3 }
 0x17a   :  { %v880_v30 = vpop.f32.mrf.mxu1 }
 0x17b   :  { %v1213_v31 = vadd.f32 %v1188_v61, %v1058_v29  ;;  %v904_v35 = vadd.f32 %v880_v30, %v2385_v19 }
 0x17c   :  { %v1345_v62 = vpop.f32.mrf.mxu0 }
 0x17d   :  { %v1368_v33 = vadd.f32 %v1343_v41, %v1213_v31 }
 0x17f   :  { %1385 = vst.msk [vmem:[%s2499_s2 + $0x50] sm:$0xff] %vm1374_vm1, %v1368_v33 }
 0x180   :  { %v1035_v48 = vpop.f32.mrf.mxu2 }
 0x181   :  { %v1059_v34 = vadd.f32 %v1035_v48, %v904_v35  ;;  %v1190_v36 = vpop.f32.mrf.mxu3 }
 0x182   :  { %v883_v52 = vpop.f32.mrf.mxu1 }
 0x183   :  { %v1214_v37 = vadd.f32 %v1190_v36, %v1059_v34  ;;  %v905_v40 = vadd.f32 %v883_v52, %v2390_v28 }
 0x184   :  { %v1348_v38 = vpop.f32.mrf.mxu0 }
 0x185   :  { %v1369_v8 = vadd.f32 %v1345_v62, %v1214_v37 }
 0x187   :  { %1386 = vst.msk [vmem:[%s2499_s2 + $0x58] sm:$0xff] %vm1374_vm1, %v1369_v8 }
 0x188   :  { %v1038_v53 = vpop.f32.mrf.mxu2 }
 0x189   :  { %v1060_v42 = vadd.f32 %v1038_v53, %v905_v40  ;;  %v1193_v44 = vpop.f32.mrf.mxu3 }
 0x18a   :  { %v885_v45 = vpop.f32.mrf.mxu1 }
 0x18b   :  { %v1215_v46 = vadd.f32 %v1193_v44, %v1060_v42  ;;  %v906_v50 = vadd.f32 %v885_v45, %v2407_v39 }
 0x18c   :  { %v1350_v47 = vpop.f32.mrf.mxu0 }
 0x18d   :  { %v1370_v19 = vadd.f32 %v1348_v38, %v1215_v46 }
 0x18f   :  { %1387 = vst.msk [vmem:[%s2499_s2 + $0x60] sm:$0xff] %vm1374_vm1, %v1370_v19 }
 0x190   :  { %v1040_v56 = vpop.f32.mrf.mxu2 }
 0x191   :  { %v1061_v43 = vadd.f32 %v1040_v56, %v906_v50  ;;  %v1195_v51 = vpop.f32.mrf.mxu3 }
 0x192   :  { %v888_v57 = vpop.f32.mrf.mxu1 }
 0x193   :  { %v1216_v58 = vadd.f32 %v1195_v51, %v1061_v43  ;;  %v907_v1 = vadd.f32 %v888_v57, %v2412_v54 }
 0x194   :  { %v1353_v13 = vpop.f32.mrf.mxu0 }
 0x195   :  { %v1371_v28 = vadd.f32 %v1350_v47, %v1216_v58 }
 0x197   :  { %1388 = vst.msk [vmem:[%s2499_s2 + $0x68] sm:$0xff] %vm1374_vm1, %v1371_v28 }
 0x198   :  { %v1043_v2 = vpop.f32.mrf.mxu2 }
 0x199   :  { %v1062_v3 = vadd.f32 %v1043_v2, %v907_v1  ;;  %v1198_v60 = vpop.f32.mrf.mxu3 }
 0x19a   :  { %v890_v39 = vpop.f32.mrf.mxu1 }
 0x19b   :  { %v1217_v5 = vadd.f32 %v1198_v60, %v1062_v3  ;;  %v908_v7 = vadd.f32 %v890_v39, %v2415_v4 }
 0x19c   :  { %v1355_v55 = vpop.f32.mrf.mxu0 }
 0x19d   :  { %v1372_v6 = vadd.f32 %v1353_v13, %v1217_v5 }
 0x19f   :  { %1389 = vst.msk [vmem:[%s2499_s2 + $0x70] sm:$0xff] %vm1374_vm1, %v1372_v6 }
 0x1a0   :  { %v1045_v9 = vpop.f32.mrf.mxu2 }
 0x1a1   :  { %v1063_v49 = vadd.f32 %v1045_v9, %v908_v7  ;;  %v1200_v10 = vpop.f32.mrf.mxu3 }
 0x1a3   :  { %v1218_v11 = vadd.f32 %v1200_v10, %v1063_v49 }
 0x1a5   :  { %v1373_v54 = vadd.f32 %v1355_v55, %v1218_v11 }
 0x1a7   :  { %1390 = vst.msk [vmem:[%s2499_s2 + $0x78] sm:$0xff] %vm1374_vm1, %v1373_v54 }

// kernel: densenet_forward.30
= control target key start
LH: loop header
LB: loop body
LE: loop exit
PB: predicated region body
PF: predicated region fallthrough
CT: control target
= control target key end

     0   :  { %vm127_vm0 = vcmask 261120   ;;  %vm153_vm1 = vcmask 130048   ;;  %s323_s3 = inlined_call_operand.vmem [shape: bf16[32,16], index: 3, kind: input, shape index: {}]   ;;  %s324_s0 = inlined_call_operand.vmem [shape: f32[4,32,32], index: 0, kind: input, shape index: {}]   ;;  %s325_s1 = inlined_call_operand.vmem [shape: f32[1,32], index: 1, kind: input, shape index: {}]   ;;  %s326_s2 = inlined_call_operand.vmem [shape: f32[1,32], index: 2, kind: input, shape index: {}]   ;;  %s327_s4 = inlined_call_operand.vmem [shape: f32[32,16], index: 4, kind: output, shape index: {}]  }
   0x1   :  { %v185_v0 = vld [vmem:[%s323_s3 + $0x8] sm:$0xff]  ;;  %v184_v1 = vld [vmem:[%s323_s3] sm:$0xff]  ;;  %v20_v25 = vld [vmem:[%s324_s0 + $0x10] sm:$0xff] }
   0x2   :  { %v18_v2 = vld [vmem:[%s324_s0] sm:$0xff]  ;;  %v19_v3 = vld [vmem:[%s324_s0 + $0x8] sm:$0xff]  ;;  %140 = vmatpush.bf16.msra.mxu0 %v185_v0  ;;  %186 = vmatpush.bf16.msra.mxu1 %v185_v0  ;;  %v21_v26 = vld [vmem:[%s324_s0 + $0x18] sm:$0xff] }
   0x3   :  { %v230_v4 = vld [vmem:[%s325_s1] ss:$0 sm:$0xff]  ;;  %v163_v9 = vld [vmem:[%s324_s0 + $0x28] sm:$0xff]  ;;  %v164_v31 = vld [vmem:[%s324_s0 + $0x30] sm:$0xff] }
   0x4   :  { %v235_v5 = vld [vmem:[%s326_s2] ss:$0 sm:$0xff]  ;;  %v26_v7 = vmul.f32 %v230_v4, %v18_v2  ;;  %v27_v8 = vmul.f32 %v230_v4, %v19_v3  ;;  %v167_v12 = vld [vmem:[%s324_s0 + $0x48] sm:$0xff]  ;;  %v48_v13 = vmul.f32 %v230_v4, %v163_v9  ;;  %v165_v32 = vld [vmem:[%s324_s0 + $0x38] sm:$0xff]  ;;  %v28_v39 = vmul.f32 %v230_v4, %v20_v25 }
   0x5   :  { %v162_v6 = vld [vmem:[%s324_s0 + $0x20] sm:$0xff]  ;;  %v69_v15 = vmul.f32 %v230_v4, %v167_v12  ;;  %v171_v17 = vld [vmem:[%s324_s0 + $0x68] sm:$0xff]  ;;  %v29_v40 = vmul.f32 %v230_v4, %v21_v26  ;;  %v168_v41 = vld [vmem:[%s324_s0 + $0x50] sm:$0xff]  ;;  %v49_v44 = vmul.f32 %v230_v4, %v164_v31  ;;  %v50_v45 = vmul.f32 %v230_v4, %v165_v32 }
   0x6   :  { %v47_v10 = vmul.f32 %v230_v4, %v162_v6  ;;  %v166_v11 = vld [vmem:[%s324_s0 + $0x40] sm:$0xff]  ;;  %v34_v18 = vadd.f32 %v235_v5, %v26_v7  ;;  %v35_v19 = vadd.f32 %v235_v5, %v27_v8  ;;  %141 = vmatpush.bf16.msra.mxu0 %v184_v1  ;;  %187 = vmatpush.bf16.msra.mxu1 %v184_v1  ;;  %v169_v46 = vld [vmem:[%s324_s0 + $0x58] sm:$0xff]  ;;  %v172_v55 = vld [vmem:[%s324_s0 + $0x70] sm:$0xff] }
   0x7   :  { %v68_v14 = vmul.f32 %v230_v4, %v166_v11  ;;  %v170_v16 = vld [vmem:[%s324_s0 + $0x60] sm:$0xff]  ;;  %v52_v22 = vadd.f32 %v235_v5, %v48_v13  ;;  %v73_v24 = vadd.f32 %v235_v5, %v69_v15  ;;  %v90_v30 = vmul.f32 %v230_v4, %v171_v17  ;;  %v173_v56 = vld [vmem:[%s324_s0 + $0x78] sm:$0xff] }
   0x8   :  { %v51_v20 = vadd.f32 %v235_v5, %v47_v10  ;;  %v89_v21 = vmul.f32 %v230_v4, %v170_v16  ;;  %v38_v27 = vmax.f32 %v34_v18, 0.0  ;;  %v39_v28 = vmax.f32 %v35_v19, 0.0 }
   0x9   :  { %v72_v23 = vadd.f32 %v235_v5, %v68_v14  ;;  %v56_v33 = vmax.f32 %v52_v22, 0.0  ;;  %v77_v35 = vmax.f32 %v73_v24, 0.0  ;;  %v94_v38 = vadd.f32 %v235_v5, %v90_v30 }
   0xa   :  { %v55_v29 = vmax.f32 %v51_v20, 0.0  ;;  %v93_v36 = vadd.f32 %v235_v5, %v89_v21  ;;  %v36_v49 = vadd.f32 %v235_v5, %v28_v39  ;;  %v37_v50 = vadd.f32 %v235_v5, %v29_v40 }
   0xb   :  { %v76_v34 = vmax.f32 %v72_v23, 0.0  ;;  %v60_v42 = vadd.f32 %v56_v33, %v39_v28  ;;  %v98_v48 = vmax.f32 %v94_v38, 0.0  ;;  %v53_v52 = vadd.f32 %v235_v5, %v49_v44 }
   0xc   :  { %v59_v37 = vadd.f32 %v55_v29, %v38_v27  ;;  %v97_v43 = vmax.f32 %v93_v36, 0.0  ;;  %v54_v53 = vadd.f32 %v235_v5, %v50_v45  ;;  %v70_v54 = vmul.f32 %v230_v4, %v168_v41 }
   0xd   :  { %v81_v51 = vadd.f32 %v77_v35, %v60_v42  ;;  %v40_v58 = vmax.f32 %v36_v49, 0.0  ;;  %v41_v59 = vmax.f32 %v37_v50, 0.0  ;;  %v71_v60 = vmul.f32 %v230_v4, %v169_v46 }
   0xe   :  { %v80_v47 = vadd.f32 %v76_v34, %v59_v37  ;;  %v57_v62 = vmax.f32 %v53_v52, 0.0  ;;  %v58_v63 = vmax.f32 %v54_v53, 0.0  ;;  %v74_v0 = vadd.f32 %v235_v5, %v70_v54 }
   0xf   :  { %v102_v61 = vadd.f32 %v98_v48, %v81_v51  ;;  %v75_v2 = vadd.f32 %v235_v5, %v71_v60  ;;  %v91_v3 = vmul.f32 %v230_v4, %v172_v55  ;;  %v92_v6 = vmul.f32 %v230_v4, %v173_v56 }
  0x10   :  { %v101_v57 = vadd.f32 %v97_v43, %v80_v47  ;;  %v61_v8 = vadd.f32 %v57_v62, %v40_v58  ;;  %v62_v9 = vadd.f32 %v58_v63, %v41_v59  ;;  %v78_v10 = vmax.f32 %v74_v0, 0.0 }
  0x11   :  { %v106_v7 = vmul.f32 0.25, %v102_v61  ;;  %v79_v11 = vmax.f32 %v75_v2, 0.0  ;;  %v95_v12 = vadd.f32 %v235_v5, %v91_v3  ;;  %v96_v13 = vadd.f32 %v235_v5, %v92_v6 }
  0x12   :  { %v105_v1 = vmul.f32 0.25, %v101_v57  ;;  %v82_v15 = vadd.f32 %v78_v10, %v61_v8 }
  0x13   :  { %v83_v16 = vadd.f32 %v79_v11, %v62_v9  ;;  %v99_v17 = vmax.f32 %v95_v12, 0.0  ;;  %v100_v18 = vmax.f32 %v96_v13, 0.0 }
  0x14   :  { %v109_v14 = vpack.c.bf16 %v106_v7, %v105_v1 }
  0x15   :  { %v103_v19 = vadd.f32 %v99_v17, %v82_v15  ;;  %v104_v20 = vadd.f32 %v100_v18, %v83_v16 }
  0x16   :  { %182 = vmatmul.msk.bf16.vlgmr.msra.gmra.mxu0 %vm127_vm0, %v109_v14 }
  0x17   :  { %v107_v21 = vmul.f32 0.25, %v103_v19  ;;  %v108_v4 = vmul.f32 0.25, %v104_v20 }
  0x19   :  { %v110_v22 = vpack.c.bf16 %v108_v4, %v107_v21 }
  0x1b   :  { %183 = vmatmul.msk.bf16.vlgmr.msra.gmra.mxu1 %vm127_vm0, %v110_v22 }
  0x93   :  { %v143_v23 = vpop.f32.mrf.mxu0 }
  0x94   :  { %154 = vst.msk [vmem:[%s327_s4] sm:$0xff] %vm153_vm1, %v143_v23 }
  0x98   :  { %v148_v24 = vpop.f32.mrf.mxu1 }
  0x99   :  { %156 = vst.msk [vmem:[%s327_s4 + $0x10] sm:$0xff] %vm153_vm1, %v148_v24 }
  0x9b   :  { %v145_v5 = vpop.f32.mrf.mxu0 }
  0x9c   :  { %155 = vst.msk [vmem:[%s327_s4 + $0x8] sm:$0xff] %vm153_vm1, %v145_v5 }
  0xa0   :  { %v150_v25 = vpop.f32.mrf.mxu1 }
  0xa1   :  { %157 = vst.msk [vmem:[%s327_s4 + $0x18] sm:$0xff] %vm153_vm1, %v150_v25 }

// kernel: densenet_forward.31
= control target key start
LH: loop header
LB: loop body
LE: loop exit
PB: predicated region body
PF: predicated region fallthrough
CT: control target
= control target key end

     0   :  { %vm58_vm0 = vcmask 130048   ;;  %vm108_vm1 = vcmask 125952   ;;  %s207_s3 = inlined_call_operand.vmem [shape: bf16[16,16], index: 3, kind: input, shape index: {}]   ;;  %s208_s0 = inlined_call_operand.vmem [shape: f32[32,16], index: 0, kind: input, shape index: {}]   ;;  %s209_s1 = inlined_call_operand.vmem [shape: f32[1,16], index: 1, kind: input, shape index: {}]   ;;  %s210_s2 = inlined_call_operand.vmem [shape: f32[1,16], index: 2, kind: input, shape index: {}]   ;;  %s211_s4 = inlined_call_operand.vmem [shape: f32[1,16], index: 4, kind: input, shape index: {}]   ;;  %s212_s5 = inlined_call_operand.vmem [shape: f32[1,16], index: 5, kind: input, shape index: {}]   ;;  %s213_s6 = inlined_call_operand.vmem [shape: bf16[32,16], index: 6, kind: output, shape index: {}]  }
   0x1   :  { %v123_v0 = vld [vmem:[%s207_s3] sm:$0xff]  ;;  %v25_v2 = vld [vmem:[%s208_s0 + $0x8] sm:$0xff]  ;;  %v26_v5 = vld [vmem:[%s208_s0 + $0x10] sm:$0xff] }
   0x2   :  { %v24_v1 = vld [vmem:[%s208_s0] sm:$0xff]  ;;  %72 = vmatpush.bf16.msra.mxu0 %v123_v0  ;;  %124 = vmatpush.bf16.msra.mxu1 %v123_v0  ;;  %v27_v6 = vld [vmem:[%s208_s0 + $0x18] sm:$0xff] }
   0x3   :  { %v125_v3 = vld [vmem:[%s209_s1] ss:$0 sm:$0xff] }
   0x4   :  { %v126_v4 = vld [vmem:[%s210_s2] ss:$0 sm:$0xff]  ;;  %v32_v7 = vmul.f32 %v125_v3, %v24_v1  ;;  %v33_v8 = vmul.f32 %v125_v3, %v25_v2  ;;  %v34_v9 = vmul.f32 %v125_v3, %v26_v5  ;;  %v35_v10 = vmul.f32 %v125_v3, %v27_v6 }
   0x5   :  { %v127_v21 = vld [vmem:[%s211_s4] ss:$0 sm:$0xff] }
   0x6   :  { %v40_v11 = vadd.f32 %v126_v4, %v32_v7  ;;  %v41_v12 = vadd.f32 %v126_v4, %v33_v8  ;;  %v42_v13 = vadd.f32 %v126_v4, %v34_v9  ;;  %v43_v14 = vadd.f32 %v126_v4, %v35_v10  ;;  %v128_v22 = vld [vmem:[%s212_s5] ss:$0 sm:$0xff] }
   0x8   :  { %v44_v15 = vmax.f32 %v40_v11, 0.0  ;;  %v45_v16 = vmax.f32 %v41_v12, 0.0  ;;  %v46_v17 = vmax.f32 %v42_v13, 0.0  ;;  %v47_v18 = vmax.f32 %v43_v14, 0.0 }
   0xa   :  { %v48_v19 = vpack.c.bf16 %v45_v16, %v44_v15  ;;  %v49_v20 = vpack.c.bf16 %v47_v18, %v46_v17 }
   0xc   :  { %121 = vmatmul.msk.bf16.vlgmr.msra.gmra.mxu0 %vm58_vm0, %v48_v19  ;;  %122 = vmatmul.msk.bf16.vlgmr.msra.gmra.mxu1 %vm58_vm0, %v49_v20 }
  0x89   :  { %v74_v23 = vpop.f32.mrf.mxu0  ;;  %v79_v24 = vpop.f32.mrf.mxu1 }
  0x8a   :  { %v88_v25 = vmul.f32 %v127_v21, %v74_v23  ;;  %v90_v26 = vmul.f32 %v127_v21, %v79_v24 }
  0x8c   :  { %v96_v27 = vadd.f32 %v128_v22, %v88_v25  ;;  %v98_v28 = vadd.f32 %v128_v22, %v90_v26 }
  0x8e   :  { %v100_v29 = vmax.f32 %v96_v27, 0.0  ;;  %v102_v30 = vmax.f32 %v98_v28, 0.0 }
  0x90   :  { %v104_v31 = vpack.c.bf16 %v100_v29, %v100_v29  ;;  %v106_v32 = vpack.c.bf16 %v102_v30, %v102_v30 }
  0x91   :  { %v76_v33 = vpop.f32.mrf.mxu0  ;;  %v81_v34 = vpop.f32.mrf.mxu1 }
  0x92   :  { %109 = vst.msk [vmem:[%s213_s6] sm:$0xf] %vm108_vm1, %v104_v31  ;;  %v89_v35 = vmul.f32 %v127_v21, %v76_v33  ;;  %v91_v36 = vmul.f32 %v127_v21, %v81_v34 }
  0x93   :  { %111 = vst.msk [vmem:[%s213_s6 + $0x8] sm:$0xf] %vm108_vm1, %v106_v32 }
  0x94   :  { %v97_v37 = vadd.f32 %v128_v22, %v89_v35  ;;  %v99_v38 = vadd.f32 %v128_v22, %v91_v36 }
  0x96   :  { %v101_v39 = vmax.f32 %v97_v37, 0.0  ;;  %v103_v40 = vmax.f32 %v99_v38, 0.0 }
  0x98   :  { %v105_v41 = vpack.c.bf16 %v101_v39, %v101_v39  ;;  %v107_v42 = vpack.c.bf16 %v103_v40, %v103_v40 }
  0x9a   :  { %110 = vst.msk [vmem:[%s213_s6 + $0x4] sm:$0xf] %vm108_vm1, %v105_v41 }
  0x9b   :  { %112 = vst.msk [vmem:[%s213_s6 + $0xc] sm:$0xf] %vm108_vm1, %v107_v42 }

// kernel: densenet_forward.33
= control target key start
LH: loop header
LB: loop body
LE: loop exit
PB: predicated region body
PF: predicated region fallthrough
CT: control target
= control target key end

     0   :  { %vm69_vm0 = vcmask 1043456   ;;  %vm62_vm1 = vcmask 195584   ;;  %vm116_vm2 = vcmask 125952   ;;  %s219_s3 = inlined_call_operand.vmem [shape: bf16[24,16], index: 3, kind: input, shape index: {}]   ;;  %s220_s0 = inlined_call_operand.vmem [shape: f32[32,24], index: 0, kind: input, shape index: {}]   ;;  %s221_s1 = inlined_call_operand.vmem [shape: f32[1,24], index: 1, kind: input, shape index: {}]   ;;  %s222_s2 = inlined_call_operand.vmem [shape: f32[1,24], index: 2, kind: input, shape index: {}]   ;;  %s223_s4 = inlined_call_operand.vmem [shape: f32[1,16], index: 4, kind: input, shape index: {}]   ;;  %s224_s5 = inlined_call_operand.vmem [shape: f32[1,16], index: 5, kind: input, shape index: {}]   ;;  %s225_s6 = inlined_call_operand.vmem [shape: bf16[32,16], index: 6, kind: output, shape index: {}]  }
   0x1   :  { %v52_v0 = vld [vmem:[%s219_s3 + $0x8] sm:$0xf]  ;;  %v24_v1 = vld [vmem:[%s220_s0] sm:$0xff]  ;;  %v26_v6 = vld [vmem:[%s220_s0 + $0x10] sm:$0xff] }
   0x2   :  { %v58_v2 = vunpack.c.l.b16 %v52_v0  ;;  %v25_v3 = vld [vmem:[%s220_s0 + $0x8] sm:$0xff]  ;;  %v134_v4 = vld [vmem:[%s221_s1] ss:$0 sm:$0xff]  ;;  %v27_v10 = vld [vmem:[%s220_s0 + $0x18] sm:$0xff] }
   0x3   :  { %v135_v5 = vld [vmem:[%s222_s2] ss:$0 sm:$0xff]  ;;  %v32_v8 = vmul.f32 %v134_v4, %v24_v1  ;;  %v33_v9 = vmul.f32 %v134_v4, %v25_v3  ;;  %v34_v11 = vmul.f32 %v134_v4, %v26_v6  ;;  %v35_v12 = vmul.f32 %v134_v4, %v27_v10 }
   0x4   :  { %v60_v7 = vpack.c.b16 %v58_v2, %v58_v2  ;;  %v131_v17 = vld [vmem:[%s219_s3] sm:$0xff] }
   0x5   :  { %v40_v14 = vadd.f32 %v135_v5, %v32_v8  ;;  %v41_v15 = vadd.f32 %v135_v5, %v33_v9  ;;  %v42_v16 = vadd.f32 %v135_v5, %v34_v11  ;;  %v43_v18 = vadd.f32 %v135_v5, %v35_v12  ;;  %v136_v25 = vld [vmem:[%s223_s4] ss:$0 sm:$0xff] }
   0x6   :  { %v71_v13 = vsel %vm69_vm0, %v60_v7, 0  ;;  %v137_v26 = vld [vmem:[%s224_s5] ss:$0 sm:$0xff] }
   0x7   :  { %79 = vmatpush.bf16.msra.mxu0 %v71_v13  ;;  %132 = vmatpush.bf16.msra.mxu1 %v71_v13  ;;  %v44_v19 = vmax.f32 %v40_v14, 0.0  ;;  %v45_v20 = vmax.f32 %v41_v15, 0.0  ;;  %v46_v21 = vmax.f32 %v42_v16, 0.0  ;;  %v47_v22 = vmax.f32 %v43_v18, 0.0 }
   0x9   :  { %v48_v23 = vpack.c.bf16 %v45_v20, %v44_v19  ;;  %v49_v24 = vpack.c.bf16 %v47_v22, %v46_v21 }
   0xb   :  { %80 = vmatpush.bf16.msra.mxu0 %v131_v17  ;;  %133 = vmatpush.bf16.msra.mxu1 %v131_v17 }
   0xe   :  { %129 = vmatmul.msk.bf16.vlgmr.msra.gmra.mxu0 %vm62_vm1, %v48_v23  ;;  %130 = vmatmul.msk.bf16.vlgmr.msra.gmra.mxu1 %vm62_vm1, %v49_v24 }
  0x8b   :  { %v82_v27 = vpop.f32.mrf.mxu0  ;;  %v87_v28 = vpop.f32.mrf.mxu1 }
  0x8c   :  { %v96_v29 = vmul.f32 %v136_v25, %v82_v27  ;;  %v98_v30 = vmul.f32 %v136_v25, %v87_v28 }
  0x8e   :  { %v104_v31 = vadd.f32 %v137_v26, %v96_v29  ;;  %v106_v32 = vadd.f32 %v137_v26, %v98_v30 }
  0x90   :  { %v108_v33 = vmax.f32 %v104_v31, 0.0  ;;  %v110_v34 = vmax.f32 %v106_v32, 0.0 }
  0x92   :  { %v112_v35 = vpack.c.bf16 %v108_v33, %v108_v33  ;;  %v114_v36 = vpack.c.bf16 %v110_v34, %v110_v34 }
  0x93   :  { %v84_v37 = vpop.f32.mrf.mxu0  ;;  %v89_v38 = vpop.f32.mrf.mxu1 }
  0x94   :  { %117 = vst.msk [vmem:[%s225_s6] sm:$0xf] %vm116_vm2, %v112_v35  ;;  %v97_v39 = vmul.f32 %v136_v25, %v84_v37  ;;  %v99_v40 = vmul.f32 %v136_v25, %v89_v38 }
  0x95   :  { %119 = vst.msk [vmem:[%s225_s6 + $0x8] sm:$0xf] %vm116_vm2, %v114_v36 }
  0x96   :  { %v105_v41 = vadd.f32 %v137_v26, %v97_v39  ;;  %v107_v42 = vadd.f32 %v137_v26, %v99_v40 }
  0x98   :  { %v109_v43 = vmax.f32 %v105_v41, 0.0  ;;  %v111_v44 = vmax.f32 %v107_v42, 0.0 }
  0x9a   :  { %v113_v45 = vpack.c.bf16 %v109_v43, %v109_v43  ;;  %v115_v46 = vpack.c.bf16 %v111_v44, %v111_v44 }
  0x9c   :  { %118 = vst.msk [vmem:[%s225_s6 + $0x4] sm:$0xf] %vm116_vm2, %v113_v45 }
  0x9d   :  { %120 = vst.msk [vmem:[%s225_s6 + $0xc] sm:$0xf] %vm116_vm2, %v115_v46 }

// kernel: densenet_forward.32
= control target key start
LH: loop header
LB: loop body
LE: loop exit
PB: predicated region body
PF: predicated region fallthrough
CT: control target
= control target key end

     0   :  { %vm42_vm0 = vcmask 130048   ;;  %vm480_vm1 = vcmask 64512   ;;  %s821_s1 = inlined_call_operand.vmem [shape: bf16[9,16,8], index: 1, kind: input, shape index: {}]   ;;  %s822_s0 = inlined_call_operand.vmem [shape: bf16[9,32,16], index: 0, kind: input, shape index: {}]   ;;  %s823_s2 = inlined_call_operand.vmem [shape: f32[32,8], index: 2, kind: output, shape index: {}]  }
   0x1   :  { %v668_v0 = vld [vmem:[%s821_s1 + $0x8] sm:$0xff]  ;;  %v666_v1 = vld [vmem:[%s822_s0 + $0x10] sm:$0xff]  ;;  %v667_v2 = vld [vmem:[%s822_s0 + $0x18] sm:$0xff] }
   0x2   :  { %v665_v3 = vld [vmem:[%s821_s1] sm:$0xff]  ;;  %v671_v4 = vld [vmem:[%s821_s1 + $0x10] sm:$0xff]  ;;  %v674_v5 = vld [vmem:[%s821_s1 + $0x18] sm:$0xff]  ;;  %56 = vmatpush.bf16.msra.mxu0 %v668_v0  ;;  %690 = vmatpush.bf16.msra.mxu1 %v668_v0 }
   0x3   :  { %v669_v6 = vld [vmem:[%s822_s0 + $0x20] sm:$0xff]  ;;  %146 = vmatpush.bf16.msra.mxu2 %v671_v4  ;;  %v672_v8 = vld [vmem:[%s822_s0 + $0x30] sm:$0xff]  ;;  %v686_v10 = vld [vmem:[%s821_s1 + $0x38] sm:$0xff]  ;;  %199 = vmatpush.bf16.msra.mxu3 %v674_v5 }
   0x4   :  { %v677_v7 = vld [vmem:[%s821_s1 + $0x20] sm:$0xff]  ;;  %v683_v9 = vld [vmem:[%s821_s1 + $0x30] sm:$0xff]  ;;  %v680_v11 = vld [vmem:[%s821_s1 + $0x28] sm:$0xff] }
   0x5   :  { %507 = vmatmul.msk.bf16.vlgmr.msra.gmra.mxu0 %vm42_vm0, %v666_v1  ;;  %508 = vmatmul.msk.bf16.vlgmr.msra.gmra.mxu1 %vm42_vm0, %v667_v2  ;;  %v689_v12 = vld [vmem:[%s821_s1 + $0x40] sm:$0xff]  ;;  %v670_v15 = vld [vmem:[%s822_s0 + $0x28] sm:$0xff]  ;;  %v673_v16 = vld [vmem:[%s822_s0 + $0x38] sm:$0xff] }
   0x6   :  { %97 = vmatpush.bf16.msrb.mxu1 %v665_v3  ;;  %252 = vmatpush.bf16.msrb.mxu0 %v677_v7  ;;  %v663_v13 = vld [vmem:[%s822_s0] sm:$0xff]  ;;  %v664_v17 = vld [vmem:[%s822_s0 + $0x8] sm:$0xff]  ;;  %v684_v20 = vld [vmem:[%s822_s0 + $0x70] sm:$0xff] }
   0x7   :  { %541 = vmatmul.msk.bf16.vlgmr.msra.gmra.mxu2 %vm42_vm0, %v669_v6  ;;  %411 = vmatpush.bf16.msrb.mxu3 %v686_v10  ;;  %v675_v14 = vld [vmem:[%s822_s0 + $0x40] sm:$0xff]  ;;  %v676_v18 = vld [vmem:[%s822_s0 + $0x48] sm:$0xff]  ;;  %v678_v21 = vld [vmem:[%s822_s0 + $0x50] sm:$0xff] }
   0x8   :  { %561 = vmatmul.msk.bf16.vlgmr.msra.gmra.mxu3 %vm42_vm0, %v672_v8  ;;  %358 = vmatpush.bf16.msrb.mxu2 %v683_v9  ;;  %v681_v19 = vld [vmem:[%s822_s0 + $0x60] sm:$0xff]  ;;  %v682_v23 = vld [vmem:[%s822_s0 + $0x68] sm:$0xff]  ;;  %v685_v24 = vld [vmem:[%s822_s0 + $0x78] sm:$0xff] }
   0x9   :  { %v687_v22 = vld [vmem:[%s822_s0 + $0x80] sm:$0xff]  ;;  %v679_v25 = vld [vmem:[%s822_s0 + $0x58] sm:$0xff]  ;;  %v688_v26 = vld [vmem:[%s822_s0 + $0x88] sm:$0xff] }
   0xa   :  { %305 = vmatpush.bf16.msra.mxu1 %v680_v11  ;;  %464 = vmatpush.bf16.msra.mxu0 %v689_v12 }
  0x15   :  { %521 = vmatmul.msk.bf16.vlgmr.msrb.gmra.mxu1 %vm42_vm0, %v663_v13  ;;  %581 = vmatmul.msk.bf16.vlgmr.msrb.gmra.mxu0 %vm42_vm0, %v675_v14 }
  0x17   :  { %542 = vmatmul.msk.bf16.gmra.mxu2 %vm42_vm0, %v670_v15 }
  0x18   :  { %562 = vmatmul.msk.bf16.gmra.mxu3 %vm42_vm0, %v673_v16 }
  0x25   :  { %522 = vmatmul.msk.bf16.gmra.mxu1 %vm42_vm0, %v664_v17  ;;  %582 = vmatmul.msk.bf16.gmra.mxu0 %vm42_vm0, %v676_v18 }
  0x27   :  { %621 = vmatmul.msk.bf16.vlgmr.msrb.gmra.mxu2 %vm42_vm0, %v681_v19 }
  0x28   :  { %641 = vmatmul.msk.bf16.vlgmr.msrb.gmra.mxu3 %vm42_vm0, %v684_v20 }
  0x35   :  { %601 = vmatmul.msk.bf16.vlgmr.msra.gmra.mxu1 %vm42_vm0, %v678_v21  ;;  %661 = vmatmul.msk.bf16.vlgmr.msra.gmra.mxu0 %vm42_vm0, %v687_v22 }
  0x37   :  { %622 = vmatmul.msk.bf16.gmra.mxu2 %vm42_vm0, %v682_v23 }
  0x38   :  { %642 = vmatmul.msk.bf16.gmra.mxu3 %vm42_vm0, %v685_v24 }
  0x45   :  { %602 = vmatmul.msk.bf16.gmra.mxu1 %vm42_vm0, %v679_v25  ;;  %662 = vmatmul.msk.bf16.gmra.mxu0 %vm42_vm0, %v688_v26 }
  0x82   :  { %v58_v27 = vpop.f32.mrf.mxu0  ;;  %v63_v28 = vpop.f32.mrf.mxu1 }
  0x8a   :  { %v148_v29 = vpop.f32.mrf.mxu2  ;;  %v60_v30 = vpop.f32.mrf.mxu0 }
  0x8b   :  { %v65_v31 = vpop.f32.mrf.mxu1  ;;  %v201_v32 = vpop.f32.mrf.mxu3 }
  0x92   :  { %v150_v33 = vpop.f32.mrf.mxu2  ;;  %v254_v35 = vpop.f32.mrf.mxu0 }
  0x93   :  { %v99_v34 = vpop.f32.mrf.mxu1  ;;  %v203_v36 = vpop.f32.mrf.mxu3 }
  0x94   :  { %v100_v44 = vadd.f32 %v99_v34, %v58_v27 }
  0x96   :  { %v158_v46 = vadd.f32 %v148_v29, %v100_v44 }
  0x98   :  { %v211_v49 = vadd.f32 %v201_v32, %v158_v46 }
  0x9a   :  { %v153_v37 = vpop.f32.mrf.mxu2  ;;  %v256_v39 = vpop.f32.mrf.mxu0  ;;  %v264_v53 = vadd.f32 %v254_v35, %v211_v49 }
  0x9b   :  { %v101_v38 = vpop.f32.mrf.mxu1  ;;  %v206_v40 = vpop.f32.mrf.mxu3 }
  0x9c   :  { %v102_v50 = vadd.f32 %v101_v38, %v60_v30 }
  0x9e   :  { %v159_v54 = vadd.f32 %v150_v33, %v102_v50 }
  0xa0   :  { %v212_v58 = vadd.f32 %v203_v36, %v159_v54 }
  0xa2   :  { %v259_v42 = vpop.f32.mrf.mxu0  ;;  %v155_v43 = vpop.f32.mrf.mxu2  ;;  %v265_v63 = vadd.f32 %v256_v39, %v212_v58 }
  0xa3   :  { %v104_v41 = vpop.f32.mrf.mxu1  ;;  %v208_v45 = vpop.f32.mrf.mxu3 }
  0xa4   :  { %v105_v59 = vadd.f32 %v104_v41, %v63_v28 }
  0xa6   :  { %v160_v0 = vadd.f32 %v153_v37, %v105_v59 }
  0xa8   :  { %v213_v6 = vadd.f32 %v206_v40, %v160_v0 }
  0xaa   :  { %v261_v48 = vpop.f32.mrf.mxu0  ;;  %v360_v51 = vpop.f32.mrf.mxu2  ;;  %v266_v10 = vadd.f32 %v259_v42, %v213_v6 }
  0xab   :  { %v106_v47 = vpop.f32.mrf.mxu1  ;;  %v413_v52 = vpop.f32.mrf.mxu3 }
  0xac   :  { %v107_v7 = vadd.f32 %v106_v47, %v65_v31 }
  0xae   :  { %v161_v11 = vadd.f32 %v155_v43, %v107_v7 }
  0xb0   :  { %v214_v17 = vadd.f32 %v208_v45, %v161_v11 }
  0xb2   :  { %v466_v56 = vpop.f32.mrf.mxu0  ;;  %v362_v62 = vpop.f32.mrf.mxu2  ;;  %v267_v21 = vadd.f32 %v261_v48, %v214_v17 }
  0xb3   :  { %v307_v55 = vpop.f32.mrf.mxu1  ;;  %v415_v2 = vpop.f32.mrf.mxu3 }
  0xb4   :  { %v317_v57 = vadd.f32 %v307_v55, %v264_v53 }
  0xb6   :  { %v370_v60 = vadd.f32 %v360_v51, %v317_v57 }
  0xb8   :  { %v423_v61 = vadd.f32 %v413_v52, %v370_v60 }
  0xba   :  { %v476_v1 = vadd.f32 %v466_v56, %v423_v61  ;;  %v468_v5 = vpop.f32.mrf.mxu0  ;;  %v365_v13 = vpop.f32.mrf.mxu2 }
  0xbb   :  { %v309_v3 = vpop.f32.mrf.mxu1  ;;  %v418_v16 = vpop.f32.mrf.mxu3 }
  0xbc   :  { %481 = vst.msk [vmem:[%s823_s2] sm:$0xff] %vm480_vm1, %v476_v1  ;;  %v318_v4 = vadd.f32 %v309_v3, %v265_v63 }
  0xbe   :  { %v371_v8 = vadd.f32 %v362_v62, %v318_v4 }
  0xc0   :  { %v424_v9 = vadd.f32 %v415_v2, %v371_v8 }
  0xc2   :  { %v477_v12 = vadd.f32 %v468_v5, %v424_v9  ;;  %v471_v19 = vpop.f32.mrf.mxu0  ;;  %v367_v25 = vpop.f32.mrf.mxu2 }
  0xc3   :  { %v312_v14 = vpop.f32.mrf.mxu1  ;;  %v420_v27 = vpop.f32.mrf.mxu3 }
  0xc4   :  { %482 = vst.msk [vmem:[%s823_s2 + $0x8] sm:$0xff] %vm480_vm1, %v477_v12  ;;  %v319_v15 = vadd.f32 %v312_v14, %v266_v10 }
  0xc6   :  { %v372_v18 = vadd.f32 %v365_v13, %v319_v15 }
  0xc8   :  { %v425_v20 = vadd.f32 %v418_v16, %v372_v18 }
  0xca   :  { %v478_v22 = vadd.f32 %v471_v19, %v425_v20  ;;  %v473_v29 = vpop.f32.mrf.mxu0 }
  0xcb   :  { %v314_v23 = vpop.f32.mrf.mxu1 }
  0xcc   :  { %483 = vst.msk [vmem:[%s823_s2 + $0x10] sm:$0xff] %vm480_vm1, %v478_v22  ;;  %v320_v24 = vadd.f32 %v314_v23, %v267_v21 }
  0xce   :  { %v373_v26 = vadd.f32 %v367_v25, %v320_v24 }
  0xd0   :  { %v426_v28 = vadd.f32 %v420_v27, %v373_v26 }
  0xd2   :  { %v479_v30 = vadd.f32 %v473_v29, %v426_v28 }
  0xd4   :  { %484 = vst.msk [vmem:[%s823_s2 + $0x18] sm:$0xff] %vm480_vm1, %v479_v30 }

// kernel: densenet_forward.36
= control target key start
LH: loop header
LB: loop body
LE: loop exit
PB: predicated region body
PF: predicated region fallthrough
CT: control target
= control target key end

     0   :  { %vm45_vm0 = vcmask 130048   ;;  %vm74_vm1 = vcmask 125952   ;;  %s146_s3 = inlined_call_operand.vmem [shape: bf16[16,16], index: 3, kind: input, shape index: {}]   ;;  %s147_s0 = inlined_call_operand.vmem [shape: f32[8,16], index: 0, kind: input, shape index: {}]   ;;  %s148_s1 = inlined_call_operand.vmem [shape: f32[1,16], index: 1, kind: input, shape index: {}]   ;;  %s149_s2 = inlined_call_operand.vmem [shape: f32[1,16], index: 2, kind: input, shape index: {}]   ;;  %s150_s4 = inlined_call_operand.vmem [shape: f32[1,16], index: 4, kind: input, shape index: {}]   ;;  %s151_s5 = inlined_call_operand.vmem [shape: f32[1,16], index: 5, kind: input, shape index: {}]   ;;  %s152_s6 = inlined_call_operand.vmem [shape: bf16[8,16], index: 6, kind: output, shape index: {}]  }
   0x1   :  { %v85_v0 = vld [vmem:[%s146_s3] sm:$0xff] }
   0x2   :  { %v24_v1 = vld [vmem:[%s147_s0] sm:$0xff]  ;;  %56 = vmatpush.bf16.msra.mxu0 %v85_v0 }
   0x3   :  { %v86_v2 = vld [vmem:[%s148_s1] ss:$0 sm:$0xff] }
   0x4   :  { %v87_v3 = vld [vmem:[%s149_s2] ss:$0 sm:$0xff]  ;;  %v29_v4 = vmul.f32 %v86_v2, %v24_v1 }
   0x5   :  { %v88_v8 = vld [vmem:[%s150_s4] ss:$0 sm:$0xff] }
   0x6   :  { %v34_v5 = vadd.f32 %v87_v3, %v29_v4  ;;  %v89_v9 = vld [vmem:[%s151_s5] ss:$0 sm:$0xff] }
   0x8   :  { %v35_v6 = vmax.f32 %v34_v5, 0.0 }
   0xa   :  { %v36_v7 = vpack.c.bf16 %v35_v6, %v35_v6 }
   0xc   :  { %84 = vmatmul.msk.bf16.vlgmr.msra.gmra.mxu0 %vm45_vm0, %v36_v7 }
  0x89   :  { %v58_v10 = vpop.f32.mrf.mxu0 }
  0x8a   :  { %v66_v11 = vmul.f32 %v88_v8, %v58_v10 }
  0x8c   :  { %v71_v12 = vadd.f32 %v89_v9, %v66_v11 }
  0x8e   :  { %v72_v13 = vmax.f32 %v71_v12, 0.0 }
  0x90   :  { %v73_v14 = vpack.c.bf16 %v72_v13, %v72_v13 }
  0x91   :  { %v60_v15 = vpop.f32.mrf.mxu0 }
  0x92   :  { %75 = vst.msk [vmem:[%s152_s6] sm:$0xf] %vm74_vm1, %v73_v14 }

// kernel: densenet_forward.35
= control target key start
LH: loop header
LB: loop body
LE: loop exit
PB: predicated region body
PF: predicated region fallthrough
CT: control target
= control target key end

     0   :  { %vm66_vm0 = vcmask 261120   ;;  %vm83_vm1 = vcmask 130048   ;;  %s157_s3 = inlined_call_operand.vmem [shape: bf16[32,16], index: 3, kind: input, shape index: {}]   ;;  %s158_s0 = inlined_call_operand.vmem [shape: f32[4,8,32], index: 0, kind: input, shape index: {}]   ;;  %s159_s1 = inlined_call_operand.vmem [shape: f32[1,32], index: 1, kind: input, shape index: {}]   ;;  %s160_s2 = inlined_call_operand.vmem [shape: f32[1,32], index: 2, kind: input, shape index: {}]   ;;  %s161_s4 = inlined_call_operand.vmem [shape: f32[8,16], index: 4, kind: output, shape index: {}]  }
   0x1   :  { %v102_v0 = vld [vmem:[%s157_s3 + $0x8] sm:$0xff]  ;;  %v101_v1 = vld [vmem:[%s157_s3] sm:$0xff]  ;;  %v90_v6 = vld [vmem:[%s158_s0 + $0x10] sm:$0xff] }
   0x2   :  { %v18_v2 = vld [vmem:[%s158_s0] sm:$0xff]  ;;  %76 = vmatpush.bf16.msra.mxu0 %v102_v0  ;;  %v89_v5 = vld [vmem:[%s158_s0 + $0x8] sm:$0xff]  ;;  %v91_v10 = vld [vmem:[%s158_s0 + $0x18] sm:$0xff] }
   0x3   :  { %v103_v3 = vld [vmem:[%s159_s1] ss:$0 sm:$0xff] }
   0x4   :  { %v104_v4 = vld [vmem:[%s160_s2] ss:$0 sm:$0xff]  ;;  %v23_v7 = vmul.f32 %v103_v3, %v18_v2  ;;  %v32_v8 = vmul.f32 %v103_v3, %v89_v5  ;;  %v38_v9 = vmul.f32 %v103_v3, %v90_v6  ;;  %v44_v11 = vmul.f32 %v103_v3, %v91_v10 }
   0x6   :  { %v28_v12 = vadd.f32 %v104_v4, %v23_v7  ;;  %v33_v13 = vadd.f32 %v104_v4, %v32_v8  ;;  %v39_v14 = vadd.f32 %v104_v4, %v38_v9  ;;  %77 = vmatpush.bf16.msra.mxu0 %v101_v1  ;;  %v45_v15 = vadd.f32 %v104_v4, %v44_v11 }
   0x8   :  { %v29_v16 = vmax.f32 %v28_v12, 0.0  ;;  %v34_v17 = vmax.f32 %v33_v13, 0.0  ;;  %v40_v18 = vmax.f32 %v39_v14, 0.0  ;;  %v46_v20 = vmax.f32 %v45_v15, 0.0 }
   0xa   :  { %v35_v19 = vadd.f32 %v34_v17, %v29_v16 }
   0xc   :  { %v41_v21 = vadd.f32 %v40_v18, %v35_v19 }
   0xe   :  { %v47_v22 = vadd.f32 %v46_v20, %v41_v21 }
  0x10   :  { %v48_v23 = vmul.f32 0.25, %v47_v22 }
  0x12   :  { %v49_v24 = vpack.c.bf16 %v48_v23, %v48_v23 }
  0x14   :  { %100 = vmatmul.msk.bf16.vlgmr.msra.gmra.mxu0 %vm66_vm0, %v49_v24 }
  0x91   :  { %v79_v25 = vpop.f32.mrf.mxu0 }
  0x92   :  { %84 = vst.msk [vmem:[%s161_s4] sm:$0xff] %vm83_vm1, %v79_v25 }
  0x99   :  { %v81_v26 = vpop.f32.mrf.mxu0 }

// kernel: densenet_forward.38
= control target key start
LH: loop header
LB: loop body
LE: loop exit
PB: predicated region body
PF: predicated region fallthrough
CT: control target
= control target key end

     0   :  { %vm53_vm0 = vcmask 1043456   ;;  %vm49_vm1 = vcmask 195584   ;;  %vm82_vm2 = vcmask 125952   ;;  %s157_s3 = inlined_call_operand.vmem [shape: bf16[24,16], index: 3, kind: input, shape index: {}]   ;;  %s158_s0 = inlined_call_operand.vmem [shape: f32[8,24], index: 0, kind: input, shape index: {}]   ;;  %s159_s1 = inlined_call_operand.vmem [shape: f32[1,24], index: 1, kind: input, shape index: {}]   ;;  %s160_s2 = inlined_call_operand.vmem [shape: f32[1,24], index: 2, kind: input, shape index: {}]   ;;  %s161_s4 = inlined_call_operand.vmem [shape: f32[1,16], index: 4, kind: input, shape index: {}]   ;;  %s162_s5 = inlined_call_operand.vmem [shape: f32[1,16], index: 5, kind: input, shape index: {}]   ;;  %s163_s6 = inlined_call_operand.vmem [shape: bf16[8,16], index: 6, kind: output, shape index: {}]  }
   0x1   :  { %v39_v0 = vld [vmem:[%s157_s3 + $0x8] sm:$0xf]  ;;  %v24_v1 = vld [vmem:[%s158_s0] sm:$0xff] }
   0x2   :  { %v45_v2 = vunpack.c.l.b16 %v39_v0  ;;  %v94_v3 = vld [vmem:[%s159_s1] ss:$0 sm:$0xff] }
   0x3   :  { %v95_v4 = vld [vmem:[%s160_s2] ss:$0 sm:$0xff]  ;;  %v29_v6 = vmul.f32 %v94_v3, %v24_v1 }
   0x4   :  { %v47_v5 = vpack.c.b16 %v45_v2, %v45_v2  ;;  %v93_v9 = vld [vmem:[%s157_s3] sm:$0xff] }
   0x5   :  { %v34_v8 = vadd.f32 %v95_v4, %v29_v6  ;;  %v96_v12 = vld [vmem:[%s161_s4] ss:$0 sm:$0xff] }
   0x6   :  { %v55_v7 = vsel %vm53_vm0, %v47_v5, 0  ;;  %v97_v13 = vld [vmem:[%s162_s5] ss:$0 sm:$0xff] }
   0x7   :  { %63 = vmatpush.bf16.msra.mxu0 %v55_v7  ;;  %v35_v10 = vmax.f32 %v34_v8, 0.0 }
   0x9   :  { %v36_v11 = vpack.c.bf16 %v35_v10, %v35_v10 }
   0xb   :  { %64 = vmatpush.bf16.msra.mxu0 %v93_v9 }
   0xe   :  { %92 = vmatmul.msk.bf16.vlgmr.msra.gmra.mxu0 %vm49_vm1, %v36_v11 }
  0x8b   :  { %v66_v14 = vpop.f32.mrf.mxu0 }
  0x8c   :  { %v74_v15 = vmul.f32 %v96_v12, %v66_v14 }
  0x8e   :  { %v79_v16 = vadd.f32 %v97_v13, %v74_v15 }
  0x90   :  { %v80_v17 = vmax.f32 %v79_v16, 0.0 }
  0x92   :  { %v81_v18 = vpack.c.bf16 %v80_v17, %v80_v17 }
  0x93   :  { %v68_v19 = vpop.f32.mrf.mxu0 }
  0x94   :  { %83 = vst.msk [vmem:[%s163_s6] sm:$0xf] %vm82_vm2, %v81_v18 }

// kernel: densenet_forward.37
= control target key start
LH: loop header
LB: loop body
LE: loop exit
PB: predicated region body
PF: predicated region fallthrough
CT: control target
= control target key end

     0   :  { %vm26_vm0 = vcmask 130048   ;;  %vm261_vm1 = vcmask 64512   ;;  %s426_s1 = inlined_call_operand.vmem [shape: bf16[9,16,8], index: 1, kind: input, shape index: {}]   ;;  %s427_s0 = inlined_call_operand.vmem [shape: bf16[9,8,16], index: 0, kind: input, shape index: {}]   ;;  %s428_s2 = inlined_call_operand.vmem [shape: f32[8,8], index: 2, kind: output, shape index: {}]  }
   0x1   :  { %v337_v0 = vld [vmem:[%s426_s1 + $0x8] sm:$0xff]  ;;  %v336_v1 = vld [vmem:[%s426_s1] sm:$0xff]  ;;  %v338_v2 = vld [vmem:[%s426_s1 + $0x10] sm:$0xff] }
   0x2   :  { %v339_v3 = vld [vmem:[%s426_s1 + $0x18] sm:$0xff]  ;;  %v267_v4 = vld [vmem:[%s427_s0 + $0x4] sm:$0xf]  ;;  %37 = vmatpush.bf16.msra.mxu0 %v337_v0  ;;  %59 = vmatpush.bf16.msra.mxu1 %v336_v1  ;;  %v12_v5 = vld [vmem:[%s427_s0] sm:$0xf] }
   0x3   :  { %v280_v6 = vld [vmem:[%s427_s0 + $0x8] sm:$0xf]  ;;  %v340_v7 = vld [vmem:[%s426_s1 + $0x20] sm:$0xff]  ;;  %86 = vmatpush.bf16.msra.mxu2 %v338_v2  ;;  %114 = vmatpush.bf16.msra.mxu3 %v339_v3  ;;  %v288_v8 = vld [vmem:[%s427_s0 + $0xc] sm:$0xf] }
   0x4   :  { %v342_v9 = vld [vmem:[%s426_s1 + $0x30] sm:$0xff]  ;;  %v343_v10 = vld [vmem:[%s426_s1 + $0x38] sm:$0xff]  ;;  %v341_v11 = vld [vmem:[%s426_s1 + $0x28] sm:$0xff] }
   0x5   :  { %v344_v12 = vld [vmem:[%s426_s1 + $0x40] sm:$0xff]  ;;  %274 = vmatmul.msk.bf16.vlgmr.msra.gmra.mxu0 %vm26_vm0, %v267_v4  ;;  %279 = vmatmul.msk.bf16.vlgmr.msra.gmra.mxu1 %vm26_vm0, %v12_v5  ;;  %v296_v13 = vld [vmem:[%s427_s0 + $0x10] sm:$0xf]  ;;  %v304_v14 = vld [vmem:[%s427_s0 + $0x14] sm:$0xf] }
   0x6   :  { %142 = vmatpush.bf16.msrb.mxu0 %v340_v7  ;;  %287 = vmatmul.msk.bf16.vlgmr.msra.gmra.mxu2 %vm26_vm0, %v280_v6  ;;  %v312_v15 = vld [vmem:[%s427_s0 + $0x18] sm:$0xf]  ;;  %v320_v16 = vld [vmem:[%s427_s0 + $0x1c] sm:$0xf]  ;;  %v328_v17 = vld [vmem:[%s427_s0 + $0x20] sm:$0xf] }
   0x7   :  { %295 = vmatmul.msk.bf16.vlgmr.msra.gmra.mxu3 %vm26_vm0, %v288_v8  ;;  %198 = vmatpush.bf16.msrb.mxu2 %v342_v9 }
   0x8   :  { %226 = vmatpush.bf16.msrb.mxu3 %v343_v10  ;;  %170 = vmatpush.bf16.msrb.mxu1 %v341_v11 }
   0xa   :  { %254 = vmatpush.bf16.msra.mxu0 %v344_v12 }
  0x15   :  { %303 = vmatmul.msk.bf16.vlgmr.msrb.gmra.mxu0 %vm26_vm0, %v296_v13  ;;  %311 = vmatmul.msk.bf16.vlgmr.msrb.gmra.mxu1 %vm26_vm0, %v304_v14 }
  0x16   :  { %319 = vmatmul.msk.bf16.vlgmr.msrb.gmra.mxu2 %vm26_vm0, %v312_v15 }
  0x17   :  { %327 = vmatmul.msk.bf16.vlgmr.msrb.gmra.mxu3 %vm26_vm0, %v320_v16 }
  0x25   :  { %335 = vmatmul.msk.bf16.vlgmr.msra.gmra.mxu0 %vm26_vm0, %v328_v17 }
  0x82   :  { %v39_v18 = vpop.f32.mrf.mxu0  ;;  %v61_v19 = vpop.f32.mrf.mxu1 }
  0x83   :  { %v62_v24 = vadd.f32 %v61_v19, %v39_v18 }
  0x89   :  { %v88_v20 = vpop.f32.mrf.mxu2 }
  0x8a   :  { %v116_v21 = vpop.f32.mrf.mxu3  ;;  %v41_v22 = vpop.f32.mrf.mxu0  ;;  %v92_v25 = vadd.f32 %v88_v20, %v62_v24 }
  0x8b   :  { %v63_v23 = vpop.f32.mrf.mxu1 }
  0x8c   :  { %v120_v30 = vadd.f32 %v116_v21, %v92_v25 }
  0x91   :  { %v90_v26 = vpop.f32.mrf.mxu2 }
  0x92   :  { %v118_v27 = vpop.f32.mrf.mxu3  ;;  %v144_v28 = vpop.f32.mrf.mxu0 }
  0x93   :  { %v172_v29 = vpop.f32.mrf.mxu1  ;;  %v148_v31 = vadd.f32 %v144_v28, %v120_v30 }
  0x95   :  { %v176_v36 = vadd.f32 %v172_v29, %v148_v31 }
  0x99   :  { %v200_v32 = vpop.f32.mrf.mxu2 }
  0x9a   :  { %v228_v33 = vpop.f32.mrf.mxu3  ;;  %v146_v34 = vpop.f32.mrf.mxu0  ;;  %v204_v37 = vadd.f32 %v200_v32, %v176_v36 }
  0x9b   :  { %v174_v35 = vpop.f32.mrf.mxu1 }
  0x9c   :  { %v232_v38 = vadd.f32 %v228_v33, %v204_v37 }
  0xa1   :  { %v202_v39 = vpop.f32.mrf.mxu2 }
  0xa2   :  { %v230_v40 = vpop.f32.mrf.mxu3  ;;  %v256_v41 = vpop.f32.mrf.mxu0 }
  0xa3   :  { %v260_v42 = vadd.f32 %v256_v41, %v232_v38 }
  0xa5   :  { %262 = vst.msk [vmem:[%s428_s2] sm:$0xff] %vm261_vm1, %v260_v42 }
  0xaa   :  { %v258_v43 = vpop.f32.mrf.mxu0 }

// kernel: densenet_forward.40
= control target key start
LH: loop header
LB: loop body
LE: loop exit
PB: predicated region body
PF: predicated region fallthrough
CT: control target
= control target key end

     0   :  { %vm66_vm0 = vcmask 261120   ;;  %vm83_vm1 = vcmask 123904   ;;  %s157_s3 = inlined_call_operand.vmem [shape: bf16[32,16], index: 3, kind: input, shape index: {}]   ;;  %s158_s0 = inlined_call_operand.vmem [shape: f32[4,2,32], index: 0, kind: input, shape index: {}]   ;;  %s159_s1 = inlined_call_operand.vmem [shape: f32[1,32], index: 1, kind: input, shape index: {}]   ;;  %s160_s2 = inlined_call_operand.vmem [shape: f32[1,32], index: 2, kind: input, shape index: {}]   ;;  %s161_s4 = inlined_call_operand.vmem [shape: f32[2,16], index: 4, kind: output, shape index: {}]  }
   0x1   :  { %v102_v0 = vld [vmem:[%s157_s3 + $0x8] sm:$0xff]  ;;  %v101_v1 = vld [vmem:[%s157_s3] sm:$0xff] }
   0x2   :  { %v18_v2 = vld [vmem:[%s158_s0] sm:$0x3]  ;;  %76 = vmatpush.bf16.msra.mxu0 %v102_v0  ;;  %v89_v5 = vld [vmem:[%s158_s0 + $0x2] sm:$0x3]  ;;  %v90_v6 = vld [vmem:[%s158_s0 + $0x4] sm:$0x3] }
   0x3   :  { %v103_v3 = vld [vmem:[%s159_s1] ss:$0 sm:$0xff]  ;;  %v91_v10 = vld [vmem:[%s158_s0 + $0x6] sm:$0x3] }
   0x4   :  { %v104_v4 = vld [vmem:[%s160_s2] ss:$0 sm:$0xff]  ;;  %v23_v7 = vmul.f32 %v103_v3, %v18_v2  ;;  %v32_v8 = vmul.f32 %v103_v3, %v89_v5  ;;  %v38_v9 = vmul.f32 %v103_v3, %v90_v6  ;;  %v44_v11 = vmul.f32 %v103_v3, %v91_v10 }
   0x6   :  { %v28_v12 = vadd.f32 %v104_v4, %v23_v7  ;;  %v33_v13 = vadd.f32 %v104_v4, %v32_v8  ;;  %v39_v14 = vadd.f32 %v104_v4, %v38_v9  ;;  %77 = vmatpush.bf16.msra.mxu0 %v101_v1  ;;  %v45_v15 = vadd.f32 %v104_v4, %v44_v11 }
   0x8   :  { %v29_v16 = vmax.f32 %v28_v12, 0.0  ;;  %v34_v17 = vmax.f32 %v33_v13, 0.0  ;;  %v40_v18 = vmax.f32 %v39_v14, 0.0  ;;  %v46_v20 = vmax.f32 %v45_v15, 0.0 }
   0xa   :  { %v35_v19 = vadd.f32 %v34_v17, %v29_v16 }
   0xc   :  { %v41_v21 = vadd.f32 %v40_v18, %v35_v19 }
   0xe   :  { %v47_v22 = vadd.f32 %v46_v20, %v41_v21 }
  0x10   :  { %v48_v23 = vmul.f32 0.25, %v47_v22 }
  0x12   :  { %v49_v24 = vpack.c.bf16 %v48_v23, %v48_v23 }
  0x14   :  { %100 = vmatmul.msk.bf16.vlgmr.msra.gmra.mxu0 %vm66_vm0, %v49_v24 }
  0x91   :  { %v79_v25 = vpop.f32.mrf.mxu0 }
  0x92   :  { %84 = vst.msk [vmem:[%s161_s4] sm:$0x3] %vm83_vm1, %v79_v25 }
  0x99   :  { %v81_v26 = vpop.f32.mrf.mxu0 }

// kernel: densenet_forward.44
= control target key start
LH: loop header
LB: loop body
LE: loop exit
PB: predicated region body
PF: predicated region fallthrough
CT: control target
= control target key end

     0   :  { %vm47_vm0 = vcmask 130048   ;;  %vm76_vm1 = vcmask 122880   ;;  %s191_s0 = inlined_call_operand.vmem [shape: bf16[9,2,16], index: 0, kind: input, shape index: {}, may-alias: {0,7}]   ;;  %s192_s1 = inlined_call_operand.vmem [shape: f32[2,16], index: 1, kind: input, shape index: {}]   ;;  %s193_s2 = inlined_call_operand.vmem [shape: f32[1,16], index: 2, kind: input, shape index: {}]   ;;  %s194_s3 = inlined_call_operand.vmem [shape: f32[1,16], index: 3, kind: input, shape index: {}]   ;;  %s195_s4 = inlined_call_operand.vmem [shape: bf16[16,16], index: 4, kind: input, shape index: {}]   ;;  %s196_s5 = inlined_call_operand.vmem [shape: f32[1,16], index: 5, kind: input, shape index: {}]   ;;  %s197_s6 = inlined_call_operand.vmem [shape: f32[1,16], index: 6, kind: input, shape index: {}]   ;;  %s198_s7 = inlined_call_operand.vmem [shape: bf16[9,2,16], index: 7, kind: output, shape index: {}, may-alias: {0,7}]  }
   0x1   :  { %v125_v0 = vld [vmem:[%s195_s4] sm:$0xff] }
   0x2   :  { %v26_v1 = vld [vmem:[%s192_s1] sm:$0x3]  ;;  %58 = vmatpush.bf16.msra.mxu0 %v125_v0 }
   0x3   :  { %v126_v2 = vld [vmem:[%s193_s2] ss:$0 sm:$0xff] }
   0x4   :  { %v127_v3 = vld [vmem:[%s194_s3] ss:$0 sm:$0xff]  ;;  %v31_v4 = vmul.f32 %v126_v2, %v26_v1 }
   0x5   :  { %v128_v8 = vld [vmem:[%s196_s5] ss:$0 sm:$0xff] }
   0x6   :  { %v36_v5 = vadd.f32 %v127_v3, %v31_v4  ;;  %v129_v9 = vld [vmem:[%s197_s6] ss:$0 sm:$0xff] }
   0x8   :  { %v37_v6 = vmax.f32 %v36_v5, 0.0 }
   0xa   :  { %v38_v7 = vpack.c.bf16 %v37_v6, %v37_v6 }
   0xc   :  { %123 = vmatmul.msk.bf16.vlgmr.msra.gmra.mxu0 %vm47_vm0, %v38_v7 }
  0x89   :  { %v60_v10 = vpop.f32.mrf.mxu0 }
  0x8a   :  { %v68_v11 = vmul.f32 %v128_v8, %v60_v10 }
  0x8c   :  { %v73_v12 = vadd.f32 %v129_v9, %v68_v11 }
  0x8e   :  { %v74_v13 = vmax.f32 %v73_v12, 0.0 }
  0x90   :  { %v75_v14 = vpack.c.bf16 %v74_v13, %v74_v13 }
  0x91   :  { %v62_v15 = vpop.f32.mrf.mxu0 }
  0x92   :  { %77 = vst.msk [vmem:[#allocation2] sm:$0x1] %vm76_vm1, %v75_v14 }
  0x99   :  { %v96_v16 = vld [vmem:[#allocation2] sm:$0x1] }
  0x9a   :  { %124 = vst [vmem:[%s198_s7 + $0x4] sm:$0x1] %v96_v16 }

// kernel: densenet_forward.45
= control target key start
LH: loop header
LB: loop body
LE: loop exit
PB: predicated region body
PF: predicated region fallthrough
CT: control target
= control target key end

     0   :  { %vm55_vm0 = vcmask 1043456   ;;  %vm51_vm1 = vcmask 195584   ;;  %vm84_vm2 = vcmask 122880   ;;  %s202_s0 = inlined_call_operand.vmem [shape: bf16[9,2,16], index: 0, kind: input, shape index: {}, may-alias: {0,7}]   ;;  %s203_s1 = inlined_call_operand.vmem [shape: f32[2,24], index: 1, kind: input, shape index: {}]   ;;  %s204_s2 = inlined_call_operand.vmem [shape: f32[1,24], index: 2, kind: input, shape index: {}]   ;;  %s205_s3 = inlined_call_operand.vmem [shape: f32[1,24], index: 3, kind: input, shape index: {}]   ;;  %s206_s4 = inlined_call_operand.vmem [shape: bf16[24,16], index: 4, kind: input, shape index: {}]   ;;  %s207_s5 = inlined_call_operand.vmem [shape: f32[1,16], index: 5, kind: input, shape index: {}]   ;;  %s208_s6 = inlined_call_operand.vmem [shape: f32[1,16], index: 6, kind: input, shape index: {}]   ;;  %s209_s7 = inlined_call_operand.vmem [shape: bf16[9,2,16], index: 7, kind: output, shape index: {}, may-alias: {0,7}]  }
   0x1   :  { %v41_v0 = vld [vmem:[%s206_s4 + $0x8] sm:$0xf]  ;;  %v26_v1 = vld [vmem:[%s203_s1] sm:$0x3] }
   0x2   :  { %v47_v2 = vunpack.c.l.b16 %v41_v0  ;;  %v134_v3 = vld [vmem:[%s204_s2] ss:$0 sm:$0xff] }
   0x3   :  { %v135_v4 = vld [vmem:[%s205_s3] ss:$0 sm:$0xff]  ;;  %v31_v6 = vmul.f32 %v134_v3, %v26_v1 }
   0x4   :  { %v49_v5 = vpack.c.b16 %v47_v2, %v47_v2  ;;  %v133_v9 = vld [vmem:[%s206_s4] sm:$0xff] }
   0x5   :  { %v36_v8 = vadd.f32 %v135_v4, %v31_v6  ;;  %v136_v12 = vld [vmem:[%s207_s5] ss:$0 sm:$0xff] }
   0x6   :  { %v57_v7 = vsel %vm55_vm0, %v49_v5, 0  ;;  %v137_v13 = vld [vmem:[%s208_s6] ss:$0 sm:$0xff] }
   0x7   :  { %65 = vmatpush.bf16.msra.mxu0 %v57_v7  ;;  %v37_v10 = vmax.f32 %v36_v8, 0.0 }
   0x9   :  { %v38_v11 = vpack.c.bf16 %v37_v10, %v37_v10 }
   0xb   :  { %66 = vmatpush.bf16.msra.mxu0 %v133_v9 }
   0xe   :  { %131 = vmatmul.msk.bf16.vlgmr.msra.gmra.mxu0 %vm51_vm1, %v38_v11 }
  0x8b   :  { %v68_v14 = vpop.f32.mrf.mxu0 }
  0x8c   :  { %v76_v15 = vmul.f32 %v136_v12, %v68_v14 }
  0x8e   :  { %v81_v16 = vadd.f32 %v137_v13, %v76_v15 }
  0x90   :  { %v82_v17 = vmax.f32 %v81_v16, 0.0 }
  0x92   :  { %v83_v18 = vpack.c.bf16 %v82_v17, %v82_v17 }
  0x93   :  { %v70_v19 = vpop.f32.mrf.mxu0 }
  0x94   :  { %85 = vst.msk [vmem:[#allocation2] sm:$0x1] %vm84_vm2, %v83_v18 }
  0x9b   :  { %v104_v20 = vld [vmem:[#allocation2] sm:$0x1] }
  0x9c   :  { %132 = vst [vmem:[%s209_s7 + $0x4] sm:$0x1] %v104_v20 }

// kernel: densenet_forward.41
= control target key start
LH: loop header
LB: loop body
LE: loop exit
PB: predicated region body
PF: predicated region fallthrough
CT: control target
= control target key end

     0   :  { %vm26_vm0 = vcmask 130048   ;;  %vm261_vm1 = vcmask 58368   ;;  %s426_s1 = inlined_call_operand.vmem [shape: bf16[9,16,8], index: 1, kind: input, shape index: {}]   ;;  %s427_s0 = inlined_call_operand.vmem [shape: bf16[9,2,16], index: 0, kind: input, shape index: {}]   ;;  %s428_s2 = inlined_call_operand.vmem [shape: f32[2,8], index: 2, kind: output, shape index: {}]  }
   0x1   :  { %v337_v0 = vld [vmem:[%s426_s1 + $0x8] sm:$0xff]  ;;  %v336_v1 = vld [vmem:[%s426_s1] sm:$0xff]  ;;  %v338_v2 = vld [vmem:[%s426_s1 + $0x10] sm:$0xff] }
   0x2   :  { %v339_v3 = vld [vmem:[%s426_s1 + $0x18] sm:$0xff]  ;;  %v267_v4 = vld [vmem:[%s427_s0 + $0x1] sm:$0x1]  ;;  %37 = vmatpush.bf16.msra.mxu0 %v337_v0  ;;  %59 = vmatpush.bf16.msra.mxu1 %v336_v1  ;;  %v12_v5 = vld [vmem:[%s427_s0] sm:$0x1] }
   0x3   :  { %v280_v6 = vld [vmem:[%s427_s0 + $0x2] sm:$0x1]  ;;  %86 = vmatpush.bf16.msra.mxu2 %v338_v2  ;;  %114 = vmatpush.bf16.msra.mxu3 %v339_v3  ;;  %v288_v8 = vld [vmem:[%s427_s0 + $0x3] sm:$0x1]  ;;  %v342_v9 = vld [vmem:[%s426_s1 + $0x30] sm:$0xff] }
   0x4   :  { %v340_v7 = vld [vmem:[%s426_s1 + $0x20] sm:$0xff]  ;;  %v343_v10 = vld [vmem:[%s426_s1 + $0x38] sm:$0xff]  ;;  %v341_v11 = vld [vmem:[%s426_s1 + $0x28] sm:$0xff] }
   0x5   :  { %v344_v12 = vld [vmem:[%s426_s1 + $0x40] sm:$0xff]  ;;  %274 = vmatmul.msk.bf16.vlgmr.msra.gmra.mxu0 %vm26_vm0, %v267_v4  ;;  %279 = vmatmul.msk.bf16.vlgmr.msra.gmra.mxu1 %vm26_vm0, %v12_v5  ;;  %v328_v17 = vld [vmem:[%s427_s0 + $0x8] sm:$0x1] }
   0x6   :  { %142 = vmatpush.bf16.msrb.mxu0 %v340_v7  ;;  %287 = vmatmul.msk.bf16.vlgmr.msra.gmra.mxu2 %vm26_vm0, %v280_v6  ;;  %v296_v13 = vld [vmem:[%s427_s0 + $0x4] sm:$0x1]  ;;  %v304_v14 = vld [vmem:[%s427_s0 + $0x5] sm:$0x1]  ;;  %v312_v15 = vld [vmem:[%s427_s0 + $0x6] sm:$0x1] }
   0x7   :  { %295 = vmatmul.msk.bf16.vlgmr.msra.gmra.mxu3 %vm26_vm0, %v288_v8  ;;  %198 = vmatpush.bf16.msrb.mxu2 %v342_v9  ;;  %v320_v16 = vld [vmem:[%s427_s0 + $0x7] sm:$0x1] }
   0x8   :  { %226 = vmatpush.bf16.msrb.mxu3 %v343_v10  ;;  %170 = vmatpush.bf16.msrb.mxu1 %v341_v11 }
   0xa   :  { %254 = vmatpush.bf16.msra.mxu0 %v344_v12 }
  0x15   :  { %303 = vmatmul.msk.bf16.vlgmr.msrb.gmra.mxu0 %vm26_vm0, %v296_v13  ;;  %311 = vmatmul.msk.bf16.vlgmr.msrb.gmra.mxu1 %vm26_vm0, %v304_v14 }
  0x16   :  { %319 = vmatmul.msk.bf16.vlgmr.msrb.gmra.mxu2 %vm26_vm0, %v312_v15 }
  0x17   :  { %327 = vmatmul.msk.bf16.vlgmr.msrb.gmra.mxu3 %vm26_vm0, %v320_v16 }
  0x25   :  { %335 = vmatmul.msk.bf16.vlgmr.msra.gmra.mxu0 %vm26_vm0, %v328_v17 }
  0x82   :  { %v39_v18 = vpop.f32.mrf.mxu0  ;;  %v61_v19 = vpop.f32.mrf.mxu1 }
  0x83   :  { %v62_v24 = vadd.f32 %v61_v19, %v39_v18 }
  0x89   :  { %v88_v20 = vpop.f32.mrf.mxu2 }
  0x8a   :  { %v116_v21 = vpop.f32.mrf.mxu3  ;;  %v41_v22 = vpop.f32.mrf.mxu0  ;;  %v92_v25 = vadd.f32 %v88_v20, %v62_v24 }
  0x8b   :  { %v63_v23 = vpop.f32.mrf.mxu1 }
  0x8c   :  { %v120_v30 = vadd.f32 %v116_v21, %v92_v25 }
  0x91   :  { %v90_v26 = vpop.f32.mrf.mxu2 }
  0x92   :  { %v118_v27 = vpop.f32.mrf.mxu3  ;;  %v144_v28 = vpop.f32.mrf.mxu0 }
  0x93   :  { %v172_v29 = vpop.f32.mrf.mxu1  ;;  %v148_v31 = vadd.f32 %v144_v28, %v120_v30 }
  0x95   :  { %v176_v36 = vadd.f32 %v172_v29, %v148_v31 }
  0x99   :  { %v200_v32 = vpop.f32.mrf.mxu2 }
  0x9a   :  { %v228_v33 = vpop.f32.mrf.mxu3  ;;  %v146_v34 = vpop.f32.mrf.mxu0  ;;  %v204_v37 = vadd.f32 %v200_v32, %v176_v36 }
  0x9b   :  { %v174_v35 = vpop.f32.mrf.mxu1 }
  0x9c   :  { %v232_v38 = vadd.f32 %v228_v33, %v204_v37 }
  0xa1   :  { %v202_v39 = vpop.f32.mrf.mxu2 }
  0xa2   :  { %v230_v40 = vpop.f32.mrf.mxu3  ;;  %v256_v41 = vpop.f32.mrf.mxu0 }
  0xa3   :  { %v260_v42 = vadd.f32 %v256_v41, %v232_v38 }
  0xa5   :  { %262 = vst.msk [vmem:[%s428_s2] sm:$0x3] %vm261_vm1, %v260_v42 }
  0xaa   :  { %v258_v43 = vpop.f32.mrf.mxu0 }

// kernel: densenet_forward.43
= control target key start
LH: loop header
LB: loop body
LE: loop exit
PB: predicated region body
PF: predicated region fallthrough
CT: control target
= control target key end

     0   :  { %s173_s0 = inlined_call_operand.vmem [shape: f32[1,2,32], index: 0, kind: input, shape index: {}]   ;;  %s174_s1 = inlined_call_operand.vmem [shape: f32[1,1,32], index: 1, kind: input, shape index: {}]   ;;  %s175_s2 = inlined_call_operand.vmem [shape: f32[1,1,32], index: 2, kind: input, shape index: {}]   ;;  %s176_s3 = inlined_call_operand.vmem [shape: f32[32,10], index: 3, kind: input, shape index: {}]   ;;  %s177_s4 = inlined_call_operand.vmem [shape: f32[1,10], index: 4, kind: input, shape index: {}]   ;;  %s178_s5 = inlined_call_operand.hbm [shape: f32[2,10], index: 5, kind: output, shape index: {}]  }
   0x1   :  { %v37_v0 = vld [vmem:[%s176_s3 + $0x18] sm:$0xff]  ;;  %v36_v1 = vld [vmem:[%s176_s3 + $0x10] sm:$0xff]  ;;  %v35_v2 = vld [vmem:[%s176_s3 + $0x8] sm:$0xff] }
   0x2   :  { %58 = vmatpush.msra.mxu0 %v37_v0  ;;  %v21_v3 = vld [vmem:[%s173_s0] sm:$0x3] }
   0x3   :  { %v86_v4 = vld [vmem:[%s174_s1] ss:$0 sm:$0xff] }
   0x4   :  { %v87_v5 = vld [vmem:[%s175_s2] ss:$0 sm:$0xff]  ;;  %59 = vmatpush.msra.mxu0 %v36_v1 }
   0x5   :  { %10 = vsyncpa [#allocation3], 0  ;;  %v34_v6 = vld [vmem:[%s176_s3] sm:$0xff]  ;;  %v26_v7 = vmul.f32 %v86_v4, %v21_v3  ;;  %vm42_vm0 = vcmask 261120   ;;  %s115_s1 = smov [#allocation2]   ;;  %s75_s10 = sshll.u32 %s178_s5, 4  ;;  %s76_s10 = int_to_ptr.hbm [resolvable:$true] %s75_s10 }
   0x6   :  { %60 = vmatpush.msra.mxu0 %v35_v2  ;;  %v88_v10 = vld [vmem:[%s177_s4] ss:$0 sm:$0xff]  ;;  %s73_s8 = sshll.u32 %s115_s1, 4  ;;  %vm66_vm1 = vcmask 74752   ;;  %s74_s8 = int_to_ptr.vmem [resolvable:$true] %s73_s8 }
   0x7   :  { %v31_v8 = vadd.f32 %v87_v5, %v26_v7 }
   0x8   :  { %61 = vmatpush.msra.mxu0 %v34_v6 }
   0x9   :  { %v32_v9 = vmax.f32 %v31_v8, 0.0 }
   0xb   :  { %84 = vmatmul.msk.f32.vlgmr.msra.gmra.mxu0 %vm42_vm0, %v32_v9 }
  0x88   :  { %v63_v11 = vpop.f32.mrf.mxu0 }
  0x89   :  { %v64_v12 = vadd.f32 %v88_v10, %v63_v11 }
  0x8b   :  { %67 = vst.msk [vmem:[#allocation2] sm:$0x3] %vm66_vm1, %v64_v12 }
  0x8c   :  { %78 = dma.vmem_to_hbm [thread:$0]  %s74_s8, 32, %s76_s10, [#allocation3]  }
  0x8d   :  { %113 = dma.done.wait [#allocation3], 32  }
  0x8e   :  { %114 = vsyncadd [#allocation3], 4294967264 }
  0x8f   :  { %83 = vsyncpa [#allocation3], 1 }

</bundles_post_ra>
